<compile_context>
chip_gen: v6e
topology: v6e:2x2x1
jax: 0.10.0
libtpu: 0.0.40
codegen_flags: <defaults>
</compile_context>

<pallas_src>
import functools

import jax
import jax.numpy as jnp
from jax.experimental import pallas as pl
from jax.experimental.pallas import tpu as pltpu


# --------------------------------------------------------------------------
# in-kernel helpers (traced inside the Pallas kernels)
# --------------------------------------------------------------------------
def _elu(a):
    # PyTorch ELU(alpha=1).  exp argument clamped so the discarded branch never
    # produces inf.  TODO(synk): jnp.expm1 would be marginally more precise
    # near 0; avoided here for Mosaic-lowering safety.
    return jnp.where(a > 0, a, jnp.exp(jnp.minimum(a, 0.0)) - 1.0)


def _conv_taps(xp, w_ref, b_ref, t_out, k):
    """Stride-1 conv as k shifted (t_out, Cin)@(Cin, Cout) bf16 dots, f32 acc.

    xp:    (T_pad, Cin) value, already zero-padded along time.
    w_ref: (k, Cin, Cout) bf16 ref with w_ref[j][c, o] == torch_weight[o, c, j].
    b_ref: (1, Cout) f32 ref.
    """
    cout = b_ref.shape[1]
    x16 = xp.astype(jnp.bfloat16)
    acc = jnp.zeros((t_out, cout), jnp.float32)
    for j in range(k):
        acc = acc + jnp.dot(x16[j:j + t_out, :], w_ref[j],
                            preferred_element_type=jnp.float32)
    return acc + b_ref[...]


def _downsample2(y_full, t_out):
    """y[m] = y_full[2m] via a one-hot selection matmul (MXU, no strided access)."""
    lf = y_full.shape[0]
    rows = jax.lax.broadcasted_iota(jnp.int32, (t_out, lf), 0)
    cols = jax.lax.broadcasted_iota(jnp.int32, (t_out, lf), 1)
    sel = (cols == 2 * rows).astype(jnp.float32)
    return jnp.dot(sel, y_full, preferred_element_type=jnp.float32)


def _interleave2(y_even, y_odd):
    """out[2m] = y_even[m], out[2m+1] = y_odd[m] via one-hot matmuls (MXU)."""
    t = y_even.shape[0]
    rows = jax.lax.broadcasted_iota(jnp.int32, (2 * t, t), 0)
    cols = jax.lax.broadcasted_iota(jnp.int32, (2 * t, t), 1)
    pe = (rows == 2 * cols).astype(jnp.float32)
    po = (rows == 2 * cols + 1).astype(jnp.float32)
    return (jnp.dot(pe, y_even, preferred_element_type=jnp.float32) +
            jnp.dot(po, y_odd, preferred_element_type=jnp.float32))


def _tconv_poly(hp, w_ref, b_ref, t_in):
    """PyTorch ConvTranspose1d(k=4, stride=2, padding=1) in polyphase form.

    hp:    (t_in + 2, Cin) value with hp[1 + i] = h[i], zero rows at both ends.
    w_ref: (4, Cin, Cout) bf16 ref, w_ref[j] == torch_weight[:, :, j].
      y[2m]   = h[m]   @ W[1] + h[m-1] @ W[3]
      y[2m+1] = h[m+1] @ W[0] + h[m]   @ W[2]
    """
    f32 = jnp.float32
    x16 = hp.astype(jnp.bfloat16)
    y_even = (jnp.dot(x16[1:1 + t_in, :], w_ref[1], preferred_element_type=f32) +
              jnp.dot(x16[0:t_in, :], w_ref[3], preferred_element_type=f32))
    y_odd = (jnp.dot(x16[2:2 + t_in, :], w_ref[0], preferred_element_type=f32) +
             jnp.dot(x16[1:1 + t_in, :], w_ref[2], preferred_element_type=f32))
    return _interleave2(y_even, y_odd) + b_ref[...]


# --------------------------------------------------------------------------
# fused encoder + ResidualVQ kernel (one grid step per batch element)
# --------------------------------------------------------------------------
def _encoder_rvq_kernel(x_ref, w1_ref, b1_ref, w2_ref, b2_ref, w3_ref, b3_ref,
                        w4_ref, b4_ref, cb_ref, cbn_ref, out_ref,
                        p1_ref, p2_ref, p3_ref, p4_ref, *, T, kc):
    f32 = jnp.float32
    T2, T4 = T // 2, T // 4

    # Conv1d(1 -> C, k=7, s=1, p=3) + ELU.  Cin == 1: f32 broadcast multiply.
    p1_ref[...] = jnp.zeros_like(p1_ref)
    p1_ref[3:3 + T, :] = x_ref[0].astype(f32)
    xp = p1_ref[...]
    acc = jnp.zeros((T, b1_ref.shape[1]), f32)
    for j in range(7):
        acc = acc + xp[j:j + T, :] * w1_ref[j].astype(f32)
    h = _elu(acc + b1_ref[...])                                     # (T, C)

    # Conv1d(C -> 2C, k=4, s=2, p=1) + ELU: full stride-1 conv, then select.
    p2_ref[...] = jnp.zeros_like(p2_ref)
    p2_ref[1:1 + T, :] = h.astype(jnp.bfloat16)
    h = _elu(_downsample2(_conv_taps(p2_ref[...], w2_ref, b2_ref, T - 1, 4), T2))

    # Conv1d(2C -> 4C, k=4, s=2, p=1) + ELU.
    p3_ref[...] = jnp.zeros_like(p3_ref)
    p3_ref[1:1 + T2, :] = h.astype(jnp.bfloat16)
    h = _elu(_downsample2(_conv_taps(p3_ref[...], w3_ref, b3_ref, T2 - 1, 4), T4))

    # Conv1d(4C -> D, k=3, s=1, p=1), no activation.
    p4_ref[...] = jnp.zeros_like(p4_ref)
    p4_ref[1:1 + T4, :] = h.astype(jnp.bfloat16)
    e = _conv_taps(p4_ref[...], w4_ref, b4_ref, T4, 3)              # (T4, D) f32

    # Fused ResidualVQ: n_q nearest-codebook lookups, all in VMEM / registers.
    n_q, kc_pad, _ = cb_ref.shape
    col = jax.lax.broadcasted_iota(jnp.int32, (T4, kc_pad), 1)
    res = e
    quant = jnp.zeros_like(res)
    for qi in range(n_q):
        cb = cb_ref[qi]                                             # (kc_pad, D)
        dots = jax.lax.dot_general(res, cb, (((1,), (1,)), ((), ())),
                                   preferred_element_type=f32)      # (T4, kc_pad)
        # squared distance up to a per-row constant (|res|^2), which does not
        # change the argmin; padded codebook rows are masked out.
        dist = jnp.where(col < kc, cbn_ref[qi] - 2.0 * dots, 1e30)
        min_d = jnp.min(dist, axis=-1, keepdims=True)
        idx = jnp.min(jnp.where(dist <= min_d, col, kc_pad),
                      axis=-1, keepdims=True)                       # first argmin
        onehot = (col == idx).astype(f32)
        q = jnp.dot(onehot, cb, preferred_element_type=f32)         # (T4, D)
        quant = quant + q
        res = res - q

    out_ref[0] = quant.astype(out_ref.dtype)


# --------------------------------------------------------------------------
# fused decoder kernel (one grid step per batch element)
# --------------------------------------------------------------------------
def _decoder_kernel(z_ref, wc1_ref, bc1_ref, wt1_ref, bt1_ref,
                    wt2_ref, bt2_ref, wc2_ref, bc2_ref, out_ref,
                    p0_ref, p1_ref, p2_ref, p3_ref, *, Tp):
    f32 = jnp.float32
    T2, T4 = 2 * Tp, 4 * Tp

    # Conv1d(D -> 4C, k=7, s=1, p=3) + ELU.
    p0_ref[...] = jnp.zeros_like(p0_ref)
    p0_ref[3:3 + Tp, :] = z_ref[0].astype(jnp.bfloat16)
    h = _elu(_conv_taps(p0_ref[...], wc1_ref, bc1_ref, Tp, 7))      # (Tp, 4C)

    # ConvTranspose1d(4C -> 2C, k=4, s=2, p=1) + ELU (polyphase, no zero-stuff).
    p1_ref[...] = jnp.zeros_like(p1_ref)
    p1_ref[1:1 + Tp, :] = h.astype(jnp.bfloat16)
    h = _elu(_tconv_poly(p1_ref[...], wt1_ref, bt1_ref, Tp))        # (2Tp, 2C)

    # ConvTranspose1d(2C -> C, k=4, s=2, p=1) + ELU.
    p2_ref[...] = jnp.zeros_like(p2_ref)
    p2_ref[1:1 + T2, :] = h.astype(jnp.bfloat16)
    h = _elu(_tconv_poly(p2_ref[...], wt2_ref, bt2_ref, T2))        # (4Tp, C)

    # Conv1d(C -> 1, k=7, s=1, p=3), no activation.  Cout == 1: lane-reduce.
    # TODO(synk): Cout=1 output is not lane-dense; negligible at this size.
    p3_ref[...] = jnp.zeros_like(p3_ref)
    p3_ref[3:3 + T4, :] = h.astype(jnp.bfloat16)
    xp = p3_ref[...].astype(f32)
    acc = jnp.zeros((T4, 1), f32)
    for j in range(7):
        acc = acc + jnp.sum(xp[j:j + T4, :] * wc2_ref[j].astype(f32),
                            axis=-1, keepdims=True)
    out_ref[0] = (acc + bc2_ref[...]).astype(out_ref.dtype)


# --------------------------------------------------------------------------
# host wrappers
# --------------------------------------------------------------------------
def _full_spec(a):
    zeros = (0,) * a.ndim
    return pl.BlockSpec(a.shape, lambda b, _z=zeros: _z)


def _prep_conv_w(w):   # torch Conv1d weight (Cout, Cin, k) -> (k, Cin, Cout) bf16
    return jnp.transpose(w, (2, 1, 0)).astype(jnp.bfloat16)


def _prep_tconv_w(w):  # torch ConvTranspose1d weight (Cin, Cout, k) -> (k, Cin, Cout) bf16
    return jnp.transpose(w, (2, 0, 1)).astype(jnp.bfloat16)


def _prep_b(b):
    return b.reshape(1, -1).astype(jnp.float32)


def encode_quantize(params, x_ncw):
    """(B, 1, T) waveform -> (B, T//4, D) quantized latents (encoder + RVQ fused)."""
    B, _, T = x_ncw.shape
    assert T % 4 == 0, T
    enc = params["encoder"]
    (w1, b1), (w2, b2), (w3, b3), (w4, b4) = enc["c1"], enc["c2"], enc["c3"], enc["c4"]
    D = w4.shape[0]
    c1, c2o, c3o = w1.shape[0], w2.shape[0], w3.shape[0]
    T4 = T // 4

    cbs = params["codebooks"]                              # (n_q, Kc, D)
    n_q, kc, _ = cbs.shape
    kc_pad = ((kc + 127) // 128) * 128                     # lane-dense codebook
    cb_p = jnp.pad(cbs.astype(jnp.float32), ((0, 0), (0, kc_pad - kc), (0, 0)))
    cbn_p = jnp.sum(cb_p * cb_p, axis=-1).reshape(n_q, 1, kc_pad)

    # NCW with C == 1 -> channels-last is a pure reshape (no transpose).
    x = x_ncw.reshape(B, T, 1).astype(jnp.float32)
    args = (x, _prep_conv_w(w1), _prep_b(b1), _prep_conv_w(w2), _prep_b(b2),
            _prep_conv_w(w3), _prep_b(b3), _prep_conv_w(w4), _prep_b(b4),
            cb_p, cbn_p)

    return pl.pallas_call(
        functools.partial(_encoder_rvq_kernel, T=T, kc=kc),
        out_shape=jax.ShapeDtypeStruct((B, T4, D), jnp.float32),
        grid_spec=pltpu.PrefetchScalarGridSpec(
            num_scalar_prefetch=0,
            grid=(B,),
            in_specs=[pl.BlockSpec((1, T, 1), lambda b: (b, 0, 0))]
                     + [_full_spec(a) for a in args[1:]],
            out_specs=pl.BlockSpec((1, T4, D), lambda b: (b, 0, 0)),
            scratch_shapes=[pltpu.VMEM((T + 6, 1), jnp.float32),
                            pltpu.VMEM((T + 2, c1), jnp.bfloat16),
                            pltpu.VMEM((T // 2 + 2, c2o), jnp.bfloat16),
                            pltpu.VMEM((T4 + 2, c3o), jnp.bfloat16)]),
        compiler_params=pltpu.CompilerParams(dimension_semantics=("parallel",)),
    )(*args)


def decode(params, z_btd):
    """(B, T', D) latents -> (B, 1, 4*T') waveform (whole decoder fused)."""
    B, Tp, D = z_btd.shape
    dec = params["decoder"]
    (wc1, bc1), (wt1, bt1), (wt2, bt2), (wc2, bc2) = (
        dec["c1"], dec["t1"], dec["t2"], dec["c2"])
    c4, cd2, cd1 = wc1.shape[0], wt1.shape[1], wt2.shape[1]
    T_out = 4 * Tp

    args = (z_btd.astype(jnp.float32),
            _prep_conv_w(wc1), _prep_b(bc1),
            _prep_tconv_w(wt1), _prep_b(bt1),
            _prep_tconv_w(wt2), _prep_b(bt2),
            # Cout == 1 layer packed as (k, 1, Cin) for the lane-reduce path.
            jnp.transpose(wc2, (2, 0, 1)).astype(jnp.bfloat16), _prep_b(bc2))

    out = pl.pallas_call(
        functools.partial(_decoder_kernel, Tp=Tp),
        out_shape=jax.ShapeDtypeStruct((B, T_out, 1), jnp.float32),
        grid_spec=pltpu.PrefetchScalarGridSpec(
            num_scalar_prefetch=0,
            grid=(B,),
            in_specs=[pl.BlockSpec((1, Tp, D), lambda b: (b, 0, 0))]
                     + [_full_spec(a) for a in args[1:]],
            out_specs=pl.BlockSpec((1, T_out, 1), lambda b: (b, 0, 0)),
            scratch_shapes=[pltpu.VMEM((Tp + 6, D), jnp.bfloat16),
                            pltpu.VMEM((Tp + 2, c4), jnp.bfloat16),
                            pltpu.VMEM((2 * Tp + 2, cd2), jnp.bfloat16),
                            pltpu.VMEM((4 * Tp + 6, cd1), jnp.bfloat16)]),
        compiler_params=pltpu.CompilerParams(dimension_semantics=("parallel",)),
    )(*args)
    return out.reshape(B, 1, T_out)


# --------------------------------------------------------------------------
# SoundPhi parameters + forward
# --------------------------------------------------------------------------
def _conv_init(key, cout, cin, k):
    kw, kb = jax.random.split(key)
    scale = 1.0 / jnp.sqrt(cin * k)
    w = jax.random.uniform(kw, (cout, cin, k), jnp.float32, -scale, scale)
    b = jax.random.uniform(kb, (cout,), jnp.float32, -scale, scale)
    return w, b


def _tconv_init(key, cin, cout, k):
    kw, kb = jax.random.split(key)
    scale = 1.0 / jnp.sqrt(cin * k)
    w = jax.random.uniform(kw, (cin, cout, k), jnp.float32, -scale, scale)
    b = jax.random.uniform(kb, (cout,), jnp.float32, -scale, scale)
    return w, b


def init_sound_phi(key, latent_space_dim, n_q, codebook_size):
    D = latent_space_dim
    Ce, Cd = 32, 40                                        # PhiEncoder C=32, Decoder C=40
    keys = jax.random.split(key, 9)
    enc = {"c1": _conv_init(keys[0], Ce, 1, 7),
           "c2": _conv_init(keys[1], 2 * Ce, Ce, 4),
           "c3": _conv_init(keys[2], 4 * Ce, 2 * Ce, 4),
           "c4": _conv_init(keys[3], D, 4 * Ce, 3)}
    dec = {"c1": _conv_init(keys[4], 4 * Cd, D, 7),
           "t1": _tconv_init(keys[5], 4 * Cd, 2 * Cd, 4),
           "t2": _tconv_init(keys[6], 2 * Cd, Cd, 4),
           "c2": _conv_init(keys[7], 1, Cd, 7)}
    codebooks = jax.random.normal(keys[8], (n_q, codebook_size, D), jnp.float32)
    return {"encoder": enc, "decoder": dec, "codebooks": codebooks}


def sound_phi_forward(params, x, mode="end-to-end"):
    if mode == "end-to-end":
        return decode(params, encode_quantize(params, x))
    if mode == "encode":
        return encode_quantize(params, x)
    if mode == "decode":
        return decode(params, x)                           # x: (B, T', D)
    raise ValueError(mode)


# --------------------------------------------------------------------------
if __name__ == "__main__":
    key = jax.random.PRNGKey(0)
    k_param, k_x = jax.random.split(key)

    latent_space_dim, n_q, codebook_size = 32, 4, 64
    params = init_sound_phi(k_param, latent_space_dim, n_q, codebook_size)

    B, T = 2, 64
    x = jax.random.normal(k_x, (B, 1, T), jnp.float32)     # (batch, channels=1, time)

    fwd = jax.jit(sound_phi_forward, static_argnames=("mode",))

    out = jax.block_until_ready(fwd(params, x, mode="end-to-end"))
    assert out.shape == (B, 1, T), out.shape
    assert bool(jnp.all(jnp.isfinite(out)))

    enc = jax.block_until_ready(fwd(params, x, mode="encode"))
    assert enc.shape == (B, T // 4, latent_space_dim), enc.shape
    assert bool(jnp.all(jnp.isfinite(enc)))

    dec = jax.block_until_ready(fwd(params, enc, mode="decode"))
    assert dec.shape == (B, 1, T), dec.shape

    print("KERNEL_OK")
</pallas_src>

<mosaic_0001>
module attributes {stable_mosaic.version = 11 : i64} {
  func.func @_encoder_rvq_kernel(%arg0: i32, %arg1: memref<1x64x1xf32, #tpu.memory_space<vmem>>, %arg2: memref<7x1x32xbf16, #tpu.memory_space<vmem>>, %arg3: memref<1x32xf32, #tpu.memory_space<vmem>>, %arg4: memref<4x32x64xbf16, #tpu.memory_space<vmem>>, %arg5: memref<1x64xf32, #tpu.memory_space<vmem>>, %arg6: memref<4x64x128xbf16, #tpu.memory_space<vmem>>, %arg7: memref<1x128xf32, #tpu.memory_space<vmem>>, %arg8: memref<3x128x32xbf16, #tpu.memory_space<vmem>>, %arg9: memref<1x32xf32, #tpu.memory_space<vmem>>, %arg10: memref<4x128x32xf32, #tpu.memory_space<vmem>>, %arg11: memref<4x1x128xf32, #tpu.memory_space<vmem>>, %arg12: memref<1x16x32xf32, #tpu.memory_space<vmem>>, %arg13: memref<70x1xf32, #tpu.memory_space<vmem>>, %arg14: memref<66x32xbf16, #tpu.memory_space<vmem>>, %arg15: memref<34x64xbf16, #tpu.memory_space<vmem>>, %arg16: memref<18x128xbf16, #tpu.memory_space<vmem>>) attributes {dimension_semantics = [#tpu.dimension_semantics<parallel>], iteration_bounds = array<i64: 2>, scalar_prefetch = 0 : i64, scratch_operands = 4 : i64, tpu.core_type = #tpu.core_type<tc>, window_params = [{transform_indices = @transform_0, window_bounds = array<i64: 1, 64, 1>}, {pipeline_mode = #tpu.pipeline_mode<synchronous>, transform_indices = @transform_1, window_bounds = array<i64: 7, 1, 32>}, {pipeline_mode = #tpu.pipeline_mode<synchronous>, transform_indices = @transform_2, window_bounds = array<i64: 1, 32>}, {pipeline_mode = #tpu.pipeline_mode<synchronous>, transform_indices = @transform_3, window_bounds = array<i64: 4, 32, 64>}, {pipeline_mode = #tpu.pipeline_mode<synchronous>, transform_indices = @transform_4, window_bounds = array<i64: 1, 64>}, {pipeline_mode = #tpu.pipeline_mode<synchronous>, transform_indices = @transform_5, window_bounds = array<i64: 4, 64, 128>}, {pipeline_mode = #tpu.pipeline_mode<synchronous>, transform_indices = @transform_6, window_bounds = array<i64: 1, 128>}, {pipeline_mode = #tpu.pipeline_mode<synchronous>, transform_indices = @transform_7, window_bounds = array<i64: 3, 128, 32>}, {pipeline_mode = #tpu.pipeline_mode<synchronous>, transform_indices = @transform_8, window_bounds = array<i64: 1, 32>}, {pipeline_mode = #tpu.pipeline_mode<synchronous>, transform_indices = @transform_9, window_bounds = array<i64: 4, 128, 32>}, {pipeline_mode = #tpu.pipeline_mode<synchronous>, transform_indices = @transform_10, window_bounds = array<i64: 4, 1, 128>}, {transform_indices = @transform_11, window_bounds = array<i64: 1, 16, 32>}]} {
    %cst = arith.constant 0.000000e+00 : f32
    %0 = vector.broadcast %cst : f32 to vector<70x1xf32>
    %c0 = arith.constant 0 : index
    %c0_0 = arith.constant 0 : index
    %1 = vector.load %arg13[%c0, %c0_0] : memref<70x1xf32, #tpu.memory_space<vmem>>, vector<70x1xf32>
    tpu.vector_store %arg13[%c0, %c0_0], %0 {strides = array<i32>} : memref<70x1xf32, #tpu.memory_space<vmem>>, vector<70x1xf32>,
    %c0_1 = arith.constant 0 : index
    %c0_2 = arith.constant 0 : index
    %c0_3 = arith.constant 0 : index
    %2 = vector.load %arg1[%c0_1, %c0_2, %c0_3] : memref<1x64x1xf32, #tpu.memory_space<vmem>>, vector<1x64x1xf32>
    %3 = vector.shape_cast %2 : vector<1x64x1xf32> to vector<64x1xf32>
    %c3 = arith.constant 3 : index
    %c0_4 = arith.constant 0 : index
    %4 = vector.load %arg13[%c3, %c0_4] : memref<70x1xf32, #tpu.memory_space<vmem>>, vector<64x1xf32>
    tpu.vector_store %arg13[%c3, %c0_4], %3 {strides = array<i32>} : memref<70x1xf32, #tpu.memory_space<vmem>>, vector<64x1xf32>,
    %c0_5 = arith.constant 0 : index
    %c0_6 = arith.constant 0 : index
    %5 = vector.load %arg13[%c0_5, %c0_6] : memref<70x1xf32, #tpu.memory_space<vmem>>, vector<70x1xf32>
    %cst_7 = arith.constant 0.000000e+00 : f32
    %6 = vector.broadcast %cst_7 : f32 to vector<64x32xf32>
    %7 = vector.extract_strided_slice %5 {offsets = [0, 0], sizes = [64, 1], strides = [1, 1]} : vector<70x1xf32> to vector<64x1xf32>
    %c0_8 = arith.constant 0 : index
    %c0_9 = arith.constant 0 : index
    %c0_10 = arith.constant 0 : index
    %8 = vector.load %arg2[%c0_8, %c0_9, %c0_10] : memref<7x1x32xbf16, #tpu.memory_space<vmem>>, vector<1x1x32xbf16>
    %9 = vector.shape_cast %8 : vector<1x1x32xbf16> to vector<1x32xbf16>
    %10 = arith.extf %9 : vector<1x32xbf16> to vector<1x32xf32>
    %11 = vector.broadcast %7 : vector<64x1xf32> to vector<64x32xf32>
    %12 = vector.broadcast %10 : vector<1x32xf32> to vector<64x32xf32>
    %13 = arith.mulf %11, %12 : vector<64x32xf32>
    %14 = arith.addf %6, %13 : vector<64x32xf32>
    %15 = vector.extract_strided_slice %5 {offsets = [1, 0], sizes = [64, 1], strides = [1, 1]} : vector<70x1xf32> to vector<64x1xf32>
    %c1 = arith.constant 1 : index
    %c0_11 = arith.constant 0 : index
    %c0_12 = arith.constant 0 : index
    %16 = vector.load %arg2[%c1, %c0_11, %c0_12] : memref<7x1x32xbf16, #tpu.memory_space<vmem>>, vector<1x1x32xbf16>
    %17 = vector.shape_cast %16 : vector<1x1x32xbf16> to vector<1x32xbf16>
    %18 = arith.extf %17 : vector<1x32xbf16> to vector<1x32xf32>
    %19 = vector.broadcast %15 : vector<64x1xf32> to vector<64x32xf32>
    %20 = vector.broadcast %18 : vector<1x32xf32> to vector<64x32xf32>
    %21 = arith.mulf %19, %20 : vector<64x32xf32>
    %22 = arith.addf %14, %21 : vector<64x32xf32>
    %23 = vector.extract_strided_slice %5 {offsets = [2, 0], sizes = [64, 1], strides = [1, 1]} : vector<70x1xf32> to vector<64x1xf32>
    %c2 = arith.constant 2 : index
    %c0_13 = arith.constant 0 : index
    %c0_14 = arith.constant 0 : index
    %24 = vector.load %arg2[%c2, %c0_13, %c0_14] : memref<7x1x32xbf16, #tpu.memory_space<vmem>>, vector<1x1x32xbf16>
    %25 = vector.shape_cast %24 : vector<1x1x32xbf16> to vector<1x32xbf16>
    %26 = arith.extf %25 : vector<1x32xbf16> to vector<1x32xf32>
    %27 = vector.broadcast %23 : vector<64x1xf32> to vector<64x32xf32>
    %28 = vector.broadcast %26 : vector<1x32xf32> to vector<64x32xf32>
    %29 = arith.mulf %27, %28 : vector<64x32xf32>
    %30 = arith.addf %22, %29 : vector<64x32xf32>
    %31 = vector.extract_strided_slice %5 {offsets = [3, 0], sizes = [64, 1], strides = [1, 1]} : vector<70x1xf32> to vector<64x1xf32>
    %c3_15 = arith.constant 3 : index
    %c0_16 = arith.constant 0 : index
    %c0_17 = arith.constant 0 : index
    %32 = vector.load %arg2[%c3_15, %c0_16, %c0_17] : memref<7x1x32xbf16, #tpu.memory_space<vmem>>, vector<1x1x32xbf16>
    %33 = vector.shape_cast %32 : vector<1x1x32xbf16> to vector<1x32xbf16>
    %34 = arith.extf %33 : vector<1x32xbf16> to vector<1x32xf32>
    %35 = vector.broadcast %31 : vector<64x1xf32> to vector<64x32xf32>
    %36 = vector.broadcast %34 : vector<1x32xf32> to vector<64x32xf32>
    %37 = arith.mulf %35, %36 : vector<64x32xf32>
    %38 = arith.addf %30, %37 : vector<64x32xf32>
    %39 = vector.extract_strided_slice %5 {offsets = [4, 0], sizes = [64, 1], strides = [1, 1]} : vector<70x1xf32> to vector<64x1xf32>
    %c4 = arith.constant 4 : index
    %c0_18 = arith.constant 0 : index
    %c0_19 = arith.constant 0 : index
    %40 = vector.load %arg2[%c4, %c0_18, %c0_19] : memref<7x1x32xbf16, #tpu.memory_space<vmem>>, vector<1x1x32xbf16>
    %41 = vector.shape_cast %40 : vector<1x1x32xbf16> to vector<1x32xbf16>
    %42 = arith.extf %41 : vector<1x32xbf16> to vector<1x32xf32>
    %43 = vector.broadcast %39 : vector<64x1xf32> to vector<64x32xf32>
    %44 = vector.broadcast %42 : vector<1x32xf32> to vector<64x32xf32>
    %45 = arith.mulf %43, %44 : vector<64x32xf32>
    %46 = arith.addf %38, %45 : vector<64x32xf32>
    %47 = vector.extract_strided_slice %5 {offsets = [5, 0], sizes = [64, 1], strides = [1, 1]} : vector<70x1xf32> to vector<64x1xf32>
    %c5 = arith.constant 5 : index
    %c0_20 = arith.constant 0 : index
    %c0_21 = arith.constant 0 : index
    %48 = vector.load %arg2[%c5, %c0_20, %c0_21] : memref<7x1x32xbf16, #tpu.memory_space<vmem>>, vector<1x1x32xbf16>
    %49 = vector.shape_cast %48 : vector<1x1x32xbf16> to vector<1x32xbf16>
    %50 = arith.extf %49 : vector<1x32xbf16> to vector<1x32xf32>
    %51 = vector.broadcast %47 : vector<64x1xf32> to vector<64x32xf32>
    %52 = vector.broadcast %50 : vector<1x32xf32> to vector<64x32xf32>
    %53 = arith.mulf %51, %52 : vector<64x32xf32>
    %54 = arith.addf %46, %53 : vector<64x32xf32>
    %55 = vector.extract_strided_slice %5 {offsets = [6, 0], sizes = [64, 1], strides = [1, 1]} : vector<70x1xf32> to vector<64x1xf32>
    %c6 = arith.constant 6 : index
    %c0_22 = arith.constant 0 : index
    %c0_23 = arith.constant 0 : index
    %56 = vector.load %arg2[%c6, %c0_22, %c0_23] : memref<7x1x32xbf16, #tpu.memory_space<vmem>>, vector<1x1x32xbf16>
    %57 = vector.shape_cast %56 : vector<1x1x32xbf16> to vector<1x32xbf16>
    %58 = arith.extf %57 : vector<1x32xbf16> to vector<1x32xf32>
    %59 = vector.broadcast %55 : vector<64x1xf32> to vector<64x32xf32>
    %60 = vector.broadcast %58 : vector<1x32xf32> to vector<64x32xf32>
    %61 = arith.mulf %59, %60 : vector<64x32xf32>
    %62 = arith.addf %54, %61 : vector<64x32xf32>
    %c0_24 = arith.constant 0 : index
    %c0_25 = arith.constant 0 : index
    %63 = vector.load %arg3[%c0_24, %c0_25] : memref<1x32xf32, #tpu.memory_space<vmem>>, vector<1x32xf32>
    %64 = vector.broadcast %63 : vector<1x32xf32> to vector<64x32xf32>
    %65 = arith.addf %62, %64 : vector<64x32xf32>
    %cst_26 = arith.constant 0.000000e+00 : f32
    %66 = vector.broadcast %cst_26 : f32 to vector<64x32xf32>
    %67 = arith.cmpf ogt, %65, %66 : vector<64x32xf32>
    %cst_27 = arith.constant 0.000000e+00 : f32
    %68 = vector.broadcast %cst_27 : f32 to vector<64x32xf32>
    %69 = arith.minimumf %65, %68 : vector<64x32xf32>
    %70 = math.exp %69 : vector<64x32xf32>
    %cst_28 = arith.constant 1.000000e+00 : f32
    %71 = vector.broadcast %cst_28 : f32 to vector<64x32xf32>
    %72 = arith.subf %70, %71 : vector<64x32xf32>
    %73 = arith.select %67, %65, %72 : vector<64x32xi1>, vector<64x32xf32>
    %cst_29 = arith.constant 0.000000e+00 : bf16
    %74 = vector.broadcast %cst_29 : bf16 to vector<66x32xbf16>
    %c0_30 = arith.constant 0 : index
    %c0_31 = arith.constant 0 : index
    %75 = vector.load %arg14[%c0_30, %c0_31] : memref<66x32xbf16, #tpu.memory_space<vmem>>, vector<66x32xbf16>
    tpu.vector_store %arg14[%c0_30, %c0_31], %74 {strides = array<i32>} : memref<66x32xbf16, #tpu.memory_space<vmem>>, vector<66x32xbf16>,
    %76 = arith.truncf %73 : vector<64x32xf32> to vector<64x32xbf16>
    %c1_32 = arith.constant 1 : index
    %c0_33 = arith.constant 0 : index
    %77 = vector.load %arg14[%c1_32, %c0_33] : memref<66x32xbf16, #tpu.memory_space<vmem>>, vector<64x32xbf16>
    tpu.vector_store %arg14[%c1_32, %c0_33], %76 {strides = array<i32>} : memref<66x32xbf16, #tpu.memory_space<vmem>>, vector<64x32xbf16>,
    %c0_34 = arith.constant 0 : index
    %c0_35 = arith.constant 0 : index
    %78 = vector.load %arg14[%c0_34, %c0_35] : memref<66x32xbf16, #tpu.memory_space<vmem>>, vector<66x32xbf16>
    %cst_36 = arith.constant 0.000000e+00 : f32
    %79 = vector.broadcast %cst_36 : f32 to vector<63x64xf32>
    %80 = vector.extract_strided_slice %78 {offsets = [0, 0], sizes = [63, 32], strides = [1, 1]} : vector<66x32xbf16> to vector<63x32xbf16>
    %c0_37 = arith.constant 0 : index
    %c0_38 = arith.constant 0 : index
    %c0_39 = arith.constant 0 : index
    %81 = vector.load %arg4[%c0_37, %c0_38, %c0_39] : memref<4x32x64xbf16, #tpu.memory_space<vmem>>, vector<1x32x64xbf16>
    %82 = vector.shape_cast %81 : vector<1x32x64xbf16> to vector<32x64xbf16>
    %cst_40 = arith.constant dense<0.000000e+00> : vector<63x64xf32>
    %83 = tpu.matmul %80, %82, %cst_40 {dimension_numbers = #tpu.dot_dimension_numbers<[1], [0], [0], [1], [0, 0, 1, 1], [], []>} : vector<63x32xbf16>, vector<32x64xbf16>, vector<63x64xf32> -> vector<63x64xf32>
    %84 = arith.addf %79, %83 : vector<63x64xf32>
    %85 = vector.extract_strided_slice %78 {offsets = [1, 0], sizes = [63, 32], strides = [1, 1]} : vector<66x32xbf16> to vector<63x32xbf16>
    %c1_41 = arith.constant 1 : index
    %c0_42 = arith.constant 0 : index
    %c0_43 = arith.constant 0 : index
    %86 = vector.load %arg4[%c1_41, %c0_42, %c0_43] : memref<4x32x64xbf16, #tpu.memory_space<vmem>>, vector<1x32x64xbf16>
    %87 = vector.shape_cast %86 : vector<1x32x64xbf16> to vector<32x64xbf16>
    %cst_44 = arith.constant dense<0.000000e+00> : vector<63x64xf32>
    %88 = tpu.matmul %85, %87, %cst_44 {dimension_numbers = #tpu.dot_dimension_numbers<[1], [0], [0], [1], [0, 0, 1, 1], [], []>} : vector<63x32xbf16>, vector<32x64xbf16>, vector<63x64xf32> -> vector<63x64xf32>
    %89 = arith.addf %84, %88 : vector<63x64xf32>
    %90 = vector.extract_strided_slice %78 {offsets = [2, 0], sizes = [63, 32], strides = [1, 1]} : vector<66x32xbf16> to vector<63x32xbf16>
    %c2_45 = arith.constant 2 : index
    %c0_46 = arith.constant 0 : index
    %c0_47 = arith.constant 0 : index
    %91 = vector.load %arg4[%c2_45, %c0_46, %c0_47] : memref<4x32x64xbf16, #tpu.memory_space<vmem>>, vector<1x32x64xbf16>
    %92 = vector.shape_cast %91 : vector<1x32x64xbf16> to vector<32x64xbf16>
    %cst_48 = arith.constant dense<0.000000e+00> : vector<63x64xf32>
    %93 = tpu.matmul %90, %92, %cst_48 {dimension_numbers = #tpu.dot_dimension_numbers<[1], [0], [0], [1], [0, 0, 1, 1], [], []>} : vector<63x32xbf16>, vector<32x64xbf16>, vector<63x64xf32> -> vector<63x64xf32>
    %94 = arith.addf %89, %93 : vector<63x64xf32>
    %95 = vector.extract_strided_slice %78 {offsets = [3, 0], sizes = [63, 32], strides = [1, 1]} : vector<66x32xbf16> to vector<63x32xbf16>
    %c3_49 = arith.constant 3 : index
    %c0_50 = arith.constant 0 : index
    %c0_51 = arith.constant 0 : index
    %96 = vector.load %arg4[%c3_49, %c0_50, %c0_51] : memref<4x32x64xbf16, #tpu.memory_space<vmem>>, vector<1x32x64xbf16>
    %97 = vector.shape_cast %96 : vector<1x32x64xbf16> to vector<32x64xbf16>
    %cst_52 = arith.constant dense<0.000000e+00> : vector<63x64xf32>
    %98 = tpu.matmul %95, %97, %cst_52 {dimension_numbers = #tpu.dot_dimension_numbers<[1], [0], [0], [1], [0, 0, 1, 1], [], []>} : vector<63x32xbf16>, vector<32x64xbf16>, vector<63x64xf32> -> vector<63x64xf32>
    %99 = arith.addf %94, %98 : vector<63x64xf32>
    %c0_53 = arith.constant 0 : index
    %c0_54 = arith.constant 0 : index
    %100 = vector.load %arg5[%c0_53, %c0_54] : memref<1x64xf32, #tpu.memory_space<vmem>>, vector<1x64xf32>
    %101 = vector.broadcast %100 : vector<1x64xf32> to vector<63x64xf32>
    %102 = arith.addf %99, %101 : vector<63x64xf32>
    %103 = tpu.iota {dimensions = array<i32: 0>} : vector<32x63xi32>
    %104 = tpu.iota {dimensions = array<i32: 1>} : vector<32x63xi32>
    %c2_i32 = arith.constant 2 : i32
    %105 = vector.broadcast %c2_i32 : i32 to vector<32x63xi32>
    %106 = arith.muli %105, %103 : vector<32x63xi32>
    %107 = arith.cmpi eq, %104, %106 : vector<32x63xi32>
    %108 = arith.extui %107 : vector<32x63xi1> to vector<32x63xi32>
    %109 = arith.sitofp %108 : vector<32x63xi32> to vector<32x63xf32>
    %cst_55 = arith.constant dense<0.000000e+00> : vector<32x64xf32>
    %110 = tpu.matmul %109, %102, %cst_55 {dimension_numbers = #tpu.dot_dimension_numbers<[1], [0], [0], [1], [0, 0, 1, 1], [], []>} : vector<32x63xf32>, vector<63x64xf32>, vector<32x64xf32> -> vector<32x64xf32>
    %cst_56 = arith.constant 0.000000e+00 : f32
    %111 = vector.broadcast %cst_56 : f32 to vector<32x64xf32>
    %112 = arith.cmpf ogt, %110, %111 : vector<32x64xf32>
    %cst_57 = arith.constant 0.000000e+00 : f32
    %113 = vector.broadcast %cst_57 : f32 to vector<32x64xf32>
    %114 = arith.minimumf %110, %113 : vector<32x64xf32>
    %115 = math.exp %114 : vector<32x64xf32>
    %cst_58 = arith.constant 1.000000e+00 : f32
    %116 = vector.broadcast %cst_58 : f32 to vector<32x64xf32>
    %117 = arith.subf %115, %116 : vector<32x64xf32>
    %118 = arith.select %112, %110, %117 : vector<32x64xi1>, vector<32x64xf32>
    %cst_59 = arith.constant 0.000000e+00 : bf16
    %119 = vector.broadcast %cst_59 : bf16 to vector<34x64xbf16>
    %c0_60 = arith.constant 0 : index
    %c0_61 = arith.constant 0 : index
    %120 = vector.load %arg15[%c0_60, %c0_61] : memref<34x64xbf16, #tpu.memory_space<vmem>>, vector<34x64xbf16>
    tpu.vector_store %arg15[%c0_60, %c0_61], %119 {strides = array<i32>} : memref<34x64xbf16, #tpu.memory_space<vmem>>, vector<34x64xbf16>,
    %121 = arith.truncf %118 : vector<32x64xf32> to vector<32x64xbf16>
    %c1_62 = arith.constant 1 : index
    %c0_63 = arith.constant 0 : index
    %122 = vector.load %arg15[%c1_62, %c0_63] : memref<34x64xbf16, #tpu.memory_space<vmem>>, vector<32x64xbf16>
    tpu.vector_store %arg15[%c1_62, %c0_63], %121 {strides = array<i32>} : memref<34x64xbf16, #tpu.memory_space<vmem>>, vector<32x64xbf16>,
    %c0_64 = arith.constant 0 : index
    %c0_65 = arith.constant 0 : index
    %123 = vector.load %arg15[%c0_64, %c0_65] : memref<34x64xbf16, #tpu.memory_space<vmem>>, vector<34x64xbf16>
    %cst_66 = arith.constant 0.000000e+00 : f32
    %124 = vector.broadcast %cst_66 : f32 to vector<31x128xf32>
    %125 = vector.extract_strided_slice %123 {offsets = [0, 0], sizes = [31, 64], strides = [1, 1]} : vector<34x64xbf16> to vector<31x64xbf16>
    %c0_67 = arith.constant 0 : index
    %c0_68 = arith.constant 0 : index
    %c0_69 = arith.constant 0 : index
    %126 = vector.load %arg6[%c0_67, %c0_68, %c0_69] : memref<4x64x128xbf16, #tpu.memory_space<vmem>>, vector<1x64x128xbf16>
    %127 = vector.shape_cast %126 : vector<1x64x128xbf16> to vector<64x128xbf16>
    %cst_70 = arith.constant dense<0.000000e+00> : vector<31x128xf32>
    %128 = tpu.matmul %125, %127, %cst_70 {dimension_numbers = #tpu.dot_dimension_numbers<[1], [0], [0], [1], [0, 0, 1, 1], [], []>} : vector<31x64xbf16>, vector<64x128xbf16>, vector<31x128xf32> -> vector<31x128xf32>
    %129 = arith.addf %124, %128 : vector<31x128xf32>
    %130 = vector.extract_strided_slice %123 {offsets = [1, 0], sizes = [31, 64], strides = [1, 1]} : vector<34x64xbf16> to vector<31x64xbf16>
    %c1_71 = arith.constant 1 : index
    %c0_72 = arith.constant 0 : index
    %c0_73 = arith.constant 0 : index
    %131 = vector.load %arg6[%c1_71, %c0_72, %c0_73] : memref<4x64x128xbf16, #tpu.memory_space<vmem>>, vector<1x64x128xbf16>
    %132 = vector.shape_cast %131 : vector<1x64x128xbf16> to vector<64x128xbf16>
    %cst_74 = arith.constant dense<0.000000e+00> : vector<31x128xf32>
    %133 = tpu.matmul %130, %132, %cst_74 {dimension_numbers = #tpu.dot_dimension_numbers<[1], [0], [0], [1], [0, 0, 1, 1], [], []>} : vector<31x64xbf16>, vector<64x128xbf16>, vector<31x128xf32> -> vector<31x128xf32>
    %134 = arith.addf %129, %133 : vector<31x128xf32>
    %135 = vector.extract_strided_slice %123 {offsets = [2, 0], sizes = [31, 64], strides = [1, 1]} : vector<34x64xbf16> to vector<31x64xbf16>
    %c2_75 = arith.constant 2 : index
    %c0_76 = arith.constant 0 : index
    %c0_77 = arith.constant 0 : index
    %136 = vector.load %arg6[%c2_75, %c0_76, %c0_77] : memref<4x64x128xbf16, #tpu.memory_space<vmem>>, vector<1x64x128xbf16>
    %137 = vector.shape_cast %136 : vector<1x64x128xbf16> to vector<64x128xbf16>
    %cst_78 = arith.constant dense<0.000000e+00> : vector<31x128xf32>
    %138 = tpu.matmul %135, %137, %cst_78 {dimension_numbers = #tpu.dot_dimension_numbers<[1], [0], [0], [1], [0, 0, 1, 1], [], []>} : vector<31x64xbf16>, vector<64x128xbf16>, vector<31x128xf32> -> vector<31x128xf32>
    %139 = arith.addf %134, %138 : vector<31x128xf32>
    %140 = vector.extract_strided_slice %123 {offsets = [3, 0], sizes = [31, 64], strides = [1, 1]} : vector<34x64xbf16> to vector<31x64xbf16>
    %c3_79 = arith.constant 3 : index
    %c0_80 = arith.constant 0 : index
    %c0_81 = arith.constant 0 : index
    %141 = vector.load %arg6[%c3_79, %c0_80, %c0_81] : memref<4x64x128xbf16, #tpu.memory_space<vmem>>, vector<1x64x128xbf16>
    %142 = vector.shape_cast %141 : vector<1x64x128xbf16> to vector<64x128xbf16>
    %cst_82 = arith.constant dense<0.000000e+00> : vector<31x128xf32>
    %143 = tpu.matmul %140, %142, %cst_82 {dimension_numbers = #tpu.dot_dimension_numbers<[1], [0], [0], [1], [0, 0, 1, 1], [], []>} : vector<31x64xbf16>, vector<64x128xbf16>, vector<31x128xf32> -> vector<31x128xf32>
    %144 = arith.addf %139, %143 : vector<31x128xf32>
    %c0_83 = arith.constant 0 : index
    %c0_84 = arith.constant 0 : index
    %145 = vector.load %arg7[%c0_83, %c0_84] : memref<1x128xf32, #tpu.memory_space<vmem>>, vector<1x128xf32>
    %146 = vector.broadcast %145 : vector<1x128xf32> to vector<31x128xf32>
    %147 = arith.addf %144, %146 : vector<31x128xf32>
    %148 = tpu.iota {dimensions = array<i32: 0>} : vector<16x31xi32>
    %149 = tpu.iota {dimensions = array<i32: 1>} : vector<16x31xi32>
    %c2_i32_85 = arith.constant 2 : i32
    %150 = vector.broadcast %c2_i32_85 : i32 to vector<16x31xi32>
    %151 = arith.muli %150, %148 : vector<16x31xi32>
    %152 = arith.cmpi eq, %149, %151 : vector<16x31xi32>
    %153 = arith.extui %152 : vector<16x31xi1> to vector<16x31xi32>
    %154 = arith.sitofp %153 : vector<16x31xi32> to vector<16x31xf32>
    %cst_86 = arith.constant dense<0.000000e+00> : vector<16x128xf32>
    %155 = tpu.matmul %154, %147, %cst_86 {dimension_numbers = #tpu.dot_dimension_numbers<[1], [0], [0], [1], [0, 0, 1, 1], [], []>} : vector<16x31xf32>, vector<31x128xf32>, vector<16x128xf32> -> vector<16x128xf32>
    %cst_87 = arith.constant 0.000000e+00 : f32
    %156 = vector.broadcast %cst_87 : f32 to vector<16x128xf32>
    %157 = arith.cmpf ogt, %155, %156 : vector<16x128xf32>
    %cst_88 = arith.constant 0.000000e+00 : f32
    %158 = vector.broadcast %cst_88 : f32 to vector<16x128xf32>
    %159 = arith.minimumf %155, %158 : vector<16x128xf32>
    %160 = math.exp %159 : vector<16x128xf32>
    %cst_89 = arith.constant 1.000000e+00 : f32
    %161 = vector.broadcast %cst_89 : f32 to vector<16x128xf32>
    %162 = arith.subf %160, %161 : vector<16x128xf32>
    %163 = arith.select %157, %155, %162 : vector<16x128xi1>, vector<16x128xf32>
    %cst_90 = arith.constant 0.000000e+00 : bf16
    %164 = vector.broadcast %cst_90 : bf16 to vector<18x128xbf16>
    %c0_91 = arith.constant 0 : index
    %c0_92 = arith.constant 0 : index
    %165 = vector.load %arg16[%c0_91, %c0_92] : memref<18x128xbf16, #tpu.memory_space<vmem>>, vector<18x128xbf16>
    tpu.vector_store %arg16[%c0_91, %c0_92], %164 {strides = array<i32>} : memref<18x128xbf16, #tpu.memory_space<vmem>>, vector<18x128xbf16>,
    %166 = arith.truncf %163 : vector<16x128xf32> to vector<16x128xbf16>
    %c1_93 = arith.constant 1 : index
    %c0_94 = arith.constant 0 : index
    %167 = vector.load %arg16[%c1_93, %c0_94] : memref<18x128xbf16, #tpu.memory_space<vmem>>, vector<16x128xbf16>
    tpu.vector_store %arg16[%c1_93, %c0_94], %166 {strides = array<i32>} : memref<18x128xbf16, #tpu.memory_space<vmem>>, vector<16x128xbf16>,
    %c0_95 = arith.constant 0 : index
    %c0_96 = arith.constant 0 : index
    %168 = vector.load %arg16[%c0_95, %c0_96] : memref<18x128xbf16, #tpu.memory_space<vmem>>, vector<18x128xbf16>
    %cst_97 = arith.constant 0.000000e+00 : f32
    %169 = vector.broadcast %cst_97 : f32 to vector<16x32xf32>
    %170 = vector.extract_strided_slice %168 {offsets = [0, 0], sizes = [16, 128], strides = [1, 1]} : vector<18x128xbf16> to vector<16x128xbf16>
    %c0_98 = arith.constant 0 : index
    %c0_99 = arith.constant 0 : index
    %c0_100 = arith.constant 0 : index
    %171 = vector.load %arg8[%c0_98, %c0_99, %c0_100] : memref<3x128x32xbf16, #tpu.memory_space<vmem>>, vector<1x128x32xbf16>
    %172 = vector.shape_cast %171 : vector<1x128x32xbf16> to vector<128x32xbf16>
    %cst_101 = arith.constant dense<0.000000e+00> : vector<16x32xf32>
    %173 = tpu.matmul %170, %172, %cst_101 {dimension_numbers = #tpu.dot_dimension_numbers<[1], [0], [0], [1], [0, 0, 1, 1], [], []>} : vector<16x128xbf16>, vector<128x32xbf16>, vector<16x32xf32> -> vector<16x32xf32>
    %174 = arith.addf %169, %173 : vector<16x32xf32>
    %175 = vector.extract_strided_slice %168 {offsets = [1, 0], sizes = [16, 128], strides = [1, 1]} : vector<18x128xbf16> to vector<16x128xbf16>
    %c1_102 = arith.constant 1 : index
    %c0_103 = arith.constant 0 : index
    %c0_104 = arith.constant 0 : index
    %176 = vector.load %arg8[%c1_102, %c0_103, %c0_104] : memref<3x128x32xbf16, #tpu.memory_space<vmem>>, vector<1x128x32xbf16>
    %177 = vector.shape_cast %176 : vector<1x128x32xbf16> to vector<128x32xbf16>
    %cst_105 = arith.constant dense<0.000000e+00> : vector<16x32xf32>
    %178 = tpu.matmul %175, %177, %cst_105 {dimension_numbers = #tpu.dot_dimension_numbers<[1], [0], [0], [1], [0, 0, 1, 1], [], []>} : vector<16x128xbf16>, vector<128x32xbf16>, vector<16x32xf32> -> vector<16x32xf32>
    %179 = arith.addf %174, %178 : vector<16x32xf32>
    %180 = vector.extract_strided_slice %168 {offsets = [2, 0], sizes = [16, 128], strides = [1, 1]} : vector<18x128xbf16> to vector<16x128xbf16>
    %c2_106 = arith.constant 2 : index
    %c0_107 = arith.constant 0 : index
    %c0_108 = arith.constant 0 : index
    %181 = vector.load %arg8[%c2_106, %c0_107, %c0_108] : memref<3x128x32xbf16, #tpu.memory_space<vmem>>, vector<1x128x32xbf16>
    %182 = vector.shape_cast %181 : vector<1x128x32xbf16> to vector<128x32xbf16>
    %cst_109 = arith.constant dense<0.000000e+00> : vector<16x32xf32>
    %183 = tpu.matmul %180, %182, %cst_109 {dimension_numbers = #tpu.dot_dimension_numbers<[1], [0], [0], [1], [0, 0, 1, 1], [], []>} : vector<16x128xbf16>, vector<128x32xbf16>, vector<16x32xf32> -> vector<16x32xf32>
    %184 = arith.addf %179, %183 : vector<16x32xf32>
    %c0_110 = arith.constant 0 : index
    %c0_111 = arith.constant 0 : index
    %185 = vector.load %arg9[%c0_110, %c0_111] : memref<1x32xf32, #tpu.memory_space<vmem>>, vector<1x32xf32>
    %186 = vector.broadcast %185 : vector<1x32xf32> to vector<16x32xf32>
    %187 = arith.addf %184, %186 : vector<16x32xf32>
    %188 = tpu.iota {dimensions = array<i32: 1>} : vector<16x128xi32>
    %cst_112 = arith.constant 0.000000e+00 : f32
    %189 = vector.broadcast %cst_112 : f32 to vector<16x32xf32>
    %c0_113 = arith.constant 0 : index
    %c0_114 = arith.constant 0 : index
    %c0_115 = arith.constant 0 : index
    %190 = vector.load %arg10[%c0_113, %c0_114, %c0_115] : memref<4x128x32xf32, #tpu.memory_space<vmem>>, vector<1x128x32xf32>
    %191 = vector.shape_cast %190 : vector<1x128x32xf32> to vector<128x32xf32>
    %cst_116 = arith.constant dense<0.000000e+00> : vector<16x128xf32>
    %192 = tpu.matmul %187, %191, %cst_116 {dimension_numbers = #tpu.dot_dimension_numbers<[1], [1], [0], [0], [0, 0, 1, 0], [], []>} : vector<16x32xf32>, vector<128x32xf32>, vector<16x128xf32> -> vector<16x128xf32>
    %c64_i32 = arith.constant 64 : i32
    %193 = vector.broadcast %c64_i32 : i32 to vector<16x128xi32>
    %194 = arith.cmpi slt, %188, %193 : vector<16x128xi32>
    %c0_117 = arith.constant 0 : index
    %c0_118 = arith.constant 0 : index
    %c0_119 = arith.constant 0 : index
    %195 = vector.load %arg11[%c0_117, %c0_118, %c0_119] : memref<4x1x128xf32, #tpu.memory_space<vmem>>, vector<1x1x128xf32>
    %196 = vector.shape_cast %195 : vector<1x1x128xf32> to vector<1x128xf32>
    %cst_120 = arith.constant 2.000000e+00 : f32
    %197 = vector.broadcast %cst_120 : f32 to vector<16x128xf32>
    %198 = arith.mulf %197, %192 : vector<16x128xf32>
    %199 = vector.broadcast %196 : vector<1x128xf32> to vector<16x128xf32>
    %200 = arith.subf %199, %198 : vector<16x128xf32>
    %cst_121 = arith.constant 1.000000e+30 : f32
    %201 = vector.broadcast %cst_121 : f32 to vector<16x128xf32>
    %202 = arith.select %194, %200, %201 : vector<16x128xi1>, vector<16x128xf32>
    %cst_122 = arith.constant dense<0x7F800000> : vector<16xf32>
    %203 = vector.multi_reduction <minimumf>, %202, %cst_122 [1] : vector<16x128xf32> to vector<16xf32>
    %204 = vector.shape_cast %203 : vector<16xf32> to vector<16x1xf32>
    %205 = vector.broadcast %204 : vector<16x1xf32> to vector<16x128xf32>
    %206 = arith.cmpf ole, %202, %205 : vector<16x128xf32>
    %c128_i32 = arith.constant 128 : i32
    %207 = vector.broadcast %c128_i32 : i32 to vector<16x128xi32>
    %208 = arith.select %206, %188, %207 : vector<16x128xi1>, vector<16x128xi32>
    %cst_123 = arith.constant dense<2147483647> : vector<16xi32>
    %209 = vector.multi_reduction <minsi>, %208, %cst_123 [1] : vector<16x128xi32> to vector<16xi32>
    %210 = vector.shape_cast %209 : vector<16xi32> to vector<16x1xi32>
    %211 = vector.broadcast %210 : vector<16x1xi32> to vector<16x128xi32>
    %212 = arith.cmpi eq, %188, %211 : vector<16x128xi32>
    %213 = arith.extui %212 : vector<16x128xi1> to vector<16x128xi32>
    %214 = arith.sitofp %213 : vector<16x128xi32> to vector<16x128xf32>
    %cst_124 = arith.constant dense<0.000000e+00> : vector<16x32xf32>
    %215 = tpu.matmul %214, %191, %cst_124 {dimension_numbers = #tpu.dot_dimension_numbers<[1], [0], [0], [1], [0, 0, 1, 1], [], []>} : vector<16x128xf32>, vector<128x32xf32>, vector<16x32xf32> -> vector<16x32xf32>
    %216 = arith.addf %189, %215 : vector<16x32xf32>
    %217 = arith.subf %187, %215 : vector<16x32xf32>
    %c1_125 = arith.constant 1 : index
    %c0_126 = arith.constant 0 : index
    %c0_127 = arith.constant 0 : index
    %218 = vector.load %arg10[%c1_125, %c0_126, %c0_127] : memref<4x128x32xf32, #tpu.memory_space<vmem>>, vector<1x128x32xf32>
    %219 = vector.shape_cast %218 : vector<1x128x32xf32> to vector<128x32xf32>
    %cst_128 = arith.constant dense<0.000000e+00> : vector<16x128xf32>
    %220 = tpu.matmul %217, %219, %cst_128 {dimension_numbers = #tpu.dot_dimension_numbers<[1], [1], [0], [0], [0, 0, 1, 0], [], []>} : vector<16x32xf32>, vector<128x32xf32>, vector<16x128xf32> -> vector<16x128xf32>
    %c64_i32_129 = arith.constant 64 : i32
    %221 = vector.broadcast %c64_i32_129 : i32 to vector<16x128xi32>
    %222 = arith.cmpi slt, %188, %221 : vector<16x128xi32>
    %c1_130 = arith.constant 1 : index
    %c0_131 = arith.constant 0 : index
    %c0_132 = arith.constant 0 : index
    %223 = vector.load %arg11[%c1_130, %c0_131, %c0_132] : memref<4x1x128xf32, #tpu.memory_space<vmem>>, vector<1x1x128xf32>
    %224 = vector.shape_cast %223 : vector<1x1x128xf32> to vector<1x128xf32>
    %cst_133 = arith.constant 2.000000e+00 : f32
    %225 = vector.broadcast %cst_133 : f32 to vector<16x128xf32>
    %226 = arith.mulf %225, %220 : vector<16x128xf32>
    %227 = vector.broadcast %224 : vector<1x128xf32> to vector<16x128xf32>
    %228 = arith.subf %227, %226 : vector<16x128xf32>
    %cst_134 = arith.constant 1.000000e+30 : f32
    %229 = vector.broadcast %cst_134 : f32 to vector<16x128xf32>
    %230 = arith.select %222, %228, %229 : vector<16x128xi1>, vector<16x128xf32>
    %cst_135 = arith.constant dense<0x7F800000> : vector<16xf32>
    %231 = vector.multi_reduction <minimumf>, %230, %cst_135 [1] : vector<16x128xf32> to vector<16xf32>
    %232 = vector.shape_cast %231 : vector<16xf32> to vector<16x1xf32>
    %233 = vector.broadcast %232 : vector<16x1xf32> to vector<16x128xf32>
    %234 = arith.cmpf ole, %230, %233 : vector<16x128xf32>
    %c128_i32_136 = arith.constant 128 : i32
    %235 = vector.broadcast %c128_i32_136 : i32 to vector<16x128xi32>
    %236 = arith.select %234, %188, %235 : vector<16x128xi1>, vector<16x128xi32>
    %cst_137 = arith.constant dense<2147483647> : vector<16xi32>
    %237 = vector.multi_reduction <minsi>, %236, %cst_137 [1] : vector<16x128xi32> to vector<16xi32>
    %238 = vector.shape_cast %237 : vector<16xi32> to vector<16x1xi32>
    %239 = vector.broadcast %238 : vector<16x1xi32> to vector<16x128xi32>
    %240 = arith.cmpi eq, %188, %239 : vector<16x128xi32>
    %241 = arith.extui %240 : vector<16x128xi1> to vector<16x128xi32>
    %242 = arith.sitofp %241 : vector<16x128xi32> to vector<16x128xf32>
    %cst_138 = arith.constant dense<0.000000e+00> : vector<16x32xf32>
    %243 = tpu.matmul %242, %219, %cst_138 {dimension_numbers = #tpu.dot_dimension_numbers<[1], [0], [0], [1], [0, 0, 1, 1], [], []>} : vector<16x128xf32>, vector<128x32xf32>, vector<16x32xf32> -> vector<16x32xf32>
    %244 = arith.addf %216, %243 : vector<16x32xf32>
    %245 = arith.subf %217, %243 : vector<16x32xf32>
    %c2_139 = arith.constant 2 : index
    %c0_140 = arith.constant 0 : index
    %c0_141 = arith.constant 0 : index
    %246 = vector.load %arg10[%c2_139, %c0_140, %c0_141] : memref<4x128x32xf32, #tpu.memory_space<vmem>>, vector<1x128x32xf32>
    %247 = vector.shape_cast %246 : vector<1x128x32xf32> to vector<128x32xf32>
    %cst_142 = arith.constant dense<0.000000e+00> : vector<16x128xf32>
    %248 = tpu.matmul %245, %247, %cst_142 {dimension_numbers = #tpu.dot_dimension_numbers<[1], [1], [0], [0], [0, 0, 1, 0], [], []>} : vector<16x32xf32>, vector<128x32xf32>, vector<16x128xf32> -> vector<16x128xf32>
    %c64_i32_143 = arith.constant 64 : i32
    %249 = vector.broadcast %c64_i32_143 : i32 to vector<16x128xi32>
    %250 = arith.cmpi slt, %188, %249 : vector<16x128xi32>
    %c2_144 = arith.constant 2 : index
    %c0_145 = arith.constant 0 : index
    %c0_146 = arith.constant 0 : index
    %251 = vector.load %arg11[%c2_144, %c0_145, %c0_146] : memref<4x1x128xf32, #tpu.memory_space<vmem>>, vector<1x1x128xf32>
    %252 = vector.shape_cast %251 : vector<1x1x128xf32> to vector<1x128xf32>
    %cst_147 = arith.constant 2.000000e+00 : f32
    %253 = vector.broadcast %cst_147 : f32 to vector<16x128xf32>
    %254 = arith.mulf %253, %248 : vector<16x128xf32>
    %255 = vector.broadcast %252 : vector<1x128xf32> to vector<16x128xf32>
    %256 = arith.subf %255, %254 : vector<16x128xf32>
    %cst_148 = arith.constant 1.000000e+30 : f32
    %257 = vector.broadcast %cst_148 : f32 to vector<16x128xf32>
    %258 = arith.select %250, %256, %257 : vector<16x128xi1>, vector<16x128xf32>
    %cst_149 = arith.constant dense<0x7F800000> : vector<16xf32>
    %259 = vector.multi_reduction <minimumf>, %258, %cst_149 [1] : vector<16x128xf32> to vector<16xf32>
    %260 = vector.shape_cast %259 : vector<16xf32> to vector<16x1xf32>
    %261 = vector.broadcast %260 : vector<16x1xf32> to vector<16x128xf32>
    %262 = arith.cmpf ole, %258, %261 : vector<16x128xf32>
    %c128_i32_150 = arith.constant 128 : i32
    %263 = vector.broadcast %c128_i32_150 : i32 to vector<16x128xi32>
    %264 = arith.select %262, %188, %263 : vector<16x128xi1>, vector<16x128xi32>
    %cst_151 = arith.constant dense<2147483647> : vector<16xi32>
    %265 = vector.multi_reduction <minsi>, %264, %cst_151 [1] : vector<16x128xi32> to vector<16xi32>
    %266 = vector.shape_cast %265 : vector<16xi32> to vector<16x1xi32>
    %267 = vector.broadcast %266 : vector<16x1xi32> to vector<16x128xi32>
    %268 = arith.cmpi eq, %188, %267 : vector<16x128xi32>
    %269 = arith.extui %268 : vector<16x128xi1> to vector<16x128xi32>
    %270 = arith.sitofp %269 : vector<16x128xi32> to vector<16x128xf32>
    %cst_152 = arith.constant dense<0.000000e+00> : vector<16x32xf32>
    %271 = tpu.matmul %270, %247, %cst_152 {dimension_numbers = #tpu.dot_dimension_numbers<[1], [0], [0], [1], [0, 0, 1, 1], [], []>} : vector<16x128xf32>, vector<128x32xf32>, vector<16x32xf32> -> vector<16x32xf32>
    %272 = arith.addf %244, %271 : vector<16x32xf32>
    %273 = arith.subf %245, %271 : vector<16x32xf32>
    %c3_153 = arith.constant 3 : index
    %c0_154 = arith.constant 0 : index
    %c0_155 = arith.constant 0 : index
    %274 = vector.load %arg10[%c3_153, %c0_154, %c0_155] : memref<4x128x32xf32, #tpu.memory_space<vmem>>, vector<1x128x32xf32>
    %275 = vector.shape_cast %274 : vector<1x128x32xf32> to vector<128x32xf32>
    %cst_156 = arith.constant dense<0.000000e+00> : vector<16x128xf32>
    %276 = tpu.matmul %273, %275, %cst_156 {dimension_numbers = #tpu.dot_dimension_numbers<[1], [1], [0], [0], [0, 0, 1, 0], [], []>} : vector<16x32xf32>, vector<128x32xf32>, vector<16x128xf32> -> vector<16x128xf32>
    %c64_i32_157 = arith.constant 64 : i32
    %277 = vector.broadcast %c64_i32_157 : i32 to vector<16x128xi32>
    %278 = arith.cmpi slt, %188, %277 : vector<16x128xi32>
    %c3_158 = arith.constant 3 : index
    %c0_159 = arith.constant 0 : index
    %c0_160 = arith.constant 0 : index
    %279 = vector.load %arg11[%c3_158, %c0_159, %c0_160] : memref<4x1x128xf32, #tpu.memory_space<vmem>>, vector<1x1x128xf32>
    %280 = vector.shape_cast %279 : vector<1x1x128xf32> to vector<1x128xf32>
    %cst_161 = arith.constant 2.000000e+00 : f32
    %281 = vector.broadcast %cst_161 : f32 to vector<16x128xf32>
    %282 = arith.mulf %281, %276 : vector<16x128xf32>
    %283 = vector.broadcast %280 : vector<1x128xf32> to vector<16x128xf32>
    %284 = arith.subf %283, %282 : vector<16x128xf32>
    %cst_162 = arith.constant 1.000000e+30 : f32
    %285 = vector.broadcast %cst_162 : f32 to vector<16x128xf32>
    %286 = arith.select %278, %284, %285 : vector<16x128xi1>, vector<16x128xf32>
    %cst_163 = arith.constant dense<0x7F800000> : vector<16xf32>
    %287 = vector.multi_reduction <minimumf>, %286, %cst_163 [1] : vector<16x128xf32> to vector<16xf32>
    %288 = vector.shape_cast %287 : vector<16xf32> to vector<16x1xf32>
    %289 = vector.broadcast %288 : vector<16x1xf32> to vector<16x128xf32>
    %290 = arith.cmpf ole, %286, %289 : vector<16x128xf32>
    %c128_i32_164 = arith.constant 128 : i32
    %291 = vector.broadcast %c128_i32_164 : i32 to vector<16x128xi32>
    %292 = arith.select %290, %188, %291 : vector<16x128xi1>, vector<16x128xi32>
    %cst_165 = arith.constant dense<2147483647> : vector<16xi32>
    %293 = vector.multi_reduction <minsi>, %292, %cst_165 [1] : vector<16x128xi32> to vector<16xi32>
    %294 = vector.shape_cast %293 : vector<16xi32> to vector<16x1xi32>
    %295 = vector.broadcast %294 : vector<16x1xi32> to vector<16x128xi32>
    %296 = arith.cmpi eq, %188, %295 : vector<16x128xi32>
    %297 = arith.extui %296 : vector<16x128xi1> to vector<16x128xi32>
    %298 = arith.sitofp %297 : vector<16x128xi32> to vector<16x128xf32>
    %cst_166 = arith.constant dense<0.000000e+00> : vector<16x32xf32>
    %299 = tpu.matmul %298, %275, %cst_166 {dimension_numbers = #tpu.dot_dimension_numbers<[1], [0], [0], [1], [0, 0, 1, 1], [], []>} : vector<16x128xf32>, vector<128x32xf32>, vector<16x32xf32> -> vector<16x32xf32>
    %300 = arith.addf %272, %299 : vector<16x32xf32>
    %c0_167 = arith.constant 0 : index
    %c0_168 = arith.constant 0 : index
    %c0_169 = arith.constant 0 : index
    %301 = vector.load %arg12[%c0_167, %c0_168, %c0_169] : memref<1x16x32xf32, #tpu.memory_space<vmem>>, vector<1x16x32xf32>
    %302 = vector.shape_cast %301 : vector<1x16x32xf32> to vector<16x32xf32>
    %303 = vector.shape_cast %300 : vector<16x32xf32> to vector<1x16x32xf32>
    tpu.vector_store %arg12[%c0_167, %c0_168, %c0_169], %303 {strides = array<i32>} : memref<1x16x32xf32, #tpu.memory_space<vmem>>, vector<1x16x32xf32>,
    return
  }
  func.func @transform_0(%arg0: i32) -> (i32, i32, i32) {
    %c0_i32 = arith.constant 0 : i32
    %c0_i32_0 = arith.constant 0 : i32
    %c0_i32_1 = arith.constant 0 : i32
    return %arg0, %c0_i32, %c0_i32_0 : i32, i32, i32
  }
  func.func @transform_1(%arg0: i32) -> (i32, i32, i32) {
    %c0_i32 = arith.constant 0 : i32
    %c0_i32_0 = arith.constant 0 : i32
    %c0_i32_1 = arith.constant 0 : i32
    %c0_i32_2 = arith.constant 0 : i32
    return %c0_i32, %c0_i32_0, %c0_i32_1 : i32, i32, i32
  }
  func.func @transform_2(%arg0: i32) -> (i32, i32) {
    %c0_i32 = arith.constant 0 : i32
    %c0_i32_0 = arith.constant 0 : i32
    %c0_i32_1 = arith.constant 0 : i32
    return %c0_i32, %c0_i32_0 : i32, i32
  }
  func.func @transform_3(%arg0: i32) -> (i32, i32, i32) {
    %c0_i32 = arith.constant 0 : i32
    %c0_i32_0 = arith.constant 0 : i32
    %c0_i32_1 = arith.constant 0 : i32
    %c0_i32_2 = arith.constant 0 : i32
    return %c0_i32, %c0_i32_0, %c0_i32_1 : i32, i32, i32
  }
  func.func @transform_4(%arg0: i32) -> (i32, i32) {
    %c0_i32 = arith.constant 0 : i32
    %c0_i32_0 = arith.constant 0 : i32
    %c0_i32_1 = arith.constant 0 : i32
    return %c0_i32, %c0_i32_0 : i32, i32
  }
  func.func @transform_5(%arg0: i32) -> (i32, i32, i32) {
    %c0_i32 = arith.constant 0 : i32
    %c0_i32_0 = arith.constant 0 : i32
    %c0_i32_1 = arith.constant 0 : i32
    %c0_i32_2 = arith.constant 0 : i32
    return %c0_i32, %c0_i32_0, %c0_i32_1 : i32, i32, i32
  }
  func.func @transform_6(%arg0: i32) -> (i32, i32) {
    %c0_i32 = arith.constant 0 : i32
    %c0_i32_0 = arith.constant 0 : i32
    %c0_i32_1 = arith.constant 0 : i32
    return %c0_i32, %c0_i32_0 : i32, i32
  }
  func.func @transform_7(%arg0: i32) -> (i32, i32, i32) {
    %c0_i32 = arith.constant 0 : i32
    %c0_i32_0 = arith.constant 0 : i32
    %c0_i32_1 = arith.constant 0 : i32
    %c0_i32_2 = arith.constant 0 : i32
    return %c0_i32, %c0_i32_0, %c0_i32_1 : i32, i32, i32
  }
  func.func @transform_8(%arg0: i32) -> (i32, i32) {
    %c0_i32 = arith.constant 0 : i32
    %c0_i32_0 = arith.constant 0 : i32
    %c0_i32_1 = arith.constant 0 : i32
    return %c0_i32, %c0_i32_0 : i32, i32
  }
  func.func @transform_9(%arg0: i32) -> (i32, i32, i32) {
    %c0_i32 = arith.constant 0 : i32
    %c0_i32_0 = arith.constant 0 : i32
    %c0_i32_1 = arith.constant 0 : i32
    %c0_i32_2 = arith.constant 0 : i32
    return %c0_i32, %c0_i32_0, %c0_i32_1 : i32, i32, i32
  }
  func.func @transform_10(%arg0: i32) -> (i32, i32, i32) {
    %c0_i32 = arith.constant 0 : i32
    %c0_i32_0 = arith.constant 0 : i32
    %c0_i32_1 = arith.constant 0 : i32
    %c0_i32_2 = arith.constant 0 : i32
    return %c0_i32, %c0_i32_0, %c0_i32_1 : i32, i32, i32
  }
  func.func @transform_11(%arg0: i32) -> (i32, i32, i32) {
    %c0_i32 = arith.constant 0 : i32
    %c0_i32_0 = arith.constant 0 : i32
    %c0_i32_1 = arith.constant 0 : i32
    return %arg0, %c0_i32, %c0_i32_0 : i32, i32, i32
  }
}

module attributes {stable_mosaic.version = 11 : i64} {
  func.func @_decoder_kernel(%arg0: i32, %arg1: memref<1x16x32xf32, #tpu.memory_space<vmem>>, %arg2: memref<7x32x160xbf16, #tpu.memory_space<vmem>>, %arg3: memref<1x160xf32, #tpu.memory_space<vmem>>, %arg4: memref<4x160x80xbf16, #tpu.memory_space<vmem>>, %arg5: memref<1x80xf32, #tpu.memory_space<vmem>>, %arg6: memref<4x80x40xbf16, #tpu.memory_space<vmem>>, %arg7: memref<1x40xf32, #tpu.memory_space<vmem>>, %arg8: memref<7x1x40xbf16, #tpu.memory_space<vmem>>, %arg9: memref<1x1xf32, #tpu.memory_space<vmem>>, %arg10: memref<1x64x1xf32, #tpu.memory_space<vmem>>, %arg11: memref<22x32xbf16, #tpu.memory_space<vmem>>, %arg12: memref<18x160xbf16, #tpu.memory_space<vmem>>, %arg13: memref<34x80xbf16, #tpu.memory_space<vmem>>, %arg14: memref<70x40xbf16, #tpu.memory_space<vmem>>) attributes {dimension_semantics = [#tpu.dimension_semantics<parallel>], iteration_bounds = array<i64: 2>, scalar_prefetch = 0 : i64, scratch_operands = 4 : i64, tpu.core_type = #tpu.core_type<tc>, window_params = [{transform_indices = @transform_0, window_bounds = array<i64: 1, 16, 32>}, {pipeline_mode = #tpu.pipeline_mode<synchronous>, transform_indices = @transform_1, window_bounds = array<i64: 7, 32, 160>}, {pipeline_mode = #tpu.pipeline_mode<synchronous>, transform_indices = @transform_2, window_bounds = array<i64: 1, 160>}, {pipeline_mode = #tpu.pipeline_mode<synchronous>, transform_indices = @transform_3, window_bounds = array<i64: 4, 160, 80>}, {pipeline_mode = #tpu.pipeline_mode<synchronous>, transform_indices = @transform_4, window_bounds = array<i64: 1, 80>}, {pipeline_mode = #tpu.pipeline_mode<synchronous>, transform_indices = @transform_5, window_bounds = array<i64: 4, 80, 40>}, {pipeline_mode = #tpu.pipeline_mode<synchronous>, transform_indices = @transform_6, window_bounds = array<i64: 1, 40>}, {pipeline_mode = #tpu.pipeline_mode<synchronous>, transform_indices = @transform_7, window_bounds = array<i64: 7, 1, 40>}, {pipeline_mode = #tpu.pipeline_mode<synchronous>, transform_indices = @transform_8, window_bounds = array<i64: 1, 1>}, {transform_indices = @transform_9, window_bounds = array<i64: 1, 64, 1>}]} {
    %cst = arith.constant 0.000000e+00 : bf16
    %0 = vector.broadcast %cst : bf16 to vector<22x32xbf16>
    %c0 = arith.constant 0 : index
    %c0_0 = arith.constant 0 : index
    %1 = vector.load %arg11[%c0, %c0_0] : memref<22x32xbf16, #tpu.memory_space<vmem>>, vector<22x32xbf16>
    tpu.vector_store %arg11[%c0, %c0_0], %0 {strides = array<i32>} : memref<22x32xbf16, #tpu.memory_space<vmem>>, vector<22x32xbf16>,
    %c0_1 = arith.constant 0 : index
    %c0_2 = arith.constant 0 : index
    %c0_3 = arith.constant 0 : index
    %2 = vector.load %arg1[%c0_1, %c0_2, %c0_3] : memref<1x16x32xf32, #tpu.memory_space<vmem>>, vector<1x16x32xf32>
    %3 = vector.shape_cast %2 : vector<1x16x32xf32> to vector<16x32xf32>
    %4 = arith.truncf %3 : vector<16x32xf32> to vector<16x32xbf16>
    %c3 = arith.constant 3 : index
    %c0_4 = arith.constant 0 : index
    %5 = vector.load %arg11[%c3, %c0_4] : memref<22x32xbf16, #tpu.memory_space<vmem>>, vector<16x32xbf16>
    tpu.vector_store %arg11[%c3, %c0_4], %4 {strides = array<i32>} : memref<22x32xbf16, #tpu.memory_space<vmem>>, vector<16x32xbf16>,
    %c0_5 = arith.constant 0 : index
    %c0_6 = arith.constant 0 : index
    %6 = vector.load %arg11[%c0_5, %c0_6] : memref<22x32xbf16, #tpu.memory_space<vmem>>, vector<22x32xbf16>
    %cst_7 = arith.constant 0.000000e+00 : f32
    %7 = vector.broadcast %cst_7 : f32 to vector<16x160xf32>
    %8 = vector.extract_strided_slice %6 {offsets = [0, 0], sizes = [16, 32], strides = [1, 1]} : vector<22x32xbf16> to vector<16x32xbf16>
    %c0_8 = arith.constant 0 : index
    %c0_9 = arith.constant 0 : index
    %c0_10 = arith.constant 0 : index
    %9 = vector.load %arg2[%c0_8, %c0_9, %c0_10] : memref<7x32x160xbf16, #tpu.memory_space<vmem>>, vector<1x32x160xbf16>
    %10 = vector.shape_cast %9 : vector<1x32x160xbf16> to vector<32x160xbf16>
    %cst_11 = arith.constant dense<0.000000e+00> : vector<16x160xf32>
    %11 = tpu.matmul %8, %10, %cst_11 {dimension_numbers = #tpu.dot_dimension_numbers<[1], [0], [0], [1], [0, 0, 1, 1], [], []>} : vector<16x32xbf16>, vector<32x160xbf16>, vector<16x160xf32> -> vector<16x160xf32>
    %12 = arith.addf %7, %11 : vector<16x160xf32>
    %13 = vector.extract_strided_slice %6 {offsets = [1, 0], sizes = [16, 32], strides = [1, 1]} : vector<22x32xbf16> to vector<16x32xbf16>
    %c1 = arith.constant 1 : index
    %c0_12 = arith.constant 0 : index
    %c0_13 = arith.constant 0 : index
    %14 = vector.load %arg2[%c1, %c0_12, %c0_13] : memref<7x32x160xbf16, #tpu.memory_space<vmem>>, vector<1x32x160xbf16>
    %15 = vector.shape_cast %14 : vector<1x32x160xbf16> to vector<32x160xbf16>
    %cst_14 = arith.constant dense<0.000000e+00> : vector<16x160xf32>
    %16 = tpu.matmul %13, %15, %cst_14 {dimension_numbers = #tpu.dot_dimension_numbers<[1], [0], [0], [1], [0, 0, 1, 1], [], []>} : vector<16x32xbf16>, vector<32x160xbf16>, vector<16x160xf32> -> vector<16x160xf32>
    %17 = arith.addf %12, %16 : vector<16x160xf32>
    %18 = vector.extract_strided_slice %6 {offsets = [2, 0], sizes = [16, 32], strides = [1, 1]} : vector<22x32xbf16> to vector<16x32xbf16>
    %c2 = arith.constant 2 : index
    %c0_15 = arith.constant 0 : index
    %c0_16 = arith.constant 0 : index
    %19 = vector.load %arg2[%c2, %c0_15, %c0_16] : memref<7x32x160xbf16, #tpu.memory_space<vmem>>, vector<1x32x160xbf16>
    %20 = vector.shape_cast %19 : vector<1x32x160xbf16> to vector<32x160xbf16>
    %cst_17 = arith.constant dense<0.000000e+00> : vector<16x160xf32>
    %21 = tpu.matmul %18, %20, %cst_17 {dimension_numbers = #tpu.dot_dimension_numbers<[1], [0], [0], [1], [0, 0, 1, 1], [], []>} : vector<16x32xbf16>, vector<32x160xbf16>, vector<16x160xf32> -> vector<16x160xf32>
    %22 = arith.addf %17, %21 : vector<16x160xf32>
    %23 = vector.extract_strided_slice %6 {offsets = [3, 0], sizes = [16, 32], strides = [1, 1]} : vector<22x32xbf16> to vector<16x32xbf16>
    %c3_18 = arith.constant 3 : index
    %c0_19 = arith.constant 0 : index
    %c0_20 = arith.constant 0 : index
    %24 = vector.load %arg2[%c3_18, %c0_19, %c0_20] : memref<7x32x160xbf16, #tpu.memory_space<vmem>>, vector<1x32x160xbf16>
    %25 = vector.shape_cast %24 : vector<1x32x160xbf16> to vector<32x160xbf16>
    %cst_21 = arith.constant dense<0.000000e+00> : vector<16x160xf32>
    %26 = tpu.matmul %23, %25, %cst_21 {dimension_numbers = #tpu.dot_dimension_numbers<[1], [0], [0], [1], [0, 0, 1, 1], [], []>} : vector<16x32xbf16>, vector<32x160xbf16>, vector<16x160xf32> -> vector<16x160xf32>
    %27 = arith.addf %22, %26 : vector<16x160xf32>
    %28 = vector.extract_strided_slice %6 {offsets = [4, 0], sizes = [16, 32], strides = [1, 1]} : vector<22x32xbf16> to vector<16x32xbf16>
    %c4 = arith.constant 4 : index
    %c0_22 = arith.constant 0 : index
    %c0_23 = arith.constant 0 : index
    %29 = vector.load %arg2[%c4, %c0_22, %c0_23] : memref<7x32x160xbf16, #tpu.memory_space<vmem>>, vector<1x32x160xbf16>
    %30 = vector.shape_cast %29 : vector<1x32x160xbf16> to vector<32x160xbf16>
    %cst_24 = arith.constant dense<0.000000e+00> : vector<16x160xf32>
    %31 = tpu.matmul %28, %30, %cst_24 {dimension_numbers = #tpu.dot_dimension_numbers<[1], [0], [0], [1], [0, 0, 1, 1], [], []>} : vector<16x32xbf16>, vector<32x160xbf16>, vector<16x160xf32> -> vector<16x160xf32>
    %32 = arith.addf %27, %31 : vector<16x160xf32>
    %33 = vector.extract_strided_slice %6 {offsets = [5, 0], sizes = [16, 32], strides = [1, 1]} : vector<22x32xbf16> to vector<16x32xbf16>
    %c5 = arith.constant 5 : index
    %c0_25 = arith.constant 0 : index
    %c0_26 = arith.constant 0 : index
    %34 = vector.load %arg2[%c5, %c0_25, %c0_26] : memref<7x32x160xbf16, #tpu.memory_space<vmem>>, vector<1x32x160xbf16>
    %35 = vector.shape_cast %34 : vector<1x32x160xbf16> to vector<32x160xbf16>
    %cst_27 = arith.constant dense<0.000000e+00> : vector<16x160xf32>
    %36 = tpu.matmul %33, %35, %cst_27 {dimension_numbers = #tpu.dot_dimension_numbers<[1], [0], [0], [1], [0, 0, 1, 1], [], []>} : vector<16x32xbf16>, vector<32x160xbf16>, vector<16x160xf32> -> vector<16x160xf32>
    %37 = arith.addf %32, %36 : vector<16x160xf32>
    %38 = vector.extract_strided_slice %6 {offsets = [6, 0], sizes = [16, 32], strides = [1, 1]} : vector<22x32xbf16> to vector<16x32xbf16>
    %c6 = arith.constant 6 : index
    %c0_28 = arith.constant 0 : index
    %c0_29 = arith.constant 0 : index
    %39 = vector.load %arg2[%c6, %c0_28, %c0_29] : memref<7x32x160xbf16, #tpu.memory_space<vmem>>, vector<1x32x160xbf16>
    %40 = vector.shape_cast %39 : vector<1x32x160xbf16> to vector<32x160xbf16>
    %cst_30 = arith.constant dense<0.000000e+00> : vector<16x160xf32>
    %41 = tpu.matmul %38, %40, %cst_30 {dimension_numbers = #tpu.dot_dimension_numbers<[1], [0], [0], [1], [0, 0, 1, 1], [], []>} : vector<16x32xbf16>, vector<32x160xbf16>, vector<16x160xf32> -> vector<16x160xf32>
    %42 = arith.addf %37, %41 : vector<16x160xf32>
    %c0_31 = arith.constant 0 : index
    %c0_32 = arith.constant 0 : index
    %43 = vector.load %arg3[%c0_31, %c0_32] : memref<1x160xf32, #tpu.memory_space<vmem>>, vector<1x160xf32>
    %44 = vector.broadcast %43 : vector<1x160xf32> to vector<16x160xf32>
    %45 = arith.addf %42, %44 : vector<16x160xf32>
    %cst_33 = arith.constant 0.000000e+00 : f32
    %46 = vector.broadcast %cst_33 : f32 to vector<16x160xf32>
    %47 = arith.cmpf ogt, %45, %46 : vector<16x160xf32>
    %cst_34 = arith.constant 0.000000e+00 : f32
    %48 = vector.broadcast %cst_34 : f32 to vector<16x160xf32>
    %49 = arith.minimumf %45, %48 : vector<16x160xf32>
    %50 = math.exp %49 : vector<16x160xf32>
    %cst_35 = arith.constant 1.000000e+00 : f32
    %51 = vector.broadcast %cst_35 : f32 to vector<16x160xf32>
    %52 = arith.subf %50, %51 : vector<16x160xf32>
    %53 = arith.select %47, %45, %52 : vector<16x160xi1>, vector<16x160xf32>
    %cst_36 = arith.constant 0.000000e+00 : bf16
    %54 = vector.broadcast %cst_36 : bf16 to vector<18x160xbf16>
    %c0_37 = arith.constant 0 : index
    %c0_38 = arith.constant 0 : index
    %55 = vector.load %arg12[%c0_37, %c0_38] : memref<18x160xbf16, #tpu.memory_space<vmem>>, vector<18x160xbf16>
    tpu.vector_store %arg12[%c0_37, %c0_38], %54 {strides = array<i32>} : memref<18x160xbf16, #tpu.memory_space<vmem>>, vector<18x160xbf16>,
    %56 = arith.truncf %53 : vector<16x160xf32> to vector<16x160xbf16>
    %c1_39 = arith.constant 1 : index
    %c0_40 = arith.constant 0 : index
    %57 = vector.load %arg12[%c1_39, %c0_40] : memref<18x160xbf16, #tpu.memory_space<vmem>>, vector<16x160xbf16>
    tpu.vector_store %arg12[%c1_39, %c0_40], %56 {strides = array<i32>} : memref<18x160xbf16, #tpu.memory_space<vmem>>, vector<16x160xbf16>,
    %c0_41 = arith.constant 0 : index
    %c0_42 = arith.constant 0 : index
    %58 = vector.load %arg12[%c0_41, %c0_42] : memref<18x160xbf16, #tpu.memory_space<vmem>>, vector<18x160xbf16>
    %59 = vector.extract_strided_slice %58 {offsets = [1, 0], sizes = [16, 160], strides = [1, 1]} : vector<18x160xbf16> to vector<16x160xbf16>
    %c1_43 = arith.constant 1 : index
    %c0_44 = arith.constant 0 : index
    %c0_45 = arith.constant 0 : index
    %60 = vector.load %arg4[%c1_43, %c0_44, %c0_45] : memref<4x160x80xbf16, #tpu.memory_space<vmem>>, vector<1x160x80xbf16>
    %61 = vector.shape_cast %60 : vector<1x160x80xbf16> to vector<160x80xbf16>
    %cst_46 = arith.constant dense<0.000000e+00> : vector<16x80xf32>
    %62 = tpu.matmul %59, %61, %cst_46 {dimension_numbers = #tpu.dot_dimension_numbers<[1], [0], [0], [1], [0, 0, 1, 1], [], []>} : vector<16x160xbf16>, vector<160x80xbf16>, vector<16x80xf32> -> vector<16x80xf32>
    %63 = vector.extract_strided_slice %58 {offsets = [0, 0], sizes = [16, 160], strides = [1, 1]} : vector<18x160xbf16> to vector<16x160xbf16>
    %c3_47 = arith.constant 3 : index
    %c0_48 = arith.constant 0 : index
    %c0_49 = arith.constant 0 : index
    %64 = vector.load %arg4[%c3_47, %c0_48, %c0_49] : memref<4x160x80xbf16, #tpu.memory_space<vmem>>, vector<1x160x80xbf16>
    %65 = vector.shape_cast %64 : vector<1x160x80xbf16> to vector<160x80xbf16>
    %cst_50 = arith.constant dense<0.000000e+00> : vector<16x80xf32>
    %66 = tpu.matmul %63, %65, %cst_50 {dimension_numbers = #tpu.dot_dimension_numbers<[1], [0], [0], [1], [0, 0, 1, 1], [], []>} : vector<16x160xbf16>, vector<160x80xbf16>, vector<16x80xf32> -> vector<16x80xf32>
    %67 = arith.addf %62, %66 : vector<16x80xf32>
    %68 = vector.extract_strided_slice %58 {offsets = [2, 0], sizes = [16, 160], strides = [1, 1]} : vector<18x160xbf16> to vector<16x160xbf16>
    %c0_51 = arith.constant 0 : index
    %c0_52 = arith.constant 0 : index
    %c0_53 = arith.constant 0 : index
    %69 = vector.load %arg4[%c0_51, %c0_52, %c0_53] : memref<4x160x80xbf16, #tpu.memory_space<vmem>>, vector<1x160x80xbf16>
    %70 = vector.shape_cast %69 : vector<1x160x80xbf16> to vector<160x80xbf16>
    %cst_54 = arith.constant dense<0.000000e+00> : vector<16x80xf32>
    %71 = tpu.matmul %68, %70, %cst_54 {dimension_numbers = #tpu.dot_dimension_numbers<[1], [0], [0], [1], [0, 0, 1, 1], [], []>} : vector<16x160xbf16>, vector<160x80xbf16>, vector<16x80xf32> -> vector<16x80xf32>
    %72 = vector.extract_strided_slice %58 {offsets = [1, 0], sizes = [16, 160], strides = [1, 1]} : vector<18x160xbf16> to vector<16x160xbf16>
    %c2_55 = arith.constant 2 : index
    %c0_56 = arith.constant 0 : index
    %c0_57 = arith.constant 0 : index
    %73 = vector.load %arg4[%c2_55, %c0_56, %c0_57] : memref<4x160x80xbf16, #tpu.memory_space<vmem>>, vector<1x160x80xbf16>
    %74 = vector.shape_cast %73 : vector<1x160x80xbf16> to vector<160x80xbf16>
    %cst_58 = arith.constant dense<0.000000e+00> : vector<16x80xf32>
    %75 = tpu.matmul %72, %74, %cst_58 {dimension_numbers = #tpu.dot_dimension_numbers<[1], [0], [0], [1], [0, 0, 1, 1], [], []>} : vector<16x160xbf16>, vector<160x80xbf16>, vector<16x80xf32> -> vector<16x80xf32>
    %76 = arith.addf %71, %75 : vector<16x80xf32>
    %77 = tpu.iota {dimensions = array<i32: 0>} : vector<32x16xi32>
    %78 = tpu.iota {dimensions = array<i32: 1>} : vector<32x16xi32>
    %c2_i32 = arith.constant 2 : i32
    %79 = vector.broadcast %c2_i32 : i32 to vector<32x16xi32>
    %80 = arith.muli %79, %78 : vector<32x16xi32>
    %81 = arith.cmpi eq, %77, %80 : vector<32x16xi32>
    %82 = arith.extui %81 : vector<32x16xi1> to vector<32x16xi32>
    %83 = arith.sitofp %82 : vector<32x16xi32> to vector<32x16xf32>
    %c2_i32_59 = arith.constant 2 : i32
    %84 = vector.broadcast %c2_i32_59 : i32 to vector<32x16xi32>
    %85 = arith.muli %84, %78 : vector<32x16xi32>
    %c1_i32 = arith.constant 1 : i32
    %86 = vector.broadcast %c1_i32 : i32 to vector<32x16xi32>
    %87 = arith.addi %85, %86 : vector<32x16xi32>
    %88 = arith.cmpi eq, %77, %87 : vector<32x16xi32>
    %89 = arith.extui %88 : vector<32x16xi1> to vector<32x16xi32>
    %90 = arith.sitofp %89 : vector<32x16xi32> to vector<32x16xf32>
    %cst_60 = arith.constant dense<0.000000e+00> : vector<32x80xf32>
    %91 = tpu.matmul %83, %67, %cst_60 {dimension_numbers = #tpu.dot_dimension_numbers<[1], [0], [0], [1], [0, 0, 1, 1], [], []>} : vector<32x16xf32>, vector<16x80xf32>, vector<32x80xf32> -> vector<32x80xf32>
    %cst_61 = arith.constant dense<0.000000e+00> : vector<32x80xf32>
    %92 = tpu.matmul %90, %76, %cst_61 {dimension_numbers = #tpu.dot_dimension_numbers<[1], [0], [0], [1], [0, 0, 1, 1], [], []>} : vector<32x16xf32>, vector<16x80xf32>, vector<32x80xf32> -> vector<32x80xf32>
    %93 = arith.addf %91, %92 : vector<32x80xf32>
    %c0_62 = arith.constant 0 : index
    %c0_63 = arith.constant 0 : index
    %94 = vector.load %arg5[%c0_62, %c0_63] : memref<1x80xf32, #tpu.memory_space<vmem>>, vector<1x80xf32>
    %95 = vector.broadcast %94 : vector<1x80xf32> to vector<32x80xf32>
    %96 = arith.addf %93, %95 : vector<32x80xf32>
    %cst_64 = arith.constant 0.000000e+00 : f32
    %97 = vector.broadcast %cst_64 : f32 to vector<32x80xf32>
    %98 = arith.cmpf ogt, %96, %97 : vector<32x80xf32>
    %cst_65 = arith.constant 0.000000e+00 : f32
    %99 = vector.broadcast %cst_65 : f32 to vector<32x80xf32>
    %100 = arith.minimumf %96, %99 : vector<32x80xf32>
    %101 = math.exp %100 : vector<32x80xf32>
    %cst_66 = arith.constant 1.000000e+00 : f32
    %102 = vector.broadcast %cst_66 : f32 to vector<32x80xf32>
    %103 = arith.subf %101, %102 : vector<32x80xf32>
    %104 = arith.select %98, %96, %103 : vector<32x80xi1>, vector<32x80xf32>
    %cst_67 = arith.constant 0.000000e+00 : bf16
    %105 = vector.broadcast %cst_67 : bf16 to vector<34x80xbf16>
    %c0_68 = arith.constant 0 : index
    %c0_69 = arith.constant 0 : index
    %106 = vector.load %arg13[%c0_68, %c0_69] : memref<34x80xbf16, #tpu.memory_space<vmem>>, vector<34x80xbf16>
    tpu.vector_store %arg13[%c0_68, %c0_69], %105 {strides = array<i32>} : memref<34x80xbf16, #tpu.memory_space<vmem>>, vector<34x80xbf16>,
    %107 = arith.truncf %104 : vector<32x80xf32> to vector<32x80xbf16>
    %c1_70 = arith.constant 1 : index
    %c0_71 = arith.constant 0 : index
    %108 = vector.load %arg13[%c1_70, %c0_71] : memref<34x80xbf16, #tpu.memory_space<vmem>>, vector<32x80xbf16>
    tpu.vector_store %arg13[%c1_70, %c0_71], %107 {strides = array<i32>} : memref<34x80xbf16, #tpu.memory_space<vmem>>, vector<32x80xbf16>,
    %c0_72 = arith.constant 0 : index
    %c0_73 = arith.constant 0 : index
    %109 = vector.load %arg13[%c0_72, %c0_73] : memref<34x80xbf16, #tpu.memory_space<vmem>>, vector<34x80xbf16>
    %110 = vector.extract_strided_slice %109 {offsets = [1, 0], sizes = [32, 80], strides = [1, 1]} : vector<34x80xbf16> to vector<32x80xbf16>
    %c1_74 = arith.constant 1 : index
    %c0_75 = arith.constant 0 : index
    %c0_76 = arith.constant 0 : index
    %111 = vector.load %arg6[%c1_74, %c0_75, %c0_76] : memref<4x80x40xbf16, #tpu.memory_space<vmem>>, vector<1x80x40xbf16>
    %112 = vector.shape_cast %111 : vector<1x80x40xbf16> to vector<80x40xbf16>
    %cst_77 = arith.constant dense<0.000000e+00> : vector<32x40xf32>
    %113 = tpu.matmul %110, %112, %cst_77 {dimension_numbers = #tpu.dot_dimension_numbers<[1], [0], [0], [1], [0, 0, 1, 1], [], []>} : vector<32x80xbf16>, vector<80x40xbf16>, vector<32x40xf32> -> vector<32x40xf32>
    %114 = vector.extract_strided_slice %109 {offsets = [0, 0], sizes = [32, 80], strides = [1, 1]} : vector<34x80xbf16> to vector<32x80xbf16>
    %c3_78 = arith.constant 3 : index
    %c0_79 = arith.constant 0 : index
    %c0_80 = arith.constant 0 : index
    %115 = vector.load %arg6[%c3_78, %c0_79, %c0_80] : memref<4x80x40xbf16, #tpu.memory_space<vmem>>, vector<1x80x40xbf16>
    %116 = vector.shape_cast %115 : vector<1x80x40xbf16> to vector<80x40xbf16>
    %cst_81 = arith.constant dense<0.000000e+00> : vector<32x40xf32>
    %117 = tpu.matmul %114, %116, %cst_81 {dimension_numbers = #tpu.dot_dimension_numbers<[1], [0], [0], [1], [0, 0, 1, 1], [], []>} : vector<32x80xbf16>, vector<80x40xbf16>, vector<32x40xf32> -> vector<32x40xf32>
    %118 = arith.addf %113, %117 : vector<32x40xf32>
    %119 = vector.extract_strided_slice %109 {offsets = [2, 0], sizes = [32, 80], strides = [1, 1]} : vector<34x80xbf16> to vector<32x80xbf16>
    %c0_82 = arith.constant 0 : index
    %c0_83 = arith.constant 0 : index
    %c0_84 = arith.constant 0 : index
    %120 = vector.load %arg6[%c0_82, %c0_83, %c0_84] : memref<4x80x40xbf16, #tpu.memory_space<vmem>>, vector<1x80x40xbf16>
    %121 = vector.shape_cast %120 : vector<1x80x40xbf16> to vector<80x40xbf16>
    %cst_85 = arith.constant dense<0.000000e+00> : vector<32x40xf32>
    %122 = tpu.matmul %119, %121, %cst_85 {dimension_numbers = #tpu.dot_dimension_numbers<[1], [0], [0], [1], [0, 0, 1, 1], [], []>} : vector<32x80xbf16>, vector<80x40xbf16>, vector<32x40xf32> -> vector<32x40xf32>
    %123 = vector.extract_strided_slice %109 {offsets = [1, 0], sizes = [32, 80], strides = [1, 1]} : vector<34x80xbf16> to vector<32x80xbf16>
    %c2_86 = arith.constant 2 : index
    %c0_87 = arith.constant 0 : index
    %c0_88 = arith.constant 0 : index
    %124 = vector.load %arg6[%c2_86, %c0_87, %c0_88] : memref<4x80x40xbf16, #tpu.memory_space<vmem>>, vector<1x80x40xbf16>
    %125 = vector.shape_cast %124 : vector<1x80x40xbf16> to vector<80x40xbf16>
    %cst_89 = arith.constant dense<0.000000e+00> : vector<32x40xf32>
    %126 = tpu.matmul %123, %125, %cst_89 {dimension_numbers = #tpu.dot_dimension_numbers<[1], [0], [0], [1], [0, 0, 1, 1], [], []>} : vector<32x80xbf16>, vector<80x40xbf16>, vector<32x40xf32> -> vector<32x40xf32>
    %127 = arith.addf %122, %126 : vector<32x40xf32>
    %128 = tpu.iota {dimensions = array<i32: 0>} : vector<64x32xi32>
    %129 = tpu.iota {dimensions = array<i32: 1>} : vector<64x32xi32>
    %c2_i32_90 = arith.constant 2 : i32
    %130 = vector.broadcast %c2_i32_90 : i32 to vector<64x32xi32>
    %131 = arith.muli %130, %129 : vector<64x32xi32>
    %132 = arith.cmpi eq, %128, %131 : vector<64x32xi32>
    %133 = arith.extui %132 : vector<64x32xi1> to vector<64x32xi32>
    %134 = arith.sitofp %133 : vector<64x32xi32> to vector<64x32xf32>
    %c2_i32_91 = arith.constant 2 : i32
    %135 = vector.broadcast %c2_i32_91 : i32 to vector<64x32xi32>
    %136 = arith.muli %135, %129 : vector<64x32xi32>
    %c1_i32_92 = arith.constant 1 : i32
    %137 = vector.broadcast %c1_i32_92 : i32 to vector<64x32xi32>
    %138 = arith.addi %136, %137 : vector<64x32xi32>
    %139 = arith.cmpi eq, %128, %138 : vector<64x32xi32>
    %140 = arith.extui %139 : vector<64x32xi1> to vector<64x32xi32>
    %141 = arith.sitofp %140 : vector<64x32xi32> to vector<64x32xf32>
    %cst_93 = arith.constant dense<0.000000e+00> : vector<64x40xf32>
    %142 = tpu.matmul %134, %118, %cst_93 {dimension_numbers = #tpu.dot_dimension_numbers<[1], [0], [0], [1], [0, 0, 1, 1], [], []>} : vector<64x32xf32>, vector<32x40xf32>, vector<64x40xf32> -> vector<64x40xf32>
    %cst_94 = arith.constant dense<0.000000e+00> : vector<64x40xf32>
    %143 = tpu.matmul %141, %127, %cst_94 {dimension_numbers = #tpu.dot_dimension_numbers<[1], [0], [0], [1], [0, 0, 1, 1], [], []>} : vector<64x32xf32>, vector<32x40xf32>, vector<64x40xf32> -> vector<64x40xf32>
    %144 = arith.addf %142, %143 : vector<64x40xf32>
    %c0_95 = arith.constant 0 : index
    %c0_96 = arith.constant 0 : index
    %145 = vector.load %arg7[%c0_95, %c0_96] : memref<1x40xf32, #tpu.memory_space<vmem>>, vector<1x40xf32>
    %146 = vector.broadcast %145 : vector<1x40xf32> to vector<64x40xf32>
    %147 = arith.addf %144, %146 : vector<64x40xf32>
    %cst_97 = arith.constant 0.000000e+00 : f32
    %148 = vector.broadcast %cst_97 : f32 to vector<64x40xf32>
    %149 = arith.cmpf ogt, %147, %148 : vector<64x40xf32>
    %cst_98 = arith.constant 0.000000e+00 : f32
    %150 = vector.broadcast %cst_98 : f32 to vector<64x40xf32>
    %151 = arith.minimumf %147, %150 : vector<64x40xf32>
    %152 = math.exp %151 : vector<64x40xf32>
    %cst_99 = arith.constant 1.000000e+00 : f32
    %153 = vector.broadcast %cst_99 : f32 to vector<64x40xf32>
    %154 = arith.subf %152, %153 : vector<64x40xf32>
    %155 = arith.select %149, %147, %154 : vector<64x40xi1>, vector<64x40xf32>
    %cst_100 = arith.constant 0.000000e+00 : bf16
    %156 = vector.broadcast %cst_100 : bf16 to vector<70x40xbf16>
    %c0_101 = arith.constant 0 : index
    %c0_102 = arith.constant 0 : index
    %157 = vector.load %arg14[%c0_101, %c0_102] : memref<70x40xbf16, #tpu.memory_space<vmem>>, vector<70x40xbf16>
    tpu.vector_store %arg14[%c0_101, %c0_102], %156 {strides = array<i32>} : memref<70x40xbf16, #tpu.memory_space<vmem>>, vector<70x40xbf16>,
    %158 = arith.truncf %155 : vector<64x40xf32> to vector<64x40xbf16>
    %c3_103 = arith.constant 3 : index
    %c0_104 = arith.constant 0 : index
    %159 = vector.load %arg14[%c3_103, %c0_104] : memref<70x40xbf16, #tpu.memory_space<vmem>>, vector<64x40xbf16>
    tpu.vector_store %arg14[%c3_103, %c0_104], %158 {strides = array<i32>} : memref<70x40xbf16, #tpu.memory_space<vmem>>, vector<64x40xbf16>,
    %c0_105 = arith.constant 0 : index
    %c0_106 = arith.constant 0 : index
    %160 = vector.load %arg14[%c0_105, %c0_106] : memref<70x40xbf16, #tpu.memory_space<vmem>>, vector<70x40xbf16>
    %161 = arith.extf %160 : vector<70x40xbf16> to vector<70x40xf32>
    %cst_107 = arith.constant 0.000000e+00 : f32
    %162 = vector.broadcast %cst_107 : f32 to vector<64x1xf32>
    %163 = vector.extract_strided_slice %161 {offsets = [0, 0], sizes = [64, 40], strides = [1, 1]} : vector<70x40xf32> to vector<64x40xf32>
    %c0_108 = arith.constant 0 : index
    %c0_109 = arith.constant 0 : index
    %c0_110 = arith.constant 0 : index
    %164 = vector.load %arg8[%c0_108, %c0_109, %c0_110] : memref<7x1x40xbf16, #tpu.memory_space<vmem>>, vector<1x1x40xbf16>
    %165 = vector.shape_cast %164 : vector<1x1x40xbf16> to vector<1x40xbf16>
    %166 = arith.extf %165 : vector<1x40xbf16> to vector<1x40xf32>
    %167 = vector.broadcast %166 : vector<1x40xf32> to vector<64x40xf32>
    %168 = arith.mulf %163, %167 : vector<64x40xf32>
    %cst_111 = arith.constant dense<0.000000e+00> : vector<64xf32>
    %169 = vector.multi_reduction <add>, %168, %cst_111 [1] : vector<64x40xf32> to vector<64xf32>
    %170 = vector.shape_cast %169 : vector<64xf32> to vector<64x1xf32>
    %171 = arith.addf %162, %170 : vector<64x1xf32>
    %172 = vector.extract_strided_slice %161 {offsets = [1, 0], sizes = [64, 40], strides = [1, 1]} : vector<70x40xf32> to vector<64x40xf32>
    %c1_112 = arith.constant 1 : index
    %c0_113 = arith.constant 0 : index
    %c0_114 = arith.constant 0 : index
    %173 = vector.load %arg8[%c1_112, %c0_113, %c0_114] : memref<7x1x40xbf16, #tpu.memory_space<vmem>>, vector<1x1x40xbf16>
    %174 = vector.shape_cast %173 : vector<1x1x40xbf16> to vector<1x40xbf16>
    %175 = arith.extf %174 : vector<1x40xbf16> to vector<1x40xf32>
    %176 = vector.broadcast %175 : vector<1x40xf32> to vector<64x40xf32>
    %177 = arith.mulf %172, %176 : vector<64x40xf32>
    %cst_115 = arith.constant dense<0.000000e+00> : vector<64xf32>
    %178 = vector.multi_reduction <add>, %177, %cst_115 [1] : vector<64x40xf32> to vector<64xf32>
    %179 = vector.shape_cast %178 : vector<64xf32> to vector<64x1xf32>
    %180 = arith.addf %171, %179 : vector<64x1xf32>
    %181 = vector.extract_strided_slice %161 {offsets = [2, 0], sizes = [64, 40], strides = [1, 1]} : vector<70x40xf32> to vector<64x40xf32>
    %c2_116 = arith.constant 2 : index
    %c0_117 = arith.constant 0 : index
    %c0_118 = arith.constant 0 : index
    %182 = vector.load %arg8[%c2_116, %c0_117, %c0_118] : memref<7x1x40xbf16, #tpu.memory_space<vmem>>, vector<1x1x40xbf16>
    %183 = vector.shape_cast %182 : vector<1x1x40xbf16> to vector<1x40xbf16>
    %184 = arith.extf %183 : vector<1x40xbf16> to vector<1x40xf32>
    %185 = vector.broadcast %184 : vector<1x40xf32> to vector<64x40xf32>
    %186 = arith.mulf %181, %185 : vector<64x40xf32>
    %cst_119 = arith.constant dense<0.000000e+00> : vector<64xf32>
    %187 = vector.multi_reduction <add>, %186, %cst_119 [1] : vector<64x40xf32> to vector<64xf32>
    %188 = vector.shape_cast %187 : vector<64xf32> to vector<64x1xf32>
    %189 = arith.addf %180, %188 : vector<64x1xf32>
    %190 = vector.extract_strided_slice %161 {offsets = [3, 0], sizes = [64, 40], strides = [1, 1]} : vector<70x40xf32> to vector<64x40xf32>
    %c3_120 = arith.constant 3 : index
    %c0_121 = arith.constant 0 : index
    %c0_122 = arith.constant 0 : index
    %191 = vector.load %arg8[%c3_120, %c0_121, %c0_122] : memref<7x1x40xbf16, #tpu.memory_space<vmem>>, vector<1x1x40xbf16>
    %192 = vector.shape_cast %191 : vector<1x1x40xbf16> to vector<1x40xbf16>
    %193 = arith.extf %192 : vector<1x40xbf16> to vector<1x40xf32>
    %194 = vector.broadcast %193 : vector<1x40xf32> to vector<64x40xf32>
    %195 = arith.mulf %190, %194 : vector<64x40xf32>
    %cst_123 = arith.constant dense<0.000000e+00> : vector<64xf32>
    %196 = vector.multi_reduction <add>, %195, %cst_123 [1] : vector<64x40xf32> to vector<64xf32>
    %197 = vector.shape_cast %196 : vector<64xf32> to vector<64x1xf32>
    %198 = arith.addf %189, %197 : vector<64x1xf32>
    %199 = vector.extract_strided_slice %161 {offsets = [4, 0], sizes = [64, 40], strides = [1, 1]} : vector<70x40xf32> to vector<64x40xf32>
    %c4_124 = arith.constant 4 : index
    %c0_125 = arith.constant 0 : index
    %c0_126 = arith.constant 0 : index
    %200 = vector.load %arg8[%c4_124, %c0_125, %c0_126] : memref<7x1x40xbf16, #tpu.memory_space<vmem>>, vector<1x1x40xbf16>
    %201 = vector.shape_cast %200 : vector<1x1x40xbf16> to vector<1x40xbf16>
    %202 = arith.extf %201 : vector<1x40xbf16> to vector<1x40xf32>
    %203 = vector.broadcast %202 : vector<1x40xf32> to vector<64x40xf32>
    %204 = arith.mulf %199, %203 : vector<64x40xf32>
    %cst_127 = arith.constant dense<0.000000e+00> : vector<64xf32>
    %205 = vector.multi_reduction <add>, %204, %cst_127 [1] : vector<64x40xf32> to vector<64xf32>
    %206 = vector.shape_cast %205 : vector<64xf32> to vector<64x1xf32>
    %207 = arith.addf %198, %206 : vector<64x1xf32>
    %208 = vector.extract_strided_slice %161 {offsets = [5, 0], sizes = [64, 40], strides = [1, 1]} : vector<70x40xf32> to vector<64x40xf32>
    %c5_128 = arith.constant 5 : index
    %c0_129 = arith.constant 0 : index
    %c0_130 = arith.constant 0 : index
    %209 = vector.load %arg8[%c5_128, %c0_129, %c0_130] : memref<7x1x40xbf16, #tpu.memory_space<vmem>>, vector<1x1x40xbf16>
    %210 = vector.shape_cast %209 : vector<1x1x40xbf16> to vector<1x40xbf16>
    %211 = arith.extf %210 : vector<1x40xbf16> to vector<1x40xf32>
    %212 = vector.broadcast %211 : vector<1x40xf32> to vector<64x40xf32>
    %213 = arith.mulf %208, %212 : vector<64x40xf32>
    %cst_131 = arith.constant dense<0.000000e+00> : vector<64xf32>
    %214 = vector.multi_reduction <add>, %213, %cst_131 [1] : vector<64x40xf32> to vector<64xf32>
    %215 = vector.shape_cast %214 : vector<64xf32> to vector<64x1xf32>
    %216 = arith.addf %207, %215 : vector<64x1xf32>
    %217 = vector.extract_strided_slice %161 {offsets = [6, 0], sizes = [64, 40], strides = [1, 1]} : vector<70x40xf32> to vector<64x40xf32>
    %c6_132 = arith.constant 6 : index
    %c0_133 = arith.constant 0 : index
    %c0_134 = arith.constant 0 : index
    %218 = vector.load %arg8[%c6_132, %c0_133, %c0_134] : memref<7x1x40xbf16, #tpu.memory_space<vmem>>, vector<1x1x40xbf16>
    %219 = vector.shape_cast %218 : vector<1x1x40xbf16> to vector<1x40xbf16>
    %220 = arith.extf %219 : vector<1x40xbf16> to vector<1x40xf32>
    %221 = vector.broadcast %220 : vector<1x40xf32> to vector<64x40xf32>
    %222 = arith.mulf %217, %221 : vector<64x40xf32>
    %cst_135 = arith.constant dense<0.000000e+00> : vector<64xf32>
    %223 = vector.multi_reduction <add>, %222, %cst_135 [1] : vector<64x40xf32> to vector<64xf32>
    %224 = vector.shape_cast %223 : vector<64xf32> to vector<64x1xf32>
    %225 = arith.addf %216, %224 : vector<64x1xf32>
    %c0_136 = arith.constant 0 : index
    %c0_137 = arith.constant 0 : index
    %226 = vector.load %arg9[%c0_136, %c0_137] : memref<1x1xf32, #tpu.memory_space<vmem>>, vector<1x1xf32>
    %227 = vector.broadcast %226 : vector<1x1xf32> to vector<64x1xf32>
    %228 = arith.addf %225, %227 : vector<64x1xf32>
    %c0_138 = arith.constant 0 : index
    %c0_139 = arith.constant 0 : index
    %c0_140 = arith.constant 0 : index
    %229 = vector.load %arg10[%c0_138, %c0_139, %c0_140] : memref<1x64x1xf32, #tpu.memory_space<vmem>>, vector<1x64x1xf32>
    %230 = vector.shape_cast %229 : vector<1x64x1xf32> to vector<64x1xf32>
    %231 = vector.shape_cast %228 : vector<64x1xf32> to vector<1x64x1xf32>
    tpu.vector_store %arg10[%c0_138, %c0_139, %c0_140], %231 {strides = array<i32>} : memref<1x64x1xf32, #tpu.memory_space<vmem>>, vector<1x64x1xf32>,
    return
  }
  func.func @transform_0(%arg0: i32) -> (i32, i32, i32) {
    %c0_i32 = arith.constant 0 : i32
    %c0_i32_0 = arith.constant 0 : i32
    %c0_i32_1 = arith.constant 0 : i32
    return %arg0, %c0_i32, %c0_i32_0 : i32, i32, i32
  }
  func.func @transform_1(%arg0: i32) -> (i32, i32, i32) {
    %c0_i32 = arith.constant 0 : i32
    %c0_i32_0 = arith.constant 0 : i32
    %c0_i32_1 = arith.constant 0 : i32
    %c0_i32_2 = arith.constant 0 : i32
    return %c0_i32, %c0_i32_0, %c0_i32_1 : i32, i32, i32
  }
  func.func @transform_2(%arg0: i32) -> (i32, i32) {
    %c0_i32 = arith.constant 0 : i32
    %c0_i32_0 = arith.constant 0 : i32
    %c0_i32_1 = arith.constant 0 : i32
    return %c0_i32, %c0_i32_0 : i32, i32
  }
  func.func @transform_3(%arg0: i32) -> (i32, i32, i32) {
    %c0_i32 = arith.constant 0 : i32
    %c0_i32_0 = arith.constant 0 : i32
    %c0_i32_1 = arith.constant 0 : i32
    %c0_i32_2 = arith.constant 0 : i32
    return %c0_i32, %c0_i32_0, %c0_i32_1 : i32, i32, i32
  }
  func.func @transform_4(%arg0: i32) -> (i32, i32) {
    %c0_i32 = arith.constant 0 : i32
    %c0_i32_0 = arith.constant 0 : i32
    %c0_i32_1 = arith.constant 0 : i32
    return %c0_i32, %c0_i32_0 : i32, i32
  }
  func.func @transform_5(%arg0: i32) -> (i32, i32, i32) {
    %c0_i32 = arith.constant 0 : i32
    %c0_i32_0 = arith.constant 0 : i32
    %c0_i32_1 = arith.constant 0 : i32
    %c0_i32_2 = arith.constant 0 : i32
    return %c0_i32, %c0_i32_0, %c0_i32_1 : i32, i32, i32
  }
  func.func @transform_6(%arg0: i32) -> (i32, i32) {
    %c0_i32 = arith.constant 0 : i32
    %c0_i32_0 = arith.constant 0 : i32
    %c0_i32_1 = arith.constant 0 : i32
    return %c0_i32, %c0_i32_0 : i32, i32
  }
  func.func @transform_7(%arg0: i32) -> (i32, i32, i32) {
    %c0_i32 = arith.constant 0 : i32
    %c0_i32_0 = arith.constant 0 : i32
    %c0_i32_1 = arith.constant 0 : i32
    %c0_i32_2 = arith.constant 0 : i32
    return %c0_i32, %c0_i32_0, %c0_i32_1 : i32, i32, i32
  }
  func.func @transform_8(%arg0: i32) -> (i32, i32) {
    %c0_i32 = arith.constant 0 : i32
    %c0_i32_0 = arith.constant 0 : i32
    %c0_i32_1 = arith.constant 0 : i32
    return %c0_i32, %c0_i32_0 : i32, i32
  }
  func.func @transform_9(%arg0: i32) -> (i32, i32, i32) {
    %c0_i32 = arith.constant 0 : i32
    %c0_i32_0 = arith.constant 0 : i32
    %c0_i32_1 = arith.constant 0 : i32
    return %arg0, %c0_i32, %c0_i32_0 : i32, i32, i32
  }
}

</mosaic_0001>

<bundles_post_ra>
// kernel: sound_phi_forward.2
= control target key start
LH: loop header
LB: loop body
LE: loop exit
PB: predicated region body
PF: predicated region fallthrough
CT: control target
= control target key end

     0   :  { %s5107_s17 = smov 0   ;;  %s6368_s0 = inlined_call_operand.vmem [shape: f32[2,64,1], index: 0, kind: input, shape index: {}]   ;;  %s6369_s1 = inlined_call_operand.vmem [shape: bf16[7,1,32], index: 1, kind: input, shape index: {}]   ;;  %s6370_s2 = inlined_call_operand.vmem [shape: f32[1,32], index: 2, kind: input, shape index: {}]   ;;  %s6371_s3 = inlined_call_operand.vmem [shape: bf16[4,32,64], index: 3, kind: input, shape index: {}]   ;;  %s6372_s4 = inlined_call_operand.vmem [shape: f32[1,64], index: 4, kind: input, shape index: {}]   ;;  %s6373_s5 = inlined_call_operand.vmem [shape: bf16[4,64,128], index: 5, kind: input, shape index: {}]   ;;  %s6374_s6 = inlined_call_operand.vmem [shape: f32[1,128], index: 6, kind: input, shape index: {}]   ;;  %s6375_s7 = inlined_call_operand.vmem [shape: bf16[3,128,32], index: 7, kind: input, shape index: {}]   ;;  %s6376_s8 = inlined_call_operand.vmem [shape: f32[1,32], index: 8, kind: input, shape index: {}]   ;;  %s6377_s9 = inlined_call_operand.vmem [shape: f32[4,128,32], index: 9, kind: input, shape index: {}]   ;;  %s6378_s10 = inlined_call_operand.vmem [shape: f32[4,1,128], index: 10, kind: input, shape index: {}]   ;;  %s6379_s11 = inlined_call_operand.vmem [shape: f32[2,16,32], index: 11, kind: output, shape index: {}]  }
   0x1 LB: > { %s3859_s18 = sadd.s32 4294967295, %s5041_s17   ;;  %p3863_p0 = scmp.ge.s32.totalorder %s5041_s17, 1  ;;  %s5041_s17 = sphi %s5107_s17, %s21_s17  }
   0x2   : > { %p337_p1 = scmp.lt.s32.totalorder %s5041_s17, 3 }
   0x4   : > { %p338_p2 = pnand %p3863_p0, %p337_p1 }
   0x5   : > { %p5115_p3 = scmp.lt.s32.totalorder (!%p338_p2), %s3859_s18, 1 }
   0x6   : > { %341 = sbr.rel (%p338_p2) target bundleno = 4769 (0x12a1), region = 64 }
   0xb   : > { %vm388_vm0 = vcmask 7168   ;;  %vm397_vm1 = vcmask 5120   ;;  %v5043_v0 = vmov 0   ;;  %v5044_v1 = vmov 0.0   ;;  %s6386_s18 = smov (!%p5115_p3, %s3859_s18), 1  ;;  %v4949_v19 = vld [vmem:[%s6371_s3 + $0x18] sm:$0xff]  }
   0xc   : > { %4948 = vset.pattern.permute.xlu1 %v5043_v0  ;;  %2284 = vst [vmem:[#allocation5] sm:$0xf] %v5043_v0  ;;  %2285 = vst [vmem:[#allocation5 + $0x4] sm:$0xf] %v5043_v0  ;;  %4947 = vset.pattern.permute.xlu0 %v5043_v0  ;;  %s4213_s20 = sshll.u32 %s6386_s18, 6  ;;  %vm908_vm2 = vcmask 257024   ;;  %v466_v24 = vlaneseq }
   0xd   : > { %2286 = vst [vmem:[#allocation5 + $0x8] sm:$0x1] %v5043_v0  ;;  %390 = vst.msk [vmem:[#allocation2 + $0x8] sm:$0xff] %vm388_vm0, %v5044_v1  ;;  %s381_s23 = scalar_lea.vmem %s6368_s0, %s4213_s20  ;;  %vm917_vm3 = vcmask 253952   ;;  %v4950_v20 = vld [vmem:[%s6371_s3 + $0x38] sm:$0xff]   ;;  %v4951_v21 = vld [vmem:[%s6371_s3 + $0x10] sm:$0xff]   ;;  %4466 = vmatprep.subr.bf16.mxu0 %v4949_v19 }
   0xe   : > { %391 = vst.msk [vmem:[#allocation2 + $0x10] sm:$0xff] %vm388_vm0, %v5044_v1  ;;  %392 = vst.msk [vmem:[#allocation2 + $0x18] sm:$0xff] %vm388_vm0, %v5044_v1  ;;  %v400_v2 = vld [vmem:[%s381_s23 + $0x8] sm:$0xff]  ;;  %v401_v3 = vld [vmem:[%s381_s23 + $0x10] sm:$0xff]  ;;  %4502 = vmatprep.subr.bf16.mxu1 %v4950_v20  ;;  %4467 = vmatpush3.bf16.msra.mxu0 %v4949_v19  ;;  %v5198_v26 = vshrl.u32 %v466_v24, 7  ;;  %vm516_vm4 = vcmask 1046528  }
   0xf   : > { %389 = vst.msk [vmem:[#allocation2] sm:$0xff] %vm388_vm0, %v5044_v1  ;;  %393 = vst.msk [vmem:[#allocation2 + $0x20] sm:$0xff] %vm388_vm0, %v5044_v1  ;;  %v399_v4 = vld [vmem:[%s381_s23] sm:$0xff]  ;;  %v402_v5 = vld [vmem:[%s381_s23 + $0x18] sm:$0xff]  ;;  %4503 = vmatpush3.bf16.msra.mxu1 %v4950_v20  ;;  %4468 = vmatprep.subr.bf16.mxu0 %v4951_v21  ;;  %vm575_vm5 = vcmask 1045504   ;;  %vm634_vm6 = vcmask 1044480  }
  0x10   : > { %394 = vst.msk [vmem:[#allocation2 + $0x28] sm:$0xff] %vm388_vm0, %v5044_v1  ;;  %395 = vst.msk [vmem:[#allocation2 + $0x30] sm:$0xff] %vm388_vm0, %v5044_v1  ;;  %v403_v6 = vld [vmem:[%s381_s23 + $0x20] sm:$0xff]  ;;  %v404_v7 = vld [vmem:[%s381_s23 + $0x28] sm:$0xff]  ;;  %v468_v33 = vsub.s32 0, %v5198_v26  ;;  %vm693_vm7 = vcmask 1043456  }
  0x11   : > { %396 = vst.msk [vmem:[#allocation2 + $0x38] sm:$0xff] %vm388_vm0, %v5044_v1  ;;  %408 = vst.msk [vmem:[#allocation2 + $0xb] sm:$0xff] %vm388_vm0, %v400_v2  ;;  %v405_v8 = vld [vmem:[%s381_s23 + $0x30] sm:$0xff]  ;;  %v406_v9 = vld [vmem:[%s381_s23 + $0x38] sm:$0xff]  ;;  %vm752_vm8 = vcmask 1042432   ;;  %vm811_vm9 = vcmask 1041408  }
  0x12   : > { %398 = vst.msk [vmem:[#allocation2 + $0x40] sm:$0x3f] %vm397_vm1, %v5044_v1  ;;  %v4954_v22 = vld [vmem:[%s6371_s3 + $0x30] sm:$0xff]   ;;  %v5191_v23 = vld [vmem:[%s6371_s3 + $0x8] sm:$0xff]   ;;  %4469 = vmatpush3.bf16.msra.mxu0 %v4951_v21  ;;  %v424_v25 = vld [vmem:[%s6369_s1] sm:$0x1] }
  0x13   : > { %409 = vst.msk [vmem:[#allocation2 + $0x13] sm:$0xff] %vm388_vm0, %v401_v3  ;;  %407 = vst.msk [vmem:[#allocation2 + $0x3] sm:$0xff] %vm388_vm0, %v399_v4  ;;  %4504 = vmatprep.subr.bf16.mxu1 %v4954_v22  ;;  %4478 = vmatprep.subr.bf16.mxu0 %v5191_v23  ;;  %v3868_v27 = vld [vmem:[%s6369_s1 + $0x1] sm:$0x1]  ;;  %v3869_v28 = vld [vmem:[%s6369_s1 + $0x2] sm:$0x1]  ;;  %v425_v37 = vunpack.c.l.bf16 %v424_v25 }
  0x14   : > { %410 = vst.msk [vmem:[#allocation2 + $0x1b] sm:$0xff] %vm388_vm0, %v402_v5  ;;  %411 = vst.msk [vmem:[#allocation2 + $0x23] sm:$0xff] %vm388_vm0, %v403_v6  ;;  %4505 = vmatpush3.bf16.msra.mxu1 %v4954_v22  ;;  %v3870_v29 = vld [vmem:[%s6369_s1 + $0x3] sm:$0x1]  ;;  %v3871_v30 = vld [vmem:[%s6369_s1 + $0x4] sm:$0x1]  ;;  %v488_v34 = vunpack.c.l.bf16 %v3868_v27  ;;  %v552_v35 = vunpack.c.l.bf16 %v3869_v28 }
  0x15   : > { %412 = vst.msk [vmem:[#allocation2 + $0x2b] sm:$0xff] %vm388_vm0, %v404_v7  ;;  %413 = vst.msk [vmem:[#allocation2 + $0x33] sm:$0xff] %vm388_vm0, %v405_v8  ;;  %v3872_v31 = vld [vmem:[%s6369_s1 + $0x5] sm:$0x1]  ;;  %v3873_v32 = vld [vmem:[%s6369_s1 + $0x6] sm:$0x1]  ;;  %v611_v36 = vunpack.c.l.bf16 %v3870_v29  ;;  %v670_v38 = vunpack.c.l.bf16 %v3871_v30  ;;  %v5225_v44 = vrot.slane %v425_v37, %v468_v33 }
  0x16   : > { %414 = vst.msk [vmem:[#allocation2 + $0x3b] sm:$0xff] %vm388_vm0, %v406_v9  ;;  %v729_v39 = vunpack.c.l.bf16 %v3872_v31  ;;  %v788_v40 = vunpack.c.l.bf16 %v3873_v32  ;;  %v5219_v41 = vrot.slane %v488_v34, %v468_v33  ;;  %v5221_v42 = vrot.slane %v552_v35, %v468_v33  ;;  %s4214_s23 = sshll.u32 %s6386_s18, 4 }
  0x17   : > { %909 = vst.msk [vmem:[#allocation3] sm:$0xf] %vm908_vm2, %v5043_v0  ;;  %910 = vst.msk [vmem:[#allocation3 + $0x4] sm:$0xf] %vm908_vm2, %v5043_v0  ;;  %v5223_v43 = vrot.slane %v611_v36, %v468_v33  ;;  %v5227_v45 = vrot.slane %v670_v38, %v468_v33  ;;  %vm1027_vm13 = vsmask.f32 7938  ;;  %s386_s26 = scalar_lea.vmem %s6379_s11, %s4214_s23 }
  0x18   : > { %911 = vst.msk [vmem:[#allocation3 + $0x8] sm:$0xf] %vm908_vm2, %v5043_v0  ;;  %912 = vst.msk [vmem:[#allocation3 + $0xc] sm:$0xf] %vm908_vm2, %v5043_v0  ;;  %v5229_v46 = vrot.slane %v729_v39, %v468_v33  ;;  %v5231_v47 = vrot.slane %v788_v40, %v468_v33  ;;  %vm943_vm14 = vsmask.f32 256 }
  0x19   : > { %913 = vst.msk [vmem:[#allocation3 + $0x10] sm:$0xf] %vm908_vm2, %v5043_v0  ;;  %914 = vst.msk [vmem:[#allocation3 + $0x14] sm:$0xf] %vm908_vm2, %v5043_v0  ;;  %vm944_vm15 = vsmask.f32 4368 }
  0x1a   : > { %v417_v10 = vld [vmem:[#allocation2 + $0x10] sm:$0xff]  ;;  %v415_v11 = vld [vmem:[#allocation2] sm:$0xff]  ;;  %v416_v13 = vld [vmem:[#allocation2 + $0x8] sm:$0xff]  ;;  %915 = vst.msk [vmem:[#allocation3 + $0x18] sm:$0xf] %vm908_vm2, %v5043_v0 }
  0x1b   : > { %438 = vperm.xlu1 %4948, %v417_v10   ;;  %428 = vperm.xlu0 %4947, %v415_v11   ;;  %v418_v12 = vld [vmem:[#allocation2 + $0x18] sm:$0xff]  ;;  %v419_v15 = vld [vmem:[#allocation2 + $0x20] sm:$0xff]  ;;  %916 = vst.msk [vmem:[#allocation3 + $0x1c] sm:$0xf] %vm908_vm2, %v5043_v0  ;;  %vm5532_vm0 = vmand %vm908_vm2, %vm1027_vm13 }
  0x1c   : > { %v420_v14 = vld [vmem:[#allocation2 + $0x28] sm:$0xff]  ;;  %v421_v17 = vld [vmem:[#allocation2 + $0x30] sm:$0xff]  ;;  %918 = vst.msk [vmem:[#allocation3 + $0x20] sm:$0x1] %vm917_vm3, %v5043_v0  ;;  %vm5544_vm1 = vmor %vm943_vm14, %vm944_vm15 }
  0x1d   : > { %v422_v16 = vld [vmem:[#allocation2 + $0x38] sm:$0xff]  ;;  %v423_v18 = vld [vmem:[#allocation2 + $0x40] sm:$0x3f] }
  0x1f   : > { %443 = vperm.xlu1 %4948, %v418_v12   ;;  %433 = vperm.xlu0 %4947, %v416_v13  }
  0x23   : > { %453 = vperm.xlu1 %4948, %v420_v14   ;;  %448 = vperm.xlu0 %4947, %v419_v15  }
  0x27   : > { %463 = vperm.xlu1 %4948, %v422_v16   ;;  %458 = vperm.xlu0 %4947, %v421_v17  }
  0x2b   : > { %491 = vperm.xlu0 %4947, %v423_v18  }
  0x96   : > { %v439_v48 = vpop.permute.xlu1 %438  ;;  %v429_v49 = vpop.permute.xlu0 %428 }
  0x97   : > { %v500_v50 = vmul.f32 %v5219_v41, %v439_v48  ;;  %v5235_v51 = vmul.f32 %v5221_v42, %v439_v48  ;;  %v5238_v52 = vmul.f32 %v5223_v43, %v439_v48  ;;  %v5241_v53 = vmul.f32 %v5227_v45, %v439_v48 }
  0x98   : > { %v5244_v54 = vmul.f32 %v5229_v46, %v439_v48  ;;  %v5247_v55 = vmul.f32 %v5231_v47, %v439_v48  ;;  %v472_v56 = vmul.f32 %v5225_v44, %v439_v48  ;;  %v498_v57 = vmul.f32 %v5219_v41, %v429_v49 }
  0x99   : > { %v520_v58 = vrot.slane %v500_v50, 1  ;;  %v579_v59 = vrot.slane %v5235_v51, 2  ;;  %v470_v60 = vmul.f32 %v5225_v44, %v429_v49  ;;  %v557_v61 = vmul.f32 %v5221_v42, %v429_v49 }
  0x9a   : > { %v5254_v62 = vpop.permute.xlu1 %443  ;;  %v638_v63 = vrot.slane %v5238_v52, 3  ;;  %v697_v2 = vrot.slane %v5241_v53, 4  ;;  %v616_v3 = vmul.f32 %v5223_v43, %v429_v49  ;;  %v5260_v4 = vmul.f32 %v5227_v45, %v429_v49  ;;  %v434_v13 = vpop.permute.xlu0 %433 }
  0x9b   : > { %v756_v5 = vrot.slane %v5244_v54, 5  ;;  %v815_v6 = vrot.slane %v5247_v55, 6  ;;  %v517_v7 = vrot.slane %v498_v57, 1  ;;  %v5266_v8 = vmul.f32 %v5219_v41, %v5254_v62 }
  0x9c   : > { %v576_v9 = vrot.slane %v557_v61, 2  ;;  %v5269_v10 = vmul.f32 %v5229_v46, %v429_v49  ;;  %v5272_v11 = vmul.f32 %v5231_v47, %v429_v49  ;;  %v5276_v12 = vmul.f32 %v5221_v42, %v5254_v62 }
  0x9d   : > { %v635_v14 = vrot.slane %v616_v3, 3  ;;  %v522_v15 = vrot.slane %v5266_v8, 1  ;;  %v5281_v16 = vmul.f32 %v5223_v43, %v5254_v62  ;;  %v5285_v17 = vmul.f32 %v5227_v45, %v5254_v62 }
  0x9e   : > { %v694_v18 = vrot.slane %v5260_v4, 4  ;;  %v581_v19 = vrot.slane %v5276_v12, 2  ;;  %v5291_v20 = vmul.f32 %v5229_v46, %v5254_v62  ;;  %v5295_v21 = vmul.f32 %v5231_v47, %v5254_v62 }
  0x9f   : > { %v523_v22 = vsel %vm516_vm4, %v520_v58, %v522_v15  ;;  %v640_v25 = vrot.slane %v5281_v16, 3  ;;  %v699_v27 = vrot.slane %v5285_v17, 4  ;;  %v499_v28 = vmul.f32 %v5219_v41, %v434_v13 }
  0xa0   : > { %v753_v29 = vrot.slane %v5269_v10, 5  ;;  %v544_v30 = vadd.f32 %v523_v22, %v472_v56  ;;  %v582_v31 = vsel %vm575_vm5, %v579_v59, %v581_v19  ;;  %v471_v32 = vmul.f32 %v5225_v44, %v434_v13 }
  0xa1   : > { %v758_v33 = vrot.slane %v5291_v20, 5  ;;  %v817_v34 = vrot.slane %v5295_v21, 6  ;;  %v518_v35 = vrot.slane %v499_v28, 1  ;;  %v558_v36 = vmul.f32 %v5221_v42, %v434_v13 }
  0xa2   : > { %v603_v37 = vadd.f32 %v582_v31, %v544_v30  ;;  %v641_v38 = vsel %vm634_vm6, %v638_v63, %v640_v25  ;;  %v700_v39 = vsel %vm693_vm7, %v697_v2, %v699_v27  ;;  %v617_v40 = vmul.f32 %v5223_v43, %v434_v13 }
  0xa3   : > { %v519_v48 = vsel %vm516_vm4, %v517_v7, %v518_v35  ;;  %v521_v49 = vsel %vm516_vm4, %v518_v35, %v520_v58  ;;  %v577_v50 = vrot.slane %v558_v36, 2  ;;  %v676_v51 = vmul.f32 %v5227_v45, %v434_v13  ;;  %v5327_v58 = vpop.permute.xlu1 %453 }
  0xa4   : > { %v662_v52 = vadd.f32 %v641_v38, %v603_v37  ;;  %v542_v56 = vadd.f32 %v519_v48, %v470_v60  ;;  %v543_v57 = vadd.f32 %v521_v49, %v471_v32  ;;  %v636_v61 = vrot.slane %v617_v40, 3  ;;  %v5340_v38 = vld [vmem:[%s6370_s2] ss:$0 sm:$0xff] }
  0xa5   : > { %v578_v3 = vsel %vm575_vm5, %v576_v9, %v577_v50  ;;  %v580_v4 = vsel %vm575_vm5, %v577_v50, %v579_v59  ;;  %v695_v10 = vrot.slane %v676_v51, 4  ;;  %v735_v22 = vmul.f32 %v5229_v46, %v434_v13 }
  0xa6   : > { %v812_v28 = vrot.slane %v5272_v11, 6  ;;  %v721_v30 = vadd.f32 %v700_v39, %v662_v52  ;;  %v601_v7 = vadd.f32 %v578_v3, %v542_v56  ;;  %v602_v31 = vadd.f32 %v580_v4, %v543_v57 }
  0xa7   : > { %v759_v60 = vsel %vm752_vm8, %v756_v5, %v758_v33  ;;  %v637_v9 = vsel %vm634_vm6, %v635_v14, %v636_v61  ;;  %v639_v59 = vsel %vm634_vm6, %v636_v61, %v638_v63  ;;  %v754_v32 = vrot.slane %v735_v22, 5  ;;  %v449_v61 = vpop.permute.xlu0 %448 }
  0xa8   : > { %v780_v35 = vadd.f32 %v759_v60, %v721_v30  ;;  %v660_v36 = vadd.f32 %v637_v9, %v601_v7  ;;  %v661_v37 = vadd.f32 %v639_v59, %v602_v31  ;;  %v794_v11 = vmul.f32 %v5231_v47, %v434_v13 }
  0xa9   : > { %v818_v39 = vsel %vm811_vm9, %v815_v6, %v817_v34  ;;  %v696_v14 = vsel %vm693_vm7, %v694_v18, %v695_v10  ;;  %v698_v63 = vsel %vm693_vm7, %v695_v10, %v697_v2  ;;  %v5353_v13 = vmul.f32 %v5219_v41, %v5327_v58 }
  0xaa   : > { %v839_v40 = vadd.f32 %v818_v39, %v780_v35  ;;  %v719_v48 = vadd.f32 %v696_v14, %v660_v36  ;;  %v720_v49 = vadd.f32 %v698_v63, %v661_v37  ;;  %v813_v50 = vrot.slane %v794_v11, 6 }
  0xab   : > { %v755_v51 = vsel %vm752_vm8, %v753_v29, %v754_v32  ;;  %v757_v52 = vsel %vm752_vm8, %v754_v32, %v756_v5  ;;  %v5361_v18 = vmul.f32 %v5221_v42, %v5327_v58  ;;  %v5365_v53 = vmul.f32 %v5223_v43, %v5327_v58 }
  0xac   : > { %v5368_v2 = vadd.f32 %v5340_v38, %v839_v40  ;;  %v778_v56 = vadd.f32 %v755_v51, %v719_v48  ;;  %v779_v57 = vadd.f32 %v757_v52, %v720_v49  ;;  %v473_v29 = vmul.f32 %v5225_v44, %v5254_v62 }
  0xad   : > { %v814_v54 = vsel %vm811_vm9, %v812_v28, %v813_v50  ;;  %v816_v5 = vsel %vm811_vm9, %v813_v50, %v815_v6  ;;  %v5378_v3 = vmul.f32 %v5227_v45, %v5327_v58  ;;  %v526_v30 = vrot.slane %v5353_v13, 1 }
  0xae   : > { %v870_v4 = vmin.f32 %v5368_v2, 0.0  ;;  %v837_v10 = vadd.f32 %v814_v54, %v778_v56  ;;  %v838_v22 = vadd.f32 %v816_v5, %v779_v57  ;;  %v585_v7 = vrot.slane %v5361_v18, 2 }
  0xaf   : > { %v644_v62 = vrot.slane %v5365_v53, 3  ;;  %v5386_v28 = vmul.f32 %v5229_v46, %v5327_v58  ;;  %v502_v55 = vmul.f32 %v5219_v41, %v449_v61  ;;  %v561_v9 = vmul.f32 %v5221_v42, %v449_v61 }
  0xb0   : > { %v880_v6 = vmul.f32 1.442695, %v870_v4  ;;  %v5390_v31 = vadd.f32 %v5340_v38, %v837_v10  ;;  %v5393_v60 = vadd.f32 %v5340_v38, %v838_v22  ;;  %v703_v59 = vrot.slane %v5378_v3, 4  ;;  %v464_v4 = vpop.permute.xlu1 %463 }
  0xb1   : > { %v5399_v32 = vmul.f32 %v5231_v47, %v5327_v58  ;;  %v524_v35 = vrot.slane %v502_v55, 1  ;;  %v620_v36 = vmul.f32 %v5223_v43, %v449_v61  ;;  %v762_v11 = vrot.slane %v5386_v28, 5 }
  0xb2   : > { %5007 = vpow2.f32 %v880_v6  ;;  %v868_v37 = vmin.f32 %v5390_v31, 0.0  ;;  %v474_v39 = vmul.f32 %v5225_v44, %v449_v61  ;;  %v869_v14 = vmin.f32 %v5393_v60, 0.0 }
  0xb3   : > { %v525_v63 = vsel %vm516_vm4, %v522_v15, %v524_v35  ;;  %v527_v40 = vsel %vm516_vm4, %v524_v35, %v526_v30  ;;  %v583_v48 = vrot.slane %v561_v9, 2  ;;  %v642_v52 = vrot.slane %v620_v36, 3 }
  0xb4   : > { %v876_v49 = vmul.f32 1.442695, %v868_v37  ;;  %v545_v50 = vadd.f32 %v525_v63, %v473_v29  ;;  %v546_v51 = vadd.f32 %v527_v40, %v474_v39  ;;  %v878_v56 = vmul.f32 1.442695, %v869_v14 }
  0xb5   : > { %v584_v57 = vsel %vm575_vm5, %v581_v19, %v583_v48  ;;  %v586_v8 = vsel %vm575_vm5, %v583_v48, %v585_v7  ;;  %v679_v15 = vmul.f32 %v5227_v45, %v449_v61  ;;  %v643_v29 = vsel %vm634_vm6, %v640_v25, %v642_v52 }
  0xb6   : > { %5009 = vpow2.f32 %v876_v49  ;;  %v604_v54 = vadd.f32 %v584_v57, %v545_v50  ;;  %v605_v5 = vadd.f32 %v586_v8, %v546_v51  ;;  %v645_v12 = vsel %vm634_vm6, %v642_v52, %v644_v62  ;;  %v5455_v51 = vpop.permute.xlu0 %458 }
  0xb7   : > { %5011 = vpow2.f32 %v878_v56  ;;  %v701_v19 = vrot.slane %v679_v15, 4  ;;  %v738_v10 = vmul.f32 %v5229_v46, %v449_v61  ;;  %v821_v22 = vrot.slane %v5399_v32, 6 }
  0xb8   : > { %v663_v55 = vadd.f32 %v643_v29, %v604_v54  ;;  %v664_v6 = vadd.f32 %v645_v12, %v605_v5  ;;  %v797_v9 = vmul.f32 %v5231_v47, %v449_v61  ;;  %v5435_v36 = vmul.f32 %v5219_v41, %v464_v4 }
  0xb9   : > { %v702_v16 = vsel %vm693_vm7, %v699_v27, %v701_v19  ;;  %v704_v25 = vsel %vm693_vm7, %v701_v19, %v703_v59  ;;  %v760_v35 = vrot.slane %v738_v10, 5  ;;  %v5438_v63 = vmul.f32 %v5221_v42, %v464_v4 }
  0xba   : > { %v722_v37 = vadd.f32 %v702_v16, %v663_v55  ;;  %v723_v39 = vadd.f32 %v704_v25, %v664_v6  ;;  %v819_v14 = vrot.slane %v797_v9, 6  ;;  %v475_v61 = vmul.f32 %v5225_v44, %v5327_v58 }
  0xbb   : > { %v761_v17 = vsel %vm752_vm8, %v758_v33, %v760_v35  ;;  %v763_v27 = vsel %vm752_vm8, %v760_v35, %v762_v11  ;;  %v5449_v40 = vmul.f32 %v5223_v43, %v464_v4  ;;  %vm862_vm10 = vcmp.gt.f32.partialorder %v5368_v2, 0.0 }
  0xbc   : > { %v781_v48 = vadd.f32 %v761_v17, %v722_v37  ;;  %v782_v49 = vadd.f32 %v763_v27, %v723_v39  ;;  %v5453_v50 = vmul.f32 %v5225_v44, %v464_v4  ;;  %vm860_vm11 = vcmp.gt.f32.partialorder %v5390_v31, 0.0 }
  0xbd   : > { %v820_v20 = vsel %vm811_vm9, %v817_v34, %v819_v14  ;;  %v822_v33 = vsel %vm811_vm9, %v819_v14, %v821_v22  ;;  %v5465_v58 = vmul.f32 %v5227_v45, %v464_v4  ;;  %v5468_v52 = vmul.f32 %v5229_v46, %v464_v4 }
  0xbe   : > { %vm861_vm12 = vcmp.gt.f32.partialorder %v5393_v60, 0.0  ;;  %v840_v56 = vadd.f32 %v820_v20, %v781_v48  ;;  %v841_v57 = vadd.f32 %v822_v33, %v782_v49  ;;  %v530_v8 = vrot.slane %v5435_v36, 1 }
  0xbf   : > { %v589_v21 = vrot.slane %v5438_v63, 2  ;;  %v5008_v15 = vpop.eup %5007  ;;  %v648_v34 = vrot.slane %v5449_v40, 3  ;;  %v5475_v54 = vmul.f32 %v5231_v47, %v464_v4  ;;  %v504_v5 = vmul.f32 %v5219_v41, %v5455_v51 }
  0xc0   : > { %v563_v29 = vmul.f32 %v5221_v42, %v5455_v51  ;;  %v3877_v12 = vadd.f32 -1.0, %v5008_v15  ;;  %v5482_v19 = vadd.f32 %v5340_v38, %v840_v56  ;;  %v5485_v10 = vadd.f32 %v5340_v38, %v841_v57 }
  0xc1   : > { %v476_v55 = vmul.f32 %v5225_v44, %v5455_v51  ;;  %v707_v4 = vrot.slane %v5465_v58, 4  ;;  %v766_v6 = vrot.slane %v5468_v52, 5  ;;  %v528_v9 = vrot.slane %v504_v5, 1 }
  0xc2   : > { %v587_v16 = vrot.slane %v563_v29, 2  ;;  %v902_v25 = vsel %vm862_vm10, %v5368_v2, %v3877_v12  ;;  %v871_v35 = vmin.f32 %v5482_v19, 0.0  ;;  %v622_v37 = vmul.f32 %v5223_v43, %v5455_v51 }
  0xc3   : > { %v681_v44 = vmul.f32 %v5227_v45, %v5455_v51  ;;  %v5010_v39 = vpop.eup %5009  ;;  %v4217_v14 = vpack.c.bf16 %v902_v25, %v902_v25  ;;  %v872_v17 = vmin.f32 %v5485_v10, 0.0  ;;  %v529_v27 = vsel %vm516_vm4, %v526_v30, %v528_v9 }
  0xc4   : > { %v531_v2 = vsel %vm516_vm4, %v528_v9, %v530_v8  ;;  %v5012_v48 = vpop.eup %5011  ;;  %v3875_v49 = vadd.f32 -1.0, %v5010_v39  ;;  %v882_v20 = vmul.f32 1.442695, %v871_v35  ;;  %v547_v33 = vadd.f32 %v529_v27, %v475_v61  ;;  %v5522_v27 = vpop.permute.xlu0 %491 }
  0xc5   : > { %v548_v56 = vadd.f32 %v531_v2, %v476_v55  ;;  %v964_v57 = vshrl.u32 %v4217_v14, 16  ;;  %v967_v15 = vshll.u32 %v4217_v14, 16  ;;  %v3876_v5 = vadd.f32 -1.0, %v5012_v48 }
  0xc6   : > { %v884_v29 = vmul.f32 1.442695, %v872_v17  ;;  %v900_v12 = vsel %vm860_vm11, %v5390_v31, %v3875_v49  ;;  %5013 = vpow2.f32 %v882_v20  ;;  %v588_v13 = vsel %vm575_vm5, %v585_v7, %v587_v16 }
  0xc7   : > { %v590_v30 = vsel %vm575_vm5, %v587_v16, %v589_v21  ;;  %v5515_v9 = vrot.slane %v964_v57, 7  ;;  %v901_v61 = vsel %vm861_vm12, %v5393_v60, %v3876_v5  ;;  %v4215_v55 = vpack.c.bf16 %v900_v12, %v900_v12  ;;  %v1029_v57 = vld [vmem:[#allocation3] sm:$0xf] }
  0xc8   : > { %5015 = vpow2.f32 %v884_v29  ;;  %v4216_v25 = vpack.c.bf16 %v901_v61, %v901_v61  ;;  %v606_v35 = vadd.f32 %v588_v13, %v547_v33  ;;  %v607_v31 = vadd.f32 %v590_v30, %v548_v56 }
  0xc9   : > { %v646_v39 = vrot.slane %v622_v37, 3  ;;  %v969_v18 = vor.u32 %v967_v15, %v5515_v9  ;;  %v947_v14 = vshrl.u32 %v4215_v55, 16  ;;  %v950_v7 = vshll.u32 %v4215_v55, 16 }
  0xca   : > { %v825_v17 = vrot.slane %v5475_v54, 6  ;;  %v955_v16 = vshrl.u32 %v4216_v25, 16  ;;  %v958_v2 = vshll.u32 %v4216_v25, 16  ;;  %v705_v33 = vrot.slane %v681_v44, 4  ;;  %v2694_v44 = vld [vmem:[%s6377_s9 + $0x68] sm:$0xff] }
  0xcb   : > { %v647_v60 = vsel %vm634_vm6, %v644_v62, %v646_v39  ;;  %v649_v48 = vsel %vm634_vm6, %v646_v39, %v648_v34  ;;  %v949_v49 = vrot.slane %v947_v14, 7  ;;  %v740_v53 = vmul.f32 %v5229_v46, %v5455_v51 }
  0xcc   : > { %v665_v37 = vadd.f32 %v647_v60, %v606_v35  ;;  %v666_v20 = vadd.f32 %v649_v48, %v607_v31  ;;  %v957_v15 = vrot.slane %v955_v16, 7  ;;  %v799_v62 = vmul.f32 %v5231_v47, %v5455_v51 }
  0xcd   : > { %v506_v5 = vmul.f32 %v5219_v41, %v5522_v27  ;;  %v952_v29 = vor.u32 %v950_v7, %v949_v49  ;;  %v953_v12 = vrot.slane %v949_v49, 4  ;;  %vm863_vm10 = vcmp.gt.f32.partialorder %v5482_v19, 0.0 }
  0xce   : > { %v706_v13 = vsel %vm693_vm7, %v703_v59, %v705_v33  ;;  %v708_v51 = vsel %vm693_vm7, %v705_v33, %v707_v4  ;;  %v960_v30 = vor.u32 %v958_v2, %v957_v15  ;;  %v962_v41 = vrot.slane %v957_v15, 4 }
  0xcf   : > { %v724_v61 = vadd.f32 %v706_v13, %v665_v37  ;;  %v725_v55 = vadd.f32 %v708_v51, %v666_v20  ;;  %v1030_v25 = vsel %vm5532_vm0, %v952_v29, %v1029_v57  ;;  %v764_v35 = vrot.slane %v740_v53, 5  ;;  %vm1040_vm0 = vmand %vm917_vm3, %vm943_vm14 }
  0xd0   : > { %v823_v31 = vrot.slane %v799_v62, 6  ;;  %v532_v39 = vrot.slane %v506_v5, 1  ;;  %v961_v14 = vsel %vm5544_vm1, %v953_v12, %v960_v30  ;;  %v970_v3 = vsel %vm5544_vm1, %v962_v41, %v969_v18  ;;  %1031 = vst [vmem:[#allocation3] sm:$0xf] %v1030_v25 }
  0xd1   : > { %v565_v59 = vmul.f32 %v5221_v42, %v5522_v27  ;;  %v624_v7 = vmul.f32 %v5223_v43, %v5522_v27  ;;  %1032 = vst.msk [vmem:[#allocation3 + $0x4] sm:$0xf] %vm908_vm2, %v961_v14  ;;  %1033 = vst.msk [vmem:[#allocation3 + $0x8] sm:$0xf] %vm908_vm2, %v970_v3  ;;  %v765_v16 = vsel %vm752_vm8, %v762_v11, %v764_v35  ;;  %vm864_vm11 = vcmp.gt.f32.partialorder %v5485_v10, 0.0 }
  0xd2   : > { %v767_v2 = vsel %vm752_vm8, %v764_v35, %v766_v6  ;;  %v824_v18 = vsel %vm811_vm9, %v821_v22, %v823_v31  ;;  %v826_v42 = vsel %vm811_vm9, %v823_v31, %v825_v17  ;;  %v783_v43 = vadd.f32 %v765_v16, %v724_v61 }
  0xd3   : > { %v784_v60 = vadd.f32 %v767_v2, %v725_v55  ;;  %v533_v28 = vsel %vm516_vm4, %v530_v8, %v532_v39  ;;  %v591_v48 = vrot.slane %v565_v59, 2  ;;  %v5014_v11 = vpop.eup %5013  ;;  %v650_v37 = vrot.slane %v624_v7, 3 }
  0xd4   : > { %v549_v49 = vadd.f32 %v533_v28, %v5453_v50  ;;  %v683_v32 = vmul.f32 %v5227_v45, %v5522_v27  ;;  %v742_v22 = vmul.f32 %v5229_v46, %v5522_v27  ;;  %v3878_v33 = vadd.f32 -1.0, %v5014_v11 }
  0xd5   : > { %v5016_v20 = vpop.eup %5015  ;;  %v842_v56 = vadd.f32 %v824_v18, %v783_v43  ;;  %v843_v57 = vadd.f32 %v826_v42, %v784_v60  ;;  %v592_v36 = vsel %vm575_vm5, %v589_v21, %v591_v48  ;;  %v651_v62 = vsel %vm634_vm6, %v648_v34, %v650_v37 }
  0xd6   : > { %v3879_v8 = vadd.f32 -1.0, %v5016_v20  ;;  %v608_v15 = vadd.f32 %v592_v36, %v549_v49  ;;  %v709_v50 = vrot.slane %v683_v32, 4  ;;  %v903_v45 = vsel %vm863_vm10, %v5482_v19, %v3878_v33 }
  0xd7   : > { %v857_v53 = vadd.f32 %v5340_v38, %v842_v56  ;;  %v858_v46 = vadd.f32 %v5340_v38, %v843_v57  ;;  %v4218_v21 = vpack.c.bf16 %v903_v45, %v903_v45  ;;  %v768_v29 = vrot.slane %v742_v22, 5 }
  0xd8   : > { %v904_v63 = vsel %vm864_vm11, %v5485_v10, %v3879_v8  ;;  %v667_v5 = vadd.f32 %v651_v62, %v608_v15  ;;  %v710_v51 = vsel %vm693_vm7, %v707_v4, %v709_v50  ;;  %v971_v61 = vrot.slane %v5515_v9, 4  ;;  %v5612_v7 = vld [vmem:[#allocation3] sm:$0xff]  }
  0xd9   : > { %v4219_v12 = vpack.c.bf16 %v904_v63, %v904_v63  ;;  %v873_v13 = vmin.f32 %v857_v53, 0.0  ;;  %v973_v19 = vshrl.u32 %v4218_v21, 16  ;;  %v874_v30 = vmin.f32 %v858_v46, 0.0 }
  0xda   : > { %v726_v41 = vadd.f32 %v710_v51, %v667_v5  ;;  %v976_v55 = vshll.u32 %v4218_v21, 16  ;;  %v769_v10 = vsel %vm752_vm8, %v766_v6, %v768_v29  ;;  %v801_v31 = vmul.f32 %v5231_v47, %v5522_v27 }
  0xdb   : > { %v982_v40 = vshrl.u32 %v4219_v12, 16  ;;  %v886_v25 = vmul.f32 1.442695, %v873_v13  ;;  %v975_v34 = vrot.slane %v973_v19, 7  ;;  %v888_v35 = vmul.f32 1.442695, %v874_v30 }
  0xdc   : > { %v985_v4 = vshll.u32 %v4219_v12, 16  ;;  %v785_v39 = vadd.f32 %v769_v10, %v726_v41  ;;  %v827_v9 = vrot.slane %v801_v31, 6  ;;  %v1086_v2 = vshll.u32 %v5612_v7, 16 }
  0xdd   : > { %v5609_v58 = vrot.slane %v982_v40, 7  ;;  %5017 = vpow2.f32 %v886_v25  ;;  %v978_v14 = vor.u32 %v976_v55, %v975_v34  ;;  %v980_v3 = vrot.slane %v975_v34, 4 }
  0xde   : > { %5019 = vpow2.f32 %v888_v35  ;;  %v828_v47 = vsel %vm811_vm9, %v825_v17, %v827_v9  ;;  %v1084_v43 = vshrl.u32 %v5612_v7, 16  ;;  %v1088_v60 = vrot.slane %v1086_v2, 1 }
  0xdf   : > { %v987_v59 = vor.u32 %v985_v4, %v5609_v58  ;;  %v979_v52 = vsel %vm5544_vm1, %v971_v61, %v978_v14  ;;  %v844_v27 = vadd.f32 %v828_v47, %v785_v39  ;;  %vm1082_vm5 = vsmask.f32 7424  ;;  %v1041_v39 = vld [vmem:[#allocation3 + $0x20] sm:$0x1] }
  0xe0   : > { %1034 = vst.msk [vmem:[#allocation3 + $0xc] sm:$0xf] %vm908_vm2, %v979_v52  ;;  %vm865_vm6 = vcmp.gt.f32.partialorder %v857_v53, 0.0  ;;  %vm1126_vm8 = vcmask 261120   ;;  %v1089_v49 = vor.u32 %v1088_v60, %v1084_v43  ;;  %v1410_v37 = vrot.slane %v1084_v43, 1 }
  0xe1   : > { %v988_v6 = vsel %vm5544_vm1, %v980_v3, %v987_v59  ;;  %v859_v16 = vadd.f32 %v5340_v38, %v844_v27  ;;  %v1411_v32 = vrot.slane %v1086_v2, 2  ;;  %vm866_vm9 = vcmp.gt.f32.partialorder %v858_v46, 0.0 }
  0xe2   : > { %1035 = vst.msk [vmem:[#allocation3 + $0x10] sm:$0xf] %vm908_vm2, %v988_v6  ;;  %vm1409_vm12 = vsmask.f32 6400 }
  0xe3   : > { %v875_v18 = vmin.f32 %v859_v16, 0.0  ;;  %v1412_v45 = vor.u32 %v1411_v32, %v1410_v37  ;;  %vm867_vm15 = vcmp.gt.f32.partialorder %v859_v16, 0.0 }
  0xe5   : > { %v890_v42 = vmul.f32 1.442695, %v875_v18  ;;  %v4958_v18 = vld [vmem:[%s6371_s3] sm:$0xff]  }
  0xe7   : > { %v5626_v54 = vld [vmem:[#allocation3 + $0x8] sm:$0xff]   ;;  %5021 = vpow2.f32 %v890_v42 }
  0xe8   : > { %v1091_v28 = vshll.u32 %v5626_v54, 16  ;;  %v1095_v48 = vshrl.u32 %v5626_v54, 16 }
  0xea   : > { %v5018_v17 = vpop.eup %5017  ;;  %v1093_v20 = vrot.slane %v1091_v28, 1  ;;  %v1413_v33 = vrot.slane %v1095_v48, 1  ;;  %v1414_v56 = vrot.slane %v1091_v28, 2 }
  0xeb   : > { %v5020_v11 = vpop.eup %5019  ;;  %v3880_v38 = vadd.f32 -1.0, %v5018_v17  ;;  %v4960_v17 = vld [vmem:[%s6371_s3 + $0x28] sm:$0xff]  }
  0xec   : > { %v3881_v22 = vadd.f32 -1.0, %v5020_v11  ;;  %v1094_v15 = vsel %vm1082_vm5, %v1089_v49, %v1093_v20  ;;  %v1415_v62 = vor.u32 %v1414_v56, %v1413_v33  ;;  %v1097_v52 = vor.u32 %v1095_v48, %v1093_v20 }
  0xed   : > { %v905_v57 = vsel %vm865_vm6, %v857_v53, %v3880_v38  ;;  %4470 = vmatprep.mubr.msk.bf16.mxu0 %vm1126_vm8, %v1094_v15 }
  0xee   : > { %v906_v36 = vsel %vm866_vm9, %v858_v46, %v3881_v22  ;;  %v4220_v8 = vpack.c.bf16 %v905_v57, %v905_v57  ;;  %v1416_v5 = vsel %vm1409_vm12, %v1412_v45, %v1415_v62  ;;  %v989_v46 = vrot.slane %v5609_v58, 4 }
  0xef   : > { %v4221_v50 = vpack.c.bf16 %v906_v36, %v906_v36  ;;  %4506 = vmatprep.mubr.msk.bf16.mxu1 %vm1126_vm8, %v1416_v5  ;;  %vm1694_vm9 = vcmask 519168  }
  0xf0   : > { %v991_v63 = vshrl.u32 %v4220_v8, 16  ;;  %v994_v12 = vshll.u32 %v4220_v8, 16  ;;  %1695 = vst.msk [vmem:[#allocation4] sm:$0xf] %vm1694_vm9, %v5043_v0  ;;  %1696 = vst.msk [vmem:[#allocation4 + $0x4] sm:$0xf] %vm1694_vm9, %v5043_v0 }
  0xf1   : > { %v1000_v21 = vshrl.u32 %v4221_v50, 16  ;;  %v1003_v53 = vshll.u32 %v4221_v50, 16  ;;  %1697 = vst.msk [vmem:[#allocation4 + $0x8] sm:$0xf] %vm1694_vm9, %v5043_v0  ;;  %1698 = vst.msk [vmem:[#allocation4 + $0xc] sm:$0xf] %vm1694_vm9, %v5043_v0 }
  0xf2   : > { %v993_v29 = vrot.slane %v991_v63, 7  ;;  %v1299_v63 = vrot.slane %v5626_v54, 1 }
  0xf3   : > { %v1002_v13 = vrot.slane %v1000_v21, 7  ;;  %v1298_v21 = vrot.slane %v5612_v7, 1 }
  0xf4   : > { %v996_v51 = vor.u32 %v994_v12, %v993_v29  ;;  %v998_v19 = vrot.slane %v993_v29, 4  ;;  %v5022_v41 = vpop.eup %5021 }
  0xf5   : > { %v1005_v30 = vor.u32 %v1003_v53, %v1002_v13  ;;  %v3882_v40 = vadd.f32 -1.0, %v5022_v41  ;;  %v1007_v4 = vrot.slane %v1002_v13, 4  ;;  %v1300_v5 = vsel %vm516_vm4, %v1298_v21, %v1299_v63 }
  0xf6   : > { %v997_v61 = vsel %vm5544_vm1, %v989_v46, %v996_v51  ;;  %v5690_v46 = vand.u32 127, %v466_v24  ;;  %v1553_v51 = vmul.u32 2, %v5198_v26 }
  0xf7   : > { %v1006_v55 = vsel %vm5544_vm1, %v998_v19, %v1005_v30  ;;  %1036 = vst.msk [vmem:[#allocation3 + $0x14] sm:$0xf] %vm908_vm2, %v997_v61  ;;  %v907_v25 = vsel %vm867_vm15, %v859_v16, %v3882_v40  ;;  %vm1699_vm15 = vcmask 516096  }
  0xf8   : > { %1037 = vst.msk [vmem:[#allocation3 + $0x18] sm:$0xf] %vm908_vm2, %v1006_v55  ;;  %v4222_v34 = vpack.c.bf16 %v907_v25, %v907_v25  ;;  %vm1557_vm3 = vcmp.eq.s32.totalorder %v5690_v46, %v1553_v51  ;;  %v1549_v51 = vadd.s32 16, %v5198_v26 }
  0xf9   : > { %v5695_v19 = vsel %vm1557_vm3, 1.0, %v5044_v1  ;;  %1700 = vst.msk [vmem:[#allocation4 + $0x10] sm:$0x1] %vm1699_vm15, %v5043_v0  ;;  %v4965_v0 = vld [vmem:[%s6373_s5 + $0x8] sm:$0xff]  }
  0xfa   : > { %v1009_v35 = vshrl.u32 %v4222_v34, 16  ;;  %v1012_v31 = vshll.u32 %v4222_v34, 16 }
  0xfc   : > { %v1011_v10 = vrot.slane %v1009_v35, 7 }
  0xfe   : > { %v5641_v58 = vld [vmem:[#allocation3 + $0x10] sm:$0xff]   ;;  %v1014_v14 = vor.u32 %v1012_v31, %v1011_v10  ;;  %v1016_v3 = vrot.slane %v1011_v10, 4 }
  0xff   : > { %v1099_v9 = vshll.u32 %v5641_v58, 16  ;;  %v1103_v59 = vshrl.u32 %v5641_v58, 16  ;;  %v1301_v29 = vrot.slane %v5641_v58, 1 }
 0x100   : > { %v1015_v47 = vsel %vm5544_vm1, %v1007_v4, %v1014_v14  ;;  %v1042_v6 = vsel %vm1040_vm0, %v1016_v3, %v1041_v39 }
 0x101   : > { %v1101_v27 = vrot.slane %v1099_v9, 1  ;;  %v1417_v16 = vrot.slane %v1103_v59, 1  ;;  %1038 = vst.msk [vmem:[#allocation3 + $0x1c] sm:$0xf] %vm908_vm2, %v1015_v47  ;;  %1043 = vst [vmem:[#allocation3 + $0x20] sm:$0x1] %v1042_v6  ;;  %v1302_v13 = vsel %vm516_vm4, %v1299_v63, %v1301_v29 }
 0x102   : > { %v1418_v2 = vrot.slane %v1099_v9, 2  ;;  %vm1569_vm2 = vcmask 515072  }
 0x103   : > { %v1102_v42 = vsel %vm1082_vm5, %v1097_v52, %v1101_v27  ;;  %v1105_v32 = vor.u32 %v1103_v59, %v1101_v27 }
 0x104   : > { %4471 = vmatmul.mubr.msk.bf16.vlgmr.msra.gmra.mxu0 %vm1126_vm8, %v1102_v42  ;;  %v1419_v43 = vor.u32 %v1418_v2, %v1417_v16 }
 0x105   : > { %4479 = vmatpush3.bf16.msra.mxu0 %v5191_v23 }
 0x106   : > { %v1420_v60 = vsel %vm1409_vm12, %v1415_v62, %v1419_v43  ;;  %4480 = vmatprep.subr.bf16.mxu0 %v4958_v18  ;;  %v4961_v62 = vld [vmem:[%s6371_s3 + $0x20] sm:$0xff]  }
 0x107   : > { %4507 = vmatmul.mubr.msk.bf16.vlgmr.msra.gmra.mxu1 %vm1126_vm8, %v1420_v60 }
 0x108   : > { %v4957_v28 = vld [vmem:[#allocation3 + $0x18] sm:$0xff]   ;;  %v4959_v48 = vld [vmem:[#allocation3 + $0x20] ss:$0 sps:$4 sm:$0x11]  }
 0x109   : > { %4481 = vmatpush3.bf16.msra.mxu0 %v4958_v18  ;;  %v1107_v11 = vshll.u32 %v4957_v28, 16  ;;  %v1111_v38 = vshrl.u32 %v4957_v28, 16  ;;  %v1426_v49 = vshrl.u32 %v4959_v48, 16  ;;  %v1429_v37 = vshll.u32 %v4959_v48, 16 }
 0x10a   : > { %4490 = vmatprep.subr.bf16.mxu0 %v4960_v17  ;;  %v1303_v12 = vrot.slane %v4957_v28, 1 }
 0x10b   : > { %v1109_v22 = vrot.slane %v1107_v11, 1  ;;  %v1421_v23 = vrot.slane %v1111_v38, 1  ;;  %v1422_v20 = vrot.slane %v1107_v11, 2  ;;  %v1428_v33 = vrot.slane %v1426_v49, 1 }
 0x10c   : > { %v1431_v56 = vrot.slane %v1429_v37, 2  ;;  %v1304_v53 = vsel %vm516_vm4, %v1301_v29, %v1303_v12 }
 0x10d   : > { %v1110_v57 = vsel %vm1082_vm5, %v1105_v32, %v1109_v22  ;;  %v1423_v36 = vor.u32 %v1422_v20, %v1421_v23  ;;  %v1113_v8 = vor.u32 %v1111_v38, %v1109_v22 }
 0x10e   : > { %4474 = vmatprep.mubr.msk.bf16.mxu0 %vm1126_vm8, %v1110_v57  ;;  %v1432_v15 = vor.u32 %v1431_v56, %v1428_v33 }
 0x10f   : > { %v1424_v50 = vsel %vm1409_vm12, %v1419_v43, %v1423_v36  ;;  %4475 = vmatmul.mubr.msk.bf16.gmra.mxu0 %vm1126_vm8, %v1113_v8  ;;  %v3932_v8 = vld [vmem:[%s6372_s4] ss:$0 sm:$0xff] }
 0x110   : > { %4510 = vmatprep.mubr.msk.bf16.mxu1 %vm1126_vm8, %v1424_v50  ;;  %4482 = vmatprep.mubr.msk.bf16.mxu0 %vm1126_vm8, %v5612_v7  ;;  %v1433_v45 = vsel %vm1409_vm12, %v1423_v36, %v1432_v15 }
 0x111   : > { %4511 = vmatmul.mubr.msk.bf16.gmra.mxu1 %vm1126_vm8, %v1433_v45 }
 0x117   : > { %4483 = vmatmul.mubr.msk.bf16.vlgmr.msra.gmra.mxu0 %vm1126_vm8, %v5626_v54  ;;  %v1305_v54 = vrot.slane %v4959_v48, 1 }
 0x118   : > { %4486 = vmatprep.mubr.msk.bf16.mxu0 %vm1126_vm8, %v5641_v58  ;;  %4491 = vmatpush3.bf16.msra.mxu0 %v4960_v17 }
 0x119   : > { %4492 = vmatprep.subr.bf16.mxu0 %v4961_v62  ;;  %v1306_v7 = vsel %vm516_vm4, %v1303_v12, %v1305_v54  ;;  %v1548_v12 = vadd.s32 8, %v5198_v26 }
 0x11c   : > { %4493 = vmatpush3.bf16.msra.mxu0 %v4961_v62 }
 0x11f   : > { %4487 = vmatmul.mubr.msk.bf16.gmra.mxu0 %vm1126_vm8, %v4957_v28 }
 0x120   : > { %4494 = vmatprep.mubr.msk.bf16.mxu0 %vm1126_vm8, %v1300_v5 }
 0x127   : > { %4495 = vmatmul.mubr.msk.bf16.vlgmr.msra.gmra.mxu0 %vm1126_vm8, %v1302_v13 }
 0x128   : > { %4498 = vmatprep.mubr.msk.bf16.mxu0 %vm1126_vm8, %v1304_v53 }
 0x12f   : > { %4499 = vmatmul.mubr.msk.bf16.gmra.mxu0 %vm1126_vm8, %v1306_v7 }
 0x130   : > { %4530 = vmatprep.mubr.msk.f32.mxu0 %vm1569_vm2, %v5695_v19 }
 0x1c4   : > { %v4472_v30 = vpop.f32.mrf.mxu0 }
 0x1c6   : > { %v1173_v41 = vpop.f32.mrf.mxu0 }
 0x1c7   : > { %v4508_v31 = vpop.f32.mrf.mxu1 }
 0x1c8   : > { %v4473_v61 = vpop.f32.mrf.mxu0 }
 0x1c9   : > { %v1492_v39 = vpop.f32.mrf.mxu1 }
 0x1ca   : > { %v1176_v55 = vpop.f32.mrf.mxu0 }
 0x1cb   : > { %v4509_v9 = vpop.f32.mrf.mxu1 }
 0x1cd   : > { %v1495_v47 = vpop.f32.mrf.mxu1 }
 0x1cf   : > { %v4476_v40 = vpop.f32.mrf.mxu0 }
 0x1d1   : > { %v1189_v25 = vpop.f32.mrf.mxu0  ;;  %v4512_v16 = vpop.f32.mrf.mxu1 }
 0x1d3   : > { %v4477_v34 = vpop.f32.mrf.mxu0  ;;  %v1508_v42 = vpop.f32.mrf.mxu1 }
 0x1d5   : > { %v1192_v24 = vpop.f32.mrf.mxu0  ;;  %v4513_v11 = vpop.f32.mrf.mxu1 }
 0x1d7   : > { %v4484_v35 = vpop.f32.mrf.mxu0  ;;  %v1511_v36 = vpop.f32.mrf.mxu1 }
 0x1d8   : > { %v1267_v15 = vadd.f32 %v4484_v35, %v4472_v30 }
 0x1d9   : > { %v1258_v10 = vpop.f32.mrf.mxu0 }
 0x1da   : > { %v1259_v13 = vadd.f32 %v1258_v10, %v1173_v41  ;;  %v1555_v41 = vmul.u32 2, %v1549_v51 }
 0x1db   : > { %v4485_v58 = vpop.f32.mrf.mxu0 }
 0x1dc   : > { %v1270_v22 = vadd.f32 %v4485_v58, %v4473_v61  ;;  %vm1559_vm11 = vcmp.eq.s32.totalorder %v5690_v46, %v1555_v41 }
 0x1dd   : > { %v1261_v4 = vpop.f32.mrf.mxu0 }
 0x1de   : > { %v1262_v63 = vadd.f32 %v1261_v4, %v1176_v55 }
 0x1df   : > { %v4488_v14 = vpop.f32.mrf.mxu0 }
 0x1e0   : > { %v1283_v60 = vadd.f32 %v4488_v14, %v4476_v40 }
 0x1e1   : > { %v1274_v3 = vpop.f32.mrf.mxu0 }
 0x1e2   : > { %v1275_v49 = vadd.f32 %v1274_v3, %v1189_v25  ;;  %v4962_v3 = vld [vmem:[%s6373_s5 + $0x18] sm:$0xff]  }
 0x1e3   : > { %v4489_v59 = vpop.f32.mrf.mxu0 }
 0x1e4   : > { %v1286_v28 = vadd.f32 %v4489_v59, %v4477_v34  ;;  %v1554_v34 = vmul.u32 2, %v1548_v12  ;;  %v4964_v59 = vld [vmem:[%s6373_s5 + $0x38] sm:$0xff]  }
 0x1e5   : > { %v1277_v52 = vpop.f32.mrf.mxu0  ;;  %4536 = vmatprep.subr.bf16.mxu1 %v4964_v59 }
 0x1e6   : > { %v1278_v37 = vadd.f32 %v1277_v52, %v1192_v24  ;;  %v1550_v24 = vadd.s32 24, %v5198_v26  ;;  %vm1558_vm10 = vcmp.eq.s32.totalorder %v5690_v46, %v1554_v34  ;;  %v3935_v26 = vsel %vm1559_vm11, 1.0, %v5044_v1  ;;  %v4966_v52 = vld [vmem:[%s6373_s5 + $0x30] sm:$0xff]   ;;  %4537 = vmatpush3.bf16.msra.mxu1 %v4964_v59  ;;  %vm1754_vm11 = vmand %vm1694_vm9, %vm1027_vm13 }
 0x1e7   : > { %v4496_v6 = vpop.f32.mrf.mxu0  ;;  %v5710_v14 = vsel %vm1558_vm10, 1.0, %v5044_v1  ;;  %4538 = vmatprep.subr.bf16.mxu1 %v4966_v52 }
 0x1e8   : > { %v1398_v21 = vadd.f32 %v4496_v6, %v1267_v15  ;;  %v4967_v6 = vld [vmem:[%s6373_s5] sm:$0xff]  }
 0x1e9   : > { %v1365_v27 = vpop.f32.mrf.mxu0 }
 0x1ea   : > { %v1525_v30 = vadd.f32 %v4508_v31, %v1398_v21  ;;  %v1396_v61 = vadd.f32 %v1365_v27, %v1259_v13  ;;  %v1556_v31 = vmul.u32 2, %v1550_v24  ;;  %4539 = vmatpush3.bf16.msra.mxu1 %v4966_v52  ;;  %v4972_v27 = vld [vmem:[%s6373_s5 + $0x20] sm:$0xff]   ;;  %v1763_v24 = vld [vmem:[#allocation4 + $0x10] sm:$0x1] }
 0x1eb   : > { %v4497_v2 = vpop.f32.mrf.mxu0 }
 0x1ec   : > { %v1399_v50 = vadd.f32 %v4497_v2, %v1270_v22  ;;  %v1523_v35 = vadd.f32 %v1492_v39, %v1396_v61  ;;  %v1540_v10 = vadd.f32 %v3932_v8, %v1525_v30  ;;  %vm1560_vm6 = vcmp.eq.s32.totalorder %v5690_v46, %v1556_v31  ;;  %v5761_v2 = vld [vmem:[%s6373_s5 + $0x58] sm:$0xff]   ;;  %v1755_v30 = vld [vmem:[#allocation4] sm:$0xf] }
 0x1ed   : > { %v1368_v18 = vpop.f32.mrf.mxu0  ;;  %v3936_v39 = vsel %vm1560_vm6, 1.0, %v5044_v1  ;;  %vm1762_vm6 = vmand %vm1699_vm15, %vm943_vm14  ;;  %vm1837_vm15 = vcmask 523264  }
 0x1ee   : > { %v1526_v53 = vadd.f32 %v4509_v9, %v1399_v50  ;;  %v1397_v54 = vadd.f32 %v1368_v18, %v1262_v63  ;;  %v1538_v4 = vadd.f32 %v3932_v8, %v1523_v35  ;;  %v4963_v9 = vld [vmem:[%s6373_s5 + $0x10] sm:$0xff]  }
 0x1ef   : > { %v4500_v43 = vpop.f32.mrf.mxu0 }
 0x1f0   : > { %v1402_v48 = vadd.f32 %v4500_v43, %v1283_v60  ;;  %v1524_v40 = vadd.f32 %v1495_v47, %v1397_v54  ;;  %v1541_v25 = vadd.f32 %v3932_v8, %v1526_v53  ;;  %v4969_v47 = vld [vmem:[%s6373_s5 + $0x28] sm:$0xff]  }
 0x1f1   : > { %v1381_v17 = vpop.f32.mrf.mxu0  ;;  %4540 = vmatprep.subr.bf16.mxu1 %v4969_v47 }
 0x1f2   : > { %v1529_v20 = vadd.f32 %v4512_v16, %v1402_v48  ;;  %v1400_v33 = vadd.f32 %v1381_v17, %v1275_v49  ;;  %v1539_v58 = vadd.f32 %v3932_v8, %v1524_v40  ;;  %4541 = vmatpush3.bf16.msra.mxu1 %v4969_v47  ;;  %v5756_v16 = vld [vmem:[%s6373_s5 + $0x78] sm:$0xff]  }
 0x1f3   : > { %v4501_v38 = vpop.f32.mrf.mxu0  ;;  %4542 = vmatprep.subr.bf16.mxu1 %v4972_v27 }
 0x1f4   : > { %v1403_v32 = vadd.f32 %v4501_v38, %v1286_v28  ;;  %v1527_v5 = vadd.f32 %v1508_v42, %v1400_v33  ;;  %v1544_v29 = vadd.f32 %v3932_v8, %v1529_v20 }
 0x1f5   : > { %v1384_v23 = vpop.f32.mrf.mxu0 }
 0x1f6   : > { %v1530_v56 = vadd.f32 %v4513_v11, %v1403_v32  ;;  %v1401_v57 = vadd.f32 %v1384_v23, %v1278_v37  ;;  %v1542_v55 = vadd.f32 %v3932_v8, %v1527_v5  ;;  %4543 = vmatpush3.bf16.msra.mxu1 %v4972_v27 }
 0x1f7   : > { %4560 = vmatprep.subr.bf16.mxu1 %v5761_v2 }
 0x1f8   : > { %v1545_v45 = vadd.f32 %v3932_v8, %v1530_v56  ;;  %v1528_v62 = vadd.f32 %v1511_v36, %v1401_v57 }
 0x1fa   : > { %4514 = vmatprep.subr.msk.mxu0 %vm516_vm4, %v1545_v45  ;;  %v1543_v7 = vadd.f32 %v3932_v8, %v1528_v62 }
 0x1fb   : > { %4515 = vmatpush3.msk.msra.mxu0 %vm516_vm4, %v1545_v45 }
 0x1fc   : > { %4516 = vmatprep.subr.mxu0 %v1544_v29 }
 0x1fd   : > { %4517 = vmatpush3.msra.mxu0 %v1544_v29 }
 0x1fe   : > { %4518 = vmatprep.subr.mxu0 %v1543_v7 }
 0x1ff   : > { %4519 = vmatpush3.msra.mxu0 %v1543_v7 }
 0x200   : > { %4520 = vmatprep.subr.mxu0 %v1542_v55 }
 0x201   : > { %4521 = vmatpush3.msra.mxu0 %v1542_v55 }
 0x202   : > { %4522 = vmatprep.subr.mxu0 %v1541_v25 }
 0x203   : > { %4523 = vmatpush3.msra.mxu0 %v1541_v25 }
 0x204   : > { %4524 = vmatprep.subr.mxu0 %v1540_v10 }
 0x205   : > { %4525 = vmatpush3.msra.mxu0 %v1540_v10 }
 0x206   : > { %4526 = vmatprep.subr.mxu0 %v1539_v58 }
 0x207   : > { %4527 = vmatpush3.msra.mxu0 %v1539_v58 }
 0x208   : > { %4528 = vmatprep.subr.mxu0 %v1538_v4 }
 0x209   : > { %4529 = vmatpush3.msra.mxu0 %v1538_v4 }
 0x20a   : > { %4531 = vmatmul.mubr.msk.f32.vlgmr.msra.gmra.mxu0 %vm1569_vm2, %v5710_v14  ;;  %4548 = vmatprep.subr.bf16.mxu0 %v4962_v3 }
 0x20b   : > { %4533 = vmatprep.mubr.msk.f32.mxu0 %vm1569_vm2, %v3935_v26  ;;  %4549 = vmatpush3.bf16.msra.mxu0 %v4962_v3 }
 0x20c   : > { %4550 = vmatprep.subr.bf16.mxu0 %v4963_v9 }
 0x20e   : > { %4534 = vmatmul.mubr.msk.f32.gmra.mxu0 %vm1569_vm2, %v3936_v39 }
 0x20f   : > { %4551 = vmatpush3.bf16.msra.mxu0 %v4963_v9 }
 0x210   : > { %4552 = vmatprep.subr.bf16.mxu0 %v4965_v0 }
 0x213   : > { %4553 = vmatpush3.bf16.msra.mxu0 %v4965_v0 }
 0x214   : > { %4554 = vmatprep.subr.bf16.mxu0 %v4967_v6 }
 0x217   : > { %4555 = vmatpush3.bf16.msra.mxu0 %v4967_v6 }
 0x218   : > { %4572 = vmatprep.subr.bf16.mxu0 %v5756_v16 }
 0x2ca   : > { %v4532_v18 = vpop.f32.mrf.mxu0 }
 0x2cb   : > { %v1675_v42 = vmin.f32 %v4532_v18, 0.0  ;;  %vm1671_vm0 = vcmp.gt.f32.partialorder %v4532_v18, 0.0 }
 0x2cc   : > { %v1651_v43 = vpop.f32.mrf.mxu0 }
 0x2cd   : > { %v1680_v60 = vmul.f32 1.442695, %v1675_v42  ;;  %v1674_v17 = vmin.f32 %v1651_v43, 0.0  ;;  %vm1670_vm2 = vcmp.gt.f32.partialorder %v1651_v43, 0.0  ;;  %v4973_v42 = vld [vmem:[%s6373_s5 + $0x70] sm:$0xff]  }
 0x2ce   : > { %v4535_v28 = vpop.f32.mrf.mxu0 }
 0x2cf   : > { %5023 = vpow2.f32 %v1680_v60  ;;  %v1678_v48 = vmul.f32 1.442695, %v1674_v17  ;;  %v1677_v11 = vmin.f32 %v4535_v28, 0.0  ;;  %vm1673_vm3 = vcmp.gt.f32.partialorder %v4535_v28, 0.0 }
 0x2d0   : > { %v1661_v38 = vpop.f32.mrf.mxu0 }
 0x2d1   : > { %5025 = vpow2.f32 %v1678_v48  ;;  %v1684_v49 = vmul.f32 1.442695, %v1677_v11  ;;  %v1676_v37 = vmin.f32 %v1661_v38, 0.0  ;;  %vm1672_vm10 = vcmp.gt.f32.partialorder %v1661_v38, 0.0 }
 0x2d3   : > { %5027 = vpow2.f32 %v1684_v49  ;;  %v1682_v32 = vmul.f32 1.442695, %v1676_v37 }
 0x2d5   : > { %5029 = vpow2.f32 %v1682_v32 }
 0x2dc   : > { %v5024_v22 = vpop.eup %5023 }
 0x2dd   : > { %v3943_v23 = vadd.f32 -1.0, %v5024_v22  ;;  %v4975_v22 = vld [vmem:[%s6373_s5 + $0x68] sm:$0xff]  }
 0x2de   : > { %v5026_v20 = vpop.eup %5025 }
 0x2df   : > { %v1691_v33 = vsel %vm1671_vm0, %v4532_v18, %v3943_v23  ;;  %v3942_v56 = vadd.f32 -1.0, %v5026_v20 }
 0x2e0   : > { %v5028_v57 = vpop.eup %5027  ;;  %v4224_v36 = vpack.c.bf16 %v1691_v33, %v1691_v33 }
 0x2e1   : > { %v1690_v8 = vsel %vm1670_vm2, %v1651_v43, %v3942_v56  ;;  %v3945_v15 = vadd.f32 -1.0, %v5028_v57 }
 0x2e2   : > { %v5030_v50 = vpop.eup %5029  ;;  %v1722_v45 = vshrl.u32 %v4224_v36, 16  ;;  %v4223_v62 = vpack.c.bf16 %v1690_v8, %v1690_v8  ;;  %v1725_v53 = vshll.u32 %v4224_v36, 16 }
 0x2e3   : > { %v1693_v63 = vsel %vm1673_vm3, %v4535_v28, %v3945_v15  ;;  %v3944_v21 = vadd.f32 -1.0, %v5030_v50  ;;  %vm2319_vm3 = vcmask 1040384  }
 0x2e4   : > { %v1724_v5 = vrot.slane %v1722_v45, 7  ;;  %v1714_v29 = vshrl.u32 %v4223_v62, 16  ;;  %v4226_v12 = vpack.c.bf16 %v1693_v63, %v1693_v63  ;;  %v1717_v7 = vshll.u32 %v4223_v62, 16  ;;  %v4977_v63 = vld [vmem:[%s6373_s5 + $0x60] sm:$0xff]  }
 0x2e5   : > { %v1692_v13 = vsel %vm1672_vm10, %v1661_v38, %v3944_v21  ;;  %v4978_v21 = vld [vmem:[%s6373_s5 + $0x48] sm:$0xff]   ;;  %vm2320_vm10 = vmand %vm2319_vm3, %vm943_vm14 }
 0x2e6   : > { %v1716_v54 = vrot.slane %v1714_v29, 7  ;;  %v1740_v51 = vshrl.u32 %v4226_v12, 16  ;;  %v4225_v61 = vpack.c.bf16 %v1692_v13, %v1692_v13  ;;  %v1727_v55 = vor.u32 %v1725_v53, %v1724_v5 }
 0x2e7   : > { %v1743_v31 = vshll.u32 %v4226_v12, 16  ;;  %v1729_v3 = vrot.slane %v1724_v5, 4  ;;  %v4980_v12 = vld [vmem:[%s6373_s5 + $0x40] sm:$0xff]  }
 0x2e8   : > { %v1719_v40 = vor.u32 %v1717_v7, %v1716_v54  ;;  %v1720_v25 = vrot.slane %v1716_v54, 4  ;;  %v1742_v34 = vrot.slane %v1740_v51, 7  ;;  %v1731_v41 = vshrl.u32 %v4225_v61, 16 }
 0x2e9   : > { %v1734_v26 = vshll.u32 %v4225_v61, 16 }
 0x2ea   : > { %v1728_v35 = vsel %vm5544_vm1, %v1720_v25, %v1727_v55  ;;  %v1756_v10 = vsel %vm1754_vm11, %v1719_v40, %v1755_v30  ;;  %v1747_v58 = vrot.slane %v1742_v34, 4  ;;  %v1733_v4 = vrot.slane %v1731_v41, 7  ;;  %vm2314_vm11 = vmand %vm693_vm7, %vm1027_vm13 }
 0x2eb   : > { %1757 = vst [vmem:[#allocation4] sm:$0xf] %v1756_v10  ;;  %1758 = vst.msk [vmem:[#allocation4 + $0x4] sm:$0xf] %vm1694_vm9, %v1728_v35  ;;  %v1745_v9 = vor.u32 %v1743_v31, %v1742_v34 }
 0x2ec   : > { %v1764_v39 = vsel %vm1762_vm6, %v1747_v58, %v1763_v24  ;;  %v1736_v59 = vor.u32 %v1734_v26, %v1733_v4  ;;  %v1738_v52 = vrot.slane %v1733_v4, 4 }
 0x2ed   : > { %1765 = vst [vmem:[#allocation4 + $0x10] sm:$0x1] %v1764_v39 }
 0x2ee   : > { %v1737_v0 = vsel %vm5544_vm1, %v1729_v3, %v1736_v59  ;;  %v1746_v47 = vsel %vm5544_vm1, %v1738_v52, %v1745_v9 }
 0x2ef   : > { %1759 = vst.msk [vmem:[#allocation4 + $0x8] sm:$0xf] %vm1694_vm9, %v1737_v0  ;;  %1760 = vst.msk [vmem:[#allocation4 + $0xc] sm:$0xf] %vm1694_vm9, %v1746_v47  ;;  %vm2189_vm9 = vcmask 252928  }
 0x2f2   : > { %v4968_v6 = vld [vmem:[#allocation4] sm:$0xff]  }
 0x2f3   : > { %4556 = vmatprep.mubr.msk.bf16.mxu0 %vm1837_vm15, %v4968_v6  ;;  %v1801_v27 = vshll.u32 %v4968_v6, 16  ;;  %v1799_v18 = vshrl.u32 %v4968_v6, 16  ;;  %v1982_v33 = vrot.slane %v4968_v6, 1 }
 0x2f4   : > { %v4979_v49 = vld [vmem:[#allocation4 + $0x10] ss:$0 sps:$4 sm:$0x11]  }
 0x2f5   : > { %v1803_v43 = vrot.slane %v1801_v27, 1  ;;  %v2079_v48 = vrot.slane %v1799_v18, 1  ;;  %v2080_v11 = vrot.slane %v1801_v27, 2  ;;  %v2087_v15 = vshrl.u32 %v4979_v49, 16 }
 0x2f6   : > { %v4971_v60 = vld [vmem:[#allocation4 + $0x8] sm:$0xff]   ;;  %v2090_v50 = vshll.u32 %v4979_v49, 16  ;;  %v1985_v53 = vrot.slane %v4979_v49, 1 }
 0x2f7   : > { %4557 = vmatmul.mubr.msk.bf16.vlgmr.msra.gmra.mxu0 %vm1837_vm15, %v4971_v60  ;;  %v1806_v17 = vshll.u32 %v4971_v60, 16  ;;  %v1810_v28 = vshrl.u32 %v4971_v60, 16  ;;  %v1804_v38 = vor.u32 %v1803_v43, %v1799_v18  ;;  %v1983_v32 = vrot.slane %v4971_v60, 1  ;;  %v4001_v18 = vld [vmem:[%s6374_s6] ss:$0 sm:$0xff]  ;;  %v4983_v49 = vld [vmem:[%s6375_s7 + $0x78] sm:$0xff]  }
 0x2f8   : > { %4573 = vmatpush3.bf16.msra.mxu0 %v5756_v16  ;;  %v2081_v36 = vor.u32 %v2080_v11, %v2079_v48  ;;  %v4976_v16 = vld [vmem:[%s6373_s5 + $0x50] sm:$0xff]   ;;  %v2089_v5 = vrot.slane %v2087_v15, 1  ;;  %v2092_v29 = vrot.slane %v2090_v50, 2  ;;  %v4981_v11 = vld [vmem:[%s6375_s7 + $0x38] sm:$0xff]   ;;  %v4997_v15 = vld [vmem:[%s6375_s7 + $0x40] sm:$0xff]  }
 0x2f9   : > { %4574 = vmatprep.subr.bf16.mxu0 %v4973_v42  ;;  %v1808_v37 = vrot.slane %v1806_v17, 1  ;;  %v2082_v23 = vrot.slane %v1810_v28, 1  ;;  %v2083_v20 = vrot.slane %v1806_v17, 2  ;;  %v1984_v45 = vsel %vm516_vm4, %v1982_v33, %v1983_v32  ;;  %v4990_v33 = vld [vmem:[%s6375_s7 + $0x10] sm:$0xff]   ;;  %v5892_v50 = vld [vmem:[%s6377_s9 + $0x78] sm:$0xff] }
 0x2fa   : > { %v1986_v54 = vsel %vm516_vm4, %v1983_v32, %v1985_v53  ;;  %v4986_v32 = vld [vmem:[%s6375_s7 + $0x20] sm:$0xff]  }
 0x2fb   : > { %v1809_v56 = vsel %vm1082_vm5, %v1804_v38, %v1808_v37  ;;  %v1812_v57 = vor.u32 %v1810_v28, %v1808_v37  ;;  %v2084_v8 = vor.u32 %v2083_v20, %v2082_v23  ;;  %v4982_v38 = vld [vmem:[%s6375_s7 + $0x30] sm:$0xff]   ;;  %v4988_v23 = vld [vmem:[%s6375_s7 + $0x18] sm:$0xff]   ;;  %v4989_v20 = vld [vmem:[%s6375_s7 + $0x60] sm:$0xff]  }
 0x2fc   : > { %4575 = vmatpush3.bf16.msra.mxu0 %v4973_v42  ;;  %4544 = vmatprep.mubr.msk.bf16.mxu1 %vm1837_vm15, %v1809_v56  ;;  %v4985_v37 = vld [vmem:[%s6375_s7 + $0x70] sm:$0xff]   ;;  %v4991_v56 = vld [vmem:[%s6375_s7 + $0x58] sm:$0xff]  }
 0x2fd   : > { %4545 = vmatmul.mubr.msk.bf16.vlgmr.msra.gmra.mxu1 %vm1837_vm15, %v1812_v57  ;;  %4576 = vmatprep.subr.bf16.mxu0 %v4975_v22  ;;  %v2085_v62 = vsel %vm1409_vm12, %v2081_v36, %v2084_v8  ;;  %v4992_v57 = vld [vmem:[%s6375_s7 + $0x8] sm:$0xff]   ;;  %v4993_v36 = vld [vmem:[%s6375_s7 + $0x50] sm:$0xff]  }
 0x2fe   : > { %4561 = vmatpush3.bf16.msra.mxu1 %v5761_v2  ;;  %4568 = vmatprep.mubr.msk.bf16.mxu1 %vm1837_vm15, %v1984_v45  ;;  %v2093_v2 = vor.u32 %v2092_v29, %v2089_v5 }
 0x2ff   : > { %4580 = vmatprep.mubr.msk.bf16.mxu0 %vm1837_vm15, %v2085_v62  ;;  %4562 = vmatprep.subr.bf16.mxu1 %v4976_v16 }
 0x300   : > { %4577 = vmatpush3.bf16.msra.mxu0 %v4975_v22  ;;  %v2094_v13 = vsel %vm1409_vm12, %v2084_v8, %v2093_v2  ;;  %v4987_v22 = vld [vmem:[%s6375_s7 + $0x68] sm:$0xff]   ;;  %vm5045_vm12 = vmmov 0   ;;  %v4994_v8 = vld [vmem:[%s6375_s7] sm:$0xff]  }
 0x301   : > { %4578 = vmatprep.subr.bf16.mxu0 %v4977_v63 }
 0x302   : > { %4563 = vmatpush3.bf16.msra.mxu1 %v4976_v16  ;;  %v4995_v16 = vld [vmem:[%s6375_s7 + $0x48] sm:$0xff]  }
 0x303   : > { %4564 = vmatprep.subr.bf16.mxu1 %v4978_v21 }
 0x304   : > { %4579 = vmatpush3.bf16.msra.mxu0 %v4977_v63 }
 0x305   : > { %4615 = vmatprep.subr.bf16.mxu0 %v5044_v1 }
 0x306   : > { %4565 = vmatpush3.bf16.msra.mxu1 %v4978_v21 }
 0x307   : > { %4581 = vmatmul.mubr.msk.bf16.vlgmr.msra.gmra.mxu0 %vm1837_vm15, %v2094_v13  ;;  %4566 = vmatprep.subr.bf16.mxu1 %v4980_v12 }
 0x308   : > { %4616 = vmatpush3.bf16.msra.mxu0 %v4981_v11  ;;  %4631 = vmatprep.mubr.msk.bf16.mxu0 %vm5045_vm12, %v5044_v1  ;;  %v5002_v11 = vld [vmem:[%s6375_s7 + $0xa0] sm:$0xff]  }
 0x309   : > { %4617 = vmatprep.subr.bf16.mxu0 %v5044_v1 }
 0x30a   : > { %4567 = vmatpush3.bf16.msra.mxu1 %v4980_v12 }
 0x30c   : > { %4618 = vmatpush3.bf16.msra.mxu0 %v4982_v38  ;;  %v5003_v38 = vld [vmem:[%s6375_s7 + $0x98] sm:$0xff]  }
 0x30d   : > { %4569 = vmatmul.mubr.msk.bf16.vlgmr.msra.gmra.mxu1 %vm1837_vm15, %v1986_v54  ;;  %4619 = vmatprep.subr.bf16.mxu0 %v5044_v1 }
 0x30e   : > { %4592 = vmatprep.mubr.msk.f32.mxu1 %vm2189_vm9, %v5695_v19 }
 0x3b7   : > { %v4558_v7 = vpop.f32.mrf.mxu0 }
 0x3b9   : > { %v1955_v51 = vpop.f32.mrf.mxu0 }
 0x3bb   : > { %v4559_v61 = vpop.f32.mrf.mxu0 }
 0x3bd   : > { %v4546_v30 = vpop.f32.mrf.mxu1  ;;  %v1958_v40 = vpop.f32.mrf.mxu0 }
 0x3be   : > { %v1964_v10 = vadd.f32 %v4558_v7, %v4546_v30 }
 0x3bf   : > { %v1878_v55 = vpop.f32.mrf.mxu1 }
 0x3c0   : > { %v1956_v3 = vadd.f32 %v1955_v51, %v1878_v55 }
 0x3c1   : > { %v4547_v25 = vpop.f32.mrf.mxu1 }
 0x3c2   : > { %v1967_v31 = vadd.f32 %v4559_v61, %v4547_v25  ;;  %v2321_v25 = vld [vmem:[#allocation5 + $0x8] sm:$0x1] }
 0x3c3   : > { %v1881_v24 = vpop.f32.mrf.mxu1 }
 0x3c4   : > { %v1959_v9 = vadd.f32 %v1958_v40, %v1881_v24 }
 0x3c7   : > { %v4582_v34 = vpop.f32.mrf.mxu0 }
 0x3c9   : > { %v2159_v41 = vpop.f32.mrf.mxu0 }
 0x3cb   : > { %v4583_v26 = vpop.f32.mrf.mxu0 }
 0x3cd   : > { %v4570_v35 = vpop.f32.mrf.mxu1  ;;  %v2162_v27 = vpop.f32.mrf.mxu0 }
 0x3ce   : > { %v2068_v4 = vadd.f32 %v4570_v35, %v1964_v10  ;;  %v2315_v10 = vld [vmem:[#allocation5] sm:$0xf] }
 0x3cf   : > { %v2051_v58 = vpop.f32.mrf.mxu1 }
 0x3d0   : > { %v2176_v52 = vadd.f32 %v4582_v34, %v2068_v4  ;;  %v2066_v0 = vadd.f32 %v2051_v58, %v1956_v3 }
 0x3d1   : > { %v4571_v39 = vpop.f32.mrf.mxu1 }
 0x3d2   : > { %v2069_v19 = vadd.f32 %v4571_v39, %v1967_v31  ;;  %v2174_v60 = vadd.f32 %v2159_v41, %v2066_v0  ;;  %v2187_v17 = vadd.f32 %v4001_v18, %v2176_v52 }
 0x3d3   : > { %v2054_v59 = vpop.f32.mrf.mxu1 }
 0x3d4   : > { %v2177_v47 = vadd.f32 %v4583_v26, %v2069_v19  ;;  %v2067_v6 = vadd.f32 %v2054_v59, %v1959_v9  ;;  %v2185_v48 = vadd.f32 %v4001_v18, %v2174_v60  ;;  %v2695_v59 = vld [vmem:[%s6377_s9 + $0x70] sm:$0xff]  ;;  %v2693_v60 = vld [vmem:[%s6377_s9 + $0x60] sm:$0xff] }
 0x3d6   : > { %v2188_v42 = vadd.f32 %v4001_v18, %v2177_v47  ;;  %v2175_v43 = vadd.f32 %v2162_v27, %v2067_v6 }
 0x3d8   : > { %4584 = vmatprep.subr.msk.mxu1 %vm516_vm4, %v2188_v42  ;;  %v2186_v28 = vadd.f32 %v4001_v18, %v2175_v43 }
 0x3d9   : > { %4585 = vmatpush3.msk.msra.mxu1 %vm516_vm4, %v2188_v42  ;;  %v4999_v42 = vld [vmem:[%s6375_s7 + $0xb8] sm:$0xff]  }
 0x3da   : > { %4586 = vmatprep.subr.mxu1 %v2187_v17 }
 0x3db   : > { %4587 = vmatpush3.msra.mxu1 %v2187_v17  ;;  %v5000_v17 = vld [vmem:[%s6375_s7 + $0xb0] sm:$0xff]  }
 0x3dc   : > { %4588 = vmatprep.subr.mxu1 %v2186_v28 }
 0x3dd   : > { %4589 = vmatpush3.msra.mxu1 %v2186_v28  ;;  %v2692_v28 = vld [vmem:[%s6377_s9 + $0x58] sm:$0xff] }
 0x3de   : > { %4590 = vmatprep.subr.mxu1 %v2185_v48 }
 0x3df   : > { %4591 = vmatpush3.msra.mxu1 %v2185_v48  ;;  %v5001_v48 = vld [vmem:[%s6375_s7 + $0xa8] sm:$0xff]  }
 0x3e0   : > { %4593 = vmatmul.mubr.msk.f32.vlgmr.msra.gmra.mxu1 %vm2189_vm9, %v5710_v14  ;;  %4595 = vmatprep.subr.bf16.mxu1 %v5044_v1  ;;  %v4984_v14 = vld [vmem:[%s6375_s7 + $0x28] sm:$0xff]  }
 0x3e1   : > { %4596 = vmatpush3.bf16.msra.mxu1 %v4983_v49  ;;  %4620 = vmatpush3.bf16.msra.mxu0 %v4984_v14  ;;  %v5004_v49 = vld [vmem:[%s6375_s7 + $0x90] sm:$0xff]   ;;  %v5005_v14 = vld [vmem:[%s6375_s7 + $0x88] sm:$0xff]  }
 0x3e2   : > { %4597 = vmatprep.subr.bf16.mxu1 %v5044_v1  ;;  %4621 = vmatprep.subr.bf16.mxu0 %v5044_v1 }
 0x3e3   : > { %4611 = vmatprep.mubr.msk.bf16.mxu1 %vm5045_vm12, %v5044_v1 }
 0x3e5   : > { %4598 = vmatpush3.bf16.msra.mxu1 %v4985_v37  ;;  %4622 = vmatpush3.bf16.msra.mxu0 %v4986_v32  ;;  %v5006_v37 = vld [vmem:[%s6375_s7 + $0x80] sm:$0xff]  }
 0x3e6   : > { %4599 = vmatprep.subr.bf16.mxu1 %v5044_v1  ;;  %4623 = vmatprep.subr.bf16.mxu0 %v5044_v1 }
 0x3e9   : > { %4600 = vmatpush3.bf16.msra.mxu1 %v4987_v22  ;;  %4624 = vmatpush3.bf16.msra.mxu0 %v4988_v23 }
 0x3ea   : > { %4601 = vmatprep.subr.bf16.mxu1 %v5044_v1  ;;  %4625 = vmatprep.subr.bf16.mxu0 %v5044_v1 }
 0x3ed   : > { %4602 = vmatpush3.bf16.msra.mxu1 %v4989_v20  ;;  %4626 = vmatpush3.bf16.msra.mxu0 %v4990_v33  ;;  %v2690_v20 = vld [vmem:[%s6377_s9 + $0x48] sm:$0xff]  ;;  %v2689_v33 = vld [vmem:[%s6377_s9 + $0x40] sm:$0xff] }
 0x3ee   : > { %4603 = vmatprep.subr.bf16.mxu1 %v5044_v1  ;;  %4627 = vmatprep.subr.bf16.mxu0 %v5044_v1 }
 0x3f1   : > { %4604 = vmatpush3.bf16.msra.mxu1 %v4991_v56  ;;  %4628 = vmatpush3.bf16.msra.mxu0 %v4992_v57  ;;  %v2688_v56 = vld [vmem:[%s6377_s9 + $0x38] sm:$0xff]  ;;  %v2687_v57 = vld [vmem:[%s6377_s9 + $0x30] sm:$0xff] }
 0x3f2   : > { %4605 = vmatprep.subr.bf16.mxu1 %v5044_v1  ;;  %4629 = vmatprep.subr.bf16.mxu0 %v5044_v1 }
 0x3f5   : > { %4606 = vmatpush3.bf16.msra.mxu1 %v4993_v36  ;;  %4630 = vmatpush3.bf16.msra.mxu0 %v4994_v8  ;;  %v2686_v36 = vld [vmem:[%s6377_s9 + $0x28] sm:$0xff]  ;;  %v2685_v8 = vld [vmem:[%s6377_s9 + $0x20] sm:$0xff] }
 0x3f6   : > { %4607 = vmatprep.subr.bf16.mxu1 %v5044_v1  ;;  %4655 = vmatprep.subr.msk.mxu0 %vm1126_vm8, %v5892_v50 }
 0x3f9   : > { %4608 = vmatpush3.bf16.msra.mxu1 %v4995_v16  ;;  %v2684_v16 = vld [vmem:[%s6377_s9 + $0x18] sm:$0xff] }
 0x3fa   : > { %4609 = vmatprep.subr.bf16.mxu1 %v5044_v1 }
 0x3fd   : > { %4610 = vmatpush3.bf16.msra.mxu1 %v4997_v15  ;;  %v2683_v15 = vld [vmem:[%s6377_s9 + $0x10] sm:$0xff] }
 0x3fe   : > { %4635 = vmatprep.subr.bf16.mxu1 %v5044_v1 }
 0x4a0   : > { %v4594_v45 = vpop.f32.mrf.mxu1 }
 0x4a1   : > { %v2275_v62 = vmin.f32 %v4594_v45, 0.0  ;;  %vm2273_vm0 = vcmp.gt.f32.partialorder %v4594_v45, 0.0 }
 0x4a2   : > { %v2263_v63 = vpop.f32.mrf.mxu1 }
 0x4a3   : > { %v2278_v21 = vmul.f32 1.442695, %v2275_v62  ;;  %v2274_v5 = vmin.f32 %v2263_v63, 0.0  ;;  %vm2272_vm2 = vcmp.gt.f32.partialorder %v2263_v63, 0.0 }
 0x4a5   : > { %5031 = vpow2.f32 %v2278_v21  ;;  %v2276_v29 = vmul.f32 1.442695, %v2274_v5 }
 0x4a7   : > { %5033 = vpow2.f32 %v2276_v29 }
 0x4b2   : > { %v5032_v12 = vpop.eup %5031 }
 0x4b3   : > { %v4006_v2 = vadd.f32 -1.0, %v5032_v12 }
 0x4b4   : > { %v5034_v13 = vpop.eup %5033 }
 0x4b5   : > { %v2283_v53 = vsel %vm2273_vm0, %v4594_v45, %v4006_v2  ;;  %v4005_v54 = vadd.f32 -1.0, %v5034_v13  ;;  %v2681_v45 = vld [vmem:[%s6377_s9] sm:$0xff] }
 0x4b6   : > { %v4228_v7 = vpack.c.bf16 %v2283_v53, %v2283_v53 }
 0x4b7   : > { %v2282_v51 = vsel %vm2272_vm2, %v2263_v63, %v4005_v54 }
 0x4b8   : > { %v2302_v30 = vshrl.u32 %v4228_v7, 16  ;;  %v4227_v61 = vpack.c.bf16 %v2282_v51, %v2282_v51  ;;  %v2305_v34 = vshll.u32 %v4228_v7, 16  ;;  %v4067_v7 = vld [vmem:[%s6376_s8] ss:$0 sm:$0xff] }
 0x4ba   : > { %v2304_v55 = vrot.slane %v2302_v30, 7  ;;  %v2294_v40 = vshrl.u32 %v4227_v61, 16  ;;  %v2297_v35 = vshll.u32 %v4227_v61, 16 }
 0x4bc   : > { %v2309_v24 = vrot.slane %v2304_v55, 4  ;;  %v2296_v41 = vrot.slane %v2294_v40, 7  ;;  %v2307_v58 = vor.u32 %v2305_v34, %v2304_v55 }
 0x4be   : > { %v2322_v31 = vsel %vm2320_vm10, %v2309_v24, %v2321_v25  ;;  %v2299_v4 = vor.u32 %v2297_v35, %v2296_v41  ;;  %v2300_v26 = vrot.slane %v2296_v41, 4  ;;  %v4086_v35 = vld [vmem:[%s6378_s10] ss:$0 sm:$0xff] }
 0x4bf   : > { %2323 = vst [vmem:[#allocation5 + $0x8] sm:$0x1] %v2322_v31 }
 0x4c0   : > { %v2308_v39 = vsel %vm5544_vm1, %v2300_v26, %v2307_v58  ;;  %v2316_v3 = vsel %vm2314_vm11, %v2299_v4, %v2315_v10 }
 0x4c1   : > { %2317 = vst [vmem:[#allocation5] sm:$0xf] %v2316_v3  ;;  %2318 = vst [vmem:[#allocation5 + $0x4] sm:$0xf] %v2308_v39 }
 0x4c6   : > { %v4998_v9 = vld [vmem:[#allocation5 + $0x8] ss:$0 sps:$4 sm:$0x11]  }
 0x4c7   : > { %v2376_v0 = vshll.u32 %v4998_v9, 16  ;;  %v2578_v22 = vrot.slane %v4998_v9, 1 }
 0x4c8   : > { %v4996_v19 = vld [vmem:[#allocation5] sm:$0xff]  }
 0x4c9   : > { %4632 = vmatmul.mubr.bf16.vlgmr.msra.gmra.mxu0 %v4996_v19  ;;  %v2371_v52 = vshll.u32 %v4996_v19, 16  ;;  %v2369_v47 = vshrl.u32 %v4996_v19, 16  ;;  %v2378_v18 = vrot.slane %v2376_v0, 1  ;;  %v2577_v32 = vrot.slane %v4996_v19, 1 }
 0x4ca   : > { %4656 = vmatpush3.xpose.msk.msra.mxu0 %vm1126_vm8, %v5892_v50 }
 0x4cb   : > { %v2373_v6 = vrot.slane %v2371_v52, 1  ;;  %4657 = vmatprep.subr.msk.mxu0 %vm1126_vm8, %v2695_v59  ;;  %v2579_v23 = vsel %vm516_vm4, %v2577_v32, %v2578_v22  ;;  %vm2826_vm4 = vcmp.lt.s32.totalorder %v5690_v46, 64  ;;  %v4101_v32 = vld [vmem:[%s6377_s9 + $0xd0] sm:$0xff]  ;;  %v4100_v22 = vld [vmem:[%s6377_s9 + $0xc8] sm:$0xff] }
 0x4cd   : > { %v2374_v27 = vor.u32 %v2373_v6, %v2369_v47 }
 0x4ce   : > { %4658 = vmatpush3.xpose.msk.msra.mxu0 %vm1126_vm8, %v2695_v59 }
 0x4cf   : > { %v2379_v43 = vsel %vm1082_vm5, %v2374_v27, %v2378_v18  ;;  %4659 = vmatprep.subr.msk.mxu0 %vm1126_vm8, %v2694_v44 }
 0x4d0   : > { %4612 = vmatmul.mubr.bf16.vlgmr.msra.gmra.mxu1 %v2379_v43 }
 0x4d1   : > { %4636 = vmatpush3.bf16.msra.mxu1 %v4999_v42  ;;  %4651 = vmatprep.mubr.msk.bf16.mxu1 %vm5045_vm12, %v5044_v1 }
 0x4d2   : > { %4637 = vmatprep.subr.bf16.mxu1 %v5044_v1  ;;  %4660 = vmatpush3.xpose.msk.msra.mxu0 %vm1126_vm8, %v2694_v44 }
 0x4d3   : > { %4661 = vmatprep.subr.msk.mxu0 %vm1126_vm8, %v2693_v60 }
 0x4d5   : > { %4638 = vmatpush3.bf16.msra.mxu1 %v5000_v17 }
 0x4d6   : > { %4639 = vmatprep.subr.bf16.mxu1 %v5044_v1  ;;  %4662 = vmatpush3.xpose.msk.msra.mxu0 %vm1126_vm8, %v2693_v60 }
 0x4d7   : > { %4663 = vmatprep.subr.msk.mxu0 %vm1126_vm8, %v2692_v28 }
 0x4d9   : > { %4640 = vmatpush3.bf16.msra.mxu1 %v5001_v48 }
 0x4da   : > { %4641 = vmatprep.subr.bf16.mxu1 %v5044_v1  ;;  %4664 = vmatpush3.xpose.msk.msra.mxu0 %vm1126_vm8, %v2692_v28 }
 0x4dd   : > { %4642 = vmatpush3.bf16.msra.mxu1 %v5002_v11  ;;  %v4106_v11 = vld [vmem:[%s6377_s9 + $0xf8] sm:$0xff] }
 0x4de   : > { %4643 = vmatprep.subr.bf16.mxu1 %v5044_v1 }
 0x4e1   : > { %4644 = vmatpush3.bf16.msra.mxu1 %v5003_v38  ;;  %v4105_v38 = vld [vmem:[%s6377_s9 + $0xf0] sm:$0xff] }
 0x4e2   : > { %4645 = vmatprep.subr.bf16.mxu1 %v5044_v1 }
 0x4e5   : > { %4646 = vmatpush3.bf16.msra.mxu1 %v5004_v49  ;;  %v4104_v49 = vld [vmem:[%s6377_s9 + $0xe8] sm:$0xff] }
 0x4e6   : > { %4647 = vmatprep.subr.bf16.mxu1 %v5044_v1 }
 0x4e9   : > { %4648 = vmatpush3.bf16.msra.mxu1 %v5005_v14  ;;  %v4103_v14 = vld [vmem:[%s6377_s9 + $0xe0] sm:$0xff] }
 0x4ea   : > { %4649 = vmatprep.subr.bf16.mxu1 %v5044_v1  ;;  %v2691_v1 = vld [vmem:[%s6377_s9 + $0x50] sm:$0xff] }
 0x4eb   : > { %4665 = vmatprep.subr.msk.mxu0 %vm1126_vm8, %v2691_v1 }
 0x4ec   : > { %4666 = vmatpush3.xpose.msk.msra.mxu0 %vm1126_vm8, %v2691_v1 }
 0x4ed   : > { %4650 = vmatpush3.bf16.msra.mxu1 %v5006_v37  ;;  %4667 = vmatprep.subr.msk.mxu0 %vm1126_vm8, %v2690_v20  ;;  %v4102_v37 = vld [vmem:[%s6377_s9 + $0xd8] sm:$0xff] }
 0x4ee   : > { %4690 = vmatprep.subr.mxu1 %v5892_v50 }
 0x4f0   : > { %4652 = vmatmul.mubr.bf16.vlgmr.msra.gmra.mxu1 %v2579_v23  ;;  %4668 = vmatpush3.xpose.msk.msra.mxu0 %vm1126_vm8, %v2690_v20  ;;  %v4099_v23 = vld [vmem:[%s6377_s9 + $0xc0] sm:$0xff] }
 0x4f1   : > { %4691 = vmatpush3.msra.mxu1 %v5892_v50  ;;  %4669 = vmatprep.subr.msk.mxu0 %vm1126_vm8, %v2689_v33  ;;  %v2682_v50 = vld [vmem:[%s6377_s9 + $0x8] sm:$0xff] }
 0x4f2   : > { %4692 = vmatprep.subr.mxu1 %v2695_v59 }
 0x4f3   : > { %4693 = vmatpush3.msra.mxu1 %v2695_v59 }
 0x4f4   : > { %4694 = vmatprep.subr.mxu1 %v2694_v44  ;;  %4670 = vmatpush3.xpose.msk.msra.mxu0 %vm1126_vm8, %v2689_v33 }
 0x4f5   : > { %4695 = vmatpush3.msra.mxu1 %v2694_v44  ;;  %4671 = vmatprep.subr.msk.mxu0 %vm1126_vm8, %v2688_v56 }
 0x4f6   : > { %4696 = vmatprep.subr.mxu1 %v2693_v60 }
 0x4f7   : > { %4697 = vmatpush3.msra.mxu1 %v2693_v60 }
 0x4f8   : > { %4698 = vmatprep.subr.mxu1 %v2692_v28  ;;  %4672 = vmatpush3.xpose.msk.msra.mxu0 %vm1126_vm8, %v2688_v56 }
 0x4f9   : > { %4699 = vmatpush3.msra.mxu1 %v2692_v28  ;;  %4673 = vmatprep.subr.msk.mxu0 %vm1126_vm8, %v2687_v57 }
 0x4fa   : > { %4700 = vmatprep.subr.mxu1 %v2691_v1 }
 0x4fb   : > { %4701 = vmatpush3.msra.mxu1 %v2691_v1  ;;  %v4098_v1 = vld [vmem:[%s6377_s9 + $0xb8] sm:$0xff] }
 0x4fc   : > { %4702 = vmatprep.subr.mxu1 %v2690_v20  ;;  %4674 = vmatpush3.xpose.msk.msra.mxu0 %vm1126_vm8, %v2687_v57 }
 0x4fd   : > { %4703 = vmatpush3.msra.mxu1 %v2690_v20  ;;  %4675 = vmatprep.subr.msk.mxu0 %vm1126_vm8, %v2686_v36  ;;  %v4097_v20 = vld [vmem:[%s6377_s9 + $0xb0] sm:$0xff] }
 0x4fe   : > { %4704 = vmatprep.subr.mxu1 %v2689_v33 }
 0x4ff   : > { %4705 = vmatpush3.msra.mxu1 %v2689_v33  ;;  %v4096_v33 = vld [vmem:[%s6377_s9 + $0xa8] sm:$0xff] }
 0x500   : > { %4706 = vmatprep.subr.mxu1 %v2688_v56  ;;  %4676 = vmatpush3.xpose.msk.msra.mxu0 %vm1126_vm8, %v2686_v36 }
 0x501   : > { %4707 = vmatpush3.msra.mxu1 %v2688_v56  ;;  %4677 = vmatprep.subr.msk.mxu0 %vm1126_vm8, %v2685_v8  ;;  %v4095_v56 = vld [vmem:[%s6377_s9 + $0xa0] sm:$0xff] }
 0x502   : > { %4708 = vmatprep.subr.mxu1 %v2687_v57 }
 0x503   : > { %4709 = vmatpush3.msra.mxu1 %v2687_v57  ;;  %v4094_v57 = vld [vmem:[%s6377_s9 + $0x98] sm:$0xff] }
 0x504   : > { %4710 = vmatprep.subr.mxu1 %v2686_v36  ;;  %4678 = vmatpush3.xpose.msk.msra.mxu0 %vm1126_vm8, %v2685_v8 }
 0x505   : > { %4711 = vmatpush3.msra.mxu1 %v2686_v36  ;;  %4679 = vmatprep.subr.msk.mxu0 %vm1126_vm8, %v2684_v16  ;;  %v4093_v36 = vld [vmem:[%s6377_s9 + $0x90] sm:$0xff] }
 0x506   : > { %4712 = vmatprep.subr.mxu1 %v2685_v8 }
 0x507   : > { %4713 = vmatpush3.msra.mxu1 %v2685_v8  ;;  %v4092_v8 = vld [vmem:[%s6377_s9 + $0x88] sm:$0xff] }
 0x508   : > { %4714 = vmatprep.subr.mxu1 %v2684_v16  ;;  %4680 = vmatpush3.xpose.msk.msra.mxu0 %vm1126_vm8, %v2684_v16 }
 0x509   : > { %4715 = vmatpush3.msra.mxu1 %v2684_v16  ;;  %4681 = vmatprep.subr.msk.mxu0 %vm1126_vm8, %v2683_v15 }
 0x50a   : > { %4716 = vmatprep.subr.mxu1 %v2683_v15 }
 0x50b   : > { %4717 = vmatpush3.msra.mxu1 %v2683_v15 }
 0x50c   : > { %4682 = vmatpush3.xpose.msk.msra.mxu0 %vm1126_vm8, %v2683_v15  ;;  %4718 = vmatprep.subr.mxu1 %v2682_v50 }
 0x50d   : > { %4683 = vmatprep.subr.msk.mxu0 %vm1126_vm8, %v2682_v50  ;;  %4719 = vmatpush3.msra.mxu1 %v2682_v50 }
 0x50e   : > { %4720 = vmatprep.subr.mxu1 %v2681_v45 }
 0x50f   : > { %4721 = vmatpush3.msra.mxu1 %v2681_v45 }
 0x510   : > { %4684 = vmatpush3.xpose.msk.msra.mxu0 %vm1126_vm8, %v2682_v50  ;;  %4725 = vmatprep.subr.msk.mxu1 %vm1126_vm8, %v4106_v11 }
 0x511   : > { %4685 = vmatprep.subr.msk.mxu0 %vm1126_vm8, %v2681_v45 }
 0x514   : > { %4686 = vmatpush3.xpose.msk.msra.mxu0 %vm1126_vm8, %v2681_v45 }
 0x515   : > { %4760 = vmatprep.subr.mxu0 %v4106_v11 }
 0x589   : > { %v2553_v62 = vpop.f32.mrf.mxu0 }
 0x58b   : > { %v4633_v63 = vpop.f32.mrf.mxu0 }
 0x58d   : > { %v2556_v21 = vpop.f32.mrf.mxu0 }
 0x58f   : > { %v4634_v5 = vpop.f32.mrf.mxu0 }
 0x590   : > { %v2463_v29 = vpop.f32.mrf.mxu1 }
 0x591   : > { %v2554_v53 = vadd.f32 %v2553_v62, %v2463_v29 }
 0x592   : > { %v4613_v12 = vpop.f32.mrf.mxu1 }
 0x594   : > { %v2466_v2 = vpop.f32.mrf.mxu1 }
 0x595   : > { %v2557_v61 = vadd.f32 %v2556_v21, %v2466_v2  ;;  %v5046_v2 = vmov 1.0  }
 0x596   : > { %v4614_v13 = vpop.f32.mrf.mxu1 }
 0x597   : > { %v4091_v13 = vld [vmem:[%s6377_s9 + $0x80] sm:$0xff] }
 0x5b0   : > { %v2663_v54 = vpop.f32.mrf.mxu1 }
 0x5b1   : > { %v2670_v51 = vadd.f32 %v2663_v54, %v2554_v53 }
 0x5b2   : > { %v4653_v30 = vpop.f32.mrf.mxu1 }
 0x5b3   : > { %v6018_v55 = vadd.f32 %v4067_v7, %v2670_v51 }
 0x5b4   : > { %v2666_v40 = vpop.f32.mrf.mxu1 }
 0x5b5   : > { %v2671_v25 = vadd.f32 %v2666_v40, %v2557_v61  ;;  %4687 = vmatprep.mubr.msk.f32.mxu0 %vm1126_vm8, %v6018_v55  ;;  %v4126_v61 = vld [vmem:[%s6378_s10 + $0x1] ss:$0 sm:$0xff] }
 0x5b6   : > { %v4654_v34 = vpop.f32.mrf.mxu1 }
 0x5b7   : > { %v6022_v24 = vadd.f32 %v4067_v7, %v2671_v25 }
 0x5b9   : > { %4688 = vmatmul.mubr.msk.f32.vlgmr.msra.gmra.mxu0 %vm1126_vm8, %v6022_v24 }
 0x5ba   : > { %4761 = vmatpush3.msra.mxu0 %v4106_v11 }
 0x5bb   : > { %4762 = vmatprep.subr.mxu0 %v4105_v38 }
 0x5bc   : > { %4763 = vmatpush3.msra.mxu0 %v4105_v38 }
 0x5bd   : > { %4764 = vmatprep.subr.mxu0 %v4104_v49 }
 0x5be   : > { %4765 = vmatpush3.msra.mxu0 %v4104_v49 }
 0x5bf   : > { %4766 = vmatprep.subr.mxu0 %v4103_v14 }
 0x5c0   : > { %4767 = vmatpush3.msra.mxu0 %v4103_v14 }
 0x5c1   : > { %4768 = vmatprep.subr.mxu0 %v4102_v37 }
 0x5c2   : > { %4769 = vmatpush3.msra.mxu0 %v4102_v37 }
 0x5c3   : > { %4770 = vmatprep.subr.mxu0 %v4101_v32 }
 0x5c4   : > { %4771 = vmatpush3.msra.mxu0 %v4101_v32 }
 0x5c5   : > { %4772 = vmatprep.subr.mxu0 %v4100_v22 }
 0x5c6   : > { %4773 = vmatpush3.msra.mxu0 %v4100_v22 }
 0x5c7   : > { %4774 = vmatprep.subr.mxu0 %v4099_v23 }
 0x5c8   : > { %4775 = vmatpush3.msra.mxu0 %v4099_v23 }
 0x5c9   : > { %4776 = vmatprep.subr.mxu0 %v4098_v1 }
 0x5ca   : > { %4777 = vmatpush3.msra.mxu0 %v4098_v1 }
 0x5cb   : > { %4778 = vmatprep.subr.mxu0 %v4097_v20 }
 0x5cc   : > { %4779 = vmatpush3.msra.mxu0 %v4097_v20 }
 0x5cd   : > { %4780 = vmatprep.subr.mxu0 %v4096_v33 }
 0x5ce   : > { %4781 = vmatpush3.msra.mxu0 %v4096_v33 }
 0x5cf   : > { %4782 = vmatprep.subr.mxu0 %v4095_v56 }
 0x5d0   : > { %4783 = vmatpush3.msra.mxu0 %v4095_v56 }
 0x5d1   : > { %4784 = vmatprep.subr.mxu0 %v4094_v57 }
 0x5d2   : > { %4785 = vmatpush3.msra.mxu0 %v4094_v57 }
 0x5d3   : > { %4786 = vmatprep.subr.mxu0 %v4093_v36 }
 0x5d4   : > { %4787 = vmatpush3.msra.mxu0 %v4093_v36 }
 0x5d5   : > { %4788 = vmatprep.subr.mxu0 %v4092_v8 }
 0x5d6   : > { %4789 = vmatpush3.msra.mxu0 %v4092_v8 }
 0x5d7   : > { %4790 = vmatprep.subr.mxu0 %v4091_v13 }
 0x5d8   : > { %4791 = vmatpush3.msra.mxu0 %v4091_v13 }
 0x679   : > { %v4689_v41 = vpop.f32.mrf.mxu0 }
 0x67a   : > { %v2829_v10 = vmul.f32 2.0, %v4689_v41 }
 0x67b   : > { %v2817_v58 = vpop.f32.mrf.mxu0 }
 0x67c   : > { %v2828_v31 = vmul.f32 2.0, %v2817_v58  ;;  %v2837_v4 = vsub.f32 %v4086_v35, %v2829_v10 }
 0x67e   : > { %v2839_v26 = vsel %vm2826_vm4, %v2837_v4, 1e+30  ;;  %v2836_v39 = vsub.f32 %v4086_v35, %v2828_v31 }
 0x67f   : > { %2842 = vmin.xlane.f32.xlu0 %v2839_v26 }
 0x680   : > { %v2838_v3 = vsel %vm2826_vm4, %v2836_v39, 1e+30 }
 0x681   : > { %2840 = vmin.xlane.f32.xlu1 %v2838_v3 }
 0x708   : > { %v2843_v9 = vpop.xlane.xlu0 %2842 }
 0x709   : > { %vm2845_vm7 = vcmp.le.f32.partialorder %v2839_v26, %v2843_v9 }
 0x70a   : > { %v2847_v19 = vsel %vm2845_vm7, %v5690_v46, 128  ;;  %v2841_v59 = vpop.xlane.xlu1 %2840 }
 0x70b   : > { %vm2844_vm13 = vcmp.le.f32.partialorder %v2838_v3, %v2841_v59  ;;  %v2863_v52 = vshra.s32 %v2847_v19, 16  ;;  %v2862_v27 = vand.u32 65535, %v2847_v19 }
 0x70c   : > { %v2846_v0 = vsel %vm2844_vm13, %v5690_v46, 128 }
 0x70d   : > { %v2865_v47 = vcvt.s32.f32 %v2863_v52  ;;  %v2849_v6 = vshra.s32 %v2846_v0, 16  ;;  %v2848_v18 = vand.u32 65535, %v2846_v0  ;;  %v2864_v43 = vcvt.s32.f32 %v2862_v27 }
 0x70f   : > { %2866 = vmin.xlane.f32.xlu1 %v2865_v47  ;;  %v2851_v44 = vcvt.s32.f32 %v2849_v6  ;;  %v2850_v28 = vcvt.s32.f32 %v2848_v18  ;;  %v4146_v18 = vld [vmem:[%s6377_s9 + $0x178] sm:$0xff] }
 0x710   : > { %4795 = vmatprep.subr.msk.mxu0 %vm1126_vm8, %v4146_v18 }
 0x711   : > { %2852 = vmin.xlane.f32.xlu0 %v2851_v44 }
 0x798   : > { %v2867_v42 = vpop.xlane.xlu1 %2866 }
 0x799   : > { %vm2868_vm14 = vcmp.eq.f32.partialorder %v2865_v47, %v2867_v42  ;;  %v2873_v16 = vcvt.f32.s32 %v2867_v42  ;;  %v4145_v42 = vld [vmem:[%s6377_s9 + $0x170] sm:$0xff] }
 0x79a   : > { %v2853_v60 = vpop.xlane.xlu0 %2852  ;;  %v2869_v17 = vsel %vm2868_vm14, %v2864_v43, inf  ;;  %v4144_v43 = vld [vmem:[%s6377_s9 + $0x168] sm:$0xff] }
 0x79b   : > { %2870 = vmin.xlane.f32.xlu1 %v2869_v17  ;;  %vm2854_vm1 = vcmp.eq.f32.partialorder %v2851_v44, %v2853_v60  ;;  %v2859_v15 = vcvt.f32.s32 %v2853_v60  ;;  %v2874_v62 = vshll.u32 %v2873_v16, 16  ;;  %v4143_v60 = vld [vmem:[%s6377_s9 + $0x160] sm:$0xff]  ;;  %v4142_v17 = vld [vmem:[%s6377_s9 + $0x158] sm:$0xff] }
 0x79c   : > { %v2855_v48 = vsel %vm2854_vm1, %v2850_v28, inf  ;;  %v4141_v28 = vld [vmem:[%s6377_s9 + $0x150] sm:$0xff] }
 0x79d   : > { %2856 = vmin.xlane.f32.xlu0 %v2855_v48  ;;  %v2860_v21 = vshll.u32 %v2859_v15, 16  ;;  %v4140_v48 = vld [vmem:[%s6377_s9 + $0x148] sm:$0xff] }
 0x824   : > { %v2871_v50 = vpop.xlane.xlu1 %2870 }
 0x825   : > { %v2872_v45 = vcvt.f32.s32 %v2871_v50 }
 0x826   : > { %v2857_v63 = vpop.xlane.xlu0 %2856 }
 0x827   : > { %v2858_v5 = vcvt.f32.s32 %v2857_v63  ;;  %v2875_v29 = vadd.s32 %v2874_v62, %v2872_v45  ;;  %v4131_v45 = vld [vmem:[%s6377_s9 + $0x100] sm:$0xff] }
 0x829   : > { %v2861_v12 = vadd.s32 %v2860_v21, %v2858_v5  ;;  %vm2877_vm6 = vcmp.eq.s32.totalorder %v5690_v46, %v2875_v29 }
 0x82b   : > { %vm2876_vm5 = vcmp.eq.s32.totalorder %v5690_v46, %v2861_v12  ;;  %v4166_v12 = vld [vmem:[%s6378_s10 + $0x2] ss:$0 sm:$0xff] }
 0x82c   : > { %4722 = vmatprep.mubr.msk.f32.mxu1 %vm2876_vm5, %v5046_v2 }
 0x82d   : > { %4723 = vmatmul.mubr.msk.f32.vlgmr.msra.gmra.mxu1 %vm2877_vm6, %v5046_v2 }
 0x82e   : > { %4726 = vmatpush3.xpose.msk.msra.mxu1 %vm1126_vm8, %v4106_v11  ;;  %v4139_v11 = vld [vmem:[%s6377_s9 + $0x140] sm:$0xff] }
 0x82f   : > { %4727 = vmatprep.subr.msk.mxu1 %vm1126_vm8, %v4105_v38 }
 0x832   : > { %4728 = vmatpush3.xpose.msk.msra.mxu1 %vm1126_vm8, %v4105_v38  ;;  %v4138_v38 = vld [vmem:[%s6377_s9 + $0x138] sm:$0xff] }
 0x833   : > { %4729 = vmatprep.subr.msk.mxu1 %vm1126_vm8, %v4104_v49 }
 0x836   : > { %4730 = vmatpush3.xpose.msk.msra.mxu1 %vm1126_vm8, %v4104_v49  ;;  %v4137_v49 = vld [vmem:[%s6377_s9 + $0x130] sm:$0xff] }
 0x837   : > { %4731 = vmatprep.subr.msk.mxu1 %vm1126_vm8, %v4103_v14 }
 0x83a   : > { %4732 = vmatpush3.xpose.msk.msra.mxu1 %vm1126_vm8, %v4103_v14  ;;  %v4136_v14 = vld [vmem:[%s6377_s9 + $0x128] sm:$0xff] }
 0x83b   : > { %4733 = vmatprep.subr.msk.mxu1 %vm1126_vm8, %v4102_v37 }
 0x83e   : > { %4734 = vmatpush3.xpose.msk.msra.mxu1 %vm1126_vm8, %v4102_v37  ;;  %v4135_v37 = vld [vmem:[%s6377_s9 + $0x120] sm:$0xff] }
 0x83f   : > { %4735 = vmatprep.subr.msk.mxu1 %vm1126_vm8, %v4101_v32 }
 0x842   : > { %4736 = vmatpush3.xpose.msk.msra.mxu1 %vm1126_vm8, %v4101_v32  ;;  %v4134_v32 = vld [vmem:[%s6377_s9 + $0x118] sm:$0xff] }
 0x843   : > { %4737 = vmatprep.subr.msk.mxu1 %vm1126_vm8, %v4100_v22 }
 0x846   : > { %4738 = vmatpush3.xpose.msk.msra.mxu1 %vm1126_vm8, %v4100_v22  ;;  %v4133_v22 = vld [vmem:[%s6377_s9 + $0x110] sm:$0xff] }
 0x847   : > { %4739 = vmatprep.subr.msk.mxu1 %vm1126_vm8, %v4099_v23 }
 0x84a   : > { %4740 = vmatpush3.xpose.msk.msra.mxu1 %vm1126_vm8, %v4099_v23  ;;  %v4132_v23 = vld [vmem:[%s6377_s9 + $0x108] sm:$0xff] }
 0x84b   : > { %4741 = vmatprep.subr.msk.mxu1 %vm1126_vm8, %v4098_v1 }
 0x84e   : > { %4742 = vmatpush3.xpose.msk.msra.mxu1 %vm1126_vm8, %v4098_v1 }
 0x84f   : > { %4743 = vmatprep.subr.msk.mxu1 %vm1126_vm8, %v4097_v20 }
 0x852   : > { %4744 = vmatpush3.xpose.msk.msra.mxu1 %vm1126_vm8, %v4097_v20 }
 0x853   : > { %4745 = vmatprep.subr.msk.mxu1 %vm1126_vm8, %v4096_v33 }
 0x856   : > { %4746 = vmatpush3.xpose.msk.msra.mxu1 %vm1126_vm8, %v4096_v33 }
 0x857   : > { %4747 = vmatprep.subr.msk.mxu1 %vm1126_vm8, %v4095_v56 }
 0x85a   : > { %4748 = vmatpush3.xpose.msk.msra.mxu1 %vm1126_vm8, %v4095_v56 }
 0x85b   : > { %4749 = vmatprep.subr.msk.mxu1 %vm1126_vm8, %v4094_v57 }
 0x85e   : > { %4750 = vmatpush3.xpose.msk.msra.mxu1 %vm1126_vm8, %v4094_v57 }
 0x85f   : > { %4751 = vmatprep.subr.msk.mxu1 %vm1126_vm8, %v4093_v36 }
 0x862   : > { %4752 = vmatpush3.xpose.msk.msra.mxu1 %vm1126_vm8, %v4093_v36 }
 0x863   : > { %4753 = vmatprep.subr.msk.mxu1 %vm1126_vm8, %v4092_v8 }
 0x866   : > { %4754 = vmatpush3.xpose.msk.msra.mxu1 %vm1126_vm8, %v4092_v8 }
 0x867   : > { %4755 = vmatprep.subr.msk.mxu1 %vm1126_vm8, %v4091_v13 }
 0x86a   : > { %4756 = vmatpush3.xpose.msk.msra.mxu1 %vm1126_vm8, %v4091_v13 }
 0x86b   : > { %4830 = vmatprep.subr.mxu1 %v4146_v18 }
 0x8ed   : > { %v6120_v53 = vpop.f32.mrf.mxu1 }
 0x8ee   : > { %v6130_v51 = vsub.f32 %v6022_v24, %v6120_v53 }
 0x8ef   : > { %v6122_v54 = vpop.f32.mrf.mxu1 }
 0x8f0   : > { %v6126_v7 = vsub.f32 %v6018_v55, %v6122_v54 }
 0x8f2   : > { %4757 = vmatprep.mubr.msk.f32.mxu1 %vm1126_vm8, %v6126_v7 }
 0x8f3   : > { %4758 = vmatmul.mubr.msk.f32.vlgmr.msra.gmra.mxu1 %vm1126_vm8, %v6130_v51 }
 0x8f4   : > { %4831 = vmatpush3.msra.mxu1 %v4146_v18 }
 0x8f5   : > { %4832 = vmatprep.subr.mxu1 %v4145_v42 }
 0x8f6   : > { %4833 = vmatpush3.msra.mxu1 %v4145_v42 }
 0x8f7   : > { %4834 = vmatprep.subr.mxu1 %v4144_v43 }
 0x8f8   : > { %4835 = vmatpush3.msra.mxu1 %v4144_v43 }
 0x8f9   : > { %4836 = vmatprep.subr.mxu1 %v4143_v60 }
 0x8fa   : > { %4837 = vmatpush3.msra.mxu1 %v4143_v60 }
 0x8fb   : > { %4838 = vmatprep.subr.mxu1 %v4142_v17 }
 0x8fc   : > { %4839 = vmatpush3.msra.mxu1 %v4142_v17 }
 0x8fd   : > { %4840 = vmatprep.subr.mxu1 %v4141_v28 }
 0x8fe   : > { %4841 = vmatpush3.msra.mxu1 %v4141_v28 }
 0x8ff   : > { %4842 = vmatprep.subr.mxu1 %v4140_v48 }
 0x900   : > { %4843 = vmatpush3.msra.mxu1 %v4140_v48 }
 0x901   : > { %4844 = vmatprep.subr.mxu1 %v4139_v11 }
 0x902   : > { %4845 = vmatpush3.msra.mxu1 %v4139_v11 }
 0x903   : > { %4846 = vmatprep.subr.mxu1 %v4138_v38 }
 0x904   : > { %4847 = vmatpush3.msra.mxu1 %v4138_v38 }
 0x905   : > { %4848 = vmatprep.subr.mxu1 %v4137_v49 }
 0x906   : > { %4849 = vmatpush3.msra.mxu1 %v4137_v49 }
 0x907   : > { %4850 = vmatprep.subr.mxu1 %v4136_v14 }
 0x908   : > { %4851 = vmatpush3.msra.mxu1 %v4136_v14 }
 0x909   : > { %4852 = vmatprep.subr.mxu1 %v4135_v37 }
 0x90a   : > { %4853 = vmatpush3.msra.mxu1 %v4135_v37 }
 0x90b   : > { %4854 = vmatprep.subr.mxu1 %v4134_v32 }
 0x90c   : > { %4855 = vmatpush3.msra.mxu1 %v4134_v32 }
 0x90d   : > { %4856 = vmatprep.subr.mxu1 %v4133_v22 }
 0x90e   : > { %4857 = vmatpush3.msra.mxu1 %v4133_v22 }
 0x90f   : > { %4858 = vmatprep.subr.mxu1 %v4132_v23 }
 0x910   : > { %4859 = vmatpush3.msra.mxu1 %v4132_v23 }
 0x911   : > { %4860 = vmatprep.subr.mxu1 %v4131_v45 }
 0x912   : > { %4861 = vmatpush3.msra.mxu1 %v4131_v45 }
 0x9b3   : > { %v4759_v30 = vpop.f32.mrf.mxu1 }
 0x9b4   : > { %v3110_v40 = vmul.f32 2.0, %v4759_v30 }
 0x9b5   : > { %v3098_v25 = vpop.f32.mrf.mxu1 }
 0x9b6   : > { %v3109_v34 = vmul.f32 2.0, %v3098_v25  ;;  %v3118_v55 = vsub.f32 %v4126_v61, %v3110_v40 }
 0x9b8   : > { %v3120_v41 = vsel %vm2826_vm4, %v3118_v55, 1e+30  ;;  %v3117_v24 = vsub.f32 %v4126_v61, %v3109_v34 }
 0x9b9   : > { %3123 = vmin.xlane.f32.xlu1 %v3120_v41 }
 0x9ba   : > { %v3119_v35 = vsel %vm2826_vm4, %v3117_v24, 1e+30 }
 0x9bb   : > { %3121 = vmin.xlane.f32.xlu0 %v3119_v35 }
 0xa42   : > { %v3124_v10 = vpop.xlane.xlu1 %3123 }
 0xa43   : > { %vm3126_vm15 = vcmp.le.f32.partialorder %v3120_v41, %v3124_v10 }
 0xa44   : > { %v3128_v58 = vsel %vm3126_vm15, %v5690_v46, 128  ;;  %v3122_v31 = vpop.xlane.xlu0 %3121 }
 0xa45   : > { %vm3125_vm9 = vcmp.le.f32.partialorder %v3119_v35, %v3122_v31  ;;  %v3144_v4 = vshra.s32 %v3128_v58, 16  ;;  %v3143_v19 = vand.u32 65535, %v3128_v58 }
 0xa46   : > { %v3127_v26 = vsel %vm3125_vm9, %v5690_v46, 128 }
 0xa47   : > { %v3146_v39 = vcvt.s32.f32 %v3144_v4  ;;  %v3130_v3 = vshra.s32 %v3127_v26, 16  ;;  %v3129_v59 = vand.u32 65535, %v3127_v26  ;;  %v3145_v0 = vcvt.s32.f32 %v3143_v19 }
 0xa49   : > { %3147 = vmin.xlane.f32.xlu1 %v3146_v39  ;;  %v3132_v9 = vcvt.s32.f32 %v3130_v3  ;;  %v3131_v44 = vcvt.s32.f32 %v3129_v59 }
 0xa4b   : > { %3133 = vmin.xlane.f32.xlu0 %v3132_v9 }
 0xad2   : > { %v3148_v52 = vpop.xlane.xlu1 %3147 }
 0xad3   : > { %vm3149_vm12 = vcmp.eq.f32.partialorder %v3146_v39, %v3148_v52  ;;  %v3154_v1 = vcvt.f32.s32 %v3148_v52 }
 0xad4   : > { %v3134_v47 = vpop.xlane.xlu0 %3133  ;;  %v3150_v6 = vsel %vm3149_vm12, %v3145_v0, inf  ;;  %v4186_v0 = vld [vmem:[%s6377_s9 + $0x1f8] sm:$0xff] }
 0xad5   : > { %3151 = vmin.xlane.f32.xlu1 %v3150_v6  ;;  %vm3135_vm0 = vcmp.eq.f32.partialorder %v3132_v9, %v3134_v47  ;;  %v3140_v20 = vcvt.f32.s32 %v3134_v47  ;;  %v3155_v57 = vshll.u32 %v3154_v1, 16  ;;  %4865 = vmatprep.subr.msk.mxu1 %vm1126_vm8, %v4186_v0  ;;  %v4185_v47 = vld [vmem:[%s6377_s9 + $0x1f0] sm:$0xff]  ;;  %v4184_v6 = vld [vmem:[%s6377_s9 + $0x1e8] sm:$0xff] }
 0xad6   : > { %v3136_v27 = vsel %vm3135_vm0, %v3131_v44, inf  ;;  %v4183_v44 = vld [vmem:[%s6377_s9 + $0x1e0] sm:$0xff] }
 0xad7   : > { %3137 = vmin.xlane.f32.xlu0 %v3136_v27  ;;  %v3141_v8 = vshll.u32 %v3140_v20, 16  ;;  %v4182_v27 = vld [vmem:[%s6377_s9 + $0x1d8] sm:$0xff] }
 0xb5e   : > { %v3152_v33 = vpop.xlane.xlu1 %3151 }
 0xb5f   : > { %v3153_v56 = vcvt.f32.s32 %v3152_v33 }
 0xb60   : > { %v3138_v36 = vpop.xlane.xlu0 %3137 }
 0xb61   : > { %v3139_v16 = vcvt.f32.s32 %v3138_v36  ;;  %v3156_v15 = vadd.s32 %v3155_v57, %v3153_v56  ;;  %v4171_v36 = vld [vmem:[%s6377_s9 + $0x180] sm:$0xff] }
 0xb63   : > { %v3142_v50 = vadd.s32 %v3141_v8, %v3139_v16  ;;  %vm3158_vm3 = vcmp.eq.s32.totalorder %v5690_v46, %v3156_v15 }
 0xb65   : > { %vm3157_vm2 = vcmp.eq.s32.totalorder %v5690_v46, %v3142_v50 }
 0xb66   : > { %4792 = vmatprep.mubr.msk.f32.mxu0 %vm3157_vm2, %v5046_v2 }
 0xb67   : > { %4793 = vmatmul.mubr.msk.f32.vlgmr.msra.gmra.mxu0 %vm3158_vm3, %v5046_v2 }
 0xb68   : > { %4796 = vmatpush3.xpose.msk.msra.mxu0 %vm1126_vm8, %v4146_v18  ;;  %v4181_v18 = vld [vmem:[%s6377_s9 + $0x1d0] sm:$0xff] }
 0xb69   : > { %4797 = vmatprep.subr.msk.mxu0 %vm1126_vm8, %v4145_v42 }
 0xb6c   : > { %4798 = vmatpush3.xpose.msk.msra.mxu0 %vm1126_vm8, %v4145_v42  ;;  %v4180_v42 = vld [vmem:[%s6377_s9 + $0x1c8] sm:$0xff] }
 0xb6d   : > { %4799 = vmatprep.subr.msk.mxu0 %vm1126_vm8, %v4144_v43 }
 0xb70   : > { %4800 = vmatpush3.xpose.msk.msra.mxu0 %vm1126_vm8, %v4144_v43  ;;  %v4179_v43 = vld [vmem:[%s6377_s9 + $0x1c0] sm:$0xff] }
 0xb71   : > { %4801 = vmatprep.subr.msk.mxu0 %vm1126_vm8, %v4143_v60 }
 0xb74   : > { %4802 = vmatpush3.xpose.msk.msra.mxu0 %vm1126_vm8, %v4143_v60  ;;  %v4178_v60 = vld [vmem:[%s6377_s9 + $0x1b8] sm:$0xff] }
 0xb75   : > { %4803 = vmatprep.subr.msk.mxu0 %vm1126_vm8, %v4142_v17 }
 0xb78   : > { %4804 = vmatpush3.xpose.msk.msra.mxu0 %vm1126_vm8, %v4142_v17  ;;  %v4177_v17 = vld [vmem:[%s6377_s9 + $0x1b0] sm:$0xff] }
 0xb79   : > { %4805 = vmatprep.subr.msk.mxu0 %vm1126_vm8, %v4141_v28 }
 0xb7c   : > { %4806 = vmatpush3.xpose.msk.msra.mxu0 %vm1126_vm8, %v4141_v28  ;;  %v4176_v28 = vld [vmem:[%s6377_s9 + $0x1a8] sm:$0xff] }
 0xb7d   : > { %4807 = vmatprep.subr.msk.mxu0 %vm1126_vm8, %v4140_v48 }
 0xb80   : > { %4808 = vmatpush3.xpose.msk.msra.mxu0 %vm1126_vm8, %v4140_v48  ;;  %v4175_v48 = vld [vmem:[%s6377_s9 + $0x1a0] sm:$0xff] }
 0xb81   : > { %4809 = vmatprep.subr.msk.mxu0 %vm1126_vm8, %v4139_v11 }
 0xb84   : > { %4810 = vmatpush3.xpose.msk.msra.mxu0 %vm1126_vm8, %v4139_v11  ;;  %v4174_v11 = vld [vmem:[%s6377_s9 + $0x198] sm:$0xff] }
 0xb85   : > { %4811 = vmatprep.subr.msk.mxu0 %vm1126_vm8, %v4138_v38 }
 0xb88   : > { %4812 = vmatpush3.xpose.msk.msra.mxu0 %vm1126_vm8, %v4138_v38  ;;  %v4173_v38 = vld [vmem:[%s6377_s9 + $0x190] sm:$0xff] }
 0xb89   : > { %4813 = vmatprep.subr.msk.mxu0 %vm1126_vm8, %v4137_v49 }
 0xb8c   : > { %4814 = vmatpush3.xpose.msk.msra.mxu0 %vm1126_vm8, %v4137_v49  ;;  %v4172_v49 = vld [vmem:[%s6377_s9 + $0x188] sm:$0xff] }
 0xb8d   : > { %4815 = vmatprep.subr.msk.mxu0 %vm1126_vm8, %v4136_v14 }
 0xb90   : > { %4816 = vmatpush3.xpose.msk.msra.mxu0 %vm1126_vm8, %v4136_v14 }
 0xb91   : > { %4817 = vmatprep.subr.msk.mxu0 %vm1126_vm8, %v4135_v37 }
 0xb94   : > { %4818 = vmatpush3.xpose.msk.msra.mxu0 %vm1126_vm8, %v4135_v37 }
 0xb95   : > { %4819 = vmatprep.subr.msk.mxu0 %vm1126_vm8, %v4134_v32 }
 0xb98   : > { %4820 = vmatpush3.xpose.msk.msra.mxu0 %vm1126_vm8, %v4134_v32 }
 0xb99   : > { %4821 = vmatprep.subr.msk.mxu0 %vm1126_vm8, %v4133_v22 }
 0xb9c   : > { %4822 = vmatpush3.xpose.msk.msra.mxu0 %vm1126_vm8, %v4133_v22 }
 0xb9d   : > { %4823 = vmatprep.subr.msk.mxu0 %vm1126_vm8, %v4132_v23 }
 0xba0   : > { %4824 = vmatpush3.xpose.msk.msra.mxu0 %vm1126_vm8, %v4132_v23 }
 0xba1   : > { %4825 = vmatprep.subr.msk.mxu0 %vm1126_vm8, %v4131_v45 }
 0xba4   : > { %4826 = vmatpush3.xpose.msk.msra.mxu0 %vm1126_vm8, %v4131_v45 }
 0xba5   : > { %4900 = vmatprep.subr.mxu0 %v4186_v0 }
 0xc27   : > { %v6229_v62 = vpop.f32.mrf.mxu0 }
 0xc28   : > { %v6239_v5 = vsub.f32 %v6130_v51, %v6229_v62  ;;  %v3239_v8 = vadd.f32 %v6229_v62, %v6120_v53 }
 0xc29   : > { %v6231_v63 = vpop.f32.mrf.mxu0 }
 0xc2a   : > { %v6235_v21 = vsub.f32 %v6126_v7, %v6231_v63 }
 0xc2c   : > { %4827 = vmatprep.mubr.msk.f32.mxu0 %vm1126_vm8, %v6235_v21 }
 0xc2d   : > { %4828 = vmatmul.mubr.msk.f32.vlgmr.msra.gmra.mxu0 %vm1126_vm8, %v6239_v5 }
 0xc2e   : > { %4901 = vmatpush3.msra.mxu0 %v4186_v0 }
 0xc2f   : > { %4902 = vmatprep.subr.mxu0 %v4185_v47 }
 0xc30   : > { %4903 = vmatpush3.msra.mxu0 %v4185_v47 }
 0xc31   : > { %4904 = vmatprep.subr.mxu0 %v4184_v6 }
 0xc32   : > { %4905 = vmatpush3.msra.mxu0 %v4184_v6 }
 0xc33   : > { %4906 = vmatprep.subr.mxu0 %v4183_v44 }
 0xc34   : > { %4907 = vmatpush3.msra.mxu0 %v4183_v44 }
 0xc35   : > { %4908 = vmatprep.subr.mxu0 %v4182_v27 }
 0xc36   : > { %4909 = vmatpush3.msra.mxu0 %v4182_v27 }
 0xc37   : > { %4910 = vmatprep.subr.mxu0 %v4181_v18 }
 0xc38   : > { %4911 = vmatpush3.msra.mxu0 %v4181_v18 }
 0xc39   : > { %4912 = vmatprep.subr.mxu0 %v4180_v42 }
 0xc3a   : > { %4913 = vmatpush3.msra.mxu0 %v4180_v42 }
 0xc3b   : > { %4914 = vmatprep.subr.mxu0 %v4179_v43 }
 0xc3c   : > { %4915 = vmatpush3.msra.mxu0 %v4179_v43 }
 0xc3d   : > { %4916 = vmatprep.subr.mxu0 %v4178_v60 }
 0xc3e   : > { %4917 = vmatpush3.msra.mxu0 %v4178_v60 }
 0xc3f   : > { %4918 = vmatprep.subr.mxu0 %v4177_v17 }
 0xc40   : > { %4919 = vmatpush3.msra.mxu0 %v4177_v17 }
 0xc41   : > { %4920 = vmatprep.subr.mxu0 %v4176_v28 }
 0xc42   : > { %4921 = vmatpush3.msra.mxu0 %v4176_v28 }
 0xc43   : > { %4922 = vmatprep.subr.mxu0 %v4175_v48 }
 0xc44   : > { %4923 = vmatpush3.msra.mxu0 %v4175_v48 }
 0xc45   : > { %4924 = vmatprep.subr.mxu0 %v4174_v11 }
 0xc46   : > { %4925 = vmatpush3.msra.mxu0 %v4174_v11 }
 0xc47   : > { %4926 = vmatprep.subr.mxu0 %v4173_v38 }
 0xc48   : > { %4927 = vmatpush3.msra.mxu0 %v4173_v38 }
 0xc49   : > { %4928 = vmatprep.subr.mxu0 %v4172_v49 }
 0xc4a   : > { %4929 = vmatpush3.msra.mxu0 %v4172_v49 }
 0xc4b   : > { %4930 = vmatprep.subr.mxu0 %v4171_v36 }
 0xc4c   : > { %4931 = vmatpush3.msra.mxu0 %v4171_v36 }
 0xced   : > { %v4829_v29 = vpop.f32.mrf.mxu0 }
 0xcee   : > { %v3391_v13 = vmul.f32 2.0, %v4829_v29 }
 0xcef   : > { %v3379_v30 = vpop.f32.mrf.mxu0 }
 0xcf0   : > { %v3390_v61 = vmul.f32 2.0, %v3379_v30  ;;  %v3399_v7 = vsub.f32 %v4166_v12, %v3391_v13  ;;  %v4206_v13 = vld [vmem:[%s6378_s10 + $0x3] ss:$0 sm:$0xff] }
 0xcf2   : > { %v3401_v40 = vsel %vm2826_vm4, %v3399_v7, 1e+30  ;;  %v3398_v51 = vsub.f32 %v4166_v12, %v3390_v61 }
 0xcf3   : > { %3404 = vmin.xlane.f32.xlu1 %v3401_v40 }
 0xcf4   : > { %v3400_v25 = vsel %vm2826_vm4, %v3398_v51, 1e+30 }
 0xcf5   : > { %3402 = vmin.xlane.f32.xlu0 %v3400_v25 }
 0xd7c   : > { %v3405_v34 = vpop.xlane.xlu1 %3404 }
 0xd7d   : > { %vm3407_vm10 = vcmp.le.f32.partialorder %v3401_v40, %v3405_v34 }
 0xd7e   : > { %v3409_v55 = vsel %vm3407_vm10, %v5690_v46, 128  ;;  %v3403_v41 = vpop.xlane.xlu0 %3402 }
 0xd7f   : > { %vm3406_vm11 = vcmp.le.f32.partialorder %v3400_v25, %v3403_v41  ;;  %v3425_v24 = vshra.s32 %v3409_v55, 16  ;;  %v3424_v4 = vand.u32 65535, %v3409_v55 }
 0xd80   : > { %v3408_v35 = vsel %vm3406_vm11, %v5690_v46, 128 }
 0xd81   : > { %v3427_v10 = vcvt.s32.f32 %v3425_v24  ;;  %v3411_v58 = vshra.s32 %v3408_v35, 16  ;;  %v3410_v26 = vand.u32 65535, %v3408_v35  ;;  %v3426_v3 = vcvt.s32.f32 %v3424_v4 }
 0xd83   : > { %3428 = vmin.xlane.f32.xlu1 %v3427_v10  ;;  %v3413_v31 = vcvt.s32.f32 %v3411_v58  ;;  %v3412_v59 = vcvt.s32.f32 %v3410_v26 }
 0xd85   : > { %3414 = vmin.xlane.f32.xlu0 %v3413_v31 }
 0xe0c   : > { %v3429_v39 = vpop.xlane.xlu1 %3428 }
 0xe0d   : > { %vm3430_vm7 = vcmp.eq.f32.partialorder %v3427_v10, %v3429_v39  ;;  %v3435_v14 = vcvt.f32.s32 %v3429_v39 }
 0xe0e   : > { %v3415_v9 = vpop.xlane.xlu0 %3414  ;;  %v3431_v19 = vsel %vm3430_vm7, %v3426_v3, inf }
 0xe0f   : > { %3432 = vmin.xlane.f32.xlu1 %v3431_v19  ;;  %vm3416_vm13 = vcmp.eq.f32.partialorder %v3413_v31, %v3415_v9  ;;  %v3421_v37 = vcvt.f32.s32 %v3415_v9  ;;  %v3436_v23 = vshll.u32 %v3435_v14, 16 }
 0xe10   : > { %v3417_v52 = vsel %vm3416_vm13, %v3412_v59, inf }
 0xe11   : > { %3418 = vmin.xlane.f32.xlu0 %v3417_v52  ;;  %v3422_v20 = vshll.u32 %v3421_v37, 16 }
 0xe98   : > { %v3433_v32 = vpop.xlane.xlu1 %3432 }
 0xe99   : > { %v3434_v22 = vcvt.f32.s32 %v3433_v32 }
 0xe9a   : > { %v3419_v1 = vpop.xlane.xlu0 %3418 }
 0xe9b   : > { %v3420_v33 = vcvt.f32.s32 %v3419_v1  ;;  %v3437_v56 = vadd.s32 %v3436_v23, %v3434_v22 }
 0xe9d   : > { %v3423_v57 = vadd.s32 %v3422_v20, %v3420_v33  ;;  %vm3439_vm1 = vcmp.eq.s32.totalorder %v5690_v46, %v3437_v56 }
 0xe9f   : > { %vm3438_vm14 = vcmp.eq.s32.totalorder %v5690_v46, %v3423_v57 }
 0xea0   : > { %4862 = vmatprep.mubr.msk.f32.mxu1 %vm3438_vm14, %v5046_v2 }
 0xea1   : > { %4863 = vmatmul.mubr.msk.f32.vlgmr.msra.gmra.mxu1 %vm3439_vm1, %v5046_v2 }
 0xea2   : > { %4866 = vmatpush3.xpose.msk.msra.mxu1 %vm1126_vm8, %v4186_v0 }
 0xea3   : > { %4867 = vmatprep.subr.msk.mxu1 %vm1126_vm8, %v4185_v47 }
 0xea6   : > { %4868 = vmatpush3.xpose.msk.msra.mxu1 %vm1126_vm8, %v4185_v47 }
 0xea7   : > { %4869 = vmatprep.subr.msk.mxu1 %vm1126_vm8, %v4184_v6 }
 0xeaa   : > { %4870 = vmatpush3.xpose.msk.msra.mxu1 %vm1126_vm8, %v4184_v6 }
 0xeab   : > { %4871 = vmatprep.subr.msk.mxu1 %vm1126_vm8, %v4183_v44 }
 0xeae   : > { %4872 = vmatpush3.xpose.msk.msra.mxu1 %vm1126_vm8, %v4183_v44 }
 0xeaf   : > { %4873 = vmatprep.subr.msk.mxu1 %vm1126_vm8, %v4182_v27 }
 0xeb2   : > { %4874 = vmatpush3.xpose.msk.msra.mxu1 %vm1126_vm8, %v4182_v27 }
 0xeb3   : > { %4875 = vmatprep.subr.msk.mxu1 %vm1126_vm8, %v4181_v18 }
 0xeb6   : > { %4876 = vmatpush3.xpose.msk.msra.mxu1 %vm1126_vm8, %v4181_v18 }
 0xeb7   : > { %4877 = vmatprep.subr.msk.mxu1 %vm1126_vm8, %v4180_v42 }
 0xeba   : > { %4878 = vmatpush3.xpose.msk.msra.mxu1 %vm1126_vm8, %v4180_v42 }
 0xebb   : > { %4879 = vmatprep.subr.msk.mxu1 %vm1126_vm8, %v4179_v43 }
 0xebe   : > { %4880 = vmatpush3.xpose.msk.msra.mxu1 %vm1126_vm8, %v4179_v43  ;;  %v3238_v43 = vadd.f32 %v6231_v63, %v6122_v54 }
 0xebf   : > { %4881 = vmatprep.subr.msk.mxu1 %vm1126_vm8, %v4178_v60 }
 0xec2   : > { %4882 = vmatpush3.xpose.msk.msra.mxu1 %vm1126_vm8, %v4178_v60 }
 0xec3   : > { %4883 = vmatprep.subr.msk.mxu1 %vm1126_vm8, %v4177_v17 }
 0xec6   : > { %4884 = vmatpush3.xpose.msk.msra.mxu1 %vm1126_vm8, %v4177_v17 }
 0xec7   : > { %4885 = vmatprep.subr.msk.mxu1 %vm1126_vm8, %v4176_v28 }
 0xeca   : > { %4886 = vmatpush3.xpose.msk.msra.mxu1 %vm1126_vm8, %v4176_v28 }
 0xecb   : > { %4887 = vmatprep.subr.msk.mxu1 %vm1126_vm8, %v4175_v48 }
 0xece   : > { %4888 = vmatpush3.xpose.msk.msra.mxu1 %vm1126_vm8, %v4175_v48 }
 0xecf   : > { %4889 = vmatprep.subr.msk.mxu1 %vm1126_vm8, %v4174_v11 }
 0xed2   : > { %4890 = vmatpush3.xpose.msk.msra.mxu1 %vm1126_vm8, %v4174_v11 }
 0xed3   : > { %4891 = vmatprep.subr.msk.mxu1 %vm1126_vm8, %v4173_v38 }
 0xed6   : > { %4892 = vmatpush3.xpose.msk.msra.mxu1 %vm1126_vm8, %v4173_v38 }
 0xed7   : > { %4893 = vmatprep.subr.msk.mxu1 %vm1126_vm8, %v4172_v49 }
 0xeda   : > { %4894 = vmatpush3.xpose.msk.msra.mxu1 %vm1126_vm8, %v4172_v49 }
 0xedb   : > { %4895 = vmatprep.subr.msk.mxu1 %vm1126_vm8, %v4171_v36 }
 0xede   : > { %4896 = vmatpush3.xpose.msk.msra.mxu1 %vm1126_vm8, %v4171_v36 }
 0xf61   : > { %v4864_v16 = vpop.f32.mrf.mxu1 }
 0xf62   : > { %v3520_v15 = vadd.f32 %v4864_v16, %v3239_v8  ;;  %v3522_v29 = vsub.f32 %v6239_v5, %v4864_v16 }
 0xf63   : > { %v3510_v50 = vpop.f32.mrf.mxu1 }
 0xf64   : > { %v3521_v45 = vsub.f32 %v6235_v21, %v3510_v50  ;;  %v3519_v17 = vadd.f32 %v3510_v50, %v3238_v43 }
 0xf66   : > { %4897 = vmatprep.mubr.msk.f32.mxu1 %vm1126_vm8, %v3521_v45 }
 0xf67   : > { %4898 = vmatmul.mubr.msk.f32.vlgmr.msra.gmra.mxu1 %vm1126_vm8, %v3522_v29 }
0x1027   : > { %v4899_v12 = vpop.f32.mrf.mxu1 }
0x1028   : > { %v3672_v30 = vmul.f32 2.0, %v4899_v12 }
0x1029   : > { %v3660_v61 = vpop.f32.mrf.mxu1 }
0x102a   : > { %v3671_v7 = vmul.f32 2.0, %v3660_v61  ;;  %v3680_v53 = vsub.f32 %v4206_v13, %v3672_v30 }
0x102c   : > { %v3679_v62 = vsub.f32 %v4206_v13, %v3671_v7  ;;  %v3682_v40 = vsel %vm2826_vm4, %v3680_v53, 1e+30 }
0x102d   : > { %3685 = vmin.xlane.f32.xlu1 %v3682_v40 }
0x102e   : > { %v3681_v21 = vsel %vm2826_vm4, %v3679_v62, 1e+30 }
0x102f   : > { %3683 = vmin.xlane.f32.xlu0 %v3681_v21 }
0x10b6   : > { %v3686_v5 = vpop.xlane.xlu1 %3685 }
0x10b7   : > { %vm3688_vm5 = vcmp.le.f32.partialorder %v3682_v40, %v3686_v5 }
0x10b8   : > { %v3690_v51 = vsel %vm3688_vm5, %v5690_v46, 128  ;;  %v3684_v25 = vpop.xlane.xlu0 %3683 }
0x10b9   : > { %vm3687_vm6 = vcmp.le.f32.partialorder %v3681_v21, %v3684_v25  ;;  %v3706_v34 = vshra.s32 %v3690_v51, 16  ;;  %v3705_v10 = vand.u32 65535, %v3690_v51 }
0x10ba   : > { %v3689_v55 = vsel %vm3687_vm6, %v5690_v46, 128 }
0x10bb   : > { %v3708_v41 = vcvt.s32.f32 %v3706_v34  ;;  %v3692_v24 = vshra.s32 %v3689_v55, 16  ;;  %v3691_v58 = vand.u32 65535, %v3689_v55  ;;  %v3707_v4 = vcvt.s32.f32 %v3705_v10 }
0x10bd   : > { %3709 = vmin.xlane.f32.xlu1 %v3708_v41  ;;  %v3694_v35 = vcvt.s32.f32 %v3692_v24  ;;  %v3693_v3 = vcvt.s32.f32 %v3691_v58 }
0x10bf   : > { %3695 = vmin.xlane.f32.xlu0 %v3694_v35 }
0x1146   : > { %v3710_v31 = vpop.xlane.xlu1 %3709 }
0x1147   : > { %vm3711_vm4 = vcmp.eq.f32.partialorder %v3708_v41, %v3710_v31  ;;  %v3716_v19 = vcvt.f32.s32 %v3710_v31 }
0x1148   : > { %v3696_v26 = vpop.xlane.xlu0 %3695  ;;  %v3712_v39 = vsel %vm3711_vm4, %v3707_v4, inf }
0x1149   : > { %3713 = vmin.xlane.f32.xlu1 %v3712_v39  ;;  %vm3697_vm15 = vcmp.eq.f32.partialorder %v3694_v35, %v3696_v26  ;;  %v3702_v59 = vcvt.f32.s32 %v3696_v26  ;;  %v3717_v47 = vshll.u32 %v3716_v19, 16 }
0x114a   : > { %v3698_v9 = vsel %vm3697_vm15, %v3693_v3, inf }
0x114b   : > { %3699 = vmin.xlane.f32.xlu0 %v3698_v9  ;;  %v3703_v44 = vshll.u32 %v3702_v59, 16 }
0x11d2   : > { %v3714_v52 = vpop.xlane.xlu1 %3713 }
0x11d3   : > { %v3715_v0 = vcvt.f32.s32 %v3714_v52 }
0x11d4   : > { %v3700_v6 = vpop.xlane.xlu0 %3699 }
0x11d5   : > { %v3701_v27 = vcvt.f32.s32 %v3700_v6  ;;  %v3718_v18 = vadd.s32 %v3717_v47, %v3715_v0 }
0x11d7   : > { %v3704_v42 = vadd.s32 %v3703_v44, %v3701_v27  ;;  %vm3720_vm12 = vcmp.eq.s32.totalorder %v5690_v46, %v3718_v18 }
0x11d9   : > { %vm3719_vm9 = vcmp.eq.s32.totalorder %v5690_v46, %v3704_v42 }
0x11da   : > { %4932 = vmatprep.mubr.msk.f32.mxu0 %vm3719_vm9, %v5046_v2 }
0x11db   : > { %4933 = vmatmul.mubr.msk.f32.vlgmr.msra.gmra.mxu0 %vm3720_vm12, %v5046_v2 }
0x129b   : > { %v4934_v60 = vpop.f32.mrf.mxu0 }
0x129c   : > { %v3801_v28 = vadd.f32 %v4934_v60, %v3520_v15 }
0x129d   : > { %v3791_v48 = vpop.f32.mrf.mxu0 }
0x129e   : > { %3803 = vst.msk [vmem:[%s386_s26 + $0x8] sm:$0xff] %vm1126_vm8, %v3801_v28  ;;  %v3800_v11 = vadd.f32 %v3791_v48, %v3519_v17 }
0x12a0   : > { %3802 = vst.msk [vmem:[%s386_s26] sm:$0xff] %vm1126_vm8, %v3800_v11 }
0x12a1 PF: > { %s21_s17 = sadd.s32 1, %s5041_s17  }
0x12a2   : > { %p18_p4 = scmp.ge.s32.totalorder %s21_s17, 4  }
0x12a4   :  { %20 = sbr.rel (!%p18_p4) target bundleno = 1 (0x1), region = 114 }

// kernel: sound_phi_forward.3
= control target key start
LH: loop header
LB: loop body
LE: loop exit
PB: predicated region body
PF: predicated region fallthrough
CT: control target
= control target key end

     0   :  { %s4267_s11 = smov 0   ;;  %s5353_s0 = inlined_call_operand.vmem [shape: f32[2,16,32], index: 0, kind: input, shape index: {}]   ;;  %s5354_s1 = inlined_call_operand.vmem [shape: bf16[7,32,160], index: 1, kind: input, shape index: {}]   ;;  %s5355_s2 = inlined_call_operand.vmem [shape: f32[1,160], index: 2, kind: input, shape index: {}]   ;;  %s5356_s3 = inlined_call_operand.vmem [shape: bf16[4,160,80], index: 3, kind: input, shape index: {}]   ;;  %s5357_s4 = inlined_call_operand.vmem [shape: f32[1,80], index: 4, kind: input, shape index: {}]   ;;  %s5358_s5 = inlined_call_operand.vmem [shape: bf16[4,80,40], index: 5, kind: input, shape index: {}]   ;;  %s5359_s6 = inlined_call_operand.vmem [shape: f32[1,40], index: 6, kind: input, shape index: {}]   ;;  %s5360_s7 = inlined_call_operand.vmem [shape: bf16[7,1,40], index: 7, kind: input, shape index: {}]   ;;  %s5361_s8 = inlined_call_operand.<no memory space> [shape: f32[1,1], index: 8, kind: input, shape index: {}]   ;;  %s5362_s9 = inlined_call_operand.vmem [shape: f32[2,64,1], index: 9, kind: output, shape index: {}]  }
   0x1   :  { %v14_v0 = vstv %s5361_s8 }
   0x2   :  { %15 = vst [vmem:[#allocation6] sm:$0x1] %v14_v0 }
   0x3 LB: > { %s3506_s12 = sadd.s32 4294967295, %s4210_s11   ;;  %p3510_p0 = scmp.ge.s32.totalorder %s4210_s11, 1  ;;  %s4210_s11 = sphi %s4267_s11, %s21_s11  }
   0x4   : > { %p289_p1 = scmp.lt.s32.totalorder %s4210_s11, 3 }
   0x6   : > { %p290_p2 = pnand %p3510_p0, %p289_p1 }
   0x7   : > { %p325_p3 = scmp.lt.s32.totalorder (!%p290_p2), %s3506_s12, 1 }
   0x8   : > { %293 = sbr.rel (%p290_p2) target bundleno = 1549 (0x60d), region = 56 }
   0xd   : > { %v4063_v1 = vld [vmem:[%s5354_s1 + $0x34] ss:$8 sps:$4 sm:$0xff]   ;;  %v4212_v3 = vmov 0   ;;  %vm336_vm0 = vcmask 257024   ;;  %vm339_vm1 = vcmask 256000   ;;  %s5437_s12 = smov (!%p325_p3, %s3506_s12), 1 }
   0xe   : > { %v4065_v2 = vld [vmem:[%s5354_s1 + $0x14] ss:$8 sps:$4 sm:$0xff]   ;;  %475 = vmatprep.mubr.bf16.mxu0 %v4212_v3  ;;  %540 = vmatprep.mubr.bf16.mxu1 %v4212_v3  ;;  %v4067_v4 = vld [vmem:[%s5354_s1 + $0x30] ss:$8 sps:$4 sm:$0xff]   ;;  %337 = vst.msk [vmem:[#allocation2] sm:$0xf] %vm336_vm0, %v4212_v3 }
   0xf   : > { %455 = vmatprep.subr.bf16.mxu0 %v4063_v1  ;;  %v4068_v5 = vld [vmem:[%s5354_s1 + $0x10] ss:$8 sps:$4 sm:$0xff]   ;;  %338 = vst.msk [vmem:[#allocation2 + $0x4] sm:$0xf] %vm336_vm0, %v4212_v3  ;;  %520 = vmatprep.subr.bf16.mxu1 %v4065_v2  ;;  %v4069_v6 = vld [vmem:[%s5354_s1 + $0x24] ss:$8 sps:$4 sm:$0xff]  }
  0x10   : > { %340 = vst.msk [vmem:[#allocation2 + $0x8] sm:$0x7] %vm339_vm1, %v4212_v3  ;;  %456 = vmatpush1.bf16.msra.mxu0 %v4067_v4  ;;  %521 = vmatpush1.bf16.msra.mxu1 %v4068_v5  ;;  %v4071_v7 = vld [vmem:[%s5354_s1 + $0x4] ss:$8 sps:$4 sm:$0xff]   ;;  %v4073_v8 = vld [vmem:[%s5354_s1 + $0x20] ss:$8 sps:$4 sm:$0xff]  }
  0x11   : > { %s3828_s26 = sshll.u32 %s5437_s12, 4  ;;  %457 = vmatprep.subr.bf16.mxu0 %v4069_v6  ;;  %v4074_v9 = vld [vmem:[%s5354_s1] ss:$8 sps:$4 sm:$0xff]   ;;  %522 = vmatprep.subr.bf16.mxu1 %v4071_v7  ;;  %vm5365_vm2 = vsmask.f32 1280  ;;  %vm374_vm3 = vcmask 257025  }
  0x12   : > { %s329_s10 = scalar_lea.vmem %s5353_s0, %s3828_s26  ;;  %vm5366_vm4 = vsmask.f32 7942  ;;  %v4079_v14 = vld [vmem:[%s5354_s1 + $0x54] ss:$8 sps:$4 sm:$0xff]   ;;  %vm350_vm5 = vsmask.f32 5392 }
  0x13   : > { %v341_v10 = vld [vmem:[%s329_s10] sm:$0xff]  ;;  %v342_v11 = vld [vmem:[%s329_s10 + $0x8] sm:$0xff]  ;;  %vm381_vm6 = vcmask 254976   ;;  %vm376_vm7 = vmand %vm374_vm3, %vm5366_vm4  ;;  %vm5368_vm10 = vsmask.f32 7424  ;;  %vm5369_vm11 = vcmask 261120  }
  0x14   : > { %v3830_v12 = vpack.c.bf16 %v341_v10, %v341_v10  ;;  %v3831_v13 = vpack.c.bf16 %v342_v11, %v342_v11  ;;  %458 = vmatpush1.bf16.msra.mxu0 %v4073_v8  ;;  %523 = vmatpush1.bf16.msra.mxu1 %v4074_v9  ;;  %v4082_v24 = vld [vmem:[%s5354_s1 + $0x74] ss:$8 sps:$4 sm:$0xff]   ;;  %vm4320_vm8 = vmor %vm5365_vm2, %vm350_vm5  ;;  %v4080_v34 = vld [vmem:[%s5354_s1 + $0x70] ss:$8 sps:$4 sm:$0xff]   ;;  %vm635_vm12 = vsmask.f32 6400 }
  0x15   : > { %595 = vmatprep.subr.bf16.mxu0 %v4079_v14  ;;  %v377_v23 = vld [vmem:[#allocation2] sm:$0xe]  ;;  %vm382_vm9 = vmand %vm381_vm6, %vm5365_vm2  ;;  %680 = vmatprep.subr.bf16.mxu1 %v4082_v24  ;;  %v4088_v35 = vld [vmem:[%s5354_s1 + $0x64] ss:$8 sps:$4 sm:$0xff]   ;;  %vm5367_vm13 = vcmask 1046528   ;;  %vm5364_vm15 = vcmask 1045504  }
  0x16   : > { %v353_v15 = vshrl.u32 %v3830_v12, 16  ;;  %v356_v16 = vshll.u32 %v3830_v12, 16  ;;  %v362_v17 = vshrl.u32 %v3831_v13, 16  ;;  %v365_v18 = vshll.u32 %v3831_v13, 16  ;;  %v4086_v38 = vld [vmem:[%s5354_s1 + $0x60] ss:$8 sps:$4 sm:$0xff]  }
  0x17   : > { %v383_v28 = vld [vmem:[#allocation2 + $0x8] sm:$0x3]  ;;  %v4094_v41 = vld [vmem:[%s5354_s1 + $0xb4] ss:$8 sps:$4 sm:$0xff]   ;;  %v4077_v46 = vld [vmem:[%s5354_s1 + $0x50] ss:$8 sps:$4 sm:$0xff]  }
  0x18   : > { %v355_v19 = vrot.slane %v353_v15, 6  ;;  %v358_v20 = vrot.slane %v356_v16, 7  ;;  %v364_v21 = vrot.slane %v362_v17, 6  ;;  %v367_v22 = vrot.slane %v365_v18, 7  ;;  %v4085_v51 = vld [vmem:[%s5354_s1 + $0x44] ss:$8 sps:$4 sm:$0xff]  }
  0x19   : > { %vm799_vm14 = vsmask.f32 5376  ;;  %v4092_v57 = vld [vmem:[%s5354_s1 + $0xb0] ss:$8 sps:$4 sm:$0xff]   ;;  %v4100_v61 = vld [vmem:[%s5354_s1 + $0xa4] ss:$8 sps:$4 sm:$0xff]  }
  0x1a   : > { %v359_v26 = vor.u32 %v358_v20, %v355_v19  ;;  %v368_v27 = vor.u32 %v367_v22, %v364_v21  ;;  %v4083_v2 = vld [vmem:[%s5354_s1 + $0x40] ss:$8 sps:$4 sm:$0xff]   ;;  %v4091_v7 = vld [vmem:[%s5354_s1 + $0x94] ss:$8 sps:$4 sm:$0xff]   ;;  %v4089_v9 = vld [vmem:[%s5354_s1 + $0x90] ss:$8 sps:$4 sm:$0xff]  }
  0x1b   : > { %v4098_v8 = vld [vmem:[%s5354_s1 + $0xa0] ss:$8 sps:$4 sm:$0xff]   ;;  %v4097_v12 = vld [vmem:[%s5354_s1 + $0x84] ss:$8 sps:$4 sm:$0xff]   ;;  %v4103_v16 = vld [vmem:[%s5354_s1 + $0xd4] ss:$8 sps:$4 sm:$0xff]  }
  0x1c   : > { %v360_v29 = vrot.slane %v359_v26, 4  ;;  %v370_v30 = vrot.slane %v368_v27, 4  ;;  %v378_v31 = vsel %vm376_vm7, %v359_v26, %v377_v23  ;;  %v4095_v14 = vld [vmem:[%s5354_s1 + $0x80] ss:$8 sps:$4 sm:$0xff]   ;;  %v4101_v17 = vld [vmem:[%s5354_s1 + $0xd0] ss:$8 sps:$4 sm:$0xff]  }
  0x1d   : > { %379 = vst [vmem:[#allocation2] sm:$0xe] %v378_v31  ;;  %v4106_v18 = vld [vmem:[%s5354_s1 + $0xc4] ss:$8 sps:$4 sm:$0xff]   ;;  %v4104_v20 = vld [vmem:[%s5354_s1 + $0xc0] ss:$8 sps:$4 sm:$0xff]  }
  0x1e   : > { %v369_v32 = vsel %vm4320_vm8, %v360_v29, %v368_v27  ;;  %v384_v33 = vsel %vm382_vm9, %v370_v30, %v383_v28  ;;  %v4107_v22 = vld [vmem:[%s5356_s3 + $0x128] sm:$0xff]   ;;  %v4108_v23 = vld [vmem:[%s5356_s3 + $0x120] sm:$0xff]   ;;  %v4110_v26 = vld [vmem:[%s5356_s3 + $0x118] sm:$0xff]   ;;  %vm996_vm1 = vcmask 1043456   ;;  %vm997_vm3 = vcmask 261124   ;;  %s3829_s13 = sshll.u32 %s5437_s12, 6 }
  0x1f   : > { %380 = vst.msk [vmem:[#allocation2 + $0x4] sm:$0xf] %vm336_vm0, %v369_v32  ;;  %385 = vst [vmem:[#allocation2 + $0x8] sm:$0x3] %v384_v33  ;;  %vm5363_vm0 = vcmask 1044480   ;;  %v4109_v24 = vld [vmem:[%s5356_s3 + $0x88] sm:$0xff]   ;;  %s5214_s15 = scalar_lea.vmem %s5362_s9, %s3829_s13 }
  0x20   : > { %v4111_v27 = vld [vmem:[%s5356_s3 + $0x80] sm:$0xff]   ;;  %v4112_v28 = vld [vmem:[%s5356_s3 + $0x110] sm:$0xff]   ;;  %v4113_v29 = vld [vmem:[%s5356_s3 + $0x78] sm:$0xff]   ;;  %vm1001_vm6 = vcmask 1040384   ;;  %vm1002_vm7 = vcmask 258052  }
  0x21   : > { %vm4446_vm5 = vmor %vm997_vm3, %vm996_vm1  ;;  %v4114_v31 = vld [vmem:[%s5356_s3 + $0x108] sm:$0xff]   ;;  %v4115_v32 = vld [vmem:[%s5356_s3 + $0x70] sm:$0xff]   ;;  %vm1042_vm2 = vsmask.f32 7954 }
  0x22   : > { %999 = vst.msk [vmem:[#allocation3] sm:$0xff] %vm4446_vm5, %v4212_v3  ;;  %1000 = vst.msk [vmem:[#allocation3 + $0x8] sm:$0xff] %vm4446_vm5, %v4212_v3  ;;  %v4116_v33 = vld [vmem:[%s5356_s3 + $0x100] sm:$0xff]  }
  0x23   : > { %vm1003_vm9 = vmor %vm1002_vm7, %vm1001_vm6 }
  0x24   : > { %1004 = vst.msk [vmem:[#allocation3 + $0x10] sm:$0x11] %vm1003_vm9, %v4212_v3 }
  0x26   : > { %v4334_v36 = vld [vmem:[#allocation2] sm:$0xff]   ;;  %v4336_v37 = vld [vmem:[#allocation2 + $0x8] ss:$0 sps:$4 sm:$0x77]  }
  0x27   : > { %v408_v39 = vshrl.u32 %v4334_v36, 16  ;;  %v410_v40 = vshll.u32 %v4334_v36, 16  ;;  %3532 = vmatmul.mubr.msk.bf16.vlgmr.msra.gmra.mxu1 %vm5369_vm11, %v4334_v36  ;;  %v415_v42 = vshll.u32 %v4336_v37, 16  ;;  %v557_v43 = vrot.slane %v4334_v36, 1 }
  0x28   : > { %681 = vmatpush1.bf16.msra.mxu1 %v4080_v34  ;;  %700 = vmatprep.mubr.bf16.mxu1 %v4212_v3  ;;  %v639_v44 = vshrl.u32 %v4336_v37, 16  ;;  %v721_v49 = vrot.slane %v4334_v36, 2  ;;  %v558_v52 = vrot.slane %v4336_v37, 1  ;;  %v722_v58 = vrot.slane %v4336_v37, 2  ;;  %v4117_v34 = vld [vmem:[%s5356_s3 + $0x68] sm:$0xff]  }
  0x29   : > { %v412_v45 = vrot.slane %v410_v40, 1  ;;  %682 = vmatprep.subr.bf16.mxu1 %v4088_v35  ;;  %v636_v47 = vrot.slane %v408_v39, 1  ;;  %v637_v48 = vrot.slane %v410_v40, 2  ;;  %v417_v50 = vrot.slane %v415_v42, 1  ;;  %v4118_v35 = vld [vmem:[%s5356_s3 + $0xf8] sm:$0xff]  }
  0x2a   : > { %v641_v53 = vrot.slane %v639_v44, 1  ;;  %v642_v54 = vrot.slane %v415_v42, 2  ;;  %v800_v59 = vrot.slane %v408_v39, 2  ;;  %v801_v62 = vrot.slane %v410_v40, 3  ;;  %v4121_v40 = vld [vmem:[%s5356_s3 + $0x58] sm:$0xff]  }
  0x2b   : > { %v413_v55 = vor.u32 %v412_v45, %v408_v39  ;;  %v638_v56 = vor.u32 %v637_v48, %v636_v47  ;;  %v803_v63 = vrot.slane %v639_v44, 2  ;;  %v804_v0 = vrot.slane %v415_v42, 3  ;;  %v4123_v42 = vld [vmem:[%s5356_s3 + $0x50] sm:$0xff]   ;;  %v4125_v44 = vld [vmem:[%s5356_s3 + $0x98] sm:$0xff]  }
  0x2c   : > { %683 = vmatpush1.bf16.msra.mxu1 %v4086_v38  ;;  %v643_v60 = vor.u32 %v642_v54, %v641_v53  ;;  %v883_v4 = vrot.slane %v4334_v36, 3  ;;  %v884_v5 = vrot.slane %v4336_v37, 3  ;;  %v802_v10 = vor.u32 %v801_v62, %v800_v59  ;;  %v4119_v36 = vld [vmem:[%s5356_s3 + $0x60] sm:$0xff]   ;;  %v4120_v38 = vld [vmem:[%s5356_s3 + $0xf0] sm:$0xff]  }
  0x2d   : > { %v418_v1 = vsel %vm5368_vm10, %v413_v55, %v417_v50  ;;  %842 = vmatprep.subr.bf16.mxu1 %v4094_v41  ;;  %v805_v11 = vor.u32 %v804_v0, %v803_v63  ;;  %v559_v13 = vsel %vm5367_vm13, %v557_v43, %v558_v52  ;;  %v723_v19 = vsel %vm5364_vm15, %v721_v49, %v722_v58  ;;  %v4122_v41 = vld [vmem:[%s5356_s3 + $0x138] sm:$0xff]   ;;  %v4124_v43 = vld [vmem:[%s5356_s3 + $0x130] sm:$0xff]   ;;  %vm1043_vm13 = vmand %vm997_vm3, %vm1042_vm2 }
  0x2e   : > { %3527 = vmatmul.mubr.msk.bf16.vlgmr.msra.gmra.mxu0 %vm5369_vm11, %v418_v1  ;;  %v644_v6 = vsel %vm635_vm12, %v638_v56, %v643_v60  ;;  %v885_v21 = vsel %vm5363_vm0, %v883_v4, %v884_v5  ;;  %vm1015_vm12 = vsmask.f32 256  ;;  %v4127_v45 = vld [vmem:[%s5356_s3 + $0x90] sm:$0xff]   ;;  %v958_v60 = vlaneseq }
  0x2f   : > { %596 = vmatpush1.bf16.msra.mxu0 %v4077_v46  ;;  %615 = vmatprep.mubr.bf16.mxu0 %v4212_v3  ;;  %v806_v15 = vsel %vm799_vm14, %v802_v10, %v805_v11  ;;  %vm1052_vm14 = vsmask.f32 4352  ;;  %vm4485_vm9 = vmand %vm1001_vm6, %vm1015_vm12 }
  0x30   : > { %597 = vmatprep.subr.bf16.mxu0 %v4085_v51  ;;  %3550 = vmatmul.mubr.msk.bf16.vlgmr.msra.gmra.mxu1 %vm5369_vm11, %v644_v6  ;;  %vm4493_vm0 = vmand %vm1002_vm7, %vm1052_vm14  ;;  %v4528_v5 = vshrl.u32 %v958_v60, 7  ;;  %vm1039_vm14 = vsmask.f32 7938 }
  0x31   : > { %843 = vmatpush1.bf16.msra.mxu1 %v4092_v57  ;;  %862 = vmatprep.mubr.bf16.mxu1 %v4212_v3  ;;  %vm1054_vm15 = vmor %vm4493_vm0, %vm4485_vm9  ;;  %vm5387_vm0 = vcmask 1046528  }
  0x32   : > { %844 = vmatprep.subr.bf16.mxu1 %v4100_v61  ;;  %vm4540_vm4 = vmand %vm996_vm1, %vm1039_vm14 }
  0x33   : > { %598 = vmatpush1.bf16.msra.mxu0 %v4083_v2 }
  0x34   : > { %759 = vmatprep.subr.bf16.mxu0 %v4091_v7 }
  0x35   : > { %845 = vmatpush1.bf16.msra.mxu1 %v4098_v8 }
  0x36   : > { %3541 = vmatmul.mubr.msk.bf16.vlgmr.msra.gmra.mxu0 %vm5369_vm11, %v559_v13  ;;  %1175 = vmatprep.subr.bf16.mxu1 %v4212_v3 }
  0x37   : > { %760 = vmatpush1.bf16.msra.mxu0 %v4089_v9  ;;  %779 = vmatprep.mubr.bf16.mxu0 %v4212_v3 }
  0x38   : > { %761 = vmatprep.subr.bf16.mxu0 %v4097_v12  ;;  %3568 = vmatmul.mubr.msk.bf16.vlgmr.msra.gmra.mxu1 %vm5369_vm11, %v806_v15 }
  0x39   : > { %1176 = vmatpush1.bf16.msra.mxu1 %v4107_v22 }
  0x3a   : > { %1177 = vmatprep.subr.bf16.mxu1 %v4212_v3 }
  0x3b   : > { %762 = vmatpush1.bf16.msra.mxu0 %v4095_v14  ;;  %v4531_v14 = vsub.s32 0, %v4528_v5 }
  0x3c   : > { %921 = vmatprep.subr.bf16.mxu0 %v4103_v16 }
  0x3d   : > { %1178 = vmatpush1.bf16.msra.mxu1 %v4108_v23 }
  0x3e   : > { %3559 = vmatmul.mubr.msk.bf16.vlgmr.msra.gmra.mxu0 %vm5369_vm11, %v723_v19  ;;  %1179 = vmatprep.subr.bf16.mxu1 %v4212_v3 }
  0x3f   : > { %922 = vmatpush1.bf16.msra.mxu0 %v4101_v17  ;;  %941 = vmatprep.mubr.bf16.mxu0 %v4212_v3  ;;  %v956_v17 = vld [vmem:[%s5355_s2] sm:$0x3] }
  0x40   : > { %923 = vmatprep.subr.bf16.mxu0 %v4106_v18 }
  0x41   : > { %1180 = vmatpush1.bf16.msra.mxu1 %v4110_v26  ;;  %v961_v26 = vrot.slane %v956_v17, %v4531_v14 }
  0x42   : > { %1181 = vmatprep.subr.bf16.mxu1 %v4212_v3 }
  0x43   : > { %924 = vmatpush1.bf16.msra.mxu0 %v4104_v20 }
  0x44   : > { %1308 = vmatprep.subr.bf16.mxu0 %v4212_v3 }
  0x45   : > { %1182 = vmatpush1.bf16.msra.mxu1 %v4112_v28 }
  0x46   : > { %3577 = vmatmul.mubr.msk.bf16.vlgmr.msra.gmra.mxu0 %vm5369_vm11, %v885_v21  ;;  %1183 = vmatprep.subr.bf16.mxu1 %v4212_v3  ;;  %v964_v21 = vsub.s32 1, %v4528_v5 }
  0x47   : > { %1309 = vmatpush1.bf16.msra.mxu0 %v4109_v24 }
  0x48   : > { %1310 = vmatprep.subr.bf16.mxu0 %v4212_v3 }
  0x49   : > { %1184 = vmatpush1.bf16.msra.mxu1 %v4114_v31 }
  0x4a   : > { %1185 = vmatprep.subr.bf16.mxu1 %v4212_v3 }
  0x4b   : > { %1311 = vmatpush1.bf16.msra.mxu0 %v4111_v27 }
  0x4c   : > { %1312 = vmatprep.subr.bf16.mxu0 %v4212_v3 }
  0x4d   : > { %1186 = vmatpush1.bf16.msra.mxu1 %v4116_v33  ;;  %v965_v33 = vrot.slane %v956_v17, %v964_v21 }
  0x4e   : > { %1187 = vmatprep.subr.bf16.mxu1 %v4212_v3 }
  0x4f   : > { %1313 = vmatpush1.bf16.msra.mxu0 %v4113_v29 }
  0x50   : > { %1314 = vmatprep.subr.bf16.mxu0 %v4212_v3 }
  0x51   : > { %1188 = vmatpush1.bf16.msra.mxu1 %v4118_v35 }
  0x52   : > { %1189 = vmatprep.subr.bf16.mxu1 %v4212_v3 }
  0x53   : > { %1315 = vmatpush1.bf16.msra.mxu0 %v4115_v32 }
  0x54   : > { %1316 = vmatprep.subr.bf16.mxu0 %v4212_v3 }
  0x55   : > { %1190 = vmatpush1.bf16.msra.mxu1 %v4120_v38 }
  0x56   : > { %1203 = vmatprep.subr.bf16.mxu1 %v4212_v3 }
  0x57   : > { %1317 = vmatpush1.bf16.msra.mxu0 %v4117_v34 }
  0x58   : > { %1318 = vmatprep.subr.bf16.mxu0 %v4212_v3 }
  0x59   : > { %1204 = vmatpush2.bf16.msra.mxu1 %v4122_v41 }
  0x5a   : > { %1205 = vmatprep.subr.bf16.mxu1 %v4212_v3 }
  0x5b   : > { %1319 = vmatpush1.bf16.msra.mxu0 %v4119_v36 }
  0x5c   : > { %1320 = vmatprep.subr.bf16.mxu0 %v4212_v3 }
  0x5d   : > { %1206 = vmatpush2.bf16.msra.mxu1 %v4124_v43 }
  0x5e   : > { %1450 = vmatprep.subr.bf16.mxu1 %v4212_v3 }
  0x5f   : > { %1321 = vmatpush1.bf16.msra.mxu0 %v4121_v40 }
  0x60   : > { %1322 = vmatprep.subr.bf16.mxu0 %v4212_v3 }
  0x63   : > { %1323 = vmatpush1.bf16.msra.mxu0 %v4123_v42 }
  0x64   : > { %1336 = vmatprep.subr.bf16.mxu0 %v4212_v3 }
  0x67   : > { %1337 = vmatpush2.bf16.msra.mxu0 %v4125_v44 }
  0x68   : > { %1338 = vmatprep.subr.bf16.mxu0 %v4212_v3 }
  0x6b   : > { %1339 = vmatpush2.bf16.msra.mxu0 %v4127_v45 }
  0x6c   : > { %1561 = vmatprep.subr.bf16.mxu0 %v4212_v3 }
  0xe7   : > { %v542_v46 = vpop.f32.mrf.mxu1 }
  0xe9   : > { %v544_v47 = vpop.f32.mrf.mxu1 }
  0xeb   : > { %v546_v48 = vpop.f32.mrf.mxu1 }
  0xed   : > { %v548_v49 = vpop.f32.mrf.mxu1 }
  0xee   : > { %v477_v50 = vpop.f32.mrf.mxu0 }
  0xef   : > { %v543_v59 = vadd.f32 %v542_v46, %v477_v50 }
  0xf0   : > { %v479_v51 = vpop.f32.mrf.mxu0  ;;  %v702_v52 = vpop.f32.mrf.mxu1 }
  0xf1   : > { %v545_v62 = vadd.f32 %v544_v47, %v479_v51 }
  0xf2   : > { %v481_v53 = vpop.f32.mrf.mxu0  ;;  %v704_v54 = vpop.f32.mrf.mxu1 }
  0xf3   : > { %v547_v2 = vadd.f32 %v546_v48, %v481_v53 }
  0xf4   : > { %v483_v55 = vpop.f32.mrf.mxu0  ;;  %v706_v57 = vpop.f32.mrf.mxu1 }
  0xf5   : > { %v549_v10 = vadd.f32 %v548_v49, %v483_v55 }
  0xf6   : > { %v617_v56 = vpop.f32.mrf.mxu0  ;;  %v708_v0 = vpop.f32.mrf.mxu1 }
  0xf7   : > { %v626_v63 = vadd.f32 %v617_v56, %v543_v59 }
  0xf8   : > { %v619_v58 = vpop.f32.mrf.mxu0  ;;  %v864_v9 = vpop.f32.mrf.mxu1 }
  0xf9   : > { %v627_v4 = vadd.f32 %v619_v58, %v545_v62  ;;  %v711_v7 = vadd.f32 %v702_v52, %v626_v63 }
  0xfa   : > { %v621_v61 = vpop.f32.mrf.mxu0  ;;  %v866_v20 = vpop.f32.mrf.mxu1 }
  0xfb   : > { %v628_v8 = vadd.f32 %v621_v61, %v547_v2  ;;  %v712_v12 = vadd.f32 %v704_v54, %v627_v4 }
  0xfc   : > { %v623_v1 = vpop.f32.mrf.mxu0  ;;  %v868_v31 = vpop.f32.mrf.mxu1 }
  0xfd   : > { %v629_v15 = vadd.f32 %v623_v1, %v549_v10  ;;  %v713_v18 = vadd.f32 %v706_v57, %v628_v8 }
  0xfe   : > { %v781_v6 = vpop.f32.mrf.mxu0  ;;  %v870_v42 = vpop.f32.mrf.mxu1 }
  0xff   : > { %v790_v13 = vadd.f32 %v781_v6, %v711_v7  ;;  %v714_v27 = vadd.f32 %v708_v0, %v629_v15  ;;  %v1045_v15 = vld [vmem:[#allocation3] sm:$0xff] }
 0x100   : > { %v783_v11 = vpop.f32.mrf.mxu0  ;;  %v4144_v7 = vld [vmem:[%s5356_s3 + $0xe8] sm:$0xff]  }
 0x101   : > { %v791_v19 = vadd.f32 %v783_v11, %v712_v12  ;;  %v873_v23 = vadd.f32 %v864_v9, %v790_v13 }
 0x102   : > { %v785_v16 = vpop.f32.mrf.mxu0 }
 0x103   : > { %v792_v24 = vadd.f32 %v785_v16, %v713_v18  ;;  %v874_v29 = vadd.f32 %v866_v20, %v791_v19 }
 0x104   : > { %v787_v22 = vpop.f32.mrf.mxu0 }
 0x105   : > { %v793_v34 = vadd.f32 %v787_v22, %v714_v27  ;;  %v875_v36 = vadd.f32 %v868_v31, %v792_v24 }
 0x106   : > { %v943_v28 = vpop.f32.mrf.mxu0 }
 0x107   : > { %v952_v32 = vadd.f32 %v943_v28, %v873_v23  ;;  %v876_v46 = vadd.f32 %v870_v42, %v793_v34  ;;  %v1055_v23 = vld [vmem:[#allocation3 + $0x10] sm:$0x11] }
 0x108   : > { %v945_v35 = vpop.f32.mrf.mxu0 }
 0x109   : > { %v968_v38 = vadd.f32 %v961_v26, %v952_v32  ;;  %v953_v40 = vadd.f32 %v945_v35, %v874_v29  ;;  %v4126_v35 = vld [vmem:[%s5356_s3 + $0xd8] sm:$0xff]  }
 0x10a   : > { %v947_v41 = vpop.f32.mrf.mxu0 }
 0x10b   : > { %v976_v43 = vmin.f32 %v968_v38, 0.0  ;;  %v969_v44 = vadd.f32 %v965_v33, %v953_v40  ;;  %v954_v45 = vadd.f32 %v947_v41, %v875_v36  ;;  %vm972_vm6 = vcmp.gt.f32.partialorder %v968_v38, 0.0  ;;  %v4128_v41 = vld [vmem:[%s5356_s3 + $0xd0] sm:$0xff]  }
 0x10c   : > { %v949_v47 = vpop.f32.mrf.mxu0 }
 0x10d   : > { %v980_v48 = vmul.f32 1.442695, %v976_v43  ;;  %v977_v49 = vmin.f32 %v969_v44, 0.0  ;;  %v970_v50 = vadd.f32 %v961_v26, %v954_v45  ;;  %v955_v51 = vadd.f32 %v949_v47, %v876_v46 }
 0x10e   : > { %vm973_vm7 = vcmp.gt.f32.partialorder %v969_v44, 0.0 }
 0x10f   : > { %4172 = vpow2.f32 %v980_v48  ;;  %v982_v52 = vmul.f32 1.442695, %v977_v49  ;;  %v978_v53 = vmin.f32 %v970_v50, 0.0  ;;  %v971_v54 = vadd.f32 %v965_v33, %v955_v51 }
 0x110   : > { %vm974_vm10 = vcmp.gt.f32.partialorder %v970_v50, 0.0 }
 0x111   : > { %4174 = vpow2.f32 %v982_v52  ;;  %v984_v55 = vmul.f32 1.442695, %v978_v53  ;;  %v979_v56 = vmin.f32 %v971_v54, 0.0  ;;  %vm975_vm11 = vcmp.gt.f32.partialorder %v971_v54, 0.0  ;;  %v4131_v52 = vld [vmem:[%s5356_s3 + $0x38] sm:$0xff]  }
 0x113   : > { %4176 = vpow2.f32 %v984_v55  ;;  %v986_v57 = vmul.f32 1.442695, %v979_v56 }
 0x115   : > { %4178 = vpow2.f32 %v986_v57  ;;  %v4133_v57 = vld [vmem:[%s5356_s3 + $0x30] sm:$0xff]  }
 0x11c   : > { %v4173_v58 = vpop.eup %4172 }
 0x11d   : > { %v3578_v59 = vadd.f32 -1.0, %v4173_v58  ;;  %v4134_v58 = vld [vmem:[%s5356_s3 + $0xc0] sm:$0xff]  }
 0x11e   : > { %v4175_v61 = vpop.eup %4174 }
 0x11f   : > { %v3579_v62 = vadd.f32 -1.0, %v4175_v61  ;;  %v992_v0 = vsel %vm972_vm6, %v968_v38, %v3578_v59  ;;  %vm1044_vm6 = vmor %vm1043_vm13, %vm4540_vm4  ;;  %vm5382_vm4 = vcmask 261120   ;;  %v4135_v59 = vld [vmem:[%s5356_s3 + $0x28] sm:$0xff]   ;;  %v4136_v61 = vld [vmem:[%s5356_s3 + $0xb8] sm:$0xff]  }
 0x120   : > { %v4177_v63 = vpop.eup %4176  ;;  %vm5385_vm13 = vmmov %vm5382_vm4 }
 0x121   : > { %v993_v1 = vsel %vm973_vm7, %v969_v44, %v3579_v62  ;;  %v3580_v4 = vadd.f32 -1.0, %v4177_v63  ;;  %vm1016_vm7 = vsmask.f32 4368  ;;  %vm5388_vm3 = vmmov %vm5382_vm4  ;;  %v4137_v62 = vld [vmem:[%s5356_s3 + $0x20] sm:$0xff]   ;;  %v4138_v63 = vld [vmem:[%s5356_s3 + $0xb0] sm:$0xff]  }
 0x122   : > { %v3832_v2 = vpack.c.bf16 %v993_v1, %v992_v0  ;;  %v4179_v6 = vpop.eup %4178  ;;  %vm4548_vm2 = vmor %vm1015_vm12, %vm1016_vm7  ;;  %v4139_v0 = vld [vmem:[%s5356_s3 + $0x18] sm:$0xff]   ;;  %v4140_v1 = vld [vmem:[%s5356_s3 + $0xa8] sm:$0xff]  }
 0x123   : > { %v3581_v9 = vadd.f32 -1.0, %v4179_v6  ;;  %v994_v12 = vsel %vm974_vm10, %v970_v50, %v3580_v4  ;;  %vm5383_vm10 = vsmask.f32 7424  ;;  %v4142_v4 = vld [vmem:[%s5356_s3 + $0xa0] sm:$0xff]   ;;  %v4143_v6 = vld [vmem:[%s5356_s3 + $0x8] sm:$0xff]  }
 0x124   : > { %v1019_v8 = vshrl.u32 %v3832_v2, 16  ;;  %v1022_v11 = vshll.u32 %v3832_v2, 16  ;;  %v4141_v2 = vld [vmem:[%s5356_s3 + $0x10] sm:$0xff]  }
 0x125   : > { %v995_v13 = vsel %vm975_vm11, %v971_v54, %v3581_v9  ;;  %v4132_v54 = vld [vmem:[%s5356_s3 + $0xc8] sm:$0xff]   ;;  %vm5384_vm11 = vmmov %vm5382_vm4  ;;  %v4146_v9 = vld [vmem:[%s5356_s3 + $0xe0] sm:$0xff]  }
 0x126   : > { %v1021_v10 = vrot.slane %v1019_v8, 7  ;;  %v3833_v16 = vpack.c.bf16 %v995_v13, %v994_v12  ;;  %v4145_v8 = vld [vmem:[%s5356_s3] sm:$0xff]  }
 0x128   : > { %v1024_v17 = vor.u32 %v1022_v11, %v1021_v10  ;;  %v1027_v18 = vshrl.u32 %v3833_v16, 16  ;;  %v1030_v21 = vshll.u32 %v3833_v16, 16  ;;  %v1025_v24 = vrot.slane %v1021_v10, 4  ;;  %v4147_v10 = vld [vmem:[%s5356_s3 + $0x48] sm:$0xff]   ;;  %v4148_v11 = vld [vmem:[%s5356_s3 + $0x40] sm:$0xff]  }
 0x129   : > { %v1608_v16 = vand.u32 127, %v958_v60 }
 0x12a   : > { %v1046_v19 = vsel %vm1044_vm6, %v1024_v17, %v1045_v15  ;;  %v1029_v20 = vrot.slane %v1027_v18, 7  ;;  %vm1635_vm6 = vcmask 130048  }
 0x12b   : > { %1047 = vst [vmem:[#allocation3] sm:$0xff] %v1046_v19  ;;  %v4658_v17 = vmul.u32 2, %v1608_v16 }
 0x12c   : > { %v1032_v26 = vor.u32 %v1030_v21, %v1029_v20  ;;  %v1034_v27 = vrot.slane %v1029_v20, 4 }
 0x12d   : > { %v4661_v18 = vadd.s32 1, %v4658_v17  ;;  %vm1610_vm9 = vcmp.eq.s32.totalorder %v4528_v5, %v4658_v17 }
 0x12e   : > { %v1033_v28 = vsel %vm4548_vm2, %v1025_v24, %v1032_v26  ;;  %v1056_v29 = vsel %vm1054_vm15, %v1034_v27, %v1055_v23  ;;  %vm5386_vm15 = vmmov %vm5383_vm10 }
 0x12f   : > { %1048 = vst.msk [vmem:[#allocation3 + $0x8] sm:$0xff] %vm4446_vm5, %v1033_v28  ;;  %1057 = vst [vmem:[#allocation3 + $0x10] sm:$0x11] %v1056_v29  ;;  %vm1623_vm7 = vcmp.eq.s32.totalorder %v4528_v5, %v4661_v18  ;;  %v1604_v28 = vadd.s32 8, %v4528_v5 }
 0x130   : > { %vm5389_vm5 = vmmov %vm5387_vm0 }
 0x136   : > { %v1059_v31 = vld [vmem:[#allocation3 + $0x8] sm:$0xff]  ;;  %v1060_v32 = vld [vmem:[#allocation3 + $0x10] sm:$0x11] }
 0x137   : > { %v3625_v33 = vcombine.high %v1046_v19, %v1059_v31  ;;  %v4561_v34 = vcombine.low %v1046_v19, %v1059_v31  ;;  %v3638_v36 = vcombine.high %v1060_v32, %v1060_v32  ;;  %v4566_v38 = vcombine.low %v1060_v32, %v1060_v32 }
 0x138   : > { %v4213_v19 = vmov 0.0   ;;  %v1605_v31 = vadd.s32 16, %v4528_v5 }
 0x139   : > { %3636 = vmatprep.mubr.msk.bf16.mxu1 %vm5382_vm4, %v3625_v33  ;;  %v1235_v37 = vshll.u32 %v3625_v33, 16  ;;  %v1240_v39 = vshll.u32 %v3638_v36, 16  ;;  %v1224_v30 = vshll.u32 %v4561_v34, 16  ;;  %v1229_v40 = vshll.u32 %v4566_v38, 16 }
 0x13a   : > { %1208 = vmatmul.mubr.bf16.vlgmr.msra.gmra.mxu1 %v4561_v34  ;;  %v1233_v42 = vshrl.u32 %v3625_v33, 16  ;;  %v1222_v44 = vshrl.u32 %v4561_v34, 16  ;;  %v1494_v48 = vrot.slane %v3625_v33, 1  ;;  %v1495_v49 = vrot.slane %v3638_v36, 1 }
 0x13b   : > { %1451 = vmatpush1.bf16.msra.mxu1 %v4126_v35  ;;  %v1237_v43 = vrot.slane %v1235_v37, 1  ;;  %v1226_v45 = vrot.slane %v1224_v30, 1  ;;  %v1242_v47 = vrot.slane %v1240_v39, 1  ;;  %v1231_v51 = vrot.slane %v1229_v40, 1 }
 0x13c   : > { %1452 = vmatprep.subr.bf16.mxu1 %v4212_v3  ;;  %v1496_v56 = vsel %vm5387_vm0, %v1494_v48, %v1495_v49  ;;  %v1491_v12 = vrot.slane %v4561_v34, 1  ;;  %v1492_v13 = vrot.slane %v4566_v38, 1  ;;  %v4666_v20 = vsel %vm1610_vm9, 1.0, %v4213_v19 }
 0x13d   : > { %v1238_v46 = vor.u32 %v1237_v43, %v1233_v42  ;;  %v1227_v50 = vor.u32 %v1226_v45, %v1222_v44  ;;  %v4673_v60 = vsel %vm1623_vm7, 1.0, %v4213_v19  ;;  %vm1611_vm4 = vcmp.eq.s32.totalorder %v1604_v28, %v4658_v17 }
 0x13e   : > { %v1493_v15 = vsel %vm5389_vm5, %v1491_v12, %v1492_v13  ;;  %v1606_v34 = vadd.s32 24, %v4528_v5  ;;  %v4683_v38 = vsel %vm1611_vm4, 1.0, %v4213_v19  ;;  %vm1870_vm5 = vcmask 647168  }
 0x13f   : > { %1453 = vmatpush1.bf16.msra.mxu1 %v4128_v41  ;;  %v1243_v53 = vsel %vm5383_vm10, %v1238_v46, %v1242_v47  ;;  %v1232_v55 = vsel %vm5386_vm15, %v1227_v50, %v1231_v51  ;;  %vm1612_vm10 = vcmp.eq.s32.totalorder %v1605_v31, %v4658_v17  ;;  %vm1625_vm15 = vcmp.eq.s32.totalorder %v1605_v31, %v4661_v18 }
 0x140   : > { %3649 = vmatprep.mubr.msk.bf16.mxu0 %vm5384_vm11, %v1243_v53  ;;  %3680 = vmatprep.mubr.msk.bf16.mxu1 %vm5385_vm13, %v1243_v53  ;;  %v4686_v37 = vsel %vm1612_vm10, 1.0, %v4213_v19  ;;  %vm1613_vm11 = vcmp.eq.s32.totalorder %v1606_v34, %v4658_v17  ;;  %vm1624_vm13 = vcmp.eq.s32.totalorder %v1604_v28, %v4661_v18  ;;  %v4704_v50 = vsel %vm1625_vm15, 1.0, %v4213_v19  ;;  %1871 = vst.msk [vmem:[#allocation4 + $0x10] sm:$0x1] %vm1870_vm5, %v4212_v3  ;;  %v4150_v53 = vld [vmem:[%s5358_s5 + $0x90] sm:$0xff]  }
 0x141   : > { %1341 = vmatmul.mubr.bf16.vlgmr.msra.gmra.mxu0 %v1232_v55  ;;  %1454 = vmatprep.subr.bf16.mxu1 %v4212_v3  ;;  %v4694_v39 = vsel %vm1613_vm11, 1.0, %v4213_v19  ;;  %v4701_v49 = vsel %vm1624_vm13, 1.0, %v4213_v19  ;;  %vm1626_vm0 = vcmp.eq.s32.totalorder %v1606_v34, %v4661_v18  ;;  %vm1933_vm11 = vmand %vm1870_vm5, %vm1015_vm12  ;;  %vm2004_vm12 = vcmask 654336  }
 0x142   : > { %1562 = vmatpush1.bf16.msra.mxu0 %v4131_v52  ;;  %3691 = vmatprep.mubr.msk.bf16.mxu0 %vm5388_vm3, %v1496_v56  ;;  %v4712_v51 = vsel %vm1626_vm0, 1.0, %v4213_v19  ;;  %vm1865_vm3 = vcmask 650240   ;;  %v4149_v52 = vld [vmem:[%s5358_s5 + $0x98] sm:$0xff]   ;;  %v4153_v56 = vld [vmem:[%s5358_s5 + $0x40] sm:$0xff]   ;;  %vm5392_vm13 = vcmask 1046528   ;;  %vm5393_vm15 = vcmask 261120  }
 0x143   : > { %1455 = vmatpush1.bf16.msra.mxu1 %v4132_v54  ;;  %1563 = vmatprep.subr.bf16.mxu0 %v4212_v3  ;;  %1866 = vst.msk [vmem:[#allocation4] sm:$0xf] %vm1865_vm3, %v4212_v3  ;;  %1867 = vst.msk [vmem:[#allocation4 + $0x4] sm:$0xf] %vm1865_vm3, %v4212_v3  ;;  %v4151_v54 = vld [vmem:[%s5358_s5 + $0x48] sm:$0xff]  }
 0x144   : > { %1456 = vmatprep.subr.bf16.mxu1 %v4212_v3  ;;  %1868 = vst.msk [vmem:[#allocation4 + $0x8] sm:$0xf] %vm1865_vm3, %v4212_v3  ;;  %1869 = vst.msk [vmem:[#allocation4 + $0xc] sm:$0xf] %vm1865_vm3, %v4212_v3 }
 0x145   : > { %vm1925_vm10 = vmand %vm1865_vm3, %vm1039_vm14  ;;  %vm5390_vm14 = vsmask.f32 7424 }
 0x146   : > { %1564 = vmatpush1.bf16.msra.mxu0 %v4133_v57  ;;  %v4154_v57 = vld [vmem:[%s5358_s5 + $0x80] sm:$0xff]   ;;  %vm5394_vm0 = vmmov %vm5392_vm13 }
 0x147   : > { %1457 = vmatpush1.bf16.msra.mxu1 %v4134_v58  ;;  %1565 = vmatprep.subr.bf16.mxu0 %v4212_v3  ;;  %v4155_v58 = vld [vmem:[%s5358_s5 + $0x38] sm:$0xff]  }
 0x148   : > { %1458 = vmatprep.subr.bf16.mxu1 %v4212_v3 }
 0x14a   : > { %1566 = vmatpush1.bf16.msra.mxu0 %v4135_v59  ;;  %v4156_v59 = vld [vmem:[%s5358_s5 + $0x78] sm:$0xff]  }
 0x14b   : > { %1459 = vmatpush1.bf16.msra.mxu1 %v4136_v61  ;;  %1567 = vmatprep.subr.bf16.mxu0 %v4212_v3  ;;  %v4158_v61 = vld [vmem:[%s5358_s5 + $0x30] sm:$0xff]  }
 0x14c   : > { %1460 = vmatprep.subr.bf16.mxu1 %v4212_v3 }
 0x14e   : > { %1568 = vmatpush1.bf16.msra.mxu0 %v4137_v62  ;;  %v4756_v62 = vld [vmem:[%s5358_s5 + $0x70] sm:$0xff]  }
 0x14f   : > { %1461 = vmatpush1.bf16.msra.mxu1 %v4138_v63  ;;  %1569 = vmatprep.subr.bf16.mxu0 %v4212_v3  ;;  %v4161_v63 = vld [vmem:[%s5358_s5 + $0x28] sm:$0xff]  }
 0x150   : > { %1462 = vmatprep.subr.bf16.mxu1 %v4212_v3 }
 0x152   : > { %1570 = vmatpush1.bf16.msra.mxu0 %v4139_v0  ;;  %v4765_v0 = vld [vmem:[%s5358_s5 + $0x20] sm:$0xff]  }
 0x153   : > { %1463 = vmatpush1.bf16.msra.mxu1 %v4140_v1  ;;  %1571 = vmatprep.subr.bf16.mxu0 %v4212_v3 }
 0x154   : > { %1464 = vmatprep.subr.bf16.mxu1 %v4212_v3 }
 0x156   : > { %1572 = vmatpush1.bf16.msra.mxu0 %v4141_v2 }
 0x157   : > { %1465 = vmatpush1.bf16.msra.mxu1 %v4142_v4  ;;  %1573 = vmatprep.subr.bf16.mxu0 %v4212_v3 }
 0x158   : > { %1478 = vmatprep.subr.bf16.mxu1 %v4212_v3 }
 0x15a   : > { %1574 = vmatpush1.bf16.msra.mxu0 %v4143_v6  ;;  %v3708_v6 = vld [vmem:[%s5357_s4] ss:$0 sm:$0xff] }
 0x15b   : > { %1479 = vmatpush2.bf16.msra.mxu1 %v4144_v7  ;;  %1575 = vmatprep.subr.bf16.mxu0 %v4212_v3 }
 0x15c   : > { %1480 = vmatprep.subr.bf16.mxu1 %v4212_v3 }
 0x15e   : > { %1576 = vmatpush1.bf16.msra.mxu0 %v4145_v8 }
 0x15f   : > { %1481 = vmatpush2.bf16.msra.mxu1 %v4146_v9  ;;  %1589 = vmatprep.subr.bf16.mxu0 %v4212_v3 }
 0x162   : > { %1483 = vmatmul.mubr.bf16.vlgmr.msra.gmra.mxu1 %v1232_v55  ;;  %1590 = vmatpush2.bf16.msra.mxu0 %v4147_v10  ;;  %v4152_v55 = vld [vmem:[%s5358_s5 + $0x88] sm:$0xff]  }
 0x163   : > { %1591 = vmatprep.subr.bf16.mxu0 %v4212_v3  ;;  %3933 = vmatprep.mubr.msk.f32.mxu1 %vm1635_vm6, %v4673_v60 }
 0x166   : > { %1592 = vmatpush2.bf16.msra.mxu0 %v4148_v11 }
 0x169   : > { %1594 = vmatmul.mubr.bf16.vlgmr.msra.gmra.mxu0 %v1493_v15 }
 0x16a   : > { %3943 = vmatprep.mubr.msk.f32.mxu0 %vm1635_vm6, %v4666_v20 }
 0x1fa   : > { %v1209_v21 = vpop.f32.mrf.mxu1 }
 0x1fc   : > { %v1211_v23 = vpop.f32.mrf.mxu1 }
 0x1fe   : > { %v1212_v24 = vpop.f32.mrf.mxu1 }
 0x200   : > { %v1214_v26 = vpop.f32.mrf.mxu1 }
 0x201   : > { %v1342_v27 = vpop.f32.mrf.mxu0 }
 0x202   : > { %v1343_v36 = vadd.f32 %v1342_v27, %v1209_v21 }
 0x203   : > { %v1344_v29 = vpop.f32.mrf.mxu0 }
 0x205   : > { %v1345_v32 = vpop.f32.mrf.mxu0 }
 0x206   : > { %v1346_v33 = vadd.f32 %v1345_v32, %v1212_v24 }
 0x207   : > { %v1347_v35 = vpop.f32.mrf.mxu0 }
 0x208   : > { %3939 = vmatprep.subr.mxu0 %v1346_v33 }
 0x209   : > { %3940 = vmatpush3.msra.mxu0 %v1346_v33 }
 0x20a   : > { %3941 = vmatprep.subr.mxu0 %v1343_v36 }
 0x20b   : > { %3942 = vmatpush3.msra.mxu0 %v1343_v36 }
 0x20c   : > { %3944 = vmatmul.mubr.msk.f32.vlgmr.msra.gmra.mxu0 %vm1635_vm6, %v4683_v38  ;;  %3963 = vmatprep.subr.bf16.mxu0 %v4151_v54 }
 0x20d   : > { %3946 = vmatprep.mubr.msk.f32.mxu0 %vm1635_vm6, %v4686_v37  ;;  %3964 = vmatpush3.bf16.msra.mxu0 %v4151_v54 }
 0x20e   : > { %3965 = vmatprep.subr.bf16.mxu0 %v4153_v56 }
 0x210   : > { %3947 = vmatmul.mubr.msk.f32.gmra.mxu0 %vm1635_vm6, %v4694_v39 }
 0x211   : > { %3966 = vmatpush3.bf16.msra.mxu0 %v4153_v56 }
 0x212   : > { %3967 = vmatprep.subr.bf16.mxu0 %v4155_v58 }
 0x215   : > { %3968 = vmatpush3.bf16.msra.mxu0 %v4155_v58 }
 0x216   : > { %3969 = vmatprep.subr.bf16.mxu0 %v4158_v61 }
 0x219   : > { %3970 = vmatpush3.bf16.msra.mxu0 %v4158_v61 }
 0x21a   : > { %3971 = vmatprep.subr.bf16.mxu0 %v4161_v63 }
 0x21d   : > { %3972 = vmatpush3.bf16.msra.mxu0 %v4161_v63 }
 0x21e   : > { %3991 = vmatprep.subr.bf16.mxu0 %v4765_v0 }
 0x222   : > { %v1484_v30 = vpop.f32.mrf.mxu1 }
 0x224   : > { %v1486_v40 = vpop.f32.mrf.mxu1 }
 0x226   : > { %v1487_v41 = vpop.f32.mrf.mxu1 }
 0x228   : > { %v1489_v42 = vpop.f32.mrf.mxu1 }
 0x229   : > { %v1595_v43 = vpop.f32.mrf.mxu0 }
 0x22a   : > { %v1596_v48 = vadd.f32 %v1595_v43, %v1484_v30 }
 0x22b   : > { %v1597_v44 = vpop.f32.mrf.mxu0 }
 0x22d   : > { %v1598_v45 = vpop.f32.mrf.mxu0 }
 0x22e   : > { %v1599_v46 = vadd.f32 %v1598_v45, %v1487_v41 }
 0x22f   : > { %v1600_v47 = vpop.f32.mrf.mxu0 }
 0x230   : > { %3929 = vmatprep.subr.mxu1 %v1599_v46 }
 0x231   : > { %3930 = vmatpush3.msra.mxu1 %v1599_v46 }
 0x232   : > { %3931 = vmatprep.subr.mxu1 %v1596_v48 }
 0x233   : > { %3932 = vmatpush3.msra.mxu1 %v1596_v48 }
 0x234   : > { %3934 = vmatmul.mubr.msk.f32.vlgmr.msra.gmra.mxu1 %vm1635_vm6, %v4701_v49  ;;  %3949 = vmatprep.subr.bf16.mxu1 %v4149_v52 }
 0x235   : > { %3936 = vmatprep.mubr.msk.f32.mxu1 %vm1635_vm6, %v4704_v50  ;;  %3950 = vmatpush3.bf16.msra.mxu1 %v4149_v52 }
 0x236   : > { %3951 = vmatprep.subr.bf16.mxu1 %v4150_v53 }
 0x238   : > { %3937 = vmatmul.mubr.msk.f32.gmra.mxu1 %vm1635_vm6, %v4712_v51 }
 0x239   : > { %3952 = vmatpush3.bf16.msra.mxu1 %v4150_v53 }
 0x23a   : > { %3953 = vmatprep.subr.bf16.mxu1 %v4152_v55 }
 0x23d   : > { %3954 = vmatpush3.bf16.msra.mxu1 %v4152_v55 }
 0x23e   : > { %3955 = vmatprep.subr.bf16.mxu1 %v4154_v57 }
 0x241   : > { %3956 = vmatpush3.bf16.msra.mxu1 %v4154_v57 }
 0x242   : > { %3957 = vmatprep.subr.bf16.mxu1 %v4156_v59 }
 0x245   : > { %3958 = vmatpush3.bf16.msra.mxu1 %v4156_v59 }
 0x246   : > { %3977 = vmatprep.subr.bf16.mxu1 %v4756_v62 }
 0x2cc   : > { %v3945_v1 = vpop.f32.mrf.mxu0 }
 0x2ce   : > { %v1811_v2 = vpop.f32.mrf.mxu0 }
 0x2d0   : > { %v3948_v11 = vpop.f32.mrf.mxu0 }
 0x2d2   : > { %v1821_v27 = vpop.f32.mrf.mxu0 }
 0x2f4   : > { %v3935_v4 = vpop.f32.mrf.mxu1 }
 0x2f5   : > { %v1817_v7 = vadd.f32 %v3945_v1, %v3935_v4 }
 0x2f6   : > { %v1714_v8 = vpop.f32.mrf.mxu1 }
 0x2f7   : > { %v1838_v9 = vadd.f32 %v3708_v6, %v1817_v7  ;;  %v1812_v10 = vadd.f32 %v1811_v2, %v1714_v8  ;;  %v1926_v2 = vld [vmem:[#allocation4] sm:$0xf] }
 0x2f8   : > { %v3938_v12 = vpop.f32.mrf.mxu1 }
 0x2f9   : > { %v1846_v13 = vmin.f32 %v1838_v9, 0.0  ;;  %v1837_v15 = vadd.f32 %v3708_v6, %v1812_v10  ;;  %v1827_v16 = vadd.f32 %v3948_v11, %v3938_v12  ;;  %vm1842_vm9 = vcmp.gt.f32.partialorder %v1838_v9, 0.0  ;;  %v1934_v10 = vld [vmem:[#allocation4 + $0x10] sm:$0x1] }
 0x2fa   : > { %v1724_v21 = vpop.f32.mrf.mxu1 }
 0x2fb   : > { %v1851_v23 = vmul.f32 1.442695, %v1846_v13  ;;  %v1845_v24 = vmin.f32 %v1837_v15, 0.0  ;;  %v1840_v26 = vadd.f32 %v3708_v6, %v1827_v16  ;;  %v1822_v28 = vadd.f32 %v1821_v27, %v1724_v21 }
 0x2fc   : > { %vm1841_vm6 = vcmp.gt.f32.partialorder %v1837_v15, 0.0 }
 0x2fd   : > { %4180 = vpow2.f32 %v1851_v23  ;;  %v1849_v29 = vmul.f32 1.442695, %v1845_v24  ;;  %v1848_v31 = vmin.f32 %v1840_v26, 0.0  ;;  %v1839_v32 = vadd.f32 %v3708_v6, %v1822_v28 }
 0x2fe   : > { %vm1844_vm7 = vcmp.gt.f32.partialorder %v1840_v26, 0.0 }
 0x2ff   : > { %4182 = vpow2.f32 %v1849_v29  ;;  %v1855_v33 = vmul.f32 1.442695, %v1848_v31  ;;  %v1847_v34 = vmin.f32 %v1839_v32, 0.0  ;;  %vm1843_vm4 = vcmp.gt.f32.partialorder %v1839_v32, 0.0 }
 0x301   : > { %4184 = vpow2.f32 %v1855_v33  ;;  %v1853_v35 = vmul.f32 1.442695, %v1847_v34 }
 0x303   : > { %4186 = vpow2.f32 %v1853_v35 }
 0x30a   : > { %v4181_v36 = vpop.eup %4180 }
 0x30b   : > { %v3710_v30 = vadd.f32 -1.0, %v4181_v36  ;;  %v4162_v36 = vld [vmem:[%s5358_s5 + $0x68] sm:$0xff]  }
 0x30c   : > { %v4183_v40 = vpop.eup %4182 }
 0x30d   : > { %v1862_v41 = vsel %vm1842_vm9, %v1838_v9, %v3710_v30  ;;  %v3709_v42 = vadd.f32 -1.0, %v4183_v40 }
 0x30e   : > { %v4185_v43 = vpop.eup %4184  ;;  %v3835_v44 = vpack.c.bf16 %v1862_v41, %v1862_v41 }
 0x30f   : > { %v1861_v45 = vsel %vm1841_vm6, %v1837_v15, %v3709_v42  ;;  %v3712_v46 = vadd.f32 -1.0, %v4185_v43 }
 0x310   : > { %v1893_v47 = vshrl.u32 %v3835_v44, 16  ;;  %v3834_v48 = vpack.c.bf16 %v1861_v45, %v1861_v45  ;;  %v4187_v52 = vpop.eup %4186  ;;  %v1896_v57 = vshll.u32 %v3835_v44, 16 }
 0x311   : > { %v1864_v53 = vsel %vm1844_vm7, %v1840_v26, %v3712_v46  ;;  %v3711_v58 = vadd.f32 -1.0, %v4187_v52  ;;  %v4165_v46 = vld [vmem:[%s5358_s5 + $0x60] sm:$0xff]  }
 0x312   : > { %v1895_v54 = vrot.slane %v1893_v47, 7  ;;  %v1885_v55 = vshrl.u32 %v3834_v48, 16  ;;  %v3837_v56 = vpack.c.bf16 %v1864_v53, %v1864_v53  ;;  %v1888_v61 = vshll.u32 %v3834_v48, 16 }
 0x313   : > { %v1863_v4 = vsel %vm1843_vm4, %v1839_v32, %v3711_v58  ;;  %v4168_v58 = vld [vmem:[%s5358_s5 + $0x10] sm:$0xff]  }
 0x314   : > { %v1887_v59 = vrot.slane %v1885_v55, 7  ;;  %v1911_v63 = vshrl.u32 %v3837_v56, 16  ;;  %v1898_v1 = vor.u32 %v1896_v57, %v1895_v54  ;;  %v3836_v9 = vpack.c.bf16 %v1863_v4, %v1863_v4 }
 0x315   : > { %v1914_v21 = vshll.u32 %v3837_v56, 16  ;;  %v1900_v26 = vrot.slane %v1895_v54, 4  ;;  %v4167_v56 = vld [vmem:[%s5358_s5 + $0x58] sm:$0xff]  }
 0x316   : > { %v1890_v6 = vor.u32 %v1888_v61, %v1887_v59  ;;  %v1891_v7 = vrot.slane %v1887_v59, 4  ;;  %v1913_v8 = vrot.slane %v1911_v63, 7  ;;  %v1902_v15 = vshrl.u32 %v3836_v9, 16  ;;  %v4169_v59 = vld [vmem:[%s5358_s5 + $0x50] sm:$0xff]   ;;  %v4171_v61 = vld [vmem:[%s5358_s5] sm:$0xff]  }
 0x317   : > { %v1905_v24 = vshll.u32 %v3836_v9, 16 }
 0x318   : > { %v1899_v11 = vsel %vm4548_vm2, %v1891_v7, %v1898_v1  ;;  %v1927_v12 = vsel %vm1925_vm10, %v1890_v6, %v1926_v2  ;;  %v1918_v13 = vrot.slane %v1913_v8, 4  ;;  %v1904_v23 = vrot.slane %v1902_v15, 7 }
 0x319   : > { %1928 = vst [vmem:[#allocation4] sm:$0xf] %v1927_v12  ;;  %1929 = vst.msk [vmem:[#allocation4 + $0x4] sm:$0xf] %vm1865_vm3, %v1899_v11  ;;  %v1916_v27 = vor.u32 %v1914_v21, %v1913_v8  ;;  %v2356_v15 = vadd.s32 32, %v4528_v5 }
 0x31a   : > { %v1935_v16 = vsel %vm1933_vm11, %v1918_v13, %v1934_v10  ;;  %v1907_v28 = vor.u32 %v1905_v24, %v1904_v23  ;;  %v1909_v29 = vrot.slane %v1904_v23, 4 }
 0x31b   : > { %1936 = vst [vmem:[#allocation4 + $0x10] sm:$0x1] %v1935_v16  ;;  %vm2360_vm5 = vcmp.eq.s32.totalorder %v2356_v15, %v4658_v17 }
 0x31c   : > { %v1908_v31 = vsel %vm4548_vm2, %v1900_v26, %v1907_v28  ;;  %v1917_v32 = vsel %vm4548_vm2, %v1909_v29, %v1916_v27  ;;  %vm5391_vm2 = vmmov %vm5390_vm14  ;;  %v3778_v23 = vsel %vm2360_vm5, 1.0, %v4213_v19 }
 0x31d   : > { %1930 = vst.msk [vmem:[#allocation4 + $0x8] sm:$0xf] %vm1865_vm3, %v1908_v31  ;;  %1931 = vst.msk [vmem:[#allocation4 + $0xc] sm:$0xf] %vm1865_vm3, %v1917_v32 }
 0x31e   : > { %vm5395_vm3 = vmmov %vm5393_vm15 }
 0x31f   : > { %vm5396_vm9 = vmmov %vm5395_vm3 }
 0x320   : > { %v4157_v33 = vld [vmem:[#allocation4] sm:$0xff]   ;;  %vm5397_vm6 = vmmov %vm5395_vm3 }
 0x321   : > { %3959 = vmatprep.mubr.msk.bf16.mxu1 %vm2004_vm12, %v4157_v33  ;;  %v2065_v34 = vshll.u32 %v4157_v33, 16  ;;  %v2063_v22 = vshrl.u32 %v4157_v33, 16  ;;  %v2266_v54 = vrot.slane %v4157_v33, 1  ;;  %vm5398_vm4 = vmmov %vm5395_vm3 }
 0x322   : > { %v4164_v35 = vld [vmem:[#allocation4 + $0x10] ss:$0 sps:$4 sm:$0x11]   ;;  %vm5399_vm10 = vmmov %vm5395_vm3 }
 0x323   : > { %v2067_v40 = vrot.slane %v2065_v34, 1  ;;  %v2077_v42 = vshll.u32 %v4164_v35, 16  ;;  %v2269_v63 = vrot.slane %v4164_v35, 1  ;;  %vm5400_vm11 = vmmov %vm5395_vm3  ;;  %v2358_v35 = vadd.s32 48, %v4528_v5 }
 0x324   : > { %v4160_v30 = vld [vmem:[#allocation4 + $0x8] sm:$0xff]  }
 0x325   : > { %3960 = vmatmul.mubr.msk.bf16.vlgmr.msra.gmra.mxu1 %vm2004_vm12, %v4160_v30  ;;  %v2069_v41 = vshll.u32 %v4160_v30, 16  ;;  %v2068_v43 = vor.u32 %v2067_v40, %v2063_v22  ;;  %v2073_v45 = vshrl.u32 %v4160_v30, 16  ;;  %v2267_v47 = vrot.slane %v4160_v30, 1 }
 0x326   : > { %3978 = vmatpush3.bf16.msra.mxu1 %v4756_v62  ;;  %v2079_v53 = vrot.slane %v2077_v42, 1  ;;  %v4166_v62 = vld [vmem:[%s5358_s5 + $0x18] sm:$0xff]   ;;  %v2359_v30 = vadd.s32 56, %v4528_v5 }
 0x327   : > { %3979 = vmatprep.subr.bf16.mxu1 %v4162_v36  ;;  %v2071_v44 = vrot.slane %v2069_v41, 1  ;;  %v2268_v57 = vsel %vm5392_vm13, %v2266_v54, %v2267_v47  ;;  %v2270_v1 = vsel %vm5394_vm0, %v2267_v47, %v2269_v63  ;;  %v3802_v41 = vld [vmem:[%s5359_s6] ss:$0 sm:$0xff] }
 0x328   : > { %vm2375_vm5 = vcmp.eq.s32.totalorder %v2359_v30, %v4661_v18 }
 0x329   : > { %v2072_v48 = vsel %vm5390_vm14, %v2068_v43, %v2071_v44  ;;  %v2075_v52 = vor.u32 %v2073_v45, %v2071_v44  ;;  %vm5401_vm14 = vmmov %vm5395_vm3 }
 0x32a   : > { %3980 = vmatpush3.bf16.msra.mxu1 %v4162_v36  ;;  %3973 = vmatprep.mubr.msk.bf16.mxu0 %vm2004_vm12, %v2072_v48 }
 0x32b   : > { %3987 = vmatprep.mubr.msk.bf16.mxu1 %vm2004_vm12, %v2072_v48  ;;  %v2080_v55 = vsel %vm5391_vm2, %v2075_v52, %v2079_v53  ;;  %3981 = vmatprep.subr.bf16.mxu1 %v4165_v46  ;;  %vm5402_vm2 = vmmov %vm5395_vm3 }
 0x32c   : > { %3974 = vmatmul.mubr.msk.bf16.vlgmr.msra.gmra.mxu0 %vm2004_vm12, %v2080_v55  ;;  %vm5403_vm0 = vmmov %vm5402_vm2 }
 0x32d   : > { %3992 = vmatpush3.bf16.msra.mxu0 %v4765_v0  ;;  %4001 = vmatprep.mubr.msk.bf16.mxu0 %vm2004_vm12, %v2268_v57  ;;  %v4170_v0 = vld [vmem:[%s5358_s5 + $0x8] sm:$0xff]  }
 0x32e   : > { %3982 = vmatpush3.bf16.msra.mxu1 %v4165_v46  ;;  %3993 = vmatprep.subr.bf16.mxu0 %v4166_v62 }
 0x32f   : > { %3983 = vmatprep.subr.bf16.mxu1 %v4167_v56 }
 0x331   : > { %3994 = vmatpush3.bf16.msra.mxu0 %v4166_v62 }
 0x332   : > { %3984 = vmatpush3.bf16.msra.mxu1 %v4167_v56  ;;  %3995 = vmatprep.subr.bf16.mxu0 %v4168_v58 }
 0x333   : > { %3985 = vmatprep.subr.bf16.mxu1 %v4169_v59 }
 0x335   : > { %3996 = vmatpush3.bf16.msra.mxu0 %v4168_v58 }
 0x336   : > { %3986 = vmatpush3.bf16.msra.mxu1 %v4169_v59  ;;  %3997 = vmatprep.subr.bf16.mxu0 %v4170_v0 }
 0x339   : > { %3988 = vmatmul.mubr.msk.bf16.vlgmr.msra.gmra.mxu1 %vm2004_vm12, %v2080_v55  ;;  %3998 = vmatpush3.bf16.msra.mxu0 %v4170_v0 }
 0x33a   : > { %3999 = vmatprep.subr.bf16.mxu0 %v4171_v61  ;;  %4013 = vmatprep.mubr.msk.f32.mxu1 %vm5393_vm15, %v4673_v60  ;;  %vm2374_vm15 = vcmp.eq.s32.totalorder %v2358_v35, %v4661_v18 }
 0x33d   : > { %4000 = vmatpush3.bf16.msra.mxu0 %v4171_v61 }
 0x340   : > { %4002 = vmatmul.mubr.msk.bf16.vlgmr.msra.gmra.mxu0 %vm2004_vm12, %v2270_v1  ;;  %vm2372_vm12 = vcmp.eq.s32.totalorder %v2356_v15, %v4661_v18 }
 0x341   : > { %4033 = vmatprep.mubr.msk.f32.mxu0 %vm5395_vm3, %v4666_v20  ;;  %v2357_v20 = vadd.s32 40, %v4528_v5  ;;  %v3782_v36 = vsel %vm2372_vm12, 1.0, %v4213_v19  ;;  %vm5404_vm3 = vmmov %vm5403_vm0  ;;  %v3785_v5 = vsel %vm2375_vm5, 1.0, %v4213_v19 }
 0x342   : > { %vm5409_vm12 = vmmov %vm5403_vm0 }
 0x343   : > { %vm2361_vm7 = vcmp.eq.s32.totalorder %v2357_v20, %v4658_v17  ;;  %vm2373_vm13 = vcmp.eq.s32.totalorder %v2357_v20, %v4661_v18 }
 0x344   : > { %v3779_v27 = vsel %vm2361_vm7, 1.0, %v4213_v19  ;;  %vm5406_vm7 = vmmov %vm5403_vm0 }
 0x3e5   : > { %v3961_v2 = vpop.f32.mrf.mxu1 }
 0x3e7   : > { %v2045_v4 = vpop.f32.mrf.mxu1 }
 0x3e9   : > { %v3962_v8 = vpop.f32.mrf.mxu1 }
 0x3eb   : > { %v2048_v60 = vpop.f32.mrf.mxu1 }
 0x3ec   : > { %v3975_v6 = vpop.f32.mrf.mxu0 }
 0x3ed   : > { %v2160_v12 = vadd.f32 %v3975_v6, %v3961_v2 }
 0x3ee   : > { %v2151_v7 = vpop.f32.mrf.mxu0 }
 0x3ef   : > { %v2152_v16 = vadd.f32 %v2151_v7, %v2045_v4 }
 0x3f0   : > { %v3976_v9 = vpop.f32.mrf.mxu0 }
 0x3f1   : > { %v2163_v10 = vadd.f32 %v3976_v9, %v3962_v8 }
 0x3f2   : > { %v2154_v11 = vpop.f32.mrf.mxu0 }
 0x3f3   : > { %4025 = vmatprep.subr.mxu0 %v2163_v10  ;;  %v2155_v13 = vadd.f32 %v2154_v11, %v2048_v60 }
 0x3f4   : > { %4026 = vmatpush3.msra.mxu0 %v2163_v10 }
 0x3f5   : > { %4027 = vmatprep.subr.mxu0 %v2160_v12 }
 0x3f6   : > { %4028 = vmatpush3.msra.mxu0 %v2160_v12 }
 0x3f7   : > { %4029 = vmatprep.subr.mxu0 %v2155_v13 }
 0x3f8   : > { %4030 = vmatpush3.msra.mxu0 %v2155_v13 }
 0x3f9   : > { %4031 = vmatprep.subr.mxu0 %v2152_v16  ;;  %v3989_v21 = vpop.f32.mrf.mxu1 }
 0x3fa   : > { %4032 = vmatpush3.msra.mxu0 %v2152_v16 }
 0x3fb   : > { %4034 = vmatmul.mubr.msk.f32.vlgmr.msra.gmra.mxu0 %vm5396_vm9, %v4683_v38  ;;  %v2251_v24 = vpop.f32.mrf.mxu1  ;;  %vm2362_vm9 = vcmp.eq.s32.totalorder %v2358_v35, %v4658_v17 }
 0x3fc   : > { %4036 = vmatprep.mubr.msk.f32.mxu0 %vm5397_vm6, %v4686_v37  ;;  %vm5405_vm6 = vmmov %vm5403_vm0 }
 0x3fd   : > { %v3990_v38 = vpop.f32.mrf.mxu1 }
 0x3ff   : > { %4037 = vmatmul.mubr.msk.f32.gmra.mxu0 %vm5398_vm4, %v4694_v39  ;;  %v2254_v33 = vpop.f32.mrf.mxu1  ;;  %vm2363_vm4 = vcmp.eq.s32.totalorder %v2359_v30, %v4658_v17 }
 0x400   : > { %v4003_v26 = vpop.f32.mrf.mxu0  ;;  %4039 = vmatprep.mubr.msk.f32.mxu0 %vm5399_vm10, %v3778_v23  ;;  %vm5407_vm10 = vmmov %vm5403_vm0  ;;  %v3781_v40 = vsel %vm2363_vm4, 1.0, %v4213_v19 }
 0x401   : > { %v2350_v32 = vadd.f32 %v4003_v26, %v3989_v21 }
 0x402   : > { %v2341_v28 = vpop.f32.mrf.mxu0 }
 0x403   : > { %4040 = vmatmul.mubr.msk.f32.gmra.mxu0 %vm5400_vm11, %v3779_v27  ;;  %v2342_v39 = vadd.f32 %v2341_v28, %v2251_v24  ;;  %vm5408_vm11 = vmmov %vm5403_vm0 }
 0x404   : > { %v4004_v29 = vpop.f32.mrf.mxu0 }
 0x405   : > { %v2353_v31 = vadd.f32 %v4004_v29, %v3990_v38 }
 0x406   : > { %v2344_v37 = vpop.f32.mrf.mxu0 }
 0x407   : > { %4005 = vmatprep.subr.mxu1 %v2353_v31  ;;  %v2345_v34 = vadd.f32 %v2344_v37, %v2254_v33 }
 0x408   : > { %4006 = vmatpush3.msra.mxu1 %v2353_v31 }
 0x409   : > { %4007 = vmatprep.subr.mxu1 %v2350_v32 }
 0x40a   : > { %4008 = vmatpush3.msra.mxu1 %v2350_v32 }
 0x40b   : > { %4009 = vmatprep.subr.mxu1 %v2345_v34 }
 0x40c   : > { %4010 = vmatpush3.msra.mxu1 %v2345_v34 }
 0x40d   : > { %4011 = vmatprep.subr.mxu1 %v2342_v39 }
 0x40e   : > { %4012 = vmatpush3.msra.mxu1 %v2342_v39 }
 0x40f   : > { %4014 = vmatmul.mubr.msk.f32.vlgmr.msra.gmra.mxu1 %vm5401_vm14, %v4701_v49  ;;  %4045 = vmatprep.subr.mxu1 %v2163_v10  ;;  %v3783_v49 = vsel %vm2373_vm13, 1.0, %v4213_v19  ;;  %vm2697_vm14 = vcmask 322560  }
 0x410   : > { %4049 = vmatpush3.msra.mxu1 %v2163_v10  ;;  %4016 = vmatprep.mubr.msk.f32.mxu1 %vm5402_vm2, %v4704_v50  ;;  %v3784_v50 = vsel %vm2374_vm15, 1.0, %v4213_v19  ;;  %2698 = vst.msk [vmem:[#allocation5] sm:$0xf] %vm2697_vm14, %v4212_v3  ;;  %2699 = vst.msk [vmem:[#allocation5 + $0x4] sm:$0xf] %vm2697_vm14, %v4212_v3  ;;  %vm2706_vm2 = vcmask 321536  }
 0x411   : > { %4046 = vmatprep.subr.mxu1 %v2160_v12  ;;  %2700 = vst.msk [vmem:[#allocation5 + $0x8] sm:$0xf] %vm2697_vm14, %v4212_v3  ;;  %2701 = vst.msk [vmem:[#allocation5 + $0xc] sm:$0xf] %vm2697_vm14, %v4212_v3 }
 0x412   : > { %4050 = vmatpush3.msra.mxu1 %v2160_v12  ;;  %2702 = vst.msk [vmem:[#allocation5 + $0x10] sm:$0xf] %vm2697_vm14, %v4212_v3  ;;  %2703 = vst.msk [vmem:[#allocation5 + $0x14] sm:$0xf] %vm2697_vm14, %v4212_v3 }
 0x413   : > { %4017 = vmatmul.mubr.msk.f32.gmra.mxu1 %vm5403_vm0, %v4712_v51  ;;  %4047 = vmatprep.subr.mxu1 %v2155_v13  ;;  %v3780_v51 = vsel %vm2362_vm9, 1.0, %v4213_v19  ;;  %2704 = vst.msk [vmem:[#allocation5 + $0x18] sm:$0xf] %vm2697_vm14, %v4212_v3  ;;  %2705 = vst.msk [vmem:[#allocation5 + $0x1c] sm:$0xf] %vm2697_vm14, %v4212_v3 }
 0x414   : > { %4051 = vmatpush3.msra.mxu1 %v2155_v13  ;;  %4019 = vmatprep.mubr.msk.f32.mxu1 %vm5404_vm3, %v3782_v36  ;;  %2707 = vst.msk [vmem:[#allocation5 + $0x20] sm:$0x7] %vm2706_vm2, %v4212_v3  ;;  %vm2820_vm3 = vcmask 322561  }
 0x415   : > { %4048 = vmatprep.subr.mxu1 %v2152_v16 }
 0x416   : > { %4052 = vmatpush3.msra.mxu1 %v2152_v16 }
 0x417   : > { %4020 = vmatmul.mubr.msk.f32.gmra.mxu1 %vm5405_vm6, %v3783_v49 }
 0x418   : > { %4022 = vmatprep.mubr.msk.f32.mxu1 %vm5406_vm7, %v3784_v50  ;;  %vm5410_vm7 = vsmask.f32 7942 }
 0x419   : > { %vm4907_vm4 = vmand %vm2820_vm3, %vm5410_vm7  ;;  %vm3094_vm3 = vcmask 326659  }
 0x41b   : > { %4023 = vmatmul.mubr.msk.f32.gmra.mxu1 %vm5407_vm10, %v3785_v5 }
 0x41c   : > { %4042 = vmatprep.mubr.msk.f32.mxu1 %vm5408_vm11, %v3780_v51  ;;  %vm2869_vm11 = vcmask 326656  }
 0x41f   : > { %4043 = vmatmul.mubr.msk.f32.vlgmr.msra.gmra.mxu1 %vm5409_vm12, %v3781_v40 }
 0x4bb   : > { %v4035_v17 = vpop.f32.mrf.mxu0 }
 0x4bd   : > { %v2595_v18 = vpop.f32.mrf.mxu0 }
 0x4bf   : > { %v4038_v19 = vpop.f32.mrf.mxu0 }
 0x4c1   : > { %v2605_v42 = vpop.f32.mrf.mxu0 }
 0x4c3   : > { %v4041_v48 = vpop.f32.mrf.mxu0 }
 0x4c5   : > { %v2615_v59 = vpop.f32.mrf.mxu0 }
 0x4cf   : > { %v4015_v22 = vpop.f32.mrf.mxu1 }
 0x4d0   : > { %v2601_v43 = vadd.f32 %v4035_v17, %v4015_v22 }
 0x4d1   : > { %v2470_v44 = vpop.f32.mrf.mxu1 }
 0x4d2   : > { %v2642_v45 = vadd.f32 %v3802_v41, %v2601_v43  ;;  %v2596_v46 = vadd.f32 %v2595_v18, %v2470_v44 }
 0x4d3   : > { %v4018_v47 = vpop.f32.mrf.mxu1 }
 0x4d4   : > { %v2658_v52 = vmin.f32 %v2642_v45, 0.0  ;;  %v2641_v53 = vadd.f32 %v3802_v41, %v2596_v46  ;;  %v2611_v54 = vadd.f32 %v4038_v19, %v4018_v47  ;;  %vm2650_vm13 = vcmp.gt.f32.partialorder %v2642_v45, 0.0 }
 0x4d5   : > { %v2480_v62 = vpop.f32.mrf.mxu1 }
 0x4d6   : > { %v2667_v3 = vmul.f32 1.442695, %v2658_v52  ;;  %v2657_v55 = vmin.f32 %v2641_v53, 0.0  ;;  %v2644_v56 = vadd.f32 %v3802_v41, %v2611_v54  ;;  %v2606_v57 = vadd.f32 %v2605_v42, %v2480_v62 }
 0x4d7   : > { %v4021_v58 = vpop.f32.mrf.mxu1  ;;  %vm2649_vm15 = vcmp.gt.f32.partialorder %v2641_v53, 0.0 }
 0x4d8   : > { %4188 = vpow2.f32 %v2667_v3  ;;  %v2665_v0 = vmul.f32 1.442695, %v2657_v55  ;;  %v2660_v61 = vmin.f32 %v2644_v56, 0.0  ;;  %v4887_v63 = vadd.f32 %v3802_v41, %v2606_v57 }
 0x4d9   : > { %v2621_v1 = vadd.f32 %v4041_v48, %v4021_v58  ;;  %v2490_v2 = vpop.f32.mrf.mxu1  ;;  %vm2652_vm0 = vcmp.gt.f32.partialorder %v2644_v56, 0.0 }
 0x4da   : > { %4190 = vpow2.f32 %v2665_v0  ;;  %v2671_v4 = vmul.f32 1.442695, %v2660_v61  ;;  %v2616_v6 = vadd.f32 %v2615_v59, %v2490_v2  ;;  %v2659_v7 = vmin.f32 %v4887_v63, 0.0 }
 0x4db   : > { %v4890_v8 = vadd.f32 %v3802_v41, %v2621_v1  ;;  %v4024_v9 = vpop.f32.mrf.mxu1  ;;  %vm2651_vm5 = vcmp.gt.f32.partialorder %v4887_v63, 0.0 }
 0x4dc   : > { %4192 = vpow2.f32 %v2671_v4  ;;  %v4892_v10 = vadd.f32 %v3802_v41, %v2616_v6  ;;  %v2669_v11 = vmul.f32 1.442695, %v2659_v7 }
 0x4dd   : > { %v2662_v12 = vmin.f32 %v4890_v8, 0.0  ;;  %v2500_v60 = vpop.f32.mrf.mxu1  ;;  %vm2654_vm9 = vcmp.gt.f32.partialorder %v4890_v8, 0.0 }
 0x4de   : > { %v2661_v13 = vmin.f32 %v4892_v10, 0.0  ;;  %4194 = vpow2.f32 %v2669_v11  ;;  %vm2653_vm6 = vcmp.gt.f32.partialorder %v4892_v10, 0.0 }
 0x4df   : > { %v2675_v15 = vmul.f32 1.442695, %v2662_v12  ;;  %v4044_v16 = vpop.f32.mrf.mxu1 }
 0x4e0   : > { %v2673_v20 = vmul.f32 1.442695, %v2661_v13  ;;  %v2631_v21 = vadd.f32 %v4044_v16, %v4024_v9 }
 0x4e1   : > { %4196 = vpow2.f32 %v2675_v15  ;;  %v2625_v23 = vpop.f32.mrf.mxu1  ;;  %v3819_v15 = vld [vmem:[%s5360_s7 + $0x1] sm:$0x1] }
 0x4e2   : > { %4198 = vpow2.f32 %v2673_v20  ;;  %v2626_v24 = vadd.f32 %v2625_v23, %v2500_v60  ;;  %v4896_v26 = vadd.f32 %v3802_v41, %v2631_v21 }
 0x4e4   : > { %v4898_v27 = vadd.f32 %v3802_v41, %v2626_v24  ;;  %v2664_v37 = vmin.f32 %v4896_v26, 0.0  ;;  %vm2656_vm12 = vcmp.gt.f32.partialorder %v4896_v26, 0.0 }
 0x4e5   : > { %v4189_v28 = vpop.eup %4188 }
 0x4e6   : > { %v3804_v38 = vadd.f32 -1.0, %v4189_v28  ;;  %v2663_v29 = vmin.f32 %v4898_v27, 0.0  ;;  %v2679_v51 = vmul.f32 1.442695, %v2664_v37  ;;  %vm2655_vm10 = vcmp.gt.f32.partialorder %v4898_v27, 0.0 }
 0x4e7   : > { %v4191_v31 = vpop.eup %4190 }
 0x4e8   : > { %v2690_v32 = vsel %vm2650_vm13, %v2642_v45, %v3804_v38  ;;  %v3803_v33 = vadd.f32 -1.0, %v4191_v31  ;;  %v2677_v34 = vmul.f32 1.442695, %v2663_v29  ;;  %v3820_v31 = vld [vmem:[%s5360_s7 + $0x2] sm:$0x1]  ;;  %vm3006_vm13 = vcmask 326658  }
 0x4e9   : > { %v4193_v39 = vpop.eup %4192  ;;  %v3839_v35 = vpack.c.bf16 %v2690_v32, %v2690_v32 }
 0x4ea   : > { %v2689_v36 = vsel %vm2649_vm15, %v2641_v53, %v3803_v33  ;;  %v3806_v30 = vadd.f32 -1.0, %v4193_v39  ;;  %4200 = vpow2.f32 %v2677_v34  ;;  %v2822_v53 = vld [vmem:[#allocation5] sm:$0xe]  ;;  %v2904_v33 = vunpack.c.l.bf16 %v3819_v15 }
 0x4eb   : > { %v2742_v49 = vshrl.u32 %v3839_v35, 16  ;;  %v2745_v50 = vshll.u32 %v3839_v35, 16  ;;  %v3838_v5 = vpack.c.bf16 %v2689_v36, %v2689_v36  ;;  %v4195_v40 = vpop.eup %4194  ;;  %4202 = vpow2.f32 %v2679_v51 }
 0x4ec   : > { %v2692_v17 = vsel %vm2652_vm0, %v2644_v56, %v3806_v30  ;;  %v3805_v44 = vadd.f32 -1.0, %v4195_v40  ;;  %v3821_v30 = vld [vmem:[%s5360_s7 + $0x3] sm:$0x1]  ;;  %vm2918_vm15 = vcmask 326657   ;;  %vm3181_vm0 = vcmask 326660  }
 0x4ed   : > { %v2744_v18 = vrot.slane %v2742_v49, 6  ;;  %v2747_v19 = vrot.slane %v2745_v50, 7  ;;  %v2733_v22 = vshrl.u32 %v3838_v5, 16  ;;  %v2736_v41 = vshll.u32 %v3838_v5, 16 }
 0x4ee   : > { %v4197_v42 = vpop.eup %4196  ;;  %v3841_v43 = vpack.c.bf16 %v2692_v17, %v2692_v17  ;;  %v2691_v3 = vsel %vm2651_vm5, %v4887_v63, %v3805_v44  ;;  %v2992_v5 = vunpack.c.l.bf16 %v3820_v31  ;;  %vm3355_vm5 = vcmask 326662  }
 0x4ef   : > { %v4199_v45 = vpop.eup %4198  ;;  %v2735_v46 = vrot.slane %v2733_v22, 6  ;;  %v2738_v47 = vrot.slane %v2736_v41, 7  ;;  %v3808_v48 = vadd.f32 -1.0, %v4197_v42  ;;  %v2748_v56 = vor.u32 %v2747_v19, %v2744_v18 }
 0x4f0   : > { %v2762_v54 = vshrl.u32 %v3841_v43, 16  ;;  %v2765_v62 = vshll.u32 %v3841_v43, 16  ;;  %v3807_v55 = vadd.f32 -1.0, %v4199_v45  ;;  %v3840_v58 = vpack.c.bf16 %v2691_v3, %v2691_v3 }
 0x4f1   : > { %v2739_v57 = vor.u32 %v2738_v47, %v2735_v46  ;;  %v2694_v59 = vsel %vm2654_vm9, %v4890_v8, %v3808_v48  ;;  %v2750_v16 = vrot.slane %v2748_v56, 4  ;;  %v4948_v22 = vrot.slane %v2904_v33, %v4531_v14  ;;  %v3822_v47 = vld [vmem:[%s5360_s7 + $0x4] sm:$0x1] }
 0x4f2   : > { %v2764_v0 = vrot.slane %v2762_v54, 6  ;;  %v2767_v61 = vrot.slane %v2765_v62, 7  ;;  %v3843_v1 = vpack.c.bf16 %v2694_v59, %v2694_v59  ;;  %v2693_v2 = vsel %vm2653_vm6, %v4892_v10, %v3807_v55  ;;  %v2855_v10 = vld [vmem:[%s5360_s7] sm:$0x1] }
 0x4f3   : > { %v2740_v4 = vrot.slane %v2739_v57, 4  ;;  %v2823_v6 = vsel %vm4907_vm4, %v2739_v57, %v2822_v53  ;;  %v2752_v63 = vshrl.u32 %v3840_v58, 16  ;;  %v2755_v7 = vshll.u32 %v3840_v58, 16 }
 0x4f4   : > { %2824 = vst [vmem:[#allocation5] sm:$0xe] %v2823_v6  ;;  %v2782_v9 = vshrl.u32 %v3843_v1, 16  ;;  %v2785_v11 = vshll.u32 %v3843_v1, 16  ;;  %v3842_v12 = vpack.c.bf16 %v2693_v2, %v2693_v2  ;;  %v2768_v20 = vor.u32 %v2767_v61, %v2764_v0 }
 0x4f5   : > { %v2749_v8 = vsel %vm4320_vm8, %v2740_v4, %v2748_v56  ;;  %v2754_v60 = vrot.slane %v2752_v63, 6  ;;  %v2757_v13 = vrot.slane %v2755_v7, 7  ;;  %v2856_v34 = vunpack.c.l.bf16 %v2855_v10  ;;  %v3823_v63 = vld [vmem:[%s5360_s7 + $0x5] sm:$0x1]  ;;  %v3824_v10 = vld [vmem:[%s5360_s7 + $0x6] sm:$0x1] }
 0x4f6   : > { %2825 = vst.msk [vmem:[#allocation5 + $0x4] sm:$0xf] %vm2697_vm14, %v2749_v8  ;;  %v2772_v21 = vshrl.u32 %v3842_v12, 16  ;;  %v2784_v28 = vrot.slane %v2782_v9, 6  ;;  %v2787_v38 = vrot.slane %v2785_v11, 7  ;;  %v2775_v29 = vshll.u32 %v3842_v12, 16 }
 0x4f7   : > { %v4201_v23 = vpop.eup %4200  ;;  %v2758_v24 = vor.u32 %v2757_v13, %v2754_v60  ;;  %v2770_v49 = vrot.slane %v2768_v20, 4  ;;  %v4951_v41 = vrot.slane %v2856_v34, %v4531_v14  ;;  %v3080_v42 = vunpack.c.l.bf16 %v3821_v30 }
 0x4f8   : > { %v2774_v37 = vrot.slane %v2772_v21, 6  ;;  %v3809_v32 = vadd.f32 -1.0, %v4201_v23  ;;  %v2777_v36 = vrot.slane %v2775_v29, 7  ;;  %v2788_v40 = vor.u32 %v2787_v38, %v2784_v28  ;;  %v4203_v19 = vpop.eup %4202 }
 0x4f9   : > { %v2759_v39 = vsel %vm4320_vm8, %v2750_v16, %v2758_v24  ;;  %v2760_v35 = vrot.slane %v2758_v24, 4  ;;  %v4964_v53 = vrot.slane %v2992_v5, %v4531_v14  ;;  %v3167_v58 = vunpack.c.l.bf16 %v3822_v47 }
 0x4fa   : > { %2826 = vst.msk [vmem:[#allocation5 + $0x8] sm:$0xf] %vm2697_vm14, %v2759_v39  ;;  %v2695_v50 = vsel %vm2655_vm10, %v4898_v27, %v3809_v32  ;;  %v2778_v17 = vor.u32 %v2777_v36, %v2774_v37  ;;  %v2790_v54 = vrot.slane %v2788_v40, 4  ;;  %v3810_v59 = vadd.f32 -1.0, %v4203_v19 }
 0x4fb   : > { %v2769_v51 = vsel %vm4320_vm8, %v2760_v35, %v2768_v20  ;;  %v3844_v18 = vpack.c.bf16 %v2695_v50, %v2695_v50  ;;  %v4977_v61 = vrot.slane %v3080_v42, %v4531_v14  ;;  %v4994_v11 = vrot.slane %v3167_v58, %v4531_v14 }
 0x4fc   : > { %2827 = vst.msk [vmem:[#allocation5 + $0xc] sm:$0xf] %vm2697_vm14, %v2769_v51  ;;  %v2779_v27 = vsel %vm4320_vm8, %v2770_v49, %v2778_v17  ;;  %v2780_v43 = vrot.slane %v2778_v17, 4  ;;  %v2696_v9 = vsel %vm2656_vm12, %v4896_v26, %v3810_v59  ;;  %v3253_v12 = vunpack.c.l.bf16 %v3823_v63 }
 0x4fd   : > { %v2792_v44 = vshrl.u32 %v3844_v18, 16  ;;  %v2795_v45 = vshll.u32 %v3844_v18, 16  ;;  %v3847_v46 = vld [vmem:[#allocation5] sm:$0xff]   ;;  %2828 = vst.msk [vmem:[#allocation5 + $0x10] sm:$0xf] %vm2697_vm14, %v2779_v27  ;;  %v3845_v26 = vpack.c.bf16 %v2696_v9, %v2696_v9  ;;  %v3341_v20 = vunpack.c.l.bf16 %v3824_v10 }
 0x4fe   : > { %v4959_v48 = vunpack.c.h.bf16 %v3847_v46  ;;  %v4961_v52 = vunpack.c.l.bf16 %v3847_v46  ;;  %v2789_v62 = vsel %vm4320_vm8, %v2780_v43, %v2788_v40  ;;  %v5005_v16 = vrot.slane %v3253_v12, %v4531_v14  ;;  %v2834_v43 = vld [vmem:[#allocation5 + $0x20] sm:$0x3] }
 0x4ff   : > { %v2794_v3 = vrot.slane %v2792_v44, 6  ;;  %v2797_v55 = vrot.slane %v2795_v45, 7  ;;  %2829 = vst.msk [vmem:[#allocation5 + $0x14] sm:$0xf] %vm2697_vm14, %v2789_v62  ;;  %v2802_v38 = vshrl.u32 %v3845_v26, 16  ;;  %v2805_v29 = vshll.u32 %v3845_v26, 16 }
 0x500   : > { %v2910_v56 = vmul.f32 %v4959_v48, %v4948_v22  ;;  %v2861_v57 = vmul.f32 %v4961_v52, %v4951_v41  ;;  %v2997_v4 = vmul.f32 %v4961_v52, %v4964_v53  ;;  %v2862_v6 = vmul.f32 %v4959_v48, %v4951_v41 }
 0x501   : > { %v4974_v0 = vor.u32 %v2797_v55, %v2794_v3  ;;  %v3086_v13 = vmul.f32 %v4959_v48, %v4977_v61  ;;  %v2909_v15 = vmul.f32 %v4961_v52, %v4948_v22  ;;  %v3172_v24 = vmul.f32 %v4961_v52, %v4994_v11 }
 0x502   : > { %v2922_v1 = vsel %vm2869_vm11, %v2910_v56, 0.0  ;;  %v2870_v2 = vsel %vm2869_vm11, %v2861_v57, 0.0  ;;  %v3007_v8 = vsel %vm3006_vm13, %v2997_v4, 0.0  ;;  %v2873_v60 = vsel %vm2869_vm11, %v2862_v6, 0.0 }
 0x503   : > { %v2799_v7 = vsel %vm4320_vm8, %v2790_v54, %v4974_v0  ;;  %2923 = vadd.xlane.f32.xlu1 %v2922_v1  ;;  %2871 = vadd.xlane.f32.xlu0 %v2870_v2  ;;  %v3098_v21 = vsel %vm2869_vm11, %v3086_v13, 0.0  ;;  %v2919_v23 = vsel %vm2918_vm15, %v2909_v15, 0.0  ;;  %v2998_v28 = vmul.f32 %v4959_v48, %v4964_v53  ;;  %v3862_v39 = vld [vmem:[#allocation5 + $0x8] sm:$0xff]  }
 0x504   : > { %2830 = vst.msk [vmem:[#allocation5 + $0x18] sm:$0xf] %vm2697_vm14, %v2799_v7  ;;  %v5013_v31 = vrot.slane %v3341_v20, %v4531_v14  ;;  %v3182_v37 = vsel %vm3181_vm0, %v3172_v24, 0.0  ;;  %v3259_v33 = vmul.f32 %v4959_v48, %v5005_v16  ;;  %v3085_v34 = vmul.f32 %v4961_v52, %v4977_v61 }
 0x505   : > { %v3010_v32 = vsel %vm2869_vm11, %v2998_v28, 0.0  ;;  %v2804_v35 = vrot.slane %v2802_v38, 6  ;;  %v2807_v36 = vrot.slane %v2805_v29, 7  ;;  %v3173_v50 = vmul.f32 %v4959_v48, %v4994_v11 }
 0x506   : > { %v3346_v30 = vmul.f32 %v4961_v52, %v5013_v31  ;;  %v3271_v14 = vsel %vm2869_vm11, %v3259_v33, 0.0  ;;  %v3095_v49 = vsel %vm3094_vm3, %v3085_v34, 0.0  ;;  %v5025_v5 = vunpack.c.l.bf16 %v3862_v39 }
 0x507   : > { %3008 = vadd.xlane.f32.xlu1 %v3007_v8  ;;  %2874 = vadd.xlane.f32.xlu0 %v2873_v60  ;;  %v2800_v51 = vrot.slane %v4974_v0, 4  ;;  %vm2832_vm9 = vcmask 320512   ;;  %v3258_v40 = vmul.f32 %v4961_v52, %v5005_v16  ;;  %v2808_v17 = vor.u32 %v2807_v36, %v2804_v35 }
 0x508   : > { %v3356_v18 = vsel %vm3355_vm5, %v3346_v30, 0.0  ;;  %v3185_v19 = vsel %vm2869_vm11, %v3173_v50, 0.0  ;;  %v2863_v42 = vmul.f32 %v5025_v5, %v4951_v41  ;;  %v5033_v27 = vunpack.c.h.bf16 %v3862_v39 }
 0x509   : > { %vm5413_vm6 = vsmask.f32 1280  ;;  %vm3267_vm4 = vcmask 326661   ;;  %v2809_v44 = vsel %vm4320_vm8, %v2800_v51, %v2808_v17  ;;  %v2810_v45 = vrot.slane %v2808_v17, 4 }
 0x50a   : > { %vm2833_vm7 = vmand %vm2832_vm9, %vm5413_vm6  ;;  %2831 = vst.msk [vmem:[#allocation5 + $0x1c] sm:$0xf] %vm2697_vm14, %v2809_v44  ;;  %v2876_v47 = vsel %vm2869_vm11, %v2863_v42, 0.0  ;;  %v3268_v52 = vsel %vm3267_vm4, %v3258_v40, 0.0  ;;  %v2864_v54 = vmul.f32 %v5033_v27, %v4951_v41  ;;  %v3347_v62 = vmul.f32 %v4959_v48, %v5013_v31 }
 0x50b   : > { %3099 = vadd.xlane.f32.xlu1 %v3098_v21  ;;  %2920 = vadd.xlane.f32.xlu0 %v2919_v23  ;;  %v2835_v46 = vsel %vm2833_vm7, %v2810_v45, %v2834_v43  ;;  %v2912_v25 = vmul.f32 %v5033_v27, %v4948_v22  ;;  %v2911_v56 = vmul.f32 %v5025_v5, %v4948_v22  ;;  %vm2943_vm8 = vcmask 319488  }
 0x50c   : > { %2836 = vst [vmem:[#allocation5 + $0x20] sm:$0x3] %v2835_v46  ;;  %v2879_v3 = vsel %vm2869_vm11, %v2864_v54, 0.0  ;;  %v3359_v55 = vsel %vm2869_vm11, %v3347_v62, 0.0  ;;  %v2999_v0 = vmul.f32 %v5025_v5, %v4964_v53  ;;  %v3000_v1 = vmul.f32 %v5033_v27, %v4964_v53 }
 0x50d   : > { %v2928_v48 = vsel %vm2869_vm11, %v2912_v25, 0.0  ;;  %v3088_v2 = vmul.f32 %v5033_v27, %v4977_v61  ;;  %v2925_v4 = vsel %vm2869_vm11, %v2911_v56, 0.0  ;;  %v3087_v60 = vmul.f32 %v5025_v5, %v4977_v61 }
 0x50e   : > { %v3013_v26 = vsel %vm2869_vm11, %v2999_v0, 0.0  ;;  %v3016_v20 = vsel %vm2869_vm11, %v3000_v1, 0.0  ;;  %v3174_v23 = vmul.f32 %v5025_v5, %v4994_v11  ;;  %v3175_v24 = vmul.f32 %v5033_v27, %v4994_v11 }
 0x50f   : > { %3183 = vadd.xlane.f32.xlu1 %v3182_v37  ;;  %3011 = vadd.xlane.f32.xlu0 %v3010_v32  ;;  %v3104_v21 = vsel %vm2869_vm11, %v3088_v2, 0.0  ;;  %v3101_v39 = vsel %vm2869_vm11, %v3087_v60, 0.0  ;;  %v3261_v42 = vmul.f32 %v5033_v27, %v5005_v16  ;;  %v3260_v45 = vmul.f32 %v5025_v5, %v5005_v16 }
 0x510   : > { %v3188_v43 = vsel %vm2869_vm11, %v3174_v23, 0.0  ;;  %v3191_v44 = vsel %vm2869_vm11, %v3175_v24, 0.0  ;;  %v3349_v54 = vmul.f32 %v5033_v27, %v5013_v31  ;;  %vm3292_vm10 = vcmask 323584  }
 0x511   : > { %v3864_v57 = vld [vmem:[#allocation5 + $0x18] sm:$0xff]   ;;  %v3277_v62 = vsel %vm2869_vm11, %v3261_v42, 0.0  ;;  %v3274_v25 = vsel %vm2869_vm11, %v3260_v45, 0.0  ;;  %vm5416_vm12 = vcmask 1044480   ;;  %vm3305_vm13 = vcmask 1042432  }
 0x512   : > { %v3861_v58 = vunpack.c.h.bf16 %v3864_v57  ;;  %v3860_v59 = vunpack.c.l.bf16 %v3864_v57  ;;  %v3365_v57 = vsel %vm2869_vm11, %v3349_v54, 0.0  ;;  %vm3393_vm15 = vcmask 1041408   ;;  %vm5421_vm7 = vmmov %vm5416_vm12 }
 0x513   : > { %3272 = vadd.xlane.f32.xlu1 %v3271_v14  ;;  %3096 = vadd.xlane.f32.xlu0 %v3095_v49  ;;  %vm3442_vm0 = vcmask 7168   ;;  %vm5422_vm4 = vmmov %vm5421_vm7 }
 0x514   : > { %v2868_v6 = vmul.f32 %v3861_v58, %v4951_v41  ;;  %v2916_v63 = vmul.f32 %v3861_v58, %v4948_v22  ;;  %v2867_v7 = vmul.f32 %v3860_v59, %v4951_v41  ;;  %v3003_v9 = vmul.f32 %v3860_v59, %v4964_v53 }
 0x515   : > { %v2915_v12 = vmul.f32 %v3860_v59, %v4948_v22  ;;  %v3092_v8 = vmul.f32 %v3861_v58, %v4977_v61  ;;  %v3004_v37 = vmul.f32 %v3861_v58, %v4964_v53  ;;  %v3178_v32 = vmul.f32 %v3860_v59, %v4994_v11 }
 0x516   : > { %v5068_v13 = vsel %vm2869_vm11, %v2868_v6, 0.0  ;;  %v5071_v15 = vsel %vm2869_vm11, %v2916_v63, 0.0  ;;  %v5074_v10 = vsel %vm2869_vm11, %v2867_v7, 0.0  ;;  %v5084_v28 = vsel %vm2869_vm11, %v3003_v9, 0.0 }
 0x517   : > { %3357 = vadd.xlane.f32.xlu1 %v3356_v18  ;;  %3186 = vadd.xlane.f32.xlu0 %v3185_v19  ;;  %v5087_v38 = vsel %vm2869_vm11, %v2915_v12, 0.0  ;;  %v5090_v29 = vsel %vm2869_vm11, %v3092_v8, 0.0  ;;  %v3091_v33 = vmul.f32 %v3860_v59, %v4977_v61  ;;  %v3265_v34 = vmul.f32 %v3861_v58, %v5005_v16 }
 0x518   : > { %v3179_v35 = vmul.f32 %v3861_v58, %v4994_v11  ;;  %v3352_v36 = vmul.f32 %v3860_v59, %v5013_v31  ;;  %v3264_v30 = vmul.f32 %v3860_v59, %v5005_v16  ;;  %v5101_v14 = vsel %vm2869_vm11, %v3004_v37, 0.0  ;;  %v2845_v37 = vld [vmem:[#allocation5 + $0x20] sm:$0x7] }
 0x519   : > { %v5104_v49 = vsel %vm2869_vm11, %v3178_v32, 0.0  ;;  %v5107_v50 = vsel %vm2869_vm11, %v3091_v33, 0.0  ;;  %v5110_v51 = vsel %vm2869_vm11, %v3265_v34, 0.0  ;;  %v3353_v19 = vmul.f32 %v3861_v58, %v5013_v31 }
 0x51a   : > { %v5113_v40 = vsel %vm2869_vm11, %v3179_v35, 0.0  ;;  %v5116_v17 = vsel %vm2869_vm11, %v3352_v36, 0.0  ;;  %v5119_v18 = vsel %vm2869_vm11, %v3264_v30, 0.0  ;;  %v2854_v35 = vunpack.c.l.bf16 %v2845_v37 }
 0x51b   : > { %2877 = vadd.xlane.f32.xlu1 %v2876_v47  ;;  %3269 = vadd.xlane.f32.xlu0 %v3268_v52  ;;  %v5129_v46 = vsel %vm2869_vm11, %v3353_v19, 0.0  ;;  %v3863_v47 = vld [vmem:[#allocation5 + $0x10] sm:$0xff]   ;;  %v3348_v52 = vmul.f32 %v5025_v5, %v5013_v31 }
 0x51c   : > { %v3005_v19 = vmul.f32 %v4964_v53, %v2854_v35  ;;  %v2917_v42 = vmul.f32 %v4948_v22, %v2854_v35  ;;  %v3180_v45 = vmul.f32 %v4994_v11, %v2854_v35 }
 0x51d   : > { %v3362_v56 = vsel %vm2869_vm11, %v3348_v52, 0.0 }
 0x51e   : > { %v3206_v52 = vsel %vm2697_vm14, %v3180_v45, 0.0  ;;  %vm3380_vm14 = vcmask 324608  }
 0x51f   : > { %2880 = vadd.xlane.f32.xlu1 %v2879_v3  ;;  %3360 = vadd.xlane.f32.xlu0 %v3359_v55  ;;  %v3857_v3 = vunpack.c.h.bf16 %v3863_v47  ;;  %v3856_v55 = vunpack.c.l.bf16 %v3863_v47  ;;  %v3093_v47 = vmul.f32 %v4977_v61, %v2854_v35 }
 0x521   : > { %v2866_v58 = vmul.f32 %v3857_v3, %v4951_v41  ;;  %v2865_v59 = vmul.f32 %v3856_v55, %v4951_v41  ;;  %v2913_v0 = vmul.f32 %v3856_v55, %v4948_v22  ;;  %v3002_v41 = vmul.f32 %v3857_v3, %v4964_v53 }
 0x522   : > { %v3090_v7 = vmul.f32 %v3857_v3, %v4977_v61  ;;  %v3089_v9 = vmul.f32 %v3856_v55, %v4977_v61  ;;  %v3176_v60 = vmul.f32 %v3856_v55, %v4994_v11  ;;  %v3263_v23 = vmul.f32 %v3857_v3, %v5005_v16 }
 0x523   : > { %2929 = vadd.xlane.f32.xlu1 %v2928_v48  ;;  %2926 = vadd.xlane.f32.xlu0 %v2925_v4  ;;  %v2885_v5 = vsel %vm2869_vm11, %v2866_v58, 0.0  ;;  %v2882_v27 = vsel %vm2869_vm11, %v2865_v59, 0.0  ;;  %v2914_v48 = vmul.f32 %v3857_v3, %v4948_v22  ;;  %v2931_v2 = vsel %vm2869_vm11, %v2913_v0, 0.0 }
 0x524   : > { %v3001_v4 = vmul.f32 %v3856_v55, %v4964_v53  ;;  %v3022_v63 = vsel %vm2869_vm11, %v3002_v41, 0.0  ;;  %v3110_v12 = vsel %vm2869_vm11, %v3090_v7, 0.0  ;;  %v3107_v8 = vsel %vm2869_vm11, %v3089_v9, 0.0 }
 0x525   : > { %v2934_v1 = vsel %vm2869_vm11, %v2914_v48, 0.0  ;;  %v3262_v24 = vmul.f32 %v3856_v55, %v5005_v16  ;;  %v3350_v32 = vmul.f32 %v3856_v55, %v5013_v31  ;;  %v3283_v33 = vsel %vm2869_vm11, %v3263_v23, 0.0 }
 0x526   : > { %v3019_v6 = vsel %vm2869_vm11, %v3001_v4, 0.0  ;;  %v3119_v54 = vsel %vm2706_vm2, %v3093_v47, 0.0  ;;  %v3266_v53 = vmul.f32 %v5005_v16, %v2854_v35  ;;  %v3354_v61 = vmul.f32 %v5013_v31, %v2854_v35 }
 0x527   : > { %3014 = vadd.xlane.f32.xlu1 %v3013_v26  ;;  %3017 = vadd.xlane.f32.xlu0 %v3016_v20  ;;  %v3177_v26 = vmul.f32 %v3857_v3, %v4994_v11  ;;  %v3194_v20 = vsel %vm2869_vm11, %v3176_v60, 0.0  ;;  %v3280_v34 = vsel %vm2869_vm11, %v3262_v24, 0.0  ;;  %v3368_v36 = vsel %vm2869_vm11, %v3350_v32, 0.0  ;;  %v5206_v60 = vld [vmem:[#allocation6] ss:$0 sm:$0xff] }
 0x528   : > { %v3293_v22 = vsel %vm3292_vm10, %v3266_v53, 0.0  ;;  %v3381_v11 = vsel %vm3380_vm14, %v3354_v61, 0.0  ;;  %vm5414_vm2 = vcmask 1046528  }
 0x529   : > { %vm5417_vm3 = vmmov %vm5414_vm2 }
 0x52a   : > { %vm5418_vm5 = vmmov %vm5414_vm2 }
 0x52b   : > { %3105 = vadd.xlane.f32.xlu1 %v3104_v21  ;;  %3102 = vadd.xlane.f32.xlu0 %v3101_v39  ;;  %v3197_v21 = vsel %vm2869_vm11, %v3177_v26, 0.0  ;;  %v3351_v39 = vmul.f32 %v3857_v3, %v5013_v31  ;;  %vm5424_vm10 = vmmov %vm5414_vm2 }
 0x52d   : > { %v3371_v30 = vsel %vm2869_vm11, %v3351_v39, 0.0  ;;  %vm5415_vm11 = vcmask 1045504  }
 0x52f   : > { %3189 = vadd.xlane.f32.xlu1 %v3188_v43  ;;  %3192 = vadd.xlane.f32.xlu0 %v3191_v44  ;;  %v3032_v43 = vsel %vm2832_vm9, %v3005_v19, 0.0  ;;  %v2944_v44 = vsel %vm2943_vm8, %v2917_v42, 0.0  ;;  %vm5419_vm9 = vmmov %vm5415_vm11 }
 0x530   : > { %vm5420_vm6 = vmmov %vm5419_vm9 }
 0x531   : > { %vm5423_vm8 = vmmov %vm5414_vm2 }
 0x532   : > { %vm5425_vm14 = vmmov %vm5420_vm6 }
 0x533   : > { %3278 = vadd.xlane.f32.xlu1 %v3277_v62  ;;  %3275 = vadd.xlane.f32.xlu0 %v3274_v25 }
 0x537   : > { %3363 = vadd.xlane.f32.xlu1 %v3362_v56  ;;  %3366 = vadd.xlane.f32.xlu0 %v3365_v57 }
 0x53b   : > { %2886 = vadd.xlane.f32.xlu1 %v2885_v5  ;;  %2883 = vadd.xlane.f32.xlu0 %v2882_v27 }
 0x53f   : > { %2935 = vadd.xlane.f32.xlu1 %v2934_v1  ;;  %2932 = vadd.xlane.f32.xlu0 %v2931_v2 }
 0x543   : > { %3020 = vadd.xlane.f32.xlu1 %v3019_v6  ;;  %3023 = vadd.xlane.f32.xlu0 %v3022_v63 }
 0x547   : > { %3111 = vadd.xlane.f32.xlu1 %v3110_v12  ;;  %3108 = vadd.xlane.f32.xlu0 %v3107_v8 }
 0x54b   : > { %3195 = vadd.xlane.f32.xlu1 %v3194_v20  ;;  %3198 = vadd.xlane.f32.xlu0 %v3197_v21 }
 0x54f   : > { %3284 = vadd.xlane.f32.xlu1 %v3283_v33  ;;  %3281 = vadd.xlane.f32.xlu0 %v3280_v34 }
 0x553   : > { %3369 = vadd.xlane.f32.xlu1 %v3368_v36  ;;  %3372 = vadd.xlane.f32.xlu0 %v3371_v30 }
 0x557   : > { %3033 = vadd.xlane.f32.xlu1 %v3032_v43  ;;  %2945 = vadd.xlane.f32.xlu0 %v2944_v44 }
 0x55b   : > { %3207 = vadd.xlane.f32.xlu1 %v3206_v52  ;;  %3120 = vadd.xlane.f32.xlu0 %v3119_v54 }
 0x55f   : > { %2892 = vadd.xlane.f32.xlu1 %v5068_v13  ;;  %3294 = vadd.xlane.f32.xlu0 %v3293_v22 }
 0x563   : > { %2941 = vadd.xlane.f32.xlu1 %v5071_v15  ;;  %2889 = vadd.xlane.f32.xlu0 %v5074_v10 }
 0x567   : > { %3026 = vadd.xlane.f32.xlu1 %v5084_v28  ;;  %2938 = vadd.xlane.f32.xlu0 %v5087_v38 }
 0x56b   : > { %3117 = vadd.xlane.f32.xlu1 %v5090_v29  ;;  %3029 = vadd.xlane.f32.xlu0 %v5101_v14 }
 0x56f   : > { %3201 = vadd.xlane.f32.xlu1 %v5104_v49  ;;  %3114 = vadd.xlane.f32.xlu0 %v5107_v50 }
 0x573   : > { %3290 = vadd.xlane.f32.xlu1 %v5110_v51  ;;  %3204 = vadd.xlane.f32.xlu0 %v5113_v40 }
 0x577   : > { %3375 = vadd.xlane.f32.xlu1 %v5116_v17  ;;  %3287 = vadd.xlane.f32.xlu0 %v5119_v18 }
 0x57b   : > { %3382 = vadd.xlane.f32.xlu1 %v3381_v11  ;;  %3378 = vadd.xlane.f32.xlu0 %v5129_v46 }
 0x58c   : > { %v2924_v16 = vpop.xlane.xlu1 %2923  ;;  %v2872_v13 = vpop.xlane.xlu0 %2871 }
 0x58d   : > { %v2958_v51 = vrot.slane %v2924_v16, 1 }
 0x590   : > { %v3009_v15 = vpop.xlane.xlu1 %3008  ;;  %v5190_v10 = vpop.xlane.xlu0 %2874 }
 0x591   : > { %v3045_v17 = vrot.slane %v3009_v15, 2 }
 0x594   : > { %v5192_v28 = vpop.xlane.xlu1 %3099  ;;  %v2921_v38 = vpop.xlane.xlu0 %2920 }
 0x595   : > { %v2957_v31 = vrot.slane %v2921_v38, 1  ;;  %v3133_v3 = vrot.slane %v5192_v28, 3 }
 0x597   : > { %v2959_v18 = vsel %vm5414_vm2, %v2957_v31, %v2958_v51  ;;  %vm5426_vm2 = vmmov %vm5420_vm6 }
 0x598   : > { %v3184_v29 = vpop.xlane.xlu1 %3183  ;;  %v3012_v14 = vpop.xlane.xlu0 %3011  ;;  %v2982_v57 = vadd.f32 %v2959_v18, %v2872_v13 }
 0x599   : > { %v3046_v40 = vrot.slane %v3012_v14, 2  ;;  %v3218_v58 = vrot.slane %v3184_v29, 4 }
 0x59b   : > { %v3047_v55 = vsel %vm5415_vm11, %v3045_v17, %v3046_v40  ;;  %vm5427_vm11 = vmmov %vm5422_vm4 }
 0x59c   : > { %v5194_v49 = vpop.xlane.xlu1 %3272  ;;  %v3097_v50 = vpop.xlane.xlu0 %3096  ;;  %v3070_v5 = vadd.f32 %v3047_v55, %v2982_v57 }
 0x59d   : > { %v3132_v46 = vrot.slane %v3097_v50, 3  ;;  %v3307_v0 = vrot.slane %v5194_v49, 5 }
 0x59f   : > { %v3134_v59 = vsel %vm5416_vm12, %v3132_v46, %v3133_v3  ;;  %vm5428_vm12 = vmmov %vm5422_vm4 }
 0x5a0   : > { %v3358_v62 = vpop.xlane.xlu1 %3357  ;;  %v3187_v25 = vpop.xlane.xlu0 %3186  ;;  %v3157_v4 = vadd.f32 %v3134_v59, %v3070_v5 }
 0x5a1   : > { %v3219_v56 = vrot.slane %v3187_v25, 4  ;;  %v3394_v9 = vrot.slane %v3358_v62, 6 }
 0x5a3   : > { %v3220_v1 = vsel %vm996_vm1, %v3218_v58, %v3219_v56 }
 0x5a4   : > { %v2878_v27 = vpop.xlane.xlu1 %2877  ;;  %v3270_v48 = vpop.xlane.xlu0 %3269  ;;  %v3243_v6 = vadd.f32 %v3220_v1, %v3157_v4 }
 0x5a5   : > { %v3306_v2 = vrot.slane %v3270_v48, 5 }
 0x5a7   : > { %v3308_v41 = vsel %vm3305_vm13, %v3306_v2, %v3307_v0 }
 0x5a8   : > { %v5203_v63 = vpop.xlane.xlu1 %2880  ;;  %v3361_v7 = vpop.xlane.xlu0 %3360  ;;  %v3331_v8 = vadd.f32 %v3308_v41, %v3243_v6 }
 0x5a9   : > { %v3395_v12 = vrot.slane %v3361_v7, 6 }
 0x5ab   : > { %v3396_v26 = vsel %vm3393_vm15, %v3394_v9, %v3395_v12 }
 0x5ac   : > { %v3419_v20 = vadd.f32 %v3396_v26, %v3331_v8  ;;  %v5209_v21 = vpop.xlane.xlu1 %2929  ;;  %v2927_v23 = vpop.xlane.xlu0 %2926 }
 0x5ad   : > { %v2962_v33 = vrot.slane %v5209_v21, 1  ;;  %v2960_v34 = vrot.slane %v2927_v23, 1 }
 0x5ae   : > { %v3434_v24 = vadd.f32 %v5206_v60, %v3419_v20 }
 0x5af   : > { %v2961_v19 = vsel %vm5417_vm3, %v2958_v51, %v2960_v34  ;;  %v2963_v42 = vsel %vm5418_vm5, %v2960_v34, %v2962_v33  ;;  %vm5429_vm5 = vmmov %vm5417_vm3 }
 0x5b0   : > { %3443 = vst.msk [vmem:[%s5214_s15] sm:$0xff] %vm3442_vm0, %v3434_v24  ;;  %v3015_v37 = vpop.xlane.xlu1 %3014  ;;  %v5219_v32 = vpop.xlane.xlu0 %3017  ;;  %v2983_v61 = vadd.f32 %v2961_v19, %v5190_v10  ;;  %v2984_v11 = vadd.f32 %v2963_v42, %v2878_v27 }
 0x5b1   : > { %v3048_v36 = vrot.slane %v3015_v37, 2  ;;  %v3050_v30 = vrot.slane %v5219_v32, 2 }
 0x5b3   : > { %v3049_v52 = vsel %vm5419_vm9, %v3046_v40, %v3048_v36  ;;  %v3051_v54 = vsel %vm5420_vm6, %v3048_v36, %v3050_v30  ;;  %vm5430_vm9 = vmmov %vm5426_vm2 }
 0x5b4   : > { %v5222_v39 = vpop.xlane.xlu1 %3105  ;;  %v3103_v35 = vpop.xlane.xlu0 %3102  ;;  %v3071_v15 = vadd.f32 %v3049_v52, %v2983_v61  ;;  %v3072_v28 = vadd.f32 %v3051_v54, %v2984_v11  ;;  %vm5431_vm6 = vmmov %vm5426_vm2 }
 0x5b5   : > { %v3137_v43 = vrot.slane %v5222_v39, 3  ;;  %v3135_v44 = vrot.slane %v3103_v35, 3 }
 0x5b7   : > { %v3136_v16 = vsel %vm5421_vm7, %v3133_v3, %v3135_v44  ;;  %v3138_v13 = vsel %vm5422_vm4, %v3135_v44, %v3137_v43  ;;  %vm5432_vm7 = vmmov %vm5417_vm3 }
 0x5b8   : > { %v3190_v45 = vpop.xlane.xlu1 %3189  ;;  %v5228_v47 = vpop.xlane.xlu0 %3192  ;;  %v3158_v50 = vadd.f32 %v3136_v16, %v3071_v15  ;;  %v3159_v51 = vadd.f32 %v3138_v13, %v3072_v28 }
 0x5b9   : > { %v3221_v53 = vrot.slane %v3190_v45, 4  ;;  %v3223_v22 = vrot.slane %v5228_v47, 4 }
 0x5bb   : > { %v3222_v14 = vsel %vm996_vm1, %v3219_v56, %v3221_v53  ;;  %v3224_v31 = vsel %vm996_vm1, %v3221_v53, %v3223_v22 }
 0x5bc   : > { %v5238_v38 = vpop.xlane.xlu1 %3278  ;;  %v3276_v29 = vpop.xlane.xlu0 %3275  ;;  %v3244_v18 = vadd.f32 %v3222_v14, %v3158_v50  ;;  %v3245_v46 = vadd.f32 %v3224_v31, %v3159_v51 }
 0x5bd   : > { %v3311_v10 = vrot.slane %v5238_v38, 5  ;;  %v3309_v49 = vrot.slane %v3276_v29, 5 }
 0x5bf   : > { %v3310_v40 = vsel %vm3305_vm13, %v3307_v0, %v3309_v49  ;;  %v3312_v17 = vsel %vm3305_vm13, %v3309_v49, %v3311_v10 }
 0x5c0   : > { %v3364_v62 = vpop.xlane.xlu1 %3363  ;;  %v3367_v25 = vpop.xlane.xlu0 %3366  ;;  %v3332_v56 = vadd.f32 %v3310_v40, %v3244_v18  ;;  %v3333_v57 = vadd.f32 %v3312_v17, %v3245_v46 }
 0x5c1   : > { %v3397_v3 = vrot.slane %v3364_v62, 6  ;;  %v3399_v55 = vrot.slane %v3367_v25, 6 }
 0x5c3   : > { %v3398_v58 = vsel %vm3393_vm15, %v3395_v12, %v3397_v3  ;;  %v3400_v59 = vsel %vm3393_vm15, %v3397_v3, %v3399_v55 }
 0x5c4   : > { %v3420_v5 = vadd.f32 %v3398_v58, %v3332_v56  ;;  %v3421_v27 = vadd.f32 %v3400_v59, %v3333_v57  ;;  %v5249_v48 = vpop.xlane.xlu1 %2886  ;;  %v2884_v0 = vpop.xlane.xlu0 %2883 }
 0x5c6   : > { %v3435_v1 = vadd.f32 %v5206_v60, %v3420_v5  ;;  %v3436_v2 = vadd.f32 %v5206_v60, %v3421_v27 }
 0x5c8   : > { %3444 = vst.msk [vmem:[%s5214_s15 + $0x8] sm:$0xff] %vm3442_vm0, %v3435_v1  ;;  %3445 = vst.msk [vmem:[%s5214_s15 + $0x10] sm:$0xff] %vm3442_vm0, %v3436_v2  ;;  %v5257_v4 = vpop.xlane.xlu1 %2935  ;;  %v2933_v41 = vpop.xlane.xlu0 %2932 }
 0x5c9   : > { %v2966_v9 = vrot.slane %v5257_v4, 1  ;;  %v2964_v12 = vrot.slane %v2933_v41, 1 }
 0x5cb   : > { %v2965_v23 = vsel %vm5423_vm8, %v2962_v33, %v2964_v12  ;;  %v2967_v24 = vsel %vm5424_vm10, %v2964_v12, %v2966_v9  ;;  %vm5433_vm8 = vmmov %vm5426_vm2 }
 0x5cc   : > { %v3021_v6 = vpop.xlane.xlu1 %3020  ;;  %v5259_v7 = vpop.xlane.xlu0 %3023  ;;  %v2985_v33 = vadd.f32 %v2965_v23, %v5203_v63  ;;  %v2986_v45 = vadd.f32 %v2967_v24, %v2884_v0  ;;  %vm5434_vm10 = vmmov %vm5422_vm4 }
 0x5cd   : > { %v3052_v20 = vrot.slane %v3021_v6, 2  ;;  %v3054_v21 = vrot.slane %v5259_v7, 2 }
 0x5cf   : > { %v3053_v36 = vsel %vm5425_vm14, %v3050_v30, %v3052_v20  ;;  %v3055_v19 = vsel %vm5426_vm2, %v3052_v20, %v3054_v21  ;;  %vm5435_vm14 = vmmov %vm5422_vm4 }
 0x5d0   : > { %v5262_v8 = vpop.xlane.xlu1 %3111  ;;  %v3109_v26 = vpop.xlane.xlu0 %3108  ;;  %v3073_v53 = vadd.f32 %v3053_v36, %v2985_v33  ;;  %v3074_v30 = vadd.f32 %v3055_v19, %v2986_v45 }
 0x5d1   : > { %v3141_v37 = vrot.slane %v5262_v8, 3  ;;  %v3139_v32 = vrot.slane %v3109_v26, 3 }
 0x5d3   : > { %v3140_v52 = vsel %vm5427_vm11, %v3137_v43, %v3139_v32  ;;  %v3142_v54 = vsel %vm5428_vm12, %v3139_v32, %v3141_v37 }
 0x5d4   : > { %v3196_v34 = vpop.xlane.xlu1 %3195  ;;  %v5270_v35 = vpop.xlane.xlu0 %3198  ;;  %v3160_v13 = vadd.f32 %v3140_v52, %v3073_v53  ;;  %v3161_v15 = vadd.f32 %v3142_v54, %v3074_v30 }
 0x5d5   : > { %v3225_v42 = vrot.slane %v3196_v34, 4  ;;  %v3227_v44 = vrot.slane %v5270_v35, 4 }
 0x5d7   : > { %v3226_v16 = vsel %vm996_vm1, %v3223_v22, %v3225_v42  ;;  %v3228_v63 = vsel %vm996_vm1, %v3225_v42, %v3227_v44 }
 0x5d8   : > { %v5284_v61 = vpop.xlane.xlu1 %3284  ;;  %v3282_v11 = vpop.xlane.xlu0 %3281  ;;  %v3246_v29 = vadd.f32 %v3226_v16, %v3160_v13  ;;  %v3247_v47 = vadd.f32 %v3228_v63, %v3161_v15 }
 0x5d9   : > { %v3315_v39 = vrot.slane %v5284_v61, 5  ;;  %v3313_v43 = vrot.slane %v3282_v11, 5 }
 0x5db   : > { %v3314_v28 = vsel %vm3305_vm13, %v3311_v10, %v3313_v43  ;;  %v3316_v38 = vsel %vm3305_vm13, %v3313_v43, %v3315_v39 }
 0x5dc   : > { %v3370_v22 = vpop.xlane.xlu1 %3369  ;;  %v5297_v14 = vpop.xlane.xlu0 %3372  ;;  %v3334_v50 = vadd.f32 %v3314_v28, %v3246_v29  ;;  %v3335_v51 = vadd.f32 %v3316_v38, %v3247_v47 }
 0x5dd   : > { %v3401_v31 = vrot.slane %v3370_v22, 6  ;;  %v3403_v49 = vrot.slane %v5297_v14, 6 }
 0x5df   : > { %v3402_v40 = vsel %vm3393_vm15, %v3399_v55, %v3401_v31  ;;  %v3404_v10 = vsel %vm3393_vm15, %v3401_v31, %v3403_v49 }
 0x5e0   : > { %v3422_v17 = vadd.f32 %v3402_v40, %v3334_v50  ;;  %v3423_v18 = vadd.f32 %v3404_v10, %v3335_v51  ;;  %v3034_v46 = vpop.xlane.xlu1 %3033  ;;  %v2946_v62 = vpop.xlane.xlu0 %2945 }
 0x5e1   : > { %v2972_v12 = vrot.slane %v2946_v62, 1  ;;  %v3060_v23 = vrot.slane %v3034_v46, 2 }
 0x5e2   : > { %v3437_v25 = vadd.f32 %v5206_v60, %v3422_v17  ;;  %v3438_v3 = vadd.f32 %v5206_v60, %v3423_v18 }
 0x5e4   : > { %3446 = vst.msk [vmem:[%s5214_s15 + $0x18] sm:$0xff] %vm3442_vm0, %v3437_v25  ;;  %3447 = vst.msk [vmem:[%s5214_s15 + $0x20] sm:$0xff] %vm3442_vm0, %v3438_v3  ;;  %v3208_v56 = vpop.xlane.xlu1 %3207  ;;  %v3121_v57 = vpop.xlane.xlu0 %3120 }
 0x5e5   : > { %v3233_v63 = vrot.slane %v3208_v56, 4  ;;  %v3147_v43 = vrot.slane %v3121_v57, 3 }
 0x5e8   : > { %v2893_v58 = vpop.xlane.xlu1 %2892  ;;  %v3295_v55 = vpop.xlane.xlu0 %3294 }
 0x5e9   : > { %v3321_v62 = vrot.slane %v3295_v55, 5 }
 0x5ec   : > { %v2942_v59 = vpop.xlane.xlu1 %2941  ;;  %v2890_v5 = vpop.xlane.xlu0 %2889 }
 0x5ed   : > { %v2970_v2 = vrot.slane %v2942_v59, 1 }
 0x5ef   : > { %v2973_v24 = vsel %vm5429_vm5, %v2970_v2, %v2972_v12 }
 0x5f0   : > { %v3027_v27 = vpop.xlane.xlu1 %3026  ;;  %v2939_v0 = vpop.xlane.xlu0 %2938  ;;  %v2989_v45 = vadd.f32 %v2973_v24, %v2893_v58 }
 0x5f1   : > { %v2968_v1 = vrot.slane %v2939_v0, 1  ;;  %v3056_v32 = vrot.slane %v3027_v27, 2 }
 0x5f3   : > { %v2969_v26 = vsel %vm5417_vm3, %v2966_v9, %v2968_v1  ;;  %v3057_v52 = vsel %vm5431_vm6, %v3054_v21, %v3056_v32  ;;  %v2971_v4 = vsel %vm5432_vm7, %v2968_v1, %v2970_v2 }
 0x5f4   : > { %v3118_v41 = vpop.xlane.xlu1 %3117  ;;  %v3030_v6 = vpop.xlane.xlu0 %3029  ;;  %v2987_v34 = vadd.f32 %v2969_v26, %v5249_v48  ;;  %v2988_v7 = vadd.f32 %v2971_v4, %v2890_v5 }
 0x5f5   : > { %v3058_v20 = vrot.slane %v3030_v6, 2  ;;  %v3145_v9 = vrot.slane %v3118_v41, 3 }
 0x5f6   : > { %v3075_v48 = vadd.f32 %v3057_v52, %v2987_v34 }
 0x5f7   : > { %v3061_v42 = vsel %vm5430_vm9, %v3058_v20, %v3060_v23  ;;  %v3059_v13 = vsel %vm5433_vm8, %v3056_v32, %v3058_v20  ;;  %v3148_v21 = vsel %vm5434_vm10, %v3145_v9, %v3147_v43 }
 0x5f8   : > { %v3202_v36 = vpop.xlane.xlu1 %3201  ;;  %v3115_v19 = vpop.xlane.xlu0 %3114  ;;  %v3077_v53 = vadd.f32 %v3061_v42, %v2989_v45  ;;  %v3076_v29 = vadd.f32 %v3059_v13, %v2988_v7 }
 0x5f9   : > { %v3143_v33 = vrot.slane %v3115_v19, 3  ;;  %v3229_v30 = vrot.slane %v3202_v36, 4 }
 0x5fa   : > { %v3164_v47 = vadd.f32 %v3148_v21, %v3077_v53 }
 0x5fb   : > { %v3144_v54 = vsel %vm5422_vm4, %v3141_v37, %v3143_v33  ;;  %v3146_v38 = vsel %vm5435_vm14, %v3143_v33, %v3145_v9  ;;  %v3230_v37 = vsel %vm996_vm1, %v3227_v44, %v3229_v30 }
 0x5fc   : > { %v3291_v11 = vpop.xlane.xlu1 %3290  ;;  %v3205_v16 = vpop.xlane.xlu0 %3204  ;;  %v3162_v28 = vadd.f32 %v3144_v54, %v3075_v48  ;;  %v3163_v17 = vadd.f32 %v3146_v38, %v3076_v29 }
 0x5fd   : > { %v3231_v15 = vrot.slane %v3205_v16, 4  ;;  %v3319_v50 = vrot.slane %v3291_v11, 5 }
 0x5fe   : > { %v3248_v46 = vadd.f32 %v3230_v37, %v3162_v28 }
 0x5ff   : > { %v3234_v8 = vsel %vm996_vm1, %v3231_v15, %v3233_v63  ;;  %v3232_v51 = vsel %vm996_vm1, %v3229_v30, %v3231_v15  ;;  %v3322_v58 = vsel %vm3305_vm13, %v3319_v50, %v3321_v62 }
 0x600   : > { %v3376_v22 = vpop.xlane.xlu1 %3375  ;;  %v3288_v31 = vpop.xlane.xlu0 %3287  ;;  %v3250_v18 = vadd.f32 %v3234_v8, %v3164_v47  ;;  %v3249_v3 = vadd.f32 %v3232_v51, %v3163_v17 }
 0x601   : > { %v3405_v40 = vrot.slane %v3376_v22, 6  ;;  %v3317_v10 = vrot.slane %v3288_v31, 5 }
 0x603   : > { %v3318_v25 = vsel %vm3305_vm13, %v3315_v39, %v3317_v10  ;;  %v3320_v35 = vsel %vm3305_vm13, %v3317_v10, %v3319_v50  ;;  %v3406_v59 = vsel %vm3393_vm15, %v3403_v49, %v3405_v40  ;;  %v3338_v39 = vadd.f32 %v3322_v58, %v3250_v18 }
 0x604   : > { %v3336_v44 = vadd.f32 %v3318_v25, %v3248_v46  ;;  %v3383_v56 = vpop.xlane.xlu1 %3382  ;;  %v3379_v57 = vpop.xlane.xlu0 %3378  ;;  %v3337_v61 = vadd.f32 %v3320_v35, %v3249_v3 }
 0x605   : > { %v3409_v55 = vrot.slane %v3383_v56, 6  ;;  %v3407_v5 = vrot.slane %v3379_v57, 6 }
 0x606   : > { %v3424_v27 = vadd.f32 %v3406_v59, %v3336_v44 }
 0x607   : > { %v3408_v0 = vsel %vm3393_vm15, %v3405_v40, %v3407_v5  ;;  %v3410_v1 = vsel %vm3393_vm15, %v3407_v5, %v3409_v55 }
 0x608   : > { %v3439_v2 = vadd.f32 %v5206_v60, %v3424_v27  ;;  %v3425_v41 = vadd.f32 %v3408_v0, %v3337_v61  ;;  %v3426_v6 = vadd.f32 %v3410_v1, %v3338_v39 }
 0x60a   : > { %3448 = vst.msk [vmem:[%s5214_s15 + $0x28] sm:$0xff] %vm3442_vm0, %v3439_v2  ;;  %v3440_v14 = vadd.f32 %v5206_v60, %v3425_v41  ;;  %v3441_v12 = vadd.f32 %v5206_v60, %v3426_v6 }
 0x60c   : > { %3449 = vst.msk [vmem:[%s5214_s15 + $0x30] sm:$0xff] %vm3442_vm0, %v3440_v14  ;;  %3450 = vst.msk [vmem:[%s5214_s15 + $0x38] sm:$0xff] %vm3442_vm0, %v3441_v12 }
 0x60d PF: > { %s21_s11 = sadd.s32 1, %s4210_s11  }
 0x60e   : > { %p18_p4 = scmp.ge.s32.totalorder %s21_s11, 4  }
 0x610   :  { %20 = sbr.rel (!%p18_p4) target bundleno = 3 (0x3), region = 104 }

</bundles_post_ra>
